<compile_context>
chip_gen: v6e
topology: v6e:2x2x1
jax: 0.10.0
libtpu: 0.0.40
codegen_flags: <defaults>
</compile_context>

<pallas_src>
import functools
import numpy as np
import jax
import jax.numpy as jnp
from jax.experimental import pallas as pl
from jax.experimental.pallas import tpu as pltpu

BN_EPS = 1e-5
BN_SCALE = float(1.0 / np.sqrt(1.0 + BN_EPS))
LANE = 128
ASPP_DILS = (6, 12, 18)
ASPP_PAD = max(ASPP_DILS)          # 18
COL0 = ASPP_PAD                    # image columns live at lane slots [COL0, COL0+W)


# --------------------------- small config helpers ---------------------------

@functools.lru_cache(maxsize=None)
def _vmem_limit_bytes():
    """Generation-aware VMEM budget (~3/4 of physical, capped)."""
    try:
        cap = int(pltpu.get_tpu_info().vmem_capacity_bytes)
    except Exception:                       # conservative fallback (v7x-sized)
        cap = 64 * 1024 * 1024
    return int(min(max(cap * 3 // 4, 32 * 1024 * 1024), 100 * 1024 * 1024))


def _cparams(sem):
    return pltpu.CompilerParams(dimension_semantics=sem,
                                vmem_limit_bytes=_vmem_limit_bytes())


def to_work_layout(x_nchw):
    """(N, C, H, W) -> (N, C, H*128): image cols at [COL0, COL0+W), zeros elsewhere."""
    N, C, H, W = x_nchw.shape
    assert W + 2 * COL0 <= LANE, "feature-map width too wide for the 128-lane row layout"
    x = jnp.pad(x_nchw, ((0, 0), (0, 0), (0, 0), (COL0, LANE - COL0 - W)))
    return x.reshape(N, C, H * LANE)


def _col_mask(H, W):
    col = jnp.arange(LANE)
    m = ((col >= COL0) & (col < COL0 + W)).astype(jnp.float32)
    return jnp.tile(m, (H,)).reshape(1, H * LANE)


def _fold3x3(w, scale):
    """(Cout, Cin, 3, 3) torch conv weight -> (Cout, 9*Cin) tap-major, BN folded."""
    Cout, Cin = w.shape[0], w.shape[1]
    return (w.transpose(0, 2, 3, 1).reshape(Cout, 9 * Cin) * scale).astype(jnp.bfloat16)


# ------------------------------- kernel helpers ------------------------------

def _pad_rows(xp_ref, x, H, pad):
    """Zero the padded scratch, drop the (C, H*128) image at row offset pad (+1 guard row)."""
    xp_ref[...] = jnp.zeros(xp_ref.shape, xp_ref.dtype)
    xp_ref[:, (1 + pad) * LANE:(1 + pad + H) * LANE] = x


def _build_slab(slab_ref, xp_ref, Cin, H, dil, padx):
    """im2col for a 3x3 conv with padding == dilation, into one (9*Cin, H*128) slab."""
    for t in range(9):
        dh, dw = t // 3, t % 3
        off = (1 + padx + (dh - 1) * dil) * LANE + (dw - 1) * dil
        slab_ref[t * Cin:(t + 1) * Cin, :] = xp_ref[:, off:off + H * LANE]


# ----------------------------------- kernels ---------------------------------

def _proj_kernel(x_ref, w_ref, o_ref):
    # stub backbone projection: 1x1 conv (no bias) + ReLU; zero padding columns stay zero.
    y = jnp.dot(w_ref[...], x_ref[0], preferred_element_type=jnp.float32)
    o_ref[0] = jnp.maximum(y, 0.0).astype(o_ref.dtype)


def _reduce_ctx_kernel(x_ref, w_ref, b_ref, wctx_ref, bctx_ref, g_ref, m_ref,
                       xdep_ref, ctx_ref, xp_ref, slab_ref, *, H, Cin):
    """reduce_conv 3x3 + BN + ReLU with both SE gates and the 1x1 context_conv fused
    into the epilogue: emits the depth-gated activation and the context features."""
    _pad_rows(xp_ref, x_ref[0], H, 1)
    _build_slab(slab_ref, xp_ref, Cin, H, 1, 1)
    y = jnp.dot(w_ref[...], slab_ref[...], preferred_element_type=jnp.float32)
    y = jnp.maximum(y + b_ref[0][:, None], 0.0) * m_ref[0]       # BN+ReLU, re-zero pad cols
    g = g_ref[0]                                                 # (2, mid): [dep, ctx]
    xdep_ref[0] = (y * g[0][:, None]).astype(xdep_ref.dtype)     # depth SE gate (f32 VPU)
    yc = (y * g[1][:, None]).astype(jnp.bfloat16)                # context SE gate
    ctx = jnp.dot(wctx_ref[...], yc, preferred_element_type=jnp.float32)
    ctx_ref[0] = (ctx + bctx_ref[0][:, None]).astype(ctx_ref.dtype)


def _aspp_depth_kernel(x_ref, w1_ref, wd_ref, wcat_ref, c5_ref, wdo_ref, bdo_ref,
                       o_ref, xp_ref, slab_ref, *, H, mid):
    """Fused ASPP (1x1 + three 3x3 atrous branches + pooled branch) -> cat conv
    -> bn1 -> ReLU -> depth_out.  Branch activations never leave VMEM."""
    x = x_ref[0]                                                  # (mid, H*128) bf16
    # branch 1 (1x1 + ReLU) goes straight into the cat-conv accumulator
    b1 = jnp.maximum(jnp.dot(w1_ref[...], x, preferred_element_type=jnp.float32), 0.0)
    acc = jnp.dot(wcat_ref[0], b1.astype(jnp.bfloat16),
                  preferred_element_type=jnp.float32)
    # shared zero-padded copy (pad = 18 = max dilation), built once per sample
    _pad_rows(xp_ref, x, H, ASPP_PAD)
    # branches 2-4: per-branch 9-tap im2col slab + ONE big-contraction matmul each
    for bi, d in enumerate(ASPP_DILS):
        _build_slab(slab_ref, xp_ref, mid, H, d, ASPP_PAD)
        bb = jnp.dot(wd_ref[bi], slab_ref[...], preferred_element_type=jnp.float32)
        acc = acc + jnp.dot(wcat_ref[bi + 1],
                            jnp.maximum(bb, 0.0).astype(jnp.bfloat16),
                            preferred_element_type=jnp.float32)
    # + global-avg-pool branch (its cat-conv contribution arrives per-sample as c5),
    # bn1 folded into the weights, ReLU; Dropout(0.5) is inference-mode identity.
    feat = jnp.maximum(acc + c5_ref[0, 0][:, None], 0.0)
    logits = jnp.dot(wdo_ref[...], feat.astype(jnp.bfloat16),
                     preferred_element_type=jnp.float32) + bdo_ref[0][:, None]
    o_ref[0] = logits.astype(o_ref.dtype)


def _softmax_outer_kernel(lg_ref, ctx_ref, feat_ref, prob_ref):
    """Depth softmax fused with the depth x context outer product, emitted in the
    consumer layout (D, pixels, C) so no post-kernel transpose is needed."""
    lg = lg_ref[0].astype(jnp.float32)                            # (D, 128)
    m = jnp.max(lg, axis=0, keepdims=True)
    e = jnp.exp(lg - m)
    s = jnp.sum(e, axis=0, keepdims=True)
    inv = pl.reciprocal(s, approx=True)                           # EUP slot
    inv = inv * (2.0 - s * inv)                                   # one Newton step
    sm = e * inv                                                  # (D, 128)
    prob_ref[0] = sm.astype(prob_ref.dtype)
    ctx_t = jnp.transpose(ctx_ref[0].astype(jnp.float32))         # (128, Cc)
    feat_ref[0] = (sm[:, :, None] * ctx_t[None, :, :]).astype(feat_ref.dtype)


# ----------------------------------- wrappers --------------------------------

def proj_conv(xw, w):
    N, Cin, PA = xw.shape
    Cout = w.shape[0]
    return pl.pallas_call(
        _proj_kernel,
        out_shape=jax.ShapeDtypeStruct((N, Cout, PA), jnp.bfloat16),
        grid=(N,),
        in_specs=[pl.BlockSpec((1, Cin, PA), lambda n: (n, 0, 0)),
                  pl.BlockSpec((Cout, Cin), lambda n: (0, 0))],
        out_specs=pl.BlockSpec((1, Cout, PA), lambda n: (n, 0, 0)),
        compiler_params=_cparams(("parallel",)),
    )(xw.astype(jnp.bfloat16), w.reshape(Cout, Cin).astype(jnp.bfloat16))


def reduce_and_context(xw, gates, p, cfg, H, W):
    N, Cin, PA = xw.shape
    mid, Cc = cfg["mid"], cfg["out_channels"]
    w = _fold3x3(p["reduce_w"], BN_SCALE)                              # (mid, 9*Cin)
    b = (p["reduce_b"] * BN_SCALE).reshape(1, mid).astype(jnp.float32)
    wctx = p["context_conv_w"].reshape(Cc, mid).astype(jnp.bfloat16)
    bctx = p["context_conv_b"].reshape(1, Cc).astype(jnp.float32)
    mask = _col_mask(H, W)
    return pl.pallas_call(
        functools.partial(_reduce_ctx_kernel, H=H, Cin=Cin),
        out_shape=(jax.ShapeDtypeStruct((N, mid, PA), jnp.bfloat16),
                   jax.ShapeDtypeStruct((N, Cc, PA), jnp.float32)),
        grid=(N,),
        in_specs=[pl.BlockSpec((1, Cin, PA), lambda n: (n, 0, 0)),
                  pl.BlockSpec((mid, 9 * Cin), lambda n: (0, 0)),
                  pl.BlockSpec((1, mid), lambda n: (0, 0)),
                  pl.BlockSpec((Cc, mid), lambda n: (0, 0)),
                  pl.BlockSpec((1, Cc), lambda n: (0, 0)),
                  pl.BlockSpec((1, 2, mid), lambda n: (n, 0, 0)),
                  pl.BlockSpec((1, PA), lambda n: (0, 0))],
        out_specs=(pl.BlockSpec((1, mid, PA), lambda n: (n, 0, 0)),
                   pl.BlockSpec((1, Cc, PA), lambda n: (n, 0, 0))),
        scratch_shapes=[pltpu.VMEM((Cin, (H + 4) * LANE), jnp.bfloat16),
                        pltpu.VMEM((9 * Cin, H * LANE), jnp.bfloat16)],
        compiler_params=_cparams(("parallel",)),
    )(xw, w, b, wctx, bctx, gates, mask)


def aspp_depth(x_dep, p, cfg, H, W):
    N, mid, PA = x_dep.shape
    D = cfg["depth_channels"]
    pa = p["aspp"]
    w1 = (pa["w1"].reshape(mid, mid) * BN_SCALE).astype(jnp.bfloat16)
    wd = jnp.stack([_fold3x3(pa[k], BN_SCALE) for k in ("w2", "w3", "w4")], axis=0)
    wcat_s = pa["w_cat"].reshape(mid, 5, mid) * BN_SCALE                # bn1 folded
    wcat = wcat_s[:, :4, :].transpose(1, 0, 2).astype(jnp.bfloat16)     # (4, mid, mid)
    # global-avg-pool branch (a handful of FLOPs) in plain jnp: pooled(gated x)
    # -> 1x1 conv -> BN -> ReLU -> its cat-conv contribution (a per-sample bias).
    pooled = x_dep.astype(jnp.float32).sum(axis=2) / float(H * W)       # zeros off-image
    g5 = jnp.maximum((pooled @ pa["w_gap"].reshape(mid, mid).T) * BN_SCALE, 0.0)
    c5 = (g5 @ wcat_s[:, 4, :].T).reshape(N, 1, mid).astype(jnp.float32)
    wdo = p["depth_out_w"].reshape(D, mid).astype(jnp.bfloat16)
    bdo = p["depth_out_b"].reshape(1, D).astype(jnp.float32)
    return pl.pallas_call(
        functools.partial(_aspp_depth_kernel, H=H, mid=mid),
        out_shape=jax.ShapeDtypeStruct((N, D, PA), jnp.float32),
        grid=(N,),
        in_specs=[pl.BlockSpec((1, mid, PA), lambda n: (n, 0, 0)),
                  pl.BlockSpec((mid, mid), lambda n: (0, 0)),
                  pl.BlockSpec((3, mid, 9 * mid), lambda n: (0, 0, 0)),
                  pl.BlockSpec((4, mid, mid), lambda n: (0, 0, 0)),
                  pl.BlockSpec((1, 1, mid), lambda n: (n, 0, 0)),
                  pl.BlockSpec((D, mid), lambda n: (0, 0)),
                  pl.BlockSpec((1, D), lambda n: (0, 0))],
        out_specs=pl.BlockSpec((1, D, PA), lambda n: (n, 0, 0)),
        scratch_shapes=[pltpu.VMEM((mid, (H + 2 * ASPP_PAD + 2) * LANE), jnp.bfloat16),
                        pltpu.VMEM((9 * mid, H * LANE), jnp.bfloat16)],
        compiler_params=_cparams(("parallel",)),
    )(x_dep, w1, wd, wcat, c5, wdo, bdo)


def softmax_outer(logits, context):
    N, D, PA = logits.shape
    Cc = context.shape[1]
    return pl.pallas_call(
        _softmax_outer_kernel,
        out_shape=(jax.ShapeDtypeStruct((N, D, PA, Cc), jnp.bfloat16),
                   jax.ShapeDtypeStruct((N, D, PA), jnp.float32)),
        grid=(N, PA // LANE),
        in_specs=[pl.BlockSpec((1, D, LANE), lambda n, t: (n, 0, t)),
                  pl.BlockSpec((1, Cc, LANE), lambda n, t: (n, 0, t))],
        out_specs=(pl.BlockSpec((1, D, LANE, Cc), lambda n, t: (n, 0, t, 0)),
                   pl.BlockSpec((1, D, LANE), lambda n, t: (n, 0, t))),
        compiler_params=_cparams(("parallel", "parallel")),
    )(logits, context)


# ------------------------------- model sub-modules ---------------------------

def _mlp(x, p):                                      # MLP: fc1 -> ReLU -> fc2
    h = jnp.maximum(x @ p["fc1_w"].T + p["fc1_b"], 0.0)
    return h @ p["fc2_w"].T + p["fc2_b"]


def _se_gate(vec, p):
    # NOTE: the source SE.forward never applies the sigmoid gate; matched here.
    h = jnp.maximum(vec @ p["red_w"].T + p["red_b"], 0.0)
    return h @ p["exp_w"].T + p["exp_b"]


def depth_net(feat_w, H, W, mlp_input, p, cfg):
    # nn.BatchNorm1d(27) in eval mode with default running stats -> pure scale.
    mi = (mlp_input.reshape(-1, mlp_input.shape[-1]) * BN_SCALE).astype(jnp.float32)
    # tiny MLP / SE linears stay in plain jnp (launch overhead >> compute)
    ctx_gate = _se_gate(_mlp(mi, p["context_mlp"]), p["context_se"])     # (N, mid)
    dep_gate = _se_gate(_mlp(mi, p["depth_mlp"]), p["depth_se"])         # (N, mid)
    gates = jnp.stack([dep_gate, ctx_gate], axis=1).astype(jnp.float32)  # (N, 2, mid)
    # reduce_conv + BN + ReLU with both SE gates and the context_conv fused in
    x_dep, context = reduce_and_context(feat_w, gates, p, cfg, H, W)
    # TODO(synk): the 3x BasicBlock and the DCN (deformable conv) layers of
    # depth_conv have no provided definition / clean Pallas equivalent; identity.
    logits = aspp_depth(x_dep, p, cfg, H, W)
    return logits, context


def get_cam_feats(imgs, p):
    # TODO(synk): SwinTransformer backbone + GeneralizedLSSFPN neck are external;
    # replaced by a deterministic 16x average-pool + Pallas 1x1 projection stub.
    B, NC, C, H, W = imgs.shape
    N = B * NC
    H16, W16 = H // 16, W // 16
    x = imgs.reshape(N, C, H16, 16, W16, 16).mean(axis=(3, 5))
    return proj_conv(to_work_layout(x), p["stub_proj_w"]), H16, W16


def img_detector_forward(sweep_img, data_dict, p, cfg):
    B, num_sweeps, NC = sweep_img.shape[:3]
    feat_w, H16, W16 = get_cam_feats(sweep_img[:, 0], p)
    logits, context = depth_net(feat_w, H16, W16, data_dict["mlp_input"], p, cfg)
    D, Cc = cfg["depth_channels"], cfg["out_channels"]
    feat, prob = softmax_outer(logits, context)
    # feat is already in the consumer layout (N, D, pixels, C); only the padded
    # garbage lane columns are dropped here, once, at the very end.
    feat = feat.reshape(B, NC, D, H16, LANE, Cc)[:, :, :, :, COL0:COL0 + W16, :]
    depth_prob = prob.reshape(B * NC, D, H16, LANE)[..., COL0:COL0 + W16]
    # TODO(synk): get_geometry / voxel_pooling are `pass` (unimplemented) in the
    # source module; the lifted frustum features are returned in their place.
    return feat, depth_prob


# -------------------------------- parameter init -----------------------------

def init_params(key, cfg):
    in_ch, mid = cfg["in_channels"], cfg["mid"]
    Cc, Dd = cfg["out_channels"], cfg["depth_channels"]
    keys = iter(jax.random.split(key, 64))

    def conv_w(shape):  # kaiming_normal_ (fan_in, relu gain)
        fan_in = shape[1] * shape[2] * shape[3]
        return jax.random.normal(next(keys), shape, jnp.float32) * np.sqrt(2.0 / fan_in)

    def lin_w(shape):
        return jax.random.normal(next(keys), shape, jnp.float32) / np.sqrt(shape[1])

    def lin_b(n):
        return jax.random.normal(next(keys), (n,), jnp.float32) * 0.01

    return {
        "stub_proj_w": conv_w((in_ch, 3, 1, 1)),
        "reduce_w": conv_w((mid, in_ch, 3, 3)), "reduce_b": lin_b(mid),
        "context_mlp": {"fc1_w": lin_w((mid, 27)), "fc1_b": lin_b(mid),
                        "fc2_w": lin_w((mid, mid)), "fc2_b": lin_b(mid)},
        "context_se": {"red_w": lin_w((mid, mid)), "red_b": lin_b(mid),
                       "exp_w": lin_w((mid, mid)), "exp_b": lin_b(mid)},
        "context_conv_w": conv_w((Cc, mid, 1, 1)), "context_conv_b": lin_b(Cc),
        "depth_mlp": {"fc1_w": lin_w((mid, 27)), "fc1_b": lin_b(mid),
                      "fc2_w": lin_w((mid, mid)), "fc2_b": lin_b(mid)},
        "depth_se": {"red_w": lin_w((mid, mid)), "red_b": lin_b(mid),
                     "exp_w": lin_w((mid, mid)), "exp_b": lin_b(mid)},
        "aspp": {"w1": conv_w((mid, mid, 1, 1)),
                 "w2": conv_w((mid, mid, 3, 3)),
                 "w3": conv_w((mid, mid, 3, 3)),
                 "w4": conv_w((mid, mid, 3, 3)),
                 "w_gap": conv_w((mid, mid, 1, 1)),
                 "w_cat": conv_w((mid, 5 * mid, 1, 1))},
        "depth_out_w": conv_w((Dd, mid, 1, 1)), "depth_out_b": lin_b(Dd),
    }


# ------------------------------------- main -----------------------------------

if __name__ == "__main__":
    cfg = dict(in_channels=32, mid=16, out_channels=24, depth_channels=16)
    key = jax.random.PRNGKey(0)
    k_img, k_mlp, k_param = jax.random.split(key, 3)

    B, S, NC, H, W = 1, 1, 2, 64, 64
    sweep_img = jax.random.normal(k_img, (B, S, NC, 3, H, W), jnp.float32)
    # mlp_input (camera intrinsics/extrinsics, 27-dim) comes from data_dict in bevdepth
    data_dict = {"mlp_input": jax.random.normal(k_mlp, (B, NC, 27), jnp.float32)}
    params = init_params(k_param, cfg)

    fwd = jax.jit(lambda img, dd: img_detector_forward(img, dd, params, cfg))
    feat, depth_prob = fwd(sweep_img, data_dict)
    jax.block_until_ready(feat)
    jax.block_until_ready(depth_prob)

    H16, W16 = H // 16, W // 16
    assert feat.shape == (B, NC, cfg["depth_channels"], H16, W16, cfg["out_channels"])
    assert depth_prob.shape == (B * NC, cfg["depth_channels"], H16, W16)
    assert bool(jnp.all(jnp.isfinite(feat))) and bool(jnp.all(jnp.isfinite(depth_prob)))
    # depth softmax sanity: probabilities sum to 1 over depth bins
    # (pl.reciprocal(approx=True) + one Newton step -> keep atol at 1e-3)
    assert bool(jnp.allclose(depth_prob.sum(axis=1), 1.0, atol=1e-3))
    print("KERNEL_OK")
</pallas_src>

<mosaic_0001>
module attributes {stable_mosaic.version = 11 : i64} {
  func.func @_proj_kernel(%arg0: i32, %arg1: memref<1x3x512xbf16, #tpu.memory_space<vmem>>, %arg2: memref<32x3xbf16, #tpu.memory_space<vmem>>, %arg3: memref<1x32x512xbf16, #tpu.memory_space<vmem>>) attributes {dimension_semantics = [#tpu.dimension_semantics<parallel>], iteration_bounds = array<i64: 2>, scalar_prefetch = 0 : i64, scratch_operands = 0 : i64, tpu.core_type = #tpu.core_type<tc>, window_params = [{transform_indices = @transform_0, window_bounds = array<i64: 1, 3, 512>}, {pipeline_mode = #tpu.pipeline_mode<synchronous>, transform_indices = @transform_1, window_bounds = array<i64: 32, 3>}, {transform_indices = @transform_2, window_bounds = array<i64: 1, 32, 512>}]} {
    %c0 = arith.constant 0 : index
    %c0_0 = arith.constant 0 : index
    %0 = vector.load %arg2[%c0, %c0_0] : memref<32x3xbf16, #tpu.memory_space<vmem>>, vector<32x3xbf16>
    %c0_1 = arith.constant 0 : index
    %c0_2 = arith.constant 0 : index
    %c0_3 = arith.constant 0 : index
    %1 = vector.load %arg1[%c0_1, %c0_2, %c0_3] : memref<1x3x512xbf16, #tpu.memory_space<vmem>>, vector<1x3x512xbf16>
    %2 = vector.shape_cast %1 : vector<1x3x512xbf16> to vector<3x512xbf16>
    %cst = arith.constant dense<0.000000e+00> : vector<32x512xf32>
    %3 = tpu.matmul %0, %2, %cst {dimension_numbers = #tpu.dot_dimension_numbers<[1], [0], [0], [1], [0, 0, 1, 1], [], []>} : vector<32x3xbf16>, vector<3x512xbf16>, vector<32x512xf32> -> vector<32x512xf32>
    %cst_4 = arith.constant 0.000000e+00 : f32
    %4 = vector.broadcast %cst_4 : f32 to vector<32x512xf32>
    %5 = arith.maximumf %3, %4 : vector<32x512xf32>
    %6 = arith.truncf %5 : vector<32x512xf32> to vector<32x512xbf16>
    %c0_5 = arith.constant 0 : index
    %c0_6 = arith.constant 0 : index
    %c0_7 = arith.constant 0 : index
    %7 = vector.load %arg3[%c0_5, %c0_6, %c0_7] : memref<1x32x512xbf16, #tpu.memory_space<vmem>>, vector<1x32x512xbf16>
    %8 = vector.shape_cast %7 : vector<1x32x512xbf16> to vector<32x512xbf16>
    %9 = vector.shape_cast %6 : vector<32x512xbf16> to vector<1x32x512xbf16>
    tpu.vector_store %arg3[%c0_5, %c0_6, %c0_7], %9 {strides = array<i32>} : memref<1x32x512xbf16, #tpu.memory_space<vmem>>, vector<1x32x512xbf16>,
    return
  }
  func.func @transform_0(%arg0: i32) -> (i32, i32, i32) {
    %c0_i32 = arith.constant 0 : i32
    %c0_i32_0 = arith.constant 0 : i32
    %c0_i32_1 = arith.constant 0 : i32
    return %arg0, %c0_i32, %c0_i32_0 : i32, i32, i32
  }
  func.func @transform_1(%arg0: i32) -> (i32, i32) {
    %c0_i32 = arith.constant 0 : i32
    %c0_i32_0 = arith.constant 0 : i32
    %c0_i32_1 = arith.constant 0 : i32
    return %c0_i32, %c0_i32_0 : i32, i32
  }
  func.func @transform_2(%arg0: i32) -> (i32, i32, i32) {
    %c0_i32 = arith.constant 0 : i32
    %c0_i32_0 = arith.constant 0 : i32
    %c0_i32_1 = arith.constant 0 : i32
    return %arg0, %c0_i32, %c0_i32_0 : i32, i32, i32
  }
}

module attributes {stable_mosaic.version = 11 : i64} {
  func.func @_reduce_ctx_kernel(%arg0: i32, %arg1: memref<1x32x512xbf16, #tpu.memory_space<vmem>>, %arg2: memref<16x288xbf16, #tpu.memory_space<vmem>>, %arg3: memref<1x16xf32, #tpu.memory_space<vmem>>, %arg4: memref<24x16xbf16, #tpu.memory_space<vmem>>, %arg5: memref<1x24xf32, #tpu.memory_space<vmem>>, %arg6: memref<1x2x16xf32, #tpu.memory_space<vmem>>, %arg7: memref<1x512xf32, #tpu.memory_space<vmem>>, %arg8: memref<1x16x512xbf16, #tpu.memory_space<vmem>>, %arg9: memref<1x24x512xf32, #tpu.memory_space<vmem>>, %arg10: memref<32x1024xbf16, #tpu.memory_space<vmem>>, %arg11: memref<288x512xbf16, #tpu.memory_space<vmem>>) attributes {dimension_semantics = [#tpu.dimension_semantics<parallel>], iteration_bounds = array<i64: 2>, scalar_prefetch = 0 : i64, scratch_operands = 2 : i64, tpu.core_type = #tpu.core_type<tc>, window_params = [{transform_indices = @transform_0, window_bounds = array<i64: 1, 32, 512>}, {pipeline_mode = #tpu.pipeline_mode<synchronous>, transform_indices = @transform_1, window_bounds = array<i64: 16, 288>}, {pipeline_mode = #tpu.pipeline_mode<synchronous>, transform_indices = @transform_2, window_bounds = array<i64: 1, 16>}, {pipeline_mode = #tpu.pipeline_mode<synchronous>, transform_indices = @transform_3, window_bounds = array<i64: 24, 16>}, {pipeline_mode = #tpu.pipeline_mode<synchronous>, transform_indices = @transform_4, window_bounds = array<i64: 1, 24>}, {transform_indices = @transform_5, window_bounds = array<i64: 1, 2, 16>}, {pipeline_mode = #tpu.pipeline_mode<synchronous>, transform_indices = @transform_6, window_bounds = array<i64: 1, 512>}, {transform_indices = @transform_7, window_bounds = array<i64: 1, 16, 512>}, {transform_indices = @transform_8, window_bounds = array<i64: 1, 24, 512>}]} {
    %c0 = arith.constant 0 : index
    %c0_0 = arith.constant 0 : index
    %c0_1 = arith.constant 0 : index
    %0 = vector.load %arg1[%c0, %c0_0, %c0_1] : memref<1x32x512xbf16, #tpu.memory_space<vmem>>, vector<1x32x512xbf16>
    %1 = vector.shape_cast %0 : vector<1x32x512xbf16> to vector<32x512xbf16>
    %cst = arith.constant 0.000000e+00 : bf16
    %2 = vector.broadcast %cst : bf16 to vector<32x1024xbf16>
    %c0_2 = arith.constant 0 : index
    %c0_3 = arith.constant 0 : index
    %3 = vector.load %arg10[%c0_2, %c0_3] : memref<32x1024xbf16, #tpu.memory_space<vmem>>, vector<32x1024xbf16>
    tpu.vector_store %arg10[%c0_2, %c0_3], %2 {strides = array<i32>} : memref<32x1024xbf16, #tpu.memory_space<vmem>>, vector<32x1024xbf16>,
    %c0_4 = arith.constant 0 : index
    %c256 = arith.constant 256 : index
    %4 = vector.load %arg10[%c0_4, %c256] : memref<32x1024xbf16, #tpu.memory_space<vmem>>, vector<32x512xbf16>
    tpu.vector_store %arg10[%c0_4, %c256], %1 {strides = array<i32>} : memref<32x1024xbf16, #tpu.memory_space<vmem>>, vector<32x512xbf16>,
    %c0_5 = arith.constant 0 : index
    %c127 = arith.constant 127 : index
    %5 = vector.load %arg10[%c0_5, %c127] : memref<32x1024xbf16, #tpu.memory_space<vmem>>, vector<32x512xbf16>
    %c0_6 = arith.constant 0 : index
    %c0_7 = arith.constant 0 : index
    %6 = vector.load %arg11[%c0_6, %c0_7] : memref<288x512xbf16, #tpu.memory_space<vmem>>, vector<32x512xbf16>
    tpu.vector_store %arg11[%c0_6, %c0_7], %5 {strides = array<i32>} : memref<288x512xbf16, #tpu.memory_space<vmem>>, vector<32x512xbf16>,
    %c0_8 = arith.constant 0 : index
    %c128 = arith.constant 128 : index
    %7 = vector.load %arg10[%c0_8, %c128] : memref<32x1024xbf16, #tpu.memory_space<vmem>>, vector<32x512xbf16>
    %c32 = arith.constant 32 : index
    %c0_9 = arith.constant 0 : index
    %8 = vector.load %arg11[%c32, %c0_9] : memref<288x512xbf16, #tpu.memory_space<vmem>>, vector<32x512xbf16>
    tpu.vector_store %arg11[%c32, %c0_9], %7 {strides = array<i32>} : memref<288x512xbf16, #tpu.memory_space<vmem>>, vector<32x512xbf16>,
    %c0_10 = arith.constant 0 : index
    %c129 = arith.constant 129 : index
    %9 = vector.load %arg10[%c0_10, %c129] : memref<32x1024xbf16, #tpu.memory_space<vmem>>, vector<32x512xbf16>
    %c64 = arith.constant 64 : index
    %c0_11 = arith.constant 0 : index
    %10 = vector.load %arg11[%c64, %c0_11] : memref<288x512xbf16, #tpu.memory_space<vmem>>, vector<32x512xbf16>
    tpu.vector_store %arg11[%c64, %c0_11], %9 {strides = array<i32>} : memref<288x512xbf16, #tpu.memory_space<vmem>>, vector<32x512xbf16>,
    %c0_12 = arith.constant 0 : index
    %c255 = arith.constant 255 : index
    %11 = vector.load %arg10[%c0_12, %c255] : memref<32x1024xbf16, #tpu.memory_space<vmem>>, vector<32x512xbf16>
    %c96 = arith.constant 96 : index
    %c0_13 = arith.constant 0 : index
    %12 = vector.load %arg11[%c96, %c0_13] : memref<288x512xbf16, #tpu.memory_space<vmem>>, vector<32x512xbf16>
    tpu.vector_store %arg11[%c96, %c0_13], %11 {strides = array<i32>} : memref<288x512xbf16, #tpu.memory_space<vmem>>, vector<32x512xbf16>,
    %c0_14 = arith.constant 0 : index
    %c256_15 = arith.constant 256 : index
    %13 = vector.load %arg10[%c0_14, %c256_15] : memref<32x1024xbf16, #tpu.memory_space<vmem>>, vector<32x512xbf16>
    %c128_16 = arith.constant 128 : index
    %c0_17 = arith.constant 0 : index
    %14 = vector.load %arg11[%c128_16, %c0_17] : memref<288x512xbf16, #tpu.memory_space<vmem>>, vector<32x512xbf16>
    tpu.vector_store %arg11[%c128_16, %c0_17], %13 {strides = array<i32>} : memref<288x512xbf16, #tpu.memory_space<vmem>>, vector<32x512xbf16>,
    %c0_18 = arith.constant 0 : index
    %c257 = arith.constant 257 : index
    %15 = vector.load %arg10[%c0_18, %c257] : memref<32x1024xbf16, #tpu.memory_space<vmem>>, vector<32x512xbf16>
    %c160 = arith.constant 160 : index
    %c0_19 = arith.constant 0 : index
    %16 = vector.load %arg11[%c160, %c0_19] : memref<288x512xbf16, #tpu.memory_space<vmem>>, vector<32x512xbf16>
    tpu.vector_store %arg11[%c160, %c0_19], %15 {strides = array<i32>} : memref<288x512xbf16, #tpu.memory_space<vmem>>, vector<32x512xbf16>,
    %c0_20 = arith.constant 0 : index
    %c383 = arith.constant 383 : index
    %17 = vector.load %arg10[%c0_20, %c383] : memref<32x1024xbf16, #tpu.memory_space<vmem>>, vector<32x512xbf16>
    %c192 = arith.constant 192 : index
    %c0_21 = arith.constant 0 : index
    %18 = vector.load %arg11[%c192, %c0_21] : memref<288x512xbf16, #tpu.memory_space<vmem>>, vector<32x512xbf16>
    tpu.vector_store %arg11[%c192, %c0_21], %17 {strides = array<i32>} : memref<288x512xbf16, #tpu.memory_space<vmem>>, vector<32x512xbf16>,
    %c0_22 = arith.constant 0 : index
    %c384 = arith.constant 384 : index
    %19 = vector.load %arg10[%c0_22, %c384] : memref<32x1024xbf16, #tpu.memory_space<vmem>>, vector<32x512xbf16>
    %c224 = arith.constant 224 : index
    %c0_23 = arith.constant 0 : index
    %20 = vector.load %arg11[%c224, %c0_23] : memref<288x512xbf16, #tpu.memory_space<vmem>>, vector<32x512xbf16>
    tpu.vector_store %arg11[%c224, %c0_23], %19 {strides = array<i32>} : memref<288x512xbf16, #tpu.memory_space<vmem>>, vector<32x512xbf16>,
    %c0_24 = arith.constant 0 : index
    %c385 = arith.constant 385 : index
    %21 = vector.load %arg10[%c0_24, %c385] : memref<32x1024xbf16, #tpu.memory_space<vmem>>, vector<32x512xbf16>
    %c256_25 = arith.constant 256 : index
    %c0_26 = arith.constant 0 : index
    %22 = vector.load %arg11[%c256_25, %c0_26] : memref<288x512xbf16, #tpu.memory_space<vmem>>, vector<32x512xbf16>
    tpu.vector_store %arg11[%c256_25, %c0_26], %21 {strides = array<i32>} : memref<288x512xbf16, #tpu.memory_space<vmem>>, vector<32x512xbf16>,
    %c0_27 = arith.constant 0 : index
    %c0_28 = arith.constant 0 : index
    %23 = vector.load %arg2[%c0_27, %c0_28] : memref<16x288xbf16, #tpu.memory_space<vmem>>, vector<16x288xbf16>
    %c0_29 = arith.constant 0 : index
    %c0_30 = arith.constant 0 : index
    %24 = vector.load %arg11[%c0_29, %c0_30] : memref<288x512xbf16, #tpu.memory_space<vmem>>, vector<288x512xbf16>
    %cst_31 = arith.constant dense<0.000000e+00> : vector<16x512xf32>
    %25 = tpu.matmul %23, %24, %cst_31 {dimension_numbers = #tpu.dot_dimension_numbers<[1], [0], [0], [1], [0, 0, 1, 1], [], []>} : vector<16x288xbf16>, vector<288x512xbf16>, vector<16x512xf32> -> vector<16x512xf32>
    %c0_32 = arith.constant 0 : index
    %c0_33 = arith.constant 0 : index
    %26 = vector.load %arg3[%c0_32, %c0_33] : memref<1x16xf32, #tpu.memory_space<vmem>>, vector<1x16xf32>
    %27 = vector.shape_cast %26 : vector<1x16xf32> to vector<16xf32>
    %28 = vector.shape_cast %27 : vector<16xf32> to vector<16x1xf32>
    %29 = vector.broadcast %28 : vector<16x1xf32> to vector<16x512xf32>
    %30 = arith.addf %25, %29 : vector<16x512xf32>
    %cst_34 = arith.constant 0.000000e+00 : f32
    %31 = vector.broadcast %cst_34 : f32 to vector<16x512xf32>
    %32 = arith.maximumf %30, %31 : vector<16x512xf32>
    %c0_35 = arith.constant 0 : index
    %c0_36 = arith.constant 0 : index
    %33 = vector.load %arg7[%c0_35, %c0_36] : memref<1x512xf32, #tpu.memory_space<vmem>>, vector<1x512xf32>
    %34 = vector.shape_cast %33 : vector<1x512xf32> to vector<512xf32>
    %35 = vector.shape_cast %34 : vector<512xf32> to vector<1x512xf32>
    %36 = vector.broadcast %35 : vector<1x512xf32> to vector<16x512xf32>
    %37 = arith.mulf %32, %36 : vector<16x512xf32>
    %c0_37 = arith.constant 0 : index
    %c0_38 = arith.constant 0 : index
    %c0_39 = arith.constant 0 : index
    %38 = vector.load %arg6[%c0_37, %c0_38, %c0_39] : memref<1x2x16xf32, #tpu.memory_space<vmem>>, vector<1x2x16xf32>
    %39 = vector.shape_cast %38 : vector<1x2x16xf32> to vector<2x16xf32>
    %40 = vector.extract_strided_slice %39 {offsets = [0, 0], sizes = [1, 16], strides = [1, 1]} : vector<2x16xf32> to vector<1x16xf32>
    %41 = vector.shape_cast %40 : vector<1x16xf32> to vector<16xf32>
    %42 = vector.shape_cast %41 : vector<16xf32> to vector<16x1xf32>
    %43 = vector.broadcast %42 : vector<16x1xf32> to vector<16x512xf32>
    %44 = arith.mulf %37, %43 : vector<16x512xf32>
    %45 = arith.truncf %44 : vector<16x512xf32> to vector<16x512xbf16>
    %c0_40 = arith.constant 0 : index
    %c0_41 = arith.constant 0 : index
    %c0_42 = arith.constant 0 : index
    %46 = vector.load %arg8[%c0_40, %c0_41, %c0_42] : memref<1x16x512xbf16, #tpu.memory_space<vmem>>, vector<1x16x512xbf16>
    %47 = vector.shape_cast %46 : vector<1x16x512xbf16> to vector<16x512xbf16>
    %48 = vector.shape_cast %45 : vector<16x512xbf16> to vector<1x16x512xbf16>
    tpu.vector_store %arg8[%c0_40, %c0_41, %c0_42], %48 {strides = array<i32>} : memref<1x16x512xbf16, #tpu.memory_space<vmem>>, vector<1x16x512xbf16>,
    %49 = vector.extract_strided_slice %39 {offsets = [1, 0], sizes = [1, 16], strides = [1, 1]} : vector<2x16xf32> to vector<1x16xf32>
    %50 = vector.shape_cast %49 : vector<1x16xf32> to vector<16xf32>
    %51 = vector.shape_cast %50 : vector<16xf32> to vector<16x1xf32>
    %52 = vector.broadcast %51 : vector<16x1xf32> to vector<16x512xf32>
    %53 = arith.mulf %37, %52 : vector<16x512xf32>
    %54 = arith.truncf %53 : vector<16x512xf32> to vector<16x512xbf16>
    %c0_43 = arith.constant 0 : index
    %c0_44 = arith.constant 0 : index
    %55 = vector.load %arg4[%c0_43, %c0_44] : memref<24x16xbf16, #tpu.memory_space<vmem>>, vector<24x16xbf16>
    %cst_45 = arith.constant dense<0.000000e+00> : vector<24x512xf32>
    %56 = tpu.matmul %55, %54, %cst_45 {dimension_numbers = #tpu.dot_dimension_numbers<[1], [0], [0], [1], [0, 0, 1, 1], [], []>} : vector<24x16xbf16>, vector<16x512xbf16>, vector<24x512xf32> -> vector<24x512xf32>
    %c0_46 = arith.constant 0 : index
    %c0_47 = arith.constant 0 : index
    %57 = vector.load %arg5[%c0_46, %c0_47] : memref<1x24xf32, #tpu.memory_space<vmem>>, vector<1x24xf32>
    %58 = vector.shape_cast %57 : vector<1x24xf32> to vector<24xf32>
    %59 = vector.shape_cast %58 : vector<24xf32> to vector<24x1xf32>
    %60 = vector.broadcast %59 : vector<24x1xf32> to vector<24x512xf32>
    %61 = arith.addf %56, %60 : vector<24x512xf32>
    %c0_48 = arith.constant 0 : index
    %c0_49 = arith.constant 0 : index
    %c0_50 = arith.constant 0 : index
    %62 = vector.load %arg9[%c0_48, %c0_49, %c0_50] : memref<1x24x512xf32, #tpu.memory_space<vmem>>, vector<1x24x512xf32>
    %63 = vector.shape_cast %62 : vector<1x24x512xf32> to vector<24x512xf32>
    %64 = vector.shape_cast %61 : vector<24x512xf32> to vector<1x24x512xf32>
    tpu.vector_store %arg9[%c0_48, %c0_49, %c0_50], %64 {strides = array<i32>} : memref<1x24x512xf32, #tpu.memory_space<vmem>>, vector<1x24x512xf32>,
    return
  }
  func.func @transform_0(%arg0: i32) -> (i32, i32, i32) {
    %c0_i32 = arith.constant 0 : i32
    %c0_i32_0 = arith.constant 0 : i32
    %c0_i32_1 = arith.constant 0 : i32
    return %arg0, %c0_i32, %c0_i32_0 : i32, i32, i32
  }
  func.func @transform_1(%arg0: i32) -> (i32, i32) {
    %c0_i32 = arith.constant 0 : i32
    %c0_i32_0 = arith.constant 0 : i32
    %c0_i32_1 = arith.constant 0 : i32
    return %c0_i32, %c0_i32_0 : i32, i32
  }
  func.func @transform_2(%arg0: i32) -> (i32, i32) {
    %c0_i32 = arith.constant 0 : i32
    %c0_i32_0 = arith.constant 0 : i32
    %c0_i32_1 = arith.constant 0 : i32
    return %c0_i32, %c0_i32_0 : i32, i32
  }
  func.func @transform_3(%arg0: i32) -> (i32, i32) {
    %c0_i32 = arith.constant 0 : i32
    %c0_i32_0 = arith.constant 0 : i32
    %c0_i32_1 = arith.constant 0 : i32
    return %c0_i32, %c0_i32_0 : i32, i32
  }
  func.func @transform_4(%arg0: i32) -> (i32, i32) {
    %c0_i32 = arith.constant 0 : i32
    %c0_i32_0 = arith.constant 0 : i32
    %c0_i32_1 = arith.constant 0 : i32
    return %c0_i32, %c0_i32_0 : i32, i32
  }
  func.func @transform_5(%arg0: i32) -> (i32, i32, i32) {
    %c0_i32 = arith.constant 0 : i32
    %c0_i32_0 = arith.constant 0 : i32
    %c0_i32_1 = arith.constant 0 : i32
    return %arg0, %c0_i32, %c0_i32_0 : i32, i32, i32
  }
  func.func @transform_6(%arg0: i32) -> (i32, i32) {
    %c0_i32 = arith.constant 0 : i32
    %c0_i32_0 = arith.constant 0 : i32
    %c0_i32_1 = arith.constant 0 : i32
    return %c0_i32, %c0_i32_0 : i32, i32
  }
  func.func @transform_7(%arg0: i32) -> (i32, i32, i32) {
    %c0_i32 = arith.constant 0 : i32
    %c0_i32_0 = arith.constant 0 : i32
    %c0_i32_1 = arith.constant 0 : i32
    return %arg0, %c0_i32, %c0_i32_0 : i32, i32, i32
  }
  func.func @transform_8(%arg0: i32) -> (i32, i32, i32) {
    %c0_i32 = arith.constant 0 : i32
    %c0_i32_0 = arith.constant 0 : i32
    %c0_i32_1 = arith.constant 0 : i32
    return %arg0, %c0_i32, %c0_i32_0 : i32, i32, i32
  }
}

module attributes {stable_mosaic.version = 11 : i64} {
  func.func @_softmax_outer_kernel(%arg0: i32, %arg1: i32, %arg2: memref<1x16x128xf32, #tpu.memory_space<vmem>>, %arg3: memref<1x24x128xf32, #tpu.memory_space<vmem>>, %arg4: memref<1x16x128x24xbf16, #tpu.memory_space<vmem>>, %arg5: memref<1x16x128xf32, #tpu.memory_space<vmem>>) attributes {dimension_semantics = [#tpu.dimension_semantics<parallel>, #tpu.dimension_semantics<parallel>], iteration_bounds = array<i64: 2, 4>, scalar_prefetch = 0 : i64, scratch_operands = 0 : i64, tpu.core_type = #tpu.core_type<tc>, window_params = [{transform_indices = @transform_0, window_bounds = array<i64: 1, 16, 128>}, {transform_indices = @transform_1, window_bounds = array<i64: 1, 24, 128>}, {transform_indices = @transform_2, window_bounds = array<i64: 1, 16, 128, 24>}, {transform_indices = @transform_3, window_bounds = array<i64: 1, 16, 128>}]} {
    %c0 = arith.constant 0 : index
    %c0_0 = arith.constant 0 : index
    %c0_1 = arith.constant 0 : index
    %0 = vector.load %arg2[%c0, %c0_0, %c0_1] : memref<1x16x128xf32, #tpu.memory_space<vmem>>, vector<1x16x128xf32>
    %1 = vector.shape_cast %0 : vector<1x16x128xf32> to vector<16x128xf32>
    %cst = arith.constant dense<0xFF800000> : vector<128xf32>
    %2 = vector.multi_reduction <maximumf>, %1, %cst [0] : vector<16x128xf32> to vector<128xf32>
    %3 = vector.shape_cast %2 : vector<128xf32> to vector<1x128xf32>
    %4 = vector.broadcast %3 : vector<1x128xf32> to vector<16x128xf32>
    %5 = arith.subf %1, %4 : vector<16x128xf32>
    %6 = math.exp %5 : vector<16x128xf32>
    %cst_2 = arith.constant dense<0.000000e+00> : vector<128xf32>
    %7 = vector.multi_reduction <add>, %6, %cst_2 [0] : vector<16x128xf32> to vector<128xf32>
    %8 = vector.shape_cast %7 : vector<128xf32> to vector<1x128xf32>
    %9 = tpu.reciprocal %8 {approx = true} : vector<1x128xf32> -> vector<1x128xf32>
    %10 = arith.mulf %8, %9 : vector<1x128xf32>
    %cst_3 = arith.constant 2.000000e+00 : f32
    %11 = vector.broadcast %cst_3 : f32 to vector<1x128xf32>
    %12 = arith.subf %11, %10 : vector<1x128xf32>
    %13 = arith.mulf %9, %12 : vector<1x128xf32>
    %14 = vector.broadcast %13 : vector<1x128xf32> to vector<16x128xf32>
    %15 = arith.mulf %6, %14 : vector<16x128xf32>
    %c0_4 = arith.constant 0 : index
    %c0_5 = arith.constant 0 : index
    %c0_6 = arith.constant 0 : index
    %16 = vector.load %arg5[%c0_4, %c0_5, %c0_6] : memref<1x16x128xf32, #tpu.memory_space<vmem>>, vector<1x16x128xf32>
    %17 = vector.shape_cast %16 : vector<1x16x128xf32> to vector<16x128xf32>
    %18 = vector.shape_cast %15 : vector<16x128xf32> to vector<1x16x128xf32>
    tpu.vector_store %arg5[%c0_4, %c0_5, %c0_6], %18 {strides = array<i32>} : memref<1x16x128xf32, #tpu.memory_space<vmem>>, vector<1x16x128xf32>,
    %c0_7 = arith.constant 0 : index
    %c0_8 = arith.constant 0 : index
    %c0_9 = arith.constant 0 : index
    %19 = vector.load %arg3[%c0_7, %c0_8, %c0_9] : memref<1x24x128xf32, #tpu.memory_space<vmem>>, vector<1x24x128xf32>
    %20 = vector.shape_cast %19 : vector<1x24x128xf32> to vector<24x128xf32>
    %21 = tpu.transpose %20, [1, 0] : vector<24x128xf32> -> vector<128x24xf32>
    %22 = vector.shape_cast %15 : vector<16x128xf32> to vector<16x128x1xf32>
    %23 = vector.shape_cast %21 : vector<128x24xf32> to vector<1x128x24xf32>
    %24 = vector.broadcast %22 : vector<16x128x1xf32> to vector<16x128x24xf32>
    %25 = vector.broadcast %23 : vector<1x128x24xf32> to vector<16x128x24xf32>
    %26 = arith.mulf %24, %25 : vector<16x128x24xf32>
    %27 = arith.truncf %26 : vector<16x128x24xf32> to vector<16x128x24xbf16>
    %c0_10 = arith.constant 0 : index
    %c0_11 = arith.constant 0 : index
    %c0_12 = arith.constant 0 : index
    %c0_13 = arith.constant 0 : index
    %28 = vector.load %arg4[%c0_10, %c0_11, %c0_12, %c0_13] : memref<1x16x128x24xbf16, #tpu.memory_space<vmem>>, vector<1x16x128x24xbf16>
    %29 = vector.shape_cast %28 : vector<1x16x128x24xbf16> to vector<16x128x24xbf16>
    %30 = vector.shape_cast %27 : vector<16x128x24xbf16> to vector<1x16x128x24xbf16>
    tpu.vector_store %arg4[%c0_10, %c0_11, %c0_12, %c0_13], %30 {strides = array<i32>} : memref<1x16x128x24xbf16, #tpu.memory_space<vmem>>, vector<1x16x128x24xbf16>,
    return
  }
  func.func @transform_0(%arg0: i32, %arg1: i32) -> (i32, i32, i32) {
    %c0_i32 = arith.constant 0 : i32
    %c0_i32_0 = arith.constant 0 : i32
    return %arg0, %c0_i32, %arg1 : i32, i32, i32
  }
  func.func @transform_1(%arg0: i32, %arg1: i32) -> (i32, i32, i32) {
    %c0_i32 = arith.constant 0 : i32
    %c0_i32_0 = arith.constant 0 : i32
    return %arg0, %c0_i32, %arg1 : i32, i32, i32
  }
  func.func @transform_2(%arg0: i32, %arg1: i32) -> (i32, i32, i32, i32) {
    %c0_i32 = arith.constant 0 : i32
    %c0_i32_0 = arith.constant 0 : i32
    %c0_i32_1 = arith.constant 0 : i32
    return %arg0, %c0_i32, %arg1, %c0_i32_0 : i32, i32, i32, i32
  }
  func.func @transform_3(%arg0: i32, %arg1: i32) -> (i32, i32, i32) {
    %c0_i32 = arith.constant 0 : i32
    %c0_i32_0 = arith.constant 0 : i32
    return %arg0, %c0_i32, %arg1 : i32, i32, i32
  }
}

module attributes {stable_mosaic.version = 11 : i64} {
  func.func @_aspp_depth_kernel(%arg0: i32, %arg1: memref<1x16x512xbf16, #tpu.memory_space<vmem>>, %arg2: memref<16x16xbf16, #tpu.memory_space<vmem>>, %arg3: memref<3x16x144xbf16, #tpu.memory_space<vmem>>, %arg4: memref<4x16x16xbf16, #tpu.memory_space<vmem>>, %arg5: memref<1x1x16xf32, #tpu.memory_space<vmem>>, %arg6: memref<16x16xbf16, #tpu.memory_space<vmem>>, %arg7: memref<1x16xf32, #tpu.memory_space<vmem>>, %arg8: memref<1x16x512xf32, #tpu.memory_space<vmem>>, %arg9: memref<16x5376xbf16, #tpu.memory_space<vmem>>, %arg10: memref<144x512xbf16, #tpu.memory_space<vmem>>) attributes {dimension_semantics = [#tpu.dimension_semantics<parallel>], iteration_bounds = array<i64: 2>, scalar_prefetch = 0 : i64, scratch_operands = 2 : i64, tpu.core_type = #tpu.core_type<tc>, window_params = [{transform_indices = @transform_0, window_bounds = array<i64: 1, 16, 512>}, {pipeline_mode = #tpu.pipeline_mode<synchronous>, transform_indices = @transform_1, window_bounds = array<i64: 16, 16>}, {pipeline_mode = #tpu.pipeline_mode<synchronous>, transform_indices = @transform_2, window_bounds = array<i64: 3, 16, 144>}, {pipeline_mode = #tpu.pipeline_mode<synchronous>, transform_indices = @transform_3, window_bounds = array<i64: 4, 16, 16>}, {transform_indices = @transform_4, window_bounds = array<i64: 1, 1, 16>}, {pipeline_mode = #tpu.pipeline_mode<synchronous>, transform_indices = @transform_5, window_bounds = array<i64: 16, 16>}, {pipeline_mode = #tpu.pipeline_mode<synchronous>, transform_indices = @transform_6, window_bounds = array<i64: 1, 16>}, {transform_indices = @transform_7, window_bounds = array<i64: 1, 16, 512>}]} {
    %c0 = arith.constant 0 : index
    %c0_0 = arith.constant 0 : index
    %c0_1 = arith.constant 0 : index
    %0 = vector.load %arg1[%c0, %c0_0, %c0_1] : memref<1x16x512xbf16, #tpu.memory_space<vmem>>, vector<1x16x512xbf16>
    %1 = vector.shape_cast %0 : vector<1x16x512xbf16> to vector<16x512xbf16>
    %c0_2 = arith.constant 0 : index
    %c0_3 = arith.constant 0 : index
    %2 = vector.load %arg2[%c0_2, %c0_3] : memref<16x16xbf16, #tpu.memory_space<vmem>>, vector<16x16xbf16>
    %cst = arith.constant dense<0.000000e+00> : vector<16x512xf32>
    %3 = tpu.matmul %2, %1, %cst {dimension_numbers = #tpu.dot_dimension_numbers<[1], [0], [0], [1], [0, 0, 1, 1], [], []>} : vector<16x16xbf16>, vector<16x512xbf16>, vector<16x512xf32> -> vector<16x512xf32>
    %cst_4 = arith.constant 0.000000e+00 : f32
    %4 = vector.broadcast %cst_4 : f32 to vector<16x512xf32>
    %5 = arith.maximumf %3, %4 : vector<16x512xf32>
    %c0_5 = arith.constant 0 : index
    %c0_6 = arith.constant 0 : index
    %c0_7 = arith.constant 0 : index
    %6 = vector.load %arg4[%c0_5, %c0_6, %c0_7] : memref<4x16x16xbf16, #tpu.memory_space<vmem>>, vector<1x16x16xbf16>
    %7 = vector.shape_cast %6 : vector<1x16x16xbf16> to vector<16x16xbf16>
    %8 = arith.truncf %5 : vector<16x512xf32> to vector<16x512xbf16>
    %cst_8 = arith.constant dense<0.000000e+00> : vector<16x512xf32>
    %9 = tpu.matmul %7, %8, %cst_8 {dimension_numbers = #tpu.dot_dimension_numbers<[1], [0], [0], [1], [0, 0, 1, 1], [], []>} : vector<16x16xbf16>, vector<16x512xbf16>, vector<16x512xf32> -> vector<16x512xf32>
    %cst_9 = arith.constant 0.000000e+00 : bf16
    %10 = vector.broadcast %cst_9 : bf16 to vector<16x5376xbf16>
    %c0_10 = arith.constant 0 : index
    %c0_11 = arith.constant 0 : index
    %11 = vector.load %arg9[%c0_10, %c0_11] : memref<16x5376xbf16, #tpu.memory_space<vmem>>, vector<16x5376xbf16>
    tpu.vector_store %arg9[%c0_10, %c0_11], %10 {strides = array<i32>} : memref<16x5376xbf16, #tpu.memory_space<vmem>>, vector<16x5376xbf16>,
    %c0_12 = arith.constant 0 : index
    %c2432 = arith.constant 2432 : index
    %12 = vector.load %arg9[%c0_12, %c2432] : memref<16x5376xbf16, #tpu.memory_space<vmem>>, vector<16x512xbf16>
    tpu.vector_store %arg9[%c0_12, %c2432], %1 {strides = array<i32>} : memref<16x5376xbf16, #tpu.memory_space<vmem>>, vector<16x512xbf16>,
    %c0_13 = arith.constant 0 : index
    %c1658 = arith.constant 1658 : index
    %13 = vector.load %arg9[%c0_13, %c1658] : memref<16x5376xbf16, #tpu.memory_space<vmem>>, vector<16x512xbf16>
    %c0_14 = arith.constant 0 : index
    %c0_15 = arith.constant 0 : index
    %14 = vector.load %arg10[%c0_14, %c0_15] : memref<144x512xbf16, #tpu.memory_space<vmem>>, vector<16x512xbf16>
    tpu.vector_store %arg10[%c0_14, %c0_15], %13 {strides = array<i32>} : memref<144x512xbf16, #tpu.memory_space<vmem>>, vector<16x512xbf16>,
    %c0_16 = arith.constant 0 : index
    %c1664 = arith.constant 1664 : index
    %15 = vector.load %arg9[%c0_16, %c1664] : memref<16x5376xbf16, #tpu.memory_space<vmem>>, vector<16x512xbf16>
    %c16 = arith.constant 16 : index
    %c0_17 = arith.constant 0 : index
    %16 = vector.load %arg10[%c16, %c0_17] : memref<144x512xbf16, #tpu.memory_space<vmem>>, vector<16x512xbf16>
    tpu.vector_store %arg10[%c16, %c0_17], %15 {strides = array<i32>} : memref<144x512xbf16, #tpu.memory_space<vmem>>, vector<16x512xbf16>,
    %c0_18 = arith.constant 0 : index
    %c1670 = arith.constant 1670 : index
    %17 = vector.load %arg9[%c0_18, %c1670] : memref<16x5376xbf16, #tpu.memory_space<vmem>>, vector<16x512xbf16>
    %c32 = arith.constant 32 : index
    %c0_19 = arith.constant 0 : index
    %18 = vector.load %arg10[%c32, %c0_19] : memref<144x512xbf16, #tpu.memory_space<vmem>>, vector<16x512xbf16>
    tpu.vector_store %arg10[%c32, %c0_19], %17 {strides = array<i32>} : memref<144x512xbf16, #tpu.memory_space<vmem>>, vector<16x512xbf16>,
    %c0_20 = arith.constant 0 : index
    %c2426 = arith.constant 2426 : index
    %19 = vector.load %arg9[%c0_20, %c2426] : memref<16x5376xbf16, #tpu.memory_space<vmem>>, vector<16x512xbf16>
    %c48 = arith.constant 48 : index
    %c0_21 = arith.constant 0 : index
    %20 = vector.load %arg10[%c48, %c0_21] : memref<144x512xbf16, #tpu.memory_space<vmem>>, vector<16x512xbf16>
    tpu.vector_store %arg10[%c48, %c0_21], %19 {strides = array<i32>} : memref<144x512xbf16, #tpu.memory_space<vmem>>, vector<16x512xbf16>,
    %c0_22 = arith.constant 0 : index
    %c2432_23 = arith.constant 2432 : index
    %21 = vector.load %arg9[%c0_22, %c2432_23] : memref<16x5376xbf16, #tpu.memory_space<vmem>>, vector<16x512xbf16>
    %c64 = arith.constant 64 : index
    %c0_24 = arith.constant 0 : index
    %22 = vector.load %arg10[%c64, %c0_24] : memref<144x512xbf16, #tpu.memory_space<vmem>>, vector<16x512xbf16>
    tpu.vector_store %arg10[%c64, %c0_24], %21 {strides = array<i32>} : memref<144x512xbf16, #tpu.memory_space<vmem>>, vector<16x512xbf16>,
    %c0_25 = arith.constant 0 : index
    %c2438 = arith.constant 2438 : index
    %23 = vector.load %arg9[%c0_25, %c2438] : memref<16x5376xbf16, #tpu.memory_space<vmem>>, vector<16x512xbf16>
    %c80 = arith.constant 80 : index
    %c0_26 = arith.constant 0 : index
    %24 = vector.load %arg10[%c80, %c0_26] : memref<144x512xbf16, #tpu.memory_space<vmem>>, vector<16x512xbf16>
    tpu.vector_store %arg10[%c80, %c0_26], %23 {strides = array<i32>} : memref<144x512xbf16, #tpu.memory_space<vmem>>, vector<16x512xbf16>,
    %c0_27 = arith.constant 0 : index
    %c3194 = arith.constant 3194 : index
    %25 = vector.load %arg9[%c0_27, %c3194] : memref<16x5376xbf16, #tpu.memory_space<vmem>>, vector<16x512xbf16>
    %c96 = arith.constant 96 : index
    %c0_28 = arith.constant 0 : index
    %26 = vector.load %arg10[%c96, %c0_28] : memref<144x512xbf16, #tpu.memory_space<vmem>>, vector<16x512xbf16>
    tpu.vector_store %arg10[%c96, %c0_28], %25 {strides = array<i32>} : memref<144x512xbf16, #tpu.memory_space<vmem>>, vector<16x512xbf16>,
    %c0_29 = arith.constant 0 : index
    %c3200 = arith.constant 3200 : index
    %27 = vector.load %arg9[%c0_29, %c3200] : memref<16x5376xbf16, #tpu.memory_space<vmem>>, vector<16x512xbf16>
    %c112 = arith.constant 112 : index
    %c0_30 = arith.constant 0 : index
    %28 = vector.load %arg10[%c112, %c0_30] : memref<144x512xbf16, #tpu.memory_space<vmem>>, vector<16x512xbf16>
    tpu.vector_store %arg10[%c112, %c0_30], %27 {strides = array<i32>} : memref<144x512xbf16, #tpu.memory_space<vmem>>, vector<16x512xbf16>,
    %c0_31 = arith.constant 0 : index
    %c3206 = arith.constant 3206 : index
    %29 = vector.load %arg9[%c0_31, %c3206] : memref<16x5376xbf16, #tpu.memory_space<vmem>>, vector<16x512xbf16>
    %c128 = arith.constant 128 : index
    %c0_32 = arith.constant 0 : index
    %30 = vector.load %arg10[%c128, %c0_32] : memref<144x512xbf16, #tpu.memory_space<vmem>>, vector<16x512xbf16>
    tpu.vector_store %arg10[%c128, %c0_32], %29 {strides = array<i32>} : memref<144x512xbf16, #tpu.memory_space<vmem>>, vector<16x512xbf16>,
    %c0_33 = arith.constant 0 : index
    %c0_34 = arith.constant 0 : index
    %c0_35 = arith.constant 0 : index
    %31 = vector.load %arg3[%c0_33, %c0_34, %c0_35] : memref<3x16x144xbf16, #tpu.memory_space<vmem>>, vector<1x16x144xbf16>
    %32 = vector.shape_cast %31 : vector<1x16x144xbf16> to vector<16x144xbf16>
    %c0_36 = arith.constant 0 : index
    %c0_37 = arith.constant 0 : index
    %33 = vector.load %arg10[%c0_36, %c0_37] : memref<144x512xbf16, #tpu.memory_space<vmem>>, vector<144x512xbf16>
    %cst_38 = arith.constant dense<0.000000e+00> : vector<16x512xf32>
    %34 = tpu.matmul %32, %33, %cst_38 {dimension_numbers = #tpu.dot_dimension_numbers<[1], [0], [0], [1], [0, 0, 1, 1], [], []>} : vector<16x144xbf16>, vector<144x512xbf16>, vector<16x512xf32> -> vector<16x512xf32>
    %c1 = arith.constant 1 : index
    %c0_39 = arith.constant 0 : index
    %c0_40 = arith.constant 0 : index
    %35 = vector.load %arg4[%c1, %c0_39, %c0_40] : memref<4x16x16xbf16, #tpu.memory_space<vmem>>, vector<1x16x16xbf16>
    %36 = vector.shape_cast %35 : vector<1x16x16xbf16> to vector<16x16xbf16>
    %cst_41 = arith.constant 0.000000e+00 : f32
    %37 = vector.broadcast %cst_41 : f32 to vector<16x512xf32>
    %38 = arith.maximumf %34, %37 : vector<16x512xf32>
    %39 = arith.truncf %38 : vector<16x512xf32> to vector<16x512xbf16>
    %cst_42 = arith.constant dense<0.000000e+00> : vector<16x512xf32>
    %40 = tpu.matmul %36, %39, %cst_42 {dimension_numbers = #tpu.dot_dimension_numbers<[1], [0], [0], [1], [0, 0, 1, 1], [], []>} : vector<16x16xbf16>, vector<16x512xbf16>, vector<16x512xf32> -> vector<16x512xf32>
    %41 = arith.addf %9, %40 : vector<16x512xf32>
    %c0_43 = arith.constant 0 : index
    %c884 = arith.constant 884 : index
    %42 = vector.load %arg9[%c0_43, %c884] : memref<16x5376xbf16, #tpu.memory_space<vmem>>, vector<16x512xbf16>
    %c0_44 = arith.constant 0 : index
    %c0_45 = arith.constant 0 : index
    %43 = vector.load %arg10[%c0_44, %c0_45] : memref<144x512xbf16, #tpu.memory_space<vmem>>, vector<16x512xbf16>
    tpu.vector_store %arg10[%c0_44, %c0_45], %42 {strides = array<i32>} : memref<144x512xbf16, #tpu.memory_space<vmem>>, vector<16x512xbf16>,
    %c0_46 = arith.constant 0 : index
    %c896 = arith.constant 896 : index
    %44 = vector.load %arg9[%c0_46, %c896] : memref<16x5376xbf16, #tpu.memory_space<vmem>>, vector<16x512xbf16>
    %c16_47 = arith.constant 16 : index
    %c0_48 = arith.constant 0 : index
    %45 = vector.load %arg10[%c16_47, %c0_48] : memref<144x512xbf16, #tpu.memory_space<vmem>>, vector<16x512xbf16>
    tpu.vector_store %arg10[%c16_47, %c0_48], %44 {strides = array<i32>} : memref<144x512xbf16, #tpu.memory_space<vmem>>, vector<16x512xbf16>,
    %c0_49 = arith.constant 0 : index
    %c908 = arith.constant 908 : index
    %46 = vector.load %arg9[%c0_49, %c908] : memref<16x5376xbf16, #tpu.memory_space<vmem>>, vector<16x512xbf16>
    %c32_50 = arith.constant 32 : index
    %c0_51 = arith.constant 0 : index
    %47 = vector.load %arg10[%c32_50, %c0_51] : memref<144x512xbf16, #tpu.memory_space<vmem>>, vector<16x512xbf16>
    tpu.vector_store %arg10[%c32_50, %c0_51], %46 {strides = array<i32>} : memref<144x512xbf16, #tpu.memory_space<vmem>>, vector<16x512xbf16>,
    %c0_52 = arith.constant 0 : index
    %c2420 = arith.constant 2420 : index
    %48 = vector.load %arg9[%c0_52, %c2420] : memref<16x5376xbf16, #tpu.memory_space<vmem>>, vector<16x512xbf16>
    %c48_53 = arith.constant 48 : index
    %c0_54 = arith.constant 0 : index
    %49 = vector.load %arg10[%c48_53, %c0_54] : memref<144x512xbf16, #tpu.memory_space<vmem>>, vector<16x512xbf16>
    tpu.vector_store %arg10[%c48_53, %c0_54], %48 {strides = array<i32>} : memref<144x512xbf16, #tpu.memory_space<vmem>>, vector<16x512xbf16>,
    %c0_55 = arith.constant 0 : index
    %c2432_56 = arith.constant 2432 : index
    %50 = vector.load %arg9[%c0_55, %c2432_56] : memref<16x5376xbf16, #tpu.memory_space<vmem>>, vector<16x512xbf16>
    %c64_57 = arith.constant 64 : index
    %c0_58 = arith.constant 0 : index
    %51 = vector.load %arg10[%c64_57, %c0_58] : memref<144x512xbf16, #tpu.memory_space<vmem>>, vector<16x512xbf16>
    tpu.vector_store %arg10[%c64_57, %c0_58], %50 {strides = array<i32>} : memref<144x512xbf16, #tpu.memory_space<vmem>>, vector<16x512xbf16>,
    %c0_59 = arith.constant 0 : index
    %c2444 = arith.constant 2444 : index
    %52 = vector.load %arg9[%c0_59, %c2444] : memref<16x5376xbf16, #tpu.memory_space<vmem>>, vector<16x512xbf16>
    %c80_60 = arith.constant 80 : index
    %c0_61 = arith.constant 0 : index
    %53 = vector.load %arg10[%c80_60, %c0_61] : memref<144x512xbf16, #tpu.memory_space<vmem>>, vector<16x512xbf16>
    tpu.vector_store %arg10[%c80_60, %c0_61], %52 {strides = array<i32>} : memref<144x512xbf16, #tpu.memory_space<vmem>>, vector<16x512xbf16>,
    %c0_62 = arith.constant 0 : index
    %c3956 = arith.constant 3956 : index
    %54 = vector.load %arg9[%c0_62, %c3956] : memref<16x5376xbf16, #tpu.memory_space<vmem>>, vector<16x512xbf16>
    %c96_63 = arith.constant 96 : index
    %c0_64 = arith.constant 0 : index
    %55 = vector.load %arg10[%c96_63, %c0_64] : memref<144x512xbf16, #tpu.memory_space<vmem>>, vector<16x512xbf16>
    tpu.vector_store %arg10[%c96_63, %c0_64], %54 {strides = array<i32>} : memref<144x512xbf16, #tpu.memory_space<vmem>>, vector<16x512xbf16>,
    %c0_65 = arith.constant 0 : index
    %c3968 = arith.constant 3968 : index
    %56 = vector.load %arg9[%c0_65, %c3968] : memref<16x5376xbf16, #tpu.memory_space<vmem>>, vector<16x512xbf16>
    %c112_66 = arith.constant 112 : index
    %c0_67 = arith.constant 0 : index
    %57 = vector.load %arg10[%c112_66, %c0_67] : memref<144x512xbf16, #tpu.memory_space<vmem>>, vector<16x512xbf16>
    tpu.vector_store %arg10[%c112_66, %c0_67], %56 {strides = array<i32>} : memref<144x512xbf16, #tpu.memory_space<vmem>>, vector<16x512xbf16>,
    %c0_68 = arith.constant 0 : index
    %c3980 = arith.constant 3980 : index
    %58 = vector.load %arg9[%c0_68, %c3980] : memref<16x5376xbf16, #tpu.memory_space<vmem>>, vector<16x512xbf16>
    %c128_69 = arith.constant 128 : index
    %c0_70 = arith.constant 0 : index
    %59 = vector.load %arg10[%c128_69, %c0_70] : memref<144x512xbf16, #tpu.memory_space<vmem>>, vector<16x512xbf16>
    tpu.vector_store %arg10[%c128_69, %c0_70], %58 {strides = array<i32>} : memref<144x512xbf16, #tpu.memory_space<vmem>>, vector<16x512xbf16>,
    %c1_71 = arith.constant 1 : index
    %c0_72 = arith.constant 0 : index
    %c0_73 = arith.constant 0 : index
    %60 = vector.load %arg3[%c1_71, %c0_72, %c0_73] : memref<3x16x144xbf16, #tpu.memory_space<vmem>>, vector<1x16x144xbf16>
    %61 = vector.shape_cast %60 : vector<1x16x144xbf16> to vector<16x144xbf16>
    %c0_74 = arith.constant 0 : index
    %c0_75 = arith.constant 0 : index
    %62 = vector.load %arg10[%c0_74, %c0_75] : memref<144x512xbf16, #tpu.memory_space<vmem>>, vector<144x512xbf16>
    %cst_76 = arith.constant dense<0.000000e+00> : vector<16x512xf32>
    %63 = tpu.matmul %61, %62, %cst_76 {dimension_numbers = #tpu.dot_dimension_numbers<[1], [0], [0], [1], [0, 0, 1, 1], [], []>} : vector<16x144xbf16>, vector<144x512xbf16>, vector<16x512xf32> -> vector<16x512xf32>
    %c2 = arith.constant 2 : index
    %c0_77 = arith.constant 0 : index
    %c0_78 = arith.constant 0 : index
    %64 = vector.load %arg4[%c2, %c0_77, %c0_78] : memref<4x16x16xbf16, #tpu.memory_space<vmem>>, vector<1x16x16xbf16>
    %65 = vector.shape_cast %64 : vector<1x16x16xbf16> to vector<16x16xbf16>
    %cst_79 = arith.constant 0.000000e+00 : f32
    %66 = vector.broadcast %cst_79 : f32 to vector<16x512xf32>
    %67 = arith.maximumf %63, %66 : vector<16x512xf32>
    %68 = arith.truncf %67 : vector<16x512xf32> to vector<16x512xbf16>
    %cst_80 = arith.constant dense<0.000000e+00> : vector<16x512xf32>
    %69 = tpu.matmul %65, %68, %cst_80 {dimension_numbers = #tpu.dot_dimension_numbers<[1], [0], [0], [1], [0, 0, 1, 1], [], []>} : vector<16x16xbf16>, vector<16x512xbf16>, vector<16x512xf32> -> vector<16x512xf32>
    %70 = arith.addf %41, %69 : vector<16x512xf32>
    %c0_81 = arith.constant 0 : index
    %c110 = arith.constant 110 : index
    %71 = vector.load %arg9[%c0_81, %c110] : memref<16x5376xbf16, #tpu.memory_space<vmem>>, vector<16x512xbf16>
    %c0_82 = arith.constant 0 : index
    %c0_83 = arith.constant 0 : index
    %72 = vector.load %arg10[%c0_82, %c0_83] : memref<144x512xbf16, #tpu.memory_space<vmem>>, vector<16x512xbf16>
    tpu.vector_store %arg10[%c0_82, %c0_83], %71 {strides = array<i32>} : memref<144x512xbf16, #tpu.memory_space<vmem>>, vector<16x512xbf16>,
    %c0_84 = arith.constant 0 : index
    %c128_85 = arith.constant 128 : index
    %73 = vector.load %arg9[%c0_84, %c128_85] : memref<16x5376xbf16, #tpu.memory_space<vmem>>, vector<16x512xbf16>
    %c16_86 = arith.constant 16 : index
    %c0_87 = arith.constant 0 : index
    %74 = vector.load %arg10[%c16_86, %c0_87] : memref<144x512xbf16, #tpu.memory_space<vmem>>, vector<16x512xbf16>
    tpu.vector_store %arg10[%c16_86, %c0_87], %73 {strides = array<i32>} : memref<144x512xbf16, #tpu.memory_space<vmem>>, vector<16x512xbf16>,
    %c0_88 = arith.constant 0 : index
    %c146 = arith.constant 146 : index
    %75 = vector.load %arg9[%c0_88, %c146] : memref<16x5376xbf16, #tpu.memory_space<vmem>>, vector<16x512xbf16>
    %c32_89 = arith.constant 32 : index
    %c0_90 = arith.constant 0 : index
    %76 = vector.load %arg10[%c32_89, %c0_90] : memref<144x512xbf16, #tpu.memory_space<vmem>>, vector<16x512xbf16>
    tpu.vector_store %arg10[%c32_89, %c0_90], %75 {strides = array<i32>} : memref<144x512xbf16, #tpu.memory_space<vmem>>, vector<16x512xbf16>,
    %c0_91 = arith.constant 0 : index
    %c2414 = arith.constant 2414 : index
    %77 = vector.load %arg9[%c0_91, %c2414] : memref<16x5376xbf16, #tpu.memory_space<vmem>>, vector<16x512xbf16>
    %c48_92 = arith.constant 48 : index
    %c0_93 = arith.constant 0 : index
    %78 = vector.load %arg10[%c48_92, %c0_93] : memref<144x512xbf16, #tpu.memory_space<vmem>>, vector<16x512xbf16>
    tpu.vector_store %arg10[%c48_92, %c0_93], %77 {strides = array<i32>} : memref<144x512xbf16, #tpu.memory_space<vmem>>, vector<16x512xbf16>,
    %c0_94 = arith.constant 0 : index
    %c2432_95 = arith.constant 2432 : index
    %79 = vector.load %arg9[%c0_94, %c2432_95] : memref<16x5376xbf16, #tpu.memory_space<vmem>>, vector<16x512xbf16>
    %c64_96 = arith.constant 64 : index
    %c0_97 = arith.constant 0 : index
    %80 = vector.load %arg10[%c64_96, %c0_97] : memref<144x512xbf16, #tpu.memory_space<vmem>>, vector<16x512xbf16>
    tpu.vector_store %arg10[%c64_96, %c0_97], %79 {strides = array<i32>} : memref<144x512xbf16, #tpu.memory_space<vmem>>, vector<16x512xbf16>,
    %c0_98 = arith.constant 0 : index
    %c2450 = arith.constant 2450 : index
    %81 = vector.load %arg9[%c0_98, %c2450] : memref<16x5376xbf16, #tpu.memory_space<vmem>>, vector<16x512xbf16>
    %c80_99 = arith.constant 80 : index
    %c0_100 = arith.constant 0 : index
    %82 = vector.load %arg10[%c80_99, %c0_100] : memref<144x512xbf16, #tpu.memory_space<vmem>>, vector<16x512xbf16>
    tpu.vector_store %arg10[%c80_99, %c0_100], %81 {strides = array<i32>} : memref<144x512xbf16, #tpu.memory_space<vmem>>, vector<16x512xbf16>,
    %c0_101 = arith.constant 0 : index
    %c4718 = arith.constant 4718 : index
    %83 = vector.load %arg9[%c0_101, %c4718] : memref<16x5376xbf16, #tpu.memory_space<vmem>>, vector<16x512xbf16>
    %c96_102 = arith.constant 96 : index
    %c0_103 = arith.constant 0 : index
    %84 = vector.load %arg10[%c96_102, %c0_103] : memref<144x512xbf16, #tpu.memory_space<vmem>>, vector<16x512xbf16>
    tpu.vector_store %arg10[%c96_102, %c0_103], %83 {strides = array<i32>} : memref<144x512xbf16, #tpu.memory_space<vmem>>, vector<16x512xbf16>,
    %c0_104 = arith.constant 0 : index
    %c4736 = arith.constant 4736 : index
    %85 = vector.load %arg9[%c0_104, %c4736] : memref<16x5376xbf16, #tpu.memory_space<vmem>>, vector<16x512xbf16>
    %c112_105 = arith.constant 112 : index
    %c0_106 = arith.constant 0 : index
    %86 = vector.load %arg10[%c112_105, %c0_106] : memref<144x512xbf16, #tpu.memory_space<vmem>>, vector<16x512xbf16>
    tpu.vector_store %arg10[%c112_105, %c0_106], %85 {strides = array<i32>} : memref<144x512xbf16, #tpu.memory_space<vmem>>, vector<16x512xbf16>,
    %c0_107 = arith.constant 0 : index
    %c4754 = arith.constant 4754 : index
    %87 = vector.load %arg9[%c0_107, %c4754] : memref<16x5376xbf16, #tpu.memory_space<vmem>>, vector<16x512xbf16>
    %c128_108 = arith.constant 128 : index
    %c0_109 = arith.constant 0 : index
    %88 = vector.load %arg10[%c128_108, %c0_109] : memref<144x512xbf16, #tpu.memory_space<vmem>>, vector<16x512xbf16>
    tpu.vector_store %arg10[%c128_108, %c0_109], %87 {strides = array<i32>} : memref<144x512xbf16, #tpu.memory_space<vmem>>, vector<16x512xbf16>,
    %c2_110 = arith.constant 2 : index
    %c0_111 = arith.constant 0 : index
    %c0_112 = arith.constant 0 : index
    %89 = vector.load %arg3[%c2_110, %c0_111, %c0_112] : memref<3x16x144xbf16, #tpu.memory_space<vmem>>, vector<1x16x144xbf16>
    %90 = vector.shape_cast %89 : vector<1x16x144xbf16> to vector<16x144xbf16>
    %c0_113 = arith.constant 0 : index
    %c0_114 = arith.constant 0 : index
    %91 = vector.load %arg10[%c0_113, %c0_114] : memref<144x512xbf16, #tpu.memory_space<vmem>>, vector<144x512xbf16>
    %cst_115 = arith.constant dense<0.000000e+00> : vector<16x512xf32>
    %92 = tpu.matmul %90, %91, %cst_115 {dimension_numbers = #tpu.dot_dimension_numbers<[1], [0], [0], [1], [0, 0, 1, 1], [], []>} : vector<16x144xbf16>, vector<144x512xbf16>, vector<16x512xf32> -> vector<16x512xf32>
    %c3 = arith.constant 3 : index
    %c0_116 = arith.constant 0 : index
    %c0_117 = arith.constant 0 : index
    %93 = vector.load %arg4[%c3, %c0_116, %c0_117] : memref<4x16x16xbf16, #tpu.memory_space<vmem>>, vector<1x16x16xbf16>
    %94 = vector.shape_cast %93 : vector<1x16x16xbf16> to vector<16x16xbf16>
    %cst_118 = arith.constant 0.000000e+00 : f32
    %95 = vector.broadcast %cst_118 : f32 to vector<16x512xf32>
    %96 = arith.maximumf %92, %95 : vector<16x512xf32>
    %97 = arith.truncf %96 : vector<16x512xf32> to vector<16x512xbf16>
    %cst_119 = arith.constant dense<0.000000e+00> : vector<16x512xf32>
    %98 = tpu.matmul %94, %97, %cst_119 {dimension_numbers = #tpu.dot_dimension_numbers<[1], [0], [0], [1], [0, 0, 1, 1], [], []>} : vector<16x16xbf16>, vector<16x512xbf16>, vector<16x512xf32> -> vector<16x512xf32>
    %99 = arith.addf %70, %98 : vector<16x512xf32>
    %c0_120 = arith.constant 0 : index
    %c0_121 = arith.constant 0 : index
    %c0_122 = arith.constant 0 : index
    %100 = vector.load %arg5[%c0_120, %c0_121, %c0_122] : memref<1x1x16xf32, #tpu.memory_space<vmem>>, vector<1x1x16xf32>
    %101 = vector.shape_cast %100 : vector<1x1x16xf32> to vector<16xf32>
    %102 = vector.shape_cast %101 : vector<16xf32> to vector<16x1xf32>
    %103 = vector.broadcast %102 : vector<16x1xf32> to vector<16x512xf32>
    %104 = arith.addf %99, %103 : vector<16x512xf32>
    %cst_123 = arith.constant 0.000000e+00 : f32
    %105 = vector.broadcast %cst_123 : f32 to vector<16x512xf32>
    %106 = arith.maximumf %104, %105 : vector<16x512xf32>
    %c0_124 = arith.constant 0 : index
    %c0_125 = arith.constant 0 : index
    %107 = vector.load %arg6[%c0_124, %c0_125] : memref<16x16xbf16, #tpu.memory_space<vmem>>, vector<16x16xbf16>
    %108 = arith.truncf %106 : vector<16x512xf32> to vector<16x512xbf16>
    %cst_126 = arith.constant dense<0.000000e+00> : vector<16x512xf32>
    %109 = tpu.matmul %107, %108, %cst_126 {dimension_numbers = #tpu.dot_dimension_numbers<[1], [0], [0], [1], [0, 0, 1, 1], [], []>} : vector<16x16xbf16>, vector<16x512xbf16>, vector<16x512xf32> -> vector<16x512xf32>
    %c0_127 = arith.constant 0 : index
    %c0_128 = arith.constant 0 : index
    %110 = vector.load %arg7[%c0_127, %c0_128] : memref<1x16xf32, #tpu.memory_space<vmem>>, vector<1x16xf32>
    %111 = vector.shape_cast %110 : vector<1x16xf32> to vector<16xf32>
    %112 = vector.shape_cast %111 : vector<16xf32> to vector<16x1xf32>
    %113 = vector.broadcast %112 : vector<16x1xf32> to vector<16x512xf32>
    %114 = arith.addf %109, %113 : vector<16x512xf32>
    %c0_129 = arith.constant 0 : index
    %c0_130 = arith.constant 0 : index
    %c0_131 = arith.constant 0 : index
    %115 = vector.load %arg8[%c0_129, %c0_130, %c0_131] : memref<1x16x512xf32, #tpu.memory_space<vmem>>, vector<1x16x512xf32>
    %116 = vector.shape_cast %115 : vector<1x16x512xf32> to vector<16x512xf32>
    %117 = vector.shape_cast %114 : vector<16x512xf32> to vector<1x16x512xf32>
    tpu.vector_store %arg8[%c0_129, %c0_130, %c0_131], %117 {strides = array<i32>} : memref<1x16x512xf32, #tpu.memory_space<vmem>>, vector<1x16x512xf32>,
    return
  }
  func.func @transform_0(%arg0: i32) -> (i32, i32, i32) {
    %c0_i32 = arith.constant 0 : i32
    %c0_i32_0 = arith.constant 0 : i32
    %c0_i32_1 = arith.constant 0 : i32
    return %arg0, %c0_i32, %c0_i32_0 : i32, i32, i32
  }
  func.func @transform_1(%arg0: i32) -> (i32, i32) {
    %c0_i32 = arith.constant 0 : i32
    %c0_i32_0 = arith.constant 0 : i32
    %c0_i32_1 = arith.constant 0 : i32
    return %c0_i32, %c0_i32_0 : i32, i32
  }
  func.func @transform_2(%arg0: i32) -> (i32, i32, i32) {
    %c0_i32 = arith.constant 0 : i32
    %c0_i32_0 = arith.constant 0 : i32
    %c0_i32_1 = arith.constant 0 : i32
    %c0_i32_2 = arith.constant 0 : i32
    return %c0_i32, %c0_i32_0, %c0_i32_1 : i32, i32, i32
  }
  func.func @transform_3(%arg0: i32) -> (i32, i32, i32) {
    %c0_i32 = arith.constant 0 : i32
    %c0_i32_0 = arith.constant 0 : i32
    %c0_i32_1 = arith.constant 0 : i32
    %c0_i32_2 = arith.constant 0 : i32
    return %c0_i32, %c0_i32_0, %c0_i32_1 : i32, i32, i32
  }
  func.func @transform_4(%arg0: i32) -> (i32, i32, i32) {
    %c0_i32 = arith.constant 0 : i32
    %c0_i32_0 = arith.constant 0 : i32
    %c0_i32_1 = arith.constant 0 : i32
    return %arg0, %c0_i32, %c0_i32_0 : i32, i32, i32
  }
  func.func @transform_5(%arg0: i32) -> (i32, i32) {
    %c0_i32 = arith.constant 0 : i32
    %c0_i32_0 = arith.constant 0 : i32
    %c0_i32_1 = arith.constant 0 : i32
    return %c0_i32, %c0_i32_0 : i32, i32
  }
  func.func @transform_6(%arg0: i32) -> (i32, i32) {
    %c0_i32 = arith.constant 0 : i32
    %c0_i32_0 = arith.constant 0 : i32
    %c0_i32_1 = arith.constant 0 : i32
    return %c0_i32, %c0_i32_0 : i32, i32
  }
  func.func @transform_7(%arg0: i32) -> (i32, i32, i32) {
    %c0_i32 = arith.constant 0 : i32
    %c0_i32_0 = arith.constant 0 : i32
    %c0_i32_1 = arith.constant 0 : i32
    return %arg0, %c0_i32, %c0_i32_0 : i32, i32, i32
  }
}

</mosaic_0001>

<bundles_post_ra>
// kernel: tile.8
= control target key start
LH: loop header
LB: loop body
LE: loop exit
PB: predicated region body
PF: predicated region fallthrough
CT: control target
= control target key end

     0   :  { %s22_s0 = inlined_call_operand.vmem [shape: f32[128], index: 0, kind: input, shape index: {}]   ;;  %s23_s1 = inlined_call_operand.vmem [shape: f32[4,128], index: 1, kind: output, shape index: {}]  }
   0x1   :  { %v4_v0 = vld [vmem:[%s22_s0] ss:$0 sm:$0xff] }
   0x2   :  { %5 = vst [vmem:[%s23_s1] sm:$0xf] %v4_v0 }

// kernel: squeeze.1
= control target key start
LH: loop header
LB: loop body
LE: loop exit
PB: predicated region body
PF: predicated region fallthrough
CT: control target
= control target key end

     0   :  { %2 = vsyncpa [#allocation1], 0  ;;  %s5118_s6 = smov [#allocation0]   ;;  %s7083_s0 = inlined_call_operand.hbm [shape: f32[1,1,2,3,64,64], index: 0, kind: input, shape index: {}]   ;;  %s7084_s1 = inlined_call_operand.vmem [shape: f32[2,3,4,16,4,16], index: 1, kind: output, shape index: {}]  }
   0x1   :  { %s7_s7 = sshll.u32 %s5118_s6, 4  ;;  %s8_s7 = int_to_ptr.vmem [resolvable:$true] %s7_s7 }
   0x2   :  { %s5104_s8 = scalar_lea.vmem %s8_s7, 6144  ;;  %p5109_p1 = scmp.lt.s32.totalorder %s8_s7, %s8_s7 }
   0x3   :  { %p5105_p0 = scmp.ne.s32.totalorder %s8_s7, %s5104_s8  ;;  %p5110_p2 = scmp.lt.s32.totalorder %s5104_s8, %s5104_s8 }
   0x5   :  { %p5111_p3 = por %p5110_p2, %p5109_p1 }
   0x7   :  { %p5112_p4 = pnand %p5111_p3, %p5105_p0 }
   0x9   :  { %5115 = shalt.err (!%p5112_p4)
}
   0xa   :  { %10 = dma.hbm_to_vmem [thread:$0]  %s7083_s0, 6144, %s8_s7, [#allocation1]  }
   0xb   :  { %5116 = dma.done.wait [#allocation1], 6144  }
   0xc   :  { %5117 = vsyncadd [#allocation1], 4294961152  ;;  %v5135_v0 = vld [vmem:[#allocation0 + $0x10] sm:$0xff]   ;;  %v5137_v1 = vld [vmem:[#allocation0] sm:$0xff]   ;;  %vm13_vm0 = vcmask 130048   ;;  %s5119_s0 = smov 112  }
   0xd   :  { %v5139_v2 = vld [vmem:[#allocation0 + $0x18] sm:$0xff]   ;;  %364 = vrot.lane.b32.xlu1 %v5135_v0, %s5119_s0  ;;  %346 = vrot.lane.b32.xlu0 %v5137_v1, %s5119_s0  ;;  %v5145_v3 = vld [vmem:[#allocation0 + $0x8] sm:$0xff]   ;;  %v5149_v5 = vld [vmem:[#allocation0 + $0x20] sm:$0xff]   ;;  %14 = vst.msk [vmem:[#allocation2] ss:$8 sm:$0xf] %vm13_vm0, %v5137_v1  }
   0xe   :  { %v5147_v4 = vld [vmem:[#allocation0 + $0x28] sm:$0xff]   ;;  %15 = vst.msk [vmem:[#allocation2] ss:$8 sm:$0xf0] %vm13_vm0, %v5137_v1   ;;  %v5163_v6 = vld [vmem:[#allocation0 + $0x38] sm:$0xff]   ;;  %v5165_v7 = vld [vmem:[#allocation0 + $0x30] sm:$0xff]  }
   0xf   :  { %34 = vst.msk [vmem:[#allocation2 + $0xc0] ss:$8 sm:$0xf] %vm13_vm0, %v5139_v2   ;;  %36 = vst.msk [vmem:[#allocation2 + $0xc0] ss:$8 sm:$0xf0] %vm13_vm0, %v5139_v2  }
  0x10   :  { %27 = vst.msk [vmem:[#allocation2 + $0x80] ss:$8 sm:$0xf] %vm13_vm0, %v5135_v0   ;;  %29 = vst.msk [vmem:[#allocation2 + $0x80] ss:$8 sm:$0xf0] %vm13_vm0, %v5135_v0  }
  0x11   :  { %v5167_v8 = vld [vmem:[#allocation0 + $0x48] sm:$0xff]   ;;  %20 = vst.msk [vmem:[#allocation2 + $0x40] ss:$8 sm:$0xf] %vm13_vm0, %v5145_v3   ;;  %v5181_v9 = vld [vmem:[#allocation0 + $0x40] sm:$0xff]   ;;  %v5183_v10 = vld [vmem:[#allocation0 + $0x58] sm:$0xff]   ;;  %373 = vrot.lane.b32.xlu1 %v5139_v2, %s5119_s0  ;;  %355 = vrot.lane.b32.xlu0 %v5145_v3, %s5119_s0 }
  0x12   :  { %22 = vst.msk [vmem:[#allocation2 + $0x40] ss:$8 sm:$0xf0] %vm13_vm0, %v5145_v3   ;;  %48 = vst.msk [vmem:[#allocation2 + $0x140] ss:$8 sm:$0xf] %vm13_vm0, %v5147_v4  }
  0x13   :  { %50 = vst.msk [vmem:[#allocation2 + $0x140] ss:$8 sm:$0xf0] %vm13_vm0, %v5147_v4   ;;  %41 = vst.msk [vmem:[#allocation2 + $0x100] ss:$8 sm:$0xf] %vm13_vm0, %v5149_v5  }
  0x14   :  { %43 = vst.msk [vmem:[#allocation2 + $0x100] ss:$8 sm:$0xf0] %vm13_vm0, %v5149_v5   ;;  %v5185_v11 = vld [vmem:[#allocation0 + $0x50] sm:$0xff]   ;;  %v5199_v12 = vld [vmem:[#allocation0 + $0x68] sm:$0xff]   ;;  %v5201_v13 = vld [vmem:[#allocation0 + $0x60] sm:$0xff]  }
  0x15   :  { %62 = vst.msk [vmem:[#allocation2 + $0x1c0] ss:$8 sm:$0xf] %vm13_vm0, %v5163_v6   ;;  %64 = vst.msk [vmem:[#allocation2 + $0x1c0] ss:$8 sm:$0xf0] %vm13_vm0, %v5163_v6   ;;  %391 = vrot.lane.b32.xlu1 %v5147_v4, %s5119_s0  ;;  %382 = vrot.lane.b32.xlu0 %v5149_v5, %s5119_s0 }
  0x16   :  { %55 = vst.msk [vmem:[#allocation2 + $0x180] ss:$8 sm:$0xf] %vm13_vm0, %v5165_v7   ;;  %57 = vst.msk [vmem:[#allocation2 + $0x180] ss:$8 sm:$0xf0] %vm13_vm0, %v5165_v7  }
  0x17   :  { %76 = vst.msk [vmem:[#allocation2 + $0x240] ss:$8 sm:$0xf] %vm13_vm0, %v5167_v8   ;;  %78 = vst.msk [vmem:[#allocation2 + $0x240] ss:$8 sm:$0xf0] %vm13_vm0, %v5167_v8  }
  0x18   :  { %69 = vst.msk [vmem:[#allocation2 + $0x200] ss:$8 sm:$0xf] %vm13_vm0, %v5181_v9   ;;  %71 = vst.msk [vmem:[#allocation2 + $0x200] ss:$8 sm:$0xf0] %vm13_vm0, %v5181_v9  }
  0x19   :  { %90 = vst.msk [vmem:[#allocation2 + $0x2c0] ss:$8 sm:$0xf] %vm13_vm0, %v5183_v10   ;;  %92 = vst.msk [vmem:[#allocation2 + $0x2c0] ss:$8 sm:$0xf0] %vm13_vm0, %v5183_v10   ;;  %409 = vrot.lane.b32.xlu1 %v5163_v6, %s5119_s0  ;;  %400 = vrot.lane.b32.xlu0 %v5165_v7, %s5119_s0 }
  0x1a   :  { %83 = vst.msk [vmem:[#allocation2 + $0x280] ss:$8 sm:$0xf] %vm13_vm0, %v5185_v11   ;;  %85 = vst.msk [vmem:[#allocation2 + $0x280] ss:$8 sm:$0xf0] %vm13_vm0, %v5185_v11  }
  0x1b   :  { %106 = vst.msk [vmem:[#allocation2 + $0x340] ss:$8 sm:$0xf0] %vm13_vm0, %v5199_v12   ;;  %104 = vst.msk [vmem:[#allocation2 + $0x340] ss:$8 sm:$0xf] %vm13_vm0, %v5199_v12  }
  0x1c   :  { %99 = vst.msk [vmem:[#allocation2 + $0x300] ss:$8 sm:$0xf0] %vm13_vm0, %v5201_v13   ;;  %97 = vst.msk [vmem:[#allocation2 + $0x300] ss:$8 sm:$0xf] %vm13_vm0, %v5201_v13  }
  0x1d   :  { %427 = vrot.lane.b32.xlu1 %v5167_v8, %s5119_s0  ;;  %418 = vrot.lane.b32.xlu0 %v5181_v9, %s5119_s0  ;;  %v5247_v14 = vld [vmem:[#allocation0 + $0x78] sm:$0xff]   ;;  %v5249_v15 = vld [vmem:[#allocation0 + $0x70] sm:$0xff]   ;;  %v5255_v16 = vld [vmem:[#allocation0 + $0x88] sm:$0xff]   ;;  %s5120_s11 = smov 96   ;;  %s5121_s12 = smov 80  }
  0x1e   :  { %v5257_v17 = vld [vmem:[#allocation0 + $0x80] sm:$0xff]   ;;  %v5263_v18 = vld [vmem:[#allocation0 + $0x98] sm:$0xff]   ;;  %v5265_v19 = vld [vmem:[#allocation0 + $0x90] sm:$0xff]  }
  0x1f   :  { %v5271_v20 = vld [vmem:[#allocation0 + $0xa8] sm:$0xff]   ;;  %v5273_v21 = vld [vmem:[#allocation0 + $0xa0] sm:$0xff]   ;;  %v5279_v22 = vld [vmem:[#allocation0 + $0xb8] sm:$0xff]  }
  0x20   :  { %v5281_v23 = vld [vmem:[#allocation0 + $0xb0] sm:$0xff]   ;;  %v5287_v24 = vld [vmem:[#allocation0 + $0xc8] sm:$0xff]   ;;  %v5289_v25 = vld [vmem:[#allocation0 + $0xc0] sm:$0xff]  }
  0x21   :  { %445 = vrot.lane.b32.xlu1 %v5183_v10, %s5119_s0  ;;  %436 = vrot.lane.b32.xlu0 %v5185_v11, %s5119_s0  ;;  %v5295_v26 = vld [vmem:[#allocation0 + $0xd8] sm:$0xff]   ;;  %v5297_v27 = vld [vmem:[#allocation0 + $0xd0] sm:$0xff]   ;;  %v5303_v28 = vld [vmem:[#allocation0 + $0xe8] sm:$0xff]  }
  0x22   :  { %v5305_v29 = vld [vmem:[#allocation0 + $0xe0] sm:$0xff]   ;;  %v5311_v30 = vld [vmem:[#allocation0 + $0xf8] sm:$0xff]   ;;  %v5313_v31 = vld [vmem:[#allocation0 + $0xf0] sm:$0xff]  }
  0x23   :  { %v5319_v32 = vld [vmem:[#allocation0 + $0x108] sm:$0xff]   ;;  %v5321_v33 = vld [vmem:[#allocation0 + $0x100] sm:$0xff]   ;;  %v5327_v34 = vld [vmem:[#allocation0 + $0x118] sm:$0xff]  }
  0x24   :  { %v5329_v35 = vld [vmem:[#allocation0 + $0x110] sm:$0xff]   ;;  %v5335_v36 = vld [vmem:[#allocation0 + $0x128] sm:$0xff]   ;;  %v5337_v37 = vld [vmem:[#allocation0 + $0x120] sm:$0xff]  }
  0x25   :  { %463 = vrot.lane.b32.xlu1 %v5199_v12, %s5119_s0  ;;  %454 = vrot.lane.b32.xlu0 %v5201_v13, %s5119_s0  ;;  %v5343_v38 = vld [vmem:[#allocation0 + $0x138] sm:$0xff]   ;;  %v5345_v39 = vld [vmem:[#allocation0 + $0x130] sm:$0xff]   ;;  %v5351_v40 = vld [vmem:[#allocation0 + $0x148] sm:$0xff]  }
  0x26   :  { %v5353_v41 = vld [vmem:[#allocation0 + $0x140] sm:$0xff]   ;;  %v5359_v42 = vld [vmem:[#allocation0 + $0x158] sm:$0xff]   ;;  %v5361_v43 = vld [vmem:[#allocation0 + $0x150] sm:$0xff]  }
  0x27   :  { %v5367_v44 = vld [vmem:[#allocation0 + $0x168] sm:$0xff]   ;;  %v5369_v45 = vld [vmem:[#allocation0 + $0x160] sm:$0xff]   ;;  %v5375_v46 = vld [vmem:[#allocation0 + $0x178] sm:$0xff]  }
  0x28   :  { %v5377_v47 = vld [vmem:[#allocation0 + $0x170] sm:$0xff]  }
  0x29   :  { %481 = vrot.lane.b32.xlu1 %v5247_v14, %s5119_s0  ;;  %472 = vrot.lane.b32.xlu0 %v5249_v15, %s5119_s0 }
  0x2d   :  { %499 = vrot.lane.b32.xlu1 %v5255_v16, %s5119_s0  ;;  %490 = vrot.lane.b32.xlu0 %v5257_v17, %s5119_s0 }
  0x31   :  { %517 = vrot.lane.b32.xlu1 %v5263_v18, %s5119_s0  ;;  %508 = vrot.lane.b32.xlu0 %v5265_v19, %s5119_s0 }
  0x35   :  { %535 = vrot.lane.b32.xlu1 %v5271_v20, %s5119_s0  ;;  %526 = vrot.lane.b32.xlu0 %v5273_v21, %s5119_s0 }
  0x39   :  { %553 = vrot.lane.b32.xlu1 %v5279_v22, %s5119_s0  ;;  %544 = vrot.lane.b32.xlu0 %v5281_v23, %s5119_s0 }
  0x3d   :  { %571 = vrot.lane.b32.xlu1 %v5287_v24, %s5119_s0  ;;  %562 = vrot.lane.b32.xlu0 %v5289_v25, %s5119_s0 }
  0x41   :  { %589 = vrot.lane.b32.xlu1 %v5295_v26, %s5119_s0  ;;  %580 = vrot.lane.b32.xlu0 %v5297_v27, %s5119_s0 }
  0x45   :  { %607 = vrot.lane.b32.xlu1 %v5303_v28, %s5119_s0  ;;  %598 = vrot.lane.b32.xlu0 %v5305_v29, %s5119_s0 }
  0x49   :  { %625 = vrot.lane.b32.xlu1 %v5311_v30, %s5119_s0  ;;  %616 = vrot.lane.b32.xlu0 %v5313_v31, %s5119_s0 }
  0x4d   :  { %643 = vrot.lane.b32.xlu1 %v5319_v32, %s5119_s0  ;;  %634 = vrot.lane.b32.xlu0 %v5321_v33, %s5119_s0 }
  0x51   :  { %661 = vrot.lane.b32.xlu1 %v5327_v34, %s5119_s0  ;;  %652 = vrot.lane.b32.xlu0 %v5329_v35, %s5119_s0 }
  0x55   :  { %679 = vrot.lane.b32.xlu1 %v5335_v36, %s5119_s0  ;;  %670 = vrot.lane.b32.xlu0 %v5337_v37, %s5119_s0 }
  0x59   :  { %697 = vrot.lane.b32.xlu1 %v5343_v38, %s5119_s0  ;;  %688 = vrot.lane.b32.xlu0 %v5345_v39, %s5119_s0 }
  0x5d   :  { %715 = vrot.lane.b32.xlu1 %v5351_v40, %s5119_s0  ;;  %706 = vrot.lane.b32.xlu0 %v5353_v41, %s5119_s0 }
  0x61   :  { %733 = vrot.lane.b32.xlu1 %v5359_v42, %s5119_s0  ;;  %724 = vrot.lane.b32.xlu0 %v5361_v43, %s5119_s0 }
  0x65   :  { %751 = vrot.lane.b32.xlu1 %v5367_v44, %s5119_s0  ;;  %742 = vrot.lane.b32.xlu0 %v5369_v45, %s5119_s0 }
  0x69   :  { %769 = vrot.lane.b32.xlu1 %v5375_v46, %s5119_s0  ;;  %760 = vrot.lane.b32.xlu0 %v5377_v47, %s5119_s0 }
  0x6d   :  { %786 = vrot.lane.b32.xlu1 %v5145_v3, %s5120_s11  ;;  %777 = vrot.lane.b32.xlu0 %v5137_v1, %s5120_s11 }
  0x71   :  { %804 = vrot.lane.b32.xlu1 %v5139_v2, %s5120_s11  ;;  %795 = vrot.lane.b32.xlu0 %v5135_v0, %s5120_s11 }
  0x75   :  { %822 = vrot.lane.b32.xlu1 %v5147_v4, %s5120_s11  ;;  %813 = vrot.lane.b32.xlu0 %v5149_v5, %s5120_s11 }
  0x79   :  { %840 = vrot.lane.b32.xlu1 %v5163_v6, %s5120_s11  ;;  %831 = vrot.lane.b32.xlu0 %v5165_v7, %s5120_s11 }
  0x7d   :  { %858 = vrot.lane.b32.xlu1 %v5167_v8, %s5120_s11  ;;  %849 = vrot.lane.b32.xlu0 %v5181_v9, %s5120_s11 }
  0x7f   :  { %v365_v48 = vpop.permute.xlu1 %364   ;;  %v347_v49 = vpop.permute.xlu0 %346  }
  0x80   :  { %368 = vst.msk [vmem:[#allocation2 + $0x81] ss:$8 sm:$0xf] %vm13_vm0, %v365_v48   ;;  %370 = vst.msk [vmem:[#allocation2 + $0x81] ss:$8 sm:$0xf0] %vm13_vm0, %v365_v48  }
  0x81   :  { %350 = vst.msk [vmem:[#allocation2 + $0x1] ss:$8 sm:$0xf] %vm13_vm0, %v347_v49   ;;  %352 = vst.msk [vmem:[#allocation2 + $0x1] ss:$8 sm:$0xf0] %vm13_vm0, %v347_v49   ;;  %876 = vrot.lane.b32.xlu1 %v5183_v10, %s5120_s11  ;;  %867 = vrot.lane.b32.xlu0 %v5185_v11, %s5120_s11 }
  0x83   :  { %v374_v50 = vpop.permute.xlu1 %373   ;;  %v356_v51 = vpop.permute.xlu0 %355  }
  0x84   :  { %377 = vst.msk [vmem:[#allocation2 + $0xc1] ss:$8 sm:$0xf] %vm13_vm0, %v374_v50   ;;  %379 = vst.msk [vmem:[#allocation2 + $0xc1] ss:$8 sm:$0xf0] %vm13_vm0, %v374_v50  }
  0x85   :  { %359 = vst.msk [vmem:[#allocation2 + $0x41] ss:$8 sm:$0xf] %vm13_vm0, %v356_v51   ;;  %361 = vst.msk [vmem:[#allocation2 + $0x41] ss:$8 sm:$0xf0] %vm13_vm0, %v356_v51   ;;  %894 = vrot.lane.b32.xlu1 %v5199_v12, %s5120_s11  ;;  %885 = vrot.lane.b32.xlu0 %v5201_v13, %s5120_s11 }
  0x87   :  { %v392_v52 = vpop.permute.xlu1 %391   ;;  %v383_v53 = vpop.permute.xlu0 %382  }
  0x88   :  { %395 = vst.msk [vmem:[#allocation2 + $0x141] ss:$8 sm:$0xf] %vm13_vm0, %v392_v52   ;;  %397 = vst.msk [vmem:[#allocation2 + $0x141] ss:$8 sm:$0xf0] %vm13_vm0, %v392_v52  }
  0x89   :  { %386 = vst.msk [vmem:[#allocation2 + $0x101] ss:$8 sm:$0xf] %vm13_vm0, %v383_v53   ;;  %388 = vst.msk [vmem:[#allocation2 + $0x101] ss:$8 sm:$0xf0] %vm13_vm0, %v383_v53   ;;  %912 = vrot.lane.b32.xlu1 %v5247_v14, %s5120_s11  ;;  %903 = vrot.lane.b32.xlu0 %v5249_v15, %s5120_s11 }
  0x8b   :  { %v410_v54 = vpop.permute.xlu1 %409   ;;  %v401_v55 = vpop.permute.xlu0 %400  }
  0x8c   :  { %413 = vst.msk [vmem:[#allocation2 + $0x1c1] ss:$8 sm:$0xf] %vm13_vm0, %v410_v54   ;;  %415 = vst.msk [vmem:[#allocation2 + $0x1c1] ss:$8 sm:$0xf0] %vm13_vm0, %v410_v54  }
  0x8d   :  { %404 = vst.msk [vmem:[#allocation2 + $0x181] ss:$8 sm:$0xf] %vm13_vm0, %v401_v55   ;;  %406 = vst.msk [vmem:[#allocation2 + $0x181] ss:$8 sm:$0xf0] %vm13_vm0, %v401_v55   ;;  %930 = vrot.lane.b32.xlu1 %v5255_v16, %s5120_s11  ;;  %921 = vrot.lane.b32.xlu0 %v5257_v17, %s5120_s11 }
  0x8f   :  { %v428_v56 = vpop.permute.xlu1 %427   ;;  %v419_v57 = vpop.permute.xlu0 %418  }
  0x90   :  { %431 = vst.msk [vmem:[#allocation2 + $0x241] ss:$8 sm:$0xf] %vm13_vm0, %v428_v56   ;;  %433 = vst.msk [vmem:[#allocation2 + $0x241] ss:$8 sm:$0xf0] %vm13_vm0, %v428_v56  }
  0x91   :  { %422 = vst.msk [vmem:[#allocation2 + $0x201] ss:$8 sm:$0xf] %vm13_vm0, %v419_v57   ;;  %424 = vst.msk [vmem:[#allocation2 + $0x201] ss:$8 sm:$0xf0] %vm13_vm0, %v419_v57   ;;  %948 = vrot.lane.b32.xlu1 %v5263_v18, %s5120_s11  ;;  %939 = vrot.lane.b32.xlu0 %v5265_v19, %s5120_s11 }
  0x93   :  { %v446_v58 = vpop.permute.xlu1 %445   ;;  %v437_v59 = vpop.permute.xlu0 %436  }
  0x94   :  { %449 = vst.msk [vmem:[#allocation2 + $0x2c1] ss:$8 sm:$0xf] %vm13_vm0, %v446_v58   ;;  %451 = vst.msk [vmem:[#allocation2 + $0x2c1] ss:$8 sm:$0xf0] %vm13_vm0, %v446_v58  }
  0x95   :  { %440 = vst.msk [vmem:[#allocation2 + $0x281] ss:$8 sm:$0xf] %vm13_vm0, %v437_v59   ;;  %442 = vst.msk [vmem:[#allocation2 + $0x281] ss:$8 sm:$0xf0] %vm13_vm0, %v437_v59   ;;  %966 = vrot.lane.b32.xlu1 %v5271_v20, %s5120_s11  ;;  %957 = vrot.lane.b32.xlu0 %v5273_v21, %s5120_s11 }
  0x97   :  { %v464_v60 = vpop.permute.xlu1 %463   ;;  %v455_v61 = vpop.permute.xlu0 %454  }
  0x98   :  { %467 = vst.msk [vmem:[#allocation2 + $0x341] ss:$8 sm:$0xf] %vm13_vm0, %v464_v60   ;;  %469 = vst.msk [vmem:[#allocation2 + $0x341] ss:$8 sm:$0xf0] %vm13_vm0, %v464_v60  }
  0x99   :  { %458 = vst.msk [vmem:[#allocation2 + $0x301] ss:$8 sm:$0xf] %vm13_vm0, %v455_v61   ;;  %460 = vst.msk [vmem:[#allocation2 + $0x301] ss:$8 sm:$0xf0] %vm13_vm0, %v455_v61   ;;  %984 = vrot.lane.b32.xlu1 %v5279_v22, %s5120_s11  ;;  %975 = vrot.lane.b32.xlu0 %v5281_v23, %s5120_s11 }
  0x9b   :  { %v482_v62 = vpop.permute.xlu1 %481   ;;  %v473_v63 = vpop.permute.xlu0 %472  }
  0x9c   :  { %485 = vst.msk [vmem:[#allocation2 + $0x3c1] ss:$8 sm:$0xf] %vm13_vm0, %v482_v62   ;;  %487 = vst.msk [vmem:[#allocation2 + $0x3c1] ss:$8 sm:$0xf0] %vm13_vm0, %v482_v62  }
  0x9d   :  { %476 = vst.msk [vmem:[#allocation2 + $0x381] ss:$8 sm:$0xf] %vm13_vm0, %v473_v63   ;;  %478 = vst.msk [vmem:[#allocation2 + $0x381] ss:$8 sm:$0xf0] %vm13_vm0, %v473_v63   ;;  %1002 = vrot.lane.b32.xlu1 %v5287_v24, %s5120_s11  ;;  %993 = vrot.lane.b32.xlu0 %v5289_v25, %s5120_s11 }
  0x9f   :  { %v500_v48 = vpop.permute.xlu1 %499   ;;  %v491_v49 = vpop.permute.xlu0 %490  }
  0xa0   :  { %503 = vst.msk [vmem:[#allocation2 + $0x441] ss:$8 sm:$0xf] %vm13_vm0, %v500_v48   ;;  %505 = vst.msk [vmem:[#allocation2 + $0x441] ss:$8 sm:$0xf0] %vm13_vm0, %v500_v48  }
  0xa1   :  { %494 = vst.msk [vmem:[#allocation2 + $0x401] ss:$8 sm:$0xf] %vm13_vm0, %v491_v49   ;;  %496 = vst.msk [vmem:[#allocation2 + $0x401] ss:$8 sm:$0xf0] %vm13_vm0, %v491_v49   ;;  %1020 = vrot.lane.b32.xlu1 %v5295_v26, %s5120_s11  ;;  %1011 = vrot.lane.b32.xlu0 %v5297_v27, %s5120_s11 }
  0xa3   :  { %v518_v50 = vpop.permute.xlu1 %517   ;;  %v509_v51 = vpop.permute.xlu0 %508  }
  0xa4   :  { %521 = vst.msk [vmem:[#allocation2 + $0x4c1] ss:$8 sm:$0xf] %vm13_vm0, %v518_v50   ;;  %523 = vst.msk [vmem:[#allocation2 + $0x4c1] ss:$8 sm:$0xf0] %vm13_vm0, %v518_v50  }
  0xa5   :  { %512 = vst.msk [vmem:[#allocation2 + $0x481] ss:$8 sm:$0xf] %vm13_vm0, %v509_v51   ;;  %514 = vst.msk [vmem:[#allocation2 + $0x481] ss:$8 sm:$0xf0] %vm13_vm0, %v509_v51   ;;  %1038 = vrot.lane.b32.xlu1 %v5303_v28, %s5120_s11  ;;  %1029 = vrot.lane.b32.xlu0 %v5305_v29, %s5120_s11 }
  0xa7   :  { %v536_v52 = vpop.permute.xlu1 %535   ;;  %v527_v53 = vpop.permute.xlu0 %526  }
  0xa8   :  { %539 = vst.msk [vmem:[#allocation2 + $0x541] ss:$8 sm:$0xf] %vm13_vm0, %v536_v52   ;;  %541 = vst.msk [vmem:[#allocation2 + $0x541] ss:$8 sm:$0xf0] %vm13_vm0, %v536_v52  }
  0xa9   :  { %530 = vst.msk [vmem:[#allocation2 + $0x501] ss:$8 sm:$0xf] %vm13_vm0, %v527_v53   ;;  %532 = vst.msk [vmem:[#allocation2 + $0x501] ss:$8 sm:$0xf0] %vm13_vm0, %v527_v53   ;;  %1056 = vrot.lane.b32.xlu1 %v5311_v30, %s5120_s11  ;;  %1047 = vrot.lane.b32.xlu0 %v5313_v31, %s5120_s11 }
  0xab   :  { %v554_v54 = vpop.permute.xlu1 %553   ;;  %v545_v55 = vpop.permute.xlu0 %544  }
  0xac   :  { %557 = vst.msk [vmem:[#allocation2 + $0x5c1] ss:$8 sm:$0xf] %vm13_vm0, %v554_v54   ;;  %559 = vst.msk [vmem:[#allocation2 + $0x5c1] ss:$8 sm:$0xf0] %vm13_vm0, %v554_v54  }
  0xad   :  { %548 = vst.msk [vmem:[#allocation2 + $0x581] ss:$8 sm:$0xf] %vm13_vm0, %v545_v55   ;;  %550 = vst.msk [vmem:[#allocation2 + $0x581] ss:$8 sm:$0xf0] %vm13_vm0, %v545_v55   ;;  %1074 = vrot.lane.b32.xlu1 %v5319_v32, %s5120_s11  ;;  %1065 = vrot.lane.b32.xlu0 %v5321_v33, %s5120_s11 }
  0xaf   :  { %v572_v56 = vpop.permute.xlu1 %571   ;;  %v563_v57 = vpop.permute.xlu0 %562  }
  0xb0   :  { %575 = vst.msk [vmem:[#allocation2 + $0x641] ss:$8 sm:$0xf] %vm13_vm0, %v572_v56   ;;  %577 = vst.msk [vmem:[#allocation2 + $0x641] ss:$8 sm:$0xf0] %vm13_vm0, %v572_v56  }
  0xb1   :  { %566 = vst.msk [vmem:[#allocation2 + $0x601] ss:$8 sm:$0xf] %vm13_vm0, %v563_v57   ;;  %568 = vst.msk [vmem:[#allocation2 + $0x601] ss:$8 sm:$0xf0] %vm13_vm0, %v563_v57   ;;  %1092 = vrot.lane.b32.xlu1 %v5327_v34, %s5120_s11  ;;  %1083 = vrot.lane.b32.xlu0 %v5329_v35, %s5120_s11 }
  0xb2   :  { %v115_v56 = vld [vmem:[#allocation0 + $0x78] sm:$0xff]   ;;  %v108_v57 = vld [vmem:[#allocation0 + $0x70] sm:$0xff]  }
  0xb3   :  { %v590_v58 = vpop.permute.xlu1 %589   ;;  %v581_v59 = vpop.permute.xlu0 %580   ;;  %118 = vst.msk [vmem:[#allocation2 + $0x3c0] ss:$8 sm:$0xf] %vm13_vm0, %v115_v56   ;;  %120 = vst.msk [vmem:[#allocation2 + $0x3c0] ss:$8 sm:$0xf0] %vm13_vm0, %v115_v56  }
  0xb4   :  { %593 = vst.msk [vmem:[#allocation2 + $0x6c1] ss:$8 sm:$0xf] %vm13_vm0, %v590_v58   ;;  %595 = vst.msk [vmem:[#allocation2 + $0x6c1] ss:$8 sm:$0xf0] %vm13_vm0, %v590_v58  }
  0xb5   :  { %584 = vst.msk [vmem:[#allocation2 + $0x681] ss:$8 sm:$0xf] %vm13_vm0, %v581_v59   ;;  %586 = vst.msk [vmem:[#allocation2 + $0x681] ss:$8 sm:$0xf0] %vm13_vm0, %v581_v59   ;;  %1110 = vrot.lane.b32.xlu1 %v5335_v36, %s5120_s11  ;;  %1101 = vrot.lane.b32.xlu0 %v5337_v37, %s5120_s11 }
  0xb6   :  { %111 = vst.msk [vmem:[#allocation2 + $0x380] ss:$8 sm:$0xf] %vm13_vm0, %v108_v57   ;;  %113 = vst.msk [vmem:[#allocation2 + $0x380] ss:$8 sm:$0xf0] %vm13_vm0, %v108_v57  }
  0xb7   :  { %v608_v60 = vpop.permute.xlu1 %607   ;;  %v599_v61 = vpop.permute.xlu0 %598   ;;  %v311_v56 = vld [vmem:[#allocation0 + $0x158] sm:$0xff]   ;;  %v304_v57 = vld [vmem:[#allocation0 + $0x150] sm:$0xff]  }
  0xb8   :  { %611 = vst.msk [vmem:[#allocation2 + $0x741] ss:$8 sm:$0xf] %vm13_vm0, %v608_v60   ;;  %613 = vst.msk [vmem:[#allocation2 + $0x741] ss:$8 sm:$0xf0] %vm13_vm0, %v608_v60  }
  0xb9   :  { %602 = vst.msk [vmem:[#allocation2 + $0x701] ss:$8 sm:$0xf] %vm13_vm0, %v599_v61   ;;  %604 = vst.msk [vmem:[#allocation2 + $0x701] ss:$8 sm:$0xf0] %vm13_vm0, %v599_v61   ;;  %1128 = vrot.lane.b32.xlu1 %v5343_v38, %s5120_s11  ;;  %1119 = vrot.lane.b32.xlu0 %v5345_v39, %s5120_s11 }
  0xba   :  { %314 = vst.msk [vmem:[#allocation2 + $0xac0] ss:$8 sm:$0xf] %vm13_vm0, %v311_v56   ;;  %316 = vst.msk [vmem:[#allocation2 + $0xac0] ss:$8 sm:$0xf0] %vm13_vm0, %v311_v56  }
  0xbb   :  { %v626_v62 = vpop.permute.xlu1 %625   ;;  %v617_v63 = vpop.permute.xlu0 %616   ;;  %307 = vst.msk [vmem:[#allocation2 + $0xa80] ss:$8 sm:$0xf] %vm13_vm0, %v304_v57   ;;  %309 = vst.msk [vmem:[#allocation2 + $0xa80] ss:$8 sm:$0xf0] %vm13_vm0, %v304_v57  }
  0xbc   :  { %629 = vst.msk [vmem:[#allocation2 + $0x7c1] ss:$8 sm:$0xf] %vm13_vm0, %v626_v62   ;;  %631 = vst.msk [vmem:[#allocation2 + $0x7c1] ss:$8 sm:$0xf0] %vm13_vm0, %v626_v62  }
  0xbd   :  { %620 = vst.msk [vmem:[#allocation2 + $0x781] ss:$8 sm:$0xf] %vm13_vm0, %v617_v63   ;;  %622 = vst.msk [vmem:[#allocation2 + $0x781] ss:$8 sm:$0xf0] %vm13_vm0, %v617_v63   ;;  %1146 = vrot.lane.b32.xlu1 %v5351_v40, %s5120_s11  ;;  %1137 = vrot.lane.b32.xlu0 %v5353_v41, %s5120_s11 }
  0xbe   :  { %v157_v62 = vld [vmem:[#allocation0 + $0xa8] sm:$0xff]   ;;  %v150_v63 = vld [vmem:[#allocation0 + $0xa0] sm:$0xff]  }
  0xbf   :  { %v644_v48 = vpop.permute.xlu1 %643   ;;  %v635_v49 = vpop.permute.xlu0 %634   ;;  %160 = vst.msk [vmem:[#allocation2 + $0x540] ss:$8 sm:$0xf] %vm13_vm0, %v157_v62   ;;  %162 = vst.msk [vmem:[#allocation2 + $0x540] ss:$8 sm:$0xf0] %vm13_vm0, %v157_v62  }
  0xc0   :  { %647 = vst.msk [vmem:[#allocation2 + $0x841] ss:$8 sm:$0xf] %vm13_vm0, %v644_v48   ;;  %649 = vst.msk [vmem:[#allocation2 + $0x841] ss:$8 sm:$0xf0] %vm13_vm0, %v644_v48  }
  0xc1   :  { %638 = vst.msk [vmem:[#allocation2 + $0x801] ss:$8 sm:$0xf] %vm13_vm0, %v635_v49   ;;  %640 = vst.msk [vmem:[#allocation2 + $0x801] ss:$8 sm:$0xf0] %vm13_vm0, %v635_v49   ;;  %1164 = vrot.lane.b32.xlu1 %v5359_v42, %s5120_s11  ;;  %1155 = vrot.lane.b32.xlu0 %v5361_v43, %s5120_s11 }
  0xc2   :  { %153 = vst.msk [vmem:[#allocation2 + $0x500] ss:$8 sm:$0xf] %vm13_vm0, %v150_v63   ;;  %155 = vst.msk [vmem:[#allocation2 + $0x500] ss:$8 sm:$0xf0] %vm13_vm0, %v150_v63  }
  0xc3   :  { %v662_v50 = vpop.permute.xlu1 %661   ;;  %v653_v51 = vpop.permute.xlu0 %652  }
  0xc4   :  { %665 = vst.msk [vmem:[#allocation2 + $0x8c1] ss:$8 sm:$0xf] %vm13_vm0, %v662_v50   ;;  %667 = vst.msk [vmem:[#allocation2 + $0x8c1] ss:$8 sm:$0xf0] %vm13_vm0, %v662_v50  }
  0xc5   :  { %656 = vst.msk [vmem:[#allocation2 + $0x881] ss:$8 sm:$0xf] %vm13_vm0, %v653_v51   ;;  %658 = vst.msk [vmem:[#allocation2 + $0x881] ss:$8 sm:$0xf0] %vm13_vm0, %v653_v51   ;;  %1182 = vrot.lane.b32.xlu1 %v5367_v44, %s5120_s11  ;;  %1173 = vrot.lane.b32.xlu0 %v5369_v45, %s5120_s11 }
  0xc7   :  { %v680_v52 = vpop.permute.xlu1 %679   ;;  %v671_v53 = vpop.permute.xlu0 %670  }
  0xc8   :  { %683 = vst.msk [vmem:[#allocation2 + $0x941] ss:$8 sm:$0xf] %vm13_vm0, %v680_v52   ;;  %685 = vst.msk [vmem:[#allocation2 + $0x941] ss:$8 sm:$0xf0] %vm13_vm0, %v680_v52  }
  0xc9   :  { %674 = vst.msk [vmem:[#allocation2 + $0x901] ss:$8 sm:$0xf] %vm13_vm0, %v671_v53   ;;  %676 = vst.msk [vmem:[#allocation2 + $0x901] ss:$8 sm:$0xf0] %vm13_vm0, %v671_v53   ;;  %1200 = vrot.lane.b32.xlu1 %v5375_v46, %s5120_s11  ;;  %1191 = vrot.lane.b32.xlu0 %v5377_v47, %s5120_s11 }
  0xca   :  { %v199_v52 = vld [vmem:[#allocation0 + $0xd8] sm:$0xff]   ;;  %v192_v53 = vld [vmem:[#allocation0 + $0xd0] sm:$0xff]  }
  0xcb   :  { %v698_v54 = vpop.permute.xlu1 %697   ;;  %v689_v55 = vpop.permute.xlu0 %688   ;;  %202 = vst.msk [vmem:[#allocation2 + $0x6c0] ss:$8 sm:$0xf] %vm13_vm0, %v199_v52   ;;  %204 = vst.msk [vmem:[#allocation2 + $0x6c0] ss:$8 sm:$0xf0] %vm13_vm0, %v199_v52  }
  0xcc   :  { %701 = vst.msk [vmem:[#allocation2 + $0x9c1] ss:$8 sm:$0xf] %vm13_vm0, %v698_v54   ;;  %703 = vst.msk [vmem:[#allocation2 + $0x9c1] ss:$8 sm:$0xf0] %vm13_vm0, %v698_v54  }
  0xcd   :  { %692 = vst.msk [vmem:[#allocation2 + $0x981] ss:$8 sm:$0xf] %vm13_vm0, %v689_v55   ;;  %694 = vst.msk [vmem:[#allocation2 + $0x981] ss:$8 sm:$0xf0] %vm13_vm0, %v689_v55   ;;  %1217 = vrot.lane.b32.xlu1 %v5145_v3, %s5121_s12  ;;  %1208 = vrot.lane.b32.xlu0 %v5137_v1, %s5121_s12 }
  0xce   :  { %195 = vst.msk [vmem:[#allocation2 + $0x680] ss:$8 sm:$0xf] %vm13_vm0, %v192_v53   ;;  %197 = vst.msk [vmem:[#allocation2 + $0x680] ss:$8 sm:$0xf0] %vm13_vm0, %v192_v53  }
  0xcf   :  { %v716_v1 = vpop.permute.xlu1 %715   ;;  %v707_v3 = vpop.permute.xlu0 %706  }
  0xd0   :  { %719 = vst.msk [vmem:[#allocation2 + $0xa41] ss:$8 sm:$0xf] %vm13_vm0, %v716_v1   ;;  %721 = vst.msk [vmem:[#allocation2 + $0xa41] ss:$8 sm:$0xf0] %vm13_vm0, %v716_v1  }
  0xd1   :  { %710 = vst.msk [vmem:[#allocation2 + $0xa01] ss:$8 sm:$0xf] %vm13_vm0, %v707_v3   ;;  %712 = vst.msk [vmem:[#allocation2 + $0xa01] ss:$8 sm:$0xf0] %vm13_vm0, %v707_v3   ;;  %1235 = vrot.lane.b32.xlu1 %v5139_v2, %s5121_s12  ;;  %1226 = vrot.lane.b32.xlu0 %v5135_v0, %s5121_s12 }
  0xd3   :  { %v734_v0 = vpop.permute.xlu1 %733   ;;  %v725_v2 = vpop.permute.xlu0 %724  }
  0xd4   :  { %737 = vst.msk [vmem:[#allocation2 + $0xac1] ss:$8 sm:$0xf] %vm13_vm0, %v734_v0   ;;  %739 = vst.msk [vmem:[#allocation2 + $0xac1] ss:$8 sm:$0xf0] %vm13_vm0, %v734_v0  }
  0xd5   :  { %728 = vst.msk [vmem:[#allocation2 + $0xa81] ss:$8 sm:$0xf] %vm13_vm0, %v725_v2   ;;  %730 = vst.msk [vmem:[#allocation2 + $0xa81] ss:$8 sm:$0xf0] %vm13_vm0, %v725_v2   ;;  %1253 = vrot.lane.b32.xlu1 %v5147_v4, %s5121_s12  ;;  %1244 = vrot.lane.b32.xlu0 %v5149_v5, %s5121_s12 }
  0xd6   :  { %v241_v0 = vld [vmem:[#allocation0 + $0x108] sm:$0xff]   ;;  %v234_v2 = vld [vmem:[#allocation0 + $0x100] sm:$0xff]  }
  0xd7   :  { %v752_v4 = vpop.permute.xlu1 %751   ;;  %v743_v5 = vpop.permute.xlu0 %742   ;;  %244 = vst.msk [vmem:[#allocation2 + $0x840] ss:$8 sm:$0xf] %vm13_vm0, %v241_v0   ;;  %246 = vst.msk [vmem:[#allocation2 + $0x840] ss:$8 sm:$0xf0] %vm13_vm0, %v241_v0  }
  0xd8   :  { %755 = vst.msk [vmem:[#allocation2 + $0xb41] ss:$8 sm:$0xf] %vm13_vm0, %v752_v4   ;;  %757 = vst.msk [vmem:[#allocation2 + $0xb41] ss:$8 sm:$0xf0] %vm13_vm0, %v752_v4  }
  0xd9   :  { %746 = vst.msk [vmem:[#allocation2 + $0xb01] ss:$8 sm:$0xf] %vm13_vm0, %v743_v5   ;;  %748 = vst.msk [vmem:[#allocation2 + $0xb01] ss:$8 sm:$0xf0] %vm13_vm0, %v743_v5   ;;  %1271 = vrot.lane.b32.xlu1 %v5163_v6, %s5121_s12  ;;  %1262 = vrot.lane.b32.xlu0 %v5165_v7, %s5121_s12 }
  0xda   :  { %237 = vst.msk [vmem:[#allocation2 + $0x800] ss:$8 sm:$0xf] %vm13_vm0, %v234_v2   ;;  %239 = vst.msk [vmem:[#allocation2 + $0x800] ss:$8 sm:$0xf0] %vm13_vm0, %v234_v2  }
  0xdb   :  { %v770_v6 = vpop.permute.xlu1 %769   ;;  %v761_v7 = vpop.permute.xlu0 %760  }
  0xdc   :  { %773 = vst.msk [vmem:[#allocation2 + $0xbc1] ss:$8 sm:$0xf] %vm13_vm0, %v770_v6   ;;  %775 = vst.msk [vmem:[#allocation2 + $0xbc1] ss:$8 sm:$0xf0] %vm13_vm0, %v770_v6  }
  0xdd   :  { %764 = vst.msk [vmem:[#allocation2 + $0xb81] ss:$8 sm:$0xf] %vm13_vm0, %v761_v7   ;;  %766 = vst.msk [vmem:[#allocation2 + $0xb81] ss:$8 sm:$0xf0] %vm13_vm0, %v761_v7   ;;  %1289 = vrot.lane.b32.xlu1 %v5167_v8, %s5121_s12  ;;  %1280 = vrot.lane.b32.xlu0 %v5181_v9, %s5121_s12 }
  0xdf   :  { %v787_v8 = vpop.permute.xlu1 %786   ;;  %v778_v9 = vpop.permute.xlu0 %777  }
  0xe0   :  { %790 = vst.msk [vmem:[#allocation2 + $0x42] ss:$8 sm:$0xf] %vm13_vm0, %v787_v8   ;;  %792 = vst.msk [vmem:[#allocation2 + $0x42] ss:$8 sm:$0xf0] %vm13_vm0, %v787_v8  }
  0xe1   :  { %781 = vst.msk [vmem:[#allocation2 + $0x2] ss:$8 sm:$0xf] %vm13_vm0, %v778_v9   ;;  %783 = vst.msk [vmem:[#allocation2 + $0x2] ss:$8 sm:$0xf0] %vm13_vm0, %v778_v9   ;;  %1307 = vrot.lane.b32.xlu1 %v5183_v10, %s5121_s12  ;;  %1298 = vrot.lane.b32.xlu0 %v5185_v11, %s5121_s12 }
  0xe2   :  { %v283_v8 = vld [vmem:[#allocation0 + $0x138] sm:$0xff]   ;;  %v276_v9 = vld [vmem:[#allocation0 + $0x130] sm:$0xff]  }
  0xe3   :  { %v805_v10 = vpop.permute.xlu1 %804   ;;  %v796_v11 = vpop.permute.xlu0 %795   ;;  %286 = vst.msk [vmem:[#allocation2 + $0x9c0] ss:$8 sm:$0xf] %vm13_vm0, %v283_v8   ;;  %288 = vst.msk [vmem:[#allocation2 + $0x9c0] ss:$8 sm:$0xf0] %vm13_vm0, %v283_v8  }
  0xe4   :  { %808 = vst.msk [vmem:[#allocation2 + $0xc2] ss:$8 sm:$0xf] %vm13_vm0, %v805_v10   ;;  %810 = vst.msk [vmem:[#allocation2 + $0xc2] ss:$8 sm:$0xf0] %vm13_vm0, %v805_v10  }
  0xe5   :  { %799 = vst.msk [vmem:[#allocation2 + $0x82] ss:$8 sm:$0xf] %vm13_vm0, %v796_v11   ;;  %801 = vst.msk [vmem:[#allocation2 + $0x82] ss:$8 sm:$0xf0] %vm13_vm0, %v796_v11   ;;  %1325 = vrot.lane.b32.xlu1 %v5199_v12, %s5121_s12  ;;  %1316 = vrot.lane.b32.xlu0 %v5201_v13, %s5121_s12 }
  0xe6   :  { %279 = vst.msk [vmem:[#allocation2 + $0x980] ss:$8 sm:$0xf] %vm13_vm0, %v276_v9   ;;  %281 = vst.msk [vmem:[#allocation2 + $0x980] ss:$8 sm:$0xf0] %vm13_vm0, %v276_v9  }
  0xe7   :  { %v823_v12 = vpop.permute.xlu1 %822   ;;  %v814_v13 = vpop.permute.xlu0 %813   ;;  %v297_v10 = vld [vmem:[#allocation0 + $0x148] sm:$0xff]   ;;  %v290_v11 = vld [vmem:[#allocation0 + $0x140] sm:$0xff]  }
  0xe8   :  { %826 = vst.msk [vmem:[#allocation2 + $0x142] ss:$8 sm:$0xf] %vm13_vm0, %v823_v12   ;;  %828 = vst.msk [vmem:[#allocation2 + $0x142] ss:$8 sm:$0xf0] %vm13_vm0, %v823_v12  }
  0xe9   :  { %817 = vst.msk [vmem:[#allocation2 + $0x102] ss:$8 sm:$0xf] %vm13_vm0, %v814_v13   ;;  %819 = vst.msk [vmem:[#allocation2 + $0x102] ss:$8 sm:$0xf0] %vm13_vm0, %v814_v13   ;;  %1343 = vrot.lane.b32.xlu1 %v5247_v14, %s5121_s12  ;;  %1334 = vrot.lane.b32.xlu0 %v5249_v15, %s5121_s12 }
  0xea   :  { %300 = vst.msk [vmem:[#allocation2 + $0xa40] ss:$8 sm:$0xf] %vm13_vm0, %v297_v10   ;;  %302 = vst.msk [vmem:[#allocation2 + $0xa40] ss:$8 sm:$0xf0] %vm13_vm0, %v297_v10  }
  0xeb   :  { %v841_v14 = vpop.permute.xlu1 %840   ;;  %v832_v15 = vpop.permute.xlu0 %831   ;;  %293 = vst.msk [vmem:[#allocation2 + $0xa00] ss:$8 sm:$0xf] %vm13_vm0, %v290_v11   ;;  %295 = vst.msk [vmem:[#allocation2 + $0xa00] ss:$8 sm:$0xf0] %vm13_vm0, %v290_v11  }
  0xec   :  { %844 = vst.msk [vmem:[#allocation2 + $0x1c2] ss:$8 sm:$0xf] %vm13_vm0, %v841_v14   ;;  %846 = vst.msk [vmem:[#allocation2 + $0x1c2] ss:$8 sm:$0xf0] %vm13_vm0, %v841_v14  }
  0xed   :  { %835 = vst.msk [vmem:[#allocation2 + $0x182] ss:$8 sm:$0xf] %vm13_vm0, %v832_v15   ;;  %837 = vst.msk [vmem:[#allocation2 + $0x182] ss:$8 sm:$0xf0] %vm13_vm0, %v832_v15   ;;  %1361 = vrot.lane.b32.xlu1 %v5255_v16, %s5121_s12  ;;  %1352 = vrot.lane.b32.xlu0 %v5257_v17, %s5121_s12 }
  0xee   :  { %v129_v16 = vld [vmem:[#allocation0 + $0x88] sm:$0xff]   ;;  %v122_v17 = vld [vmem:[#allocation0 + $0x80] sm:$0xff]  }
  0xef   :  { %132 = vst.msk [vmem:[#allocation2 + $0x440] ss:$8 sm:$0xf] %vm13_vm0, %v129_v16   ;;  %134 = vst.msk [vmem:[#allocation2 + $0x440] ss:$8 sm:$0xf0] %vm13_vm0, %v129_v16   ;;  %v859_v58 = vpop.permute.xlu1 %858   ;;  %v850_v59 = vpop.permute.xlu0 %849  }
  0xf0   :  { %125 = vst.msk [vmem:[#allocation2 + $0x400] ss:$8 sm:$0xf] %vm13_vm0, %v122_v17   ;;  %127 = vst.msk [vmem:[#allocation2 + $0x400] ss:$8 sm:$0xf0] %vm13_vm0, %v122_v17  }
  0xf1   :  { %862 = vst.msk [vmem:[#allocation2 + $0x242] ss:$8 sm:$0xf] %vm13_vm0, %v859_v58   ;;  %864 = vst.msk [vmem:[#allocation2 + $0x242] ss:$8 sm:$0xf0] %vm13_vm0, %v859_v58   ;;  %1379 = vrot.lane.b32.xlu1 %v5263_v18, %s5121_s12  ;;  %1370 = vrot.lane.b32.xlu0 %v5265_v19, %s5121_s12 }
  0xf2   :  { %853 = vst.msk [vmem:[#allocation2 + $0x202] ss:$8 sm:$0xf] %vm13_vm0, %v850_v59   ;;  %855 = vst.msk [vmem:[#allocation2 + $0x202] ss:$8 sm:$0xf0] %vm13_vm0, %v850_v59  }
  0xf3   :  { %v143_v18 = vld [vmem:[#allocation0 + $0x98] sm:$0xff]   ;;  %v136_v19 = vld [vmem:[#allocation0 + $0x90] sm:$0xff]   ;;  %v877_v60 = vpop.permute.xlu1 %876   ;;  %v868_v61 = vpop.permute.xlu0 %867   ;;  %v325_v58 = vld [vmem:[#allocation0 + $0x168] sm:$0xff]  }
  0xf4   :  { %146 = vst.msk [vmem:[#allocation2 + $0x4c0] ss:$8 sm:$0xf] %vm13_vm0, %v143_v18   ;;  %148 = vst.msk [vmem:[#allocation2 + $0x4c0] ss:$8 sm:$0xf0] %vm13_vm0, %v143_v18  }
  0xf5   :  { %139 = vst.msk [vmem:[#allocation2 + $0x480] ss:$8 sm:$0xf] %vm13_vm0, %v136_v19   ;;  %141 = vst.msk [vmem:[#allocation2 + $0x480] ss:$8 sm:$0xf0] %vm13_vm0, %v136_v19   ;;  %1397 = vrot.lane.b32.xlu1 %v5271_v20, %s5121_s12  ;;  %1388 = vrot.lane.b32.xlu0 %v5273_v21, %s5121_s12 }
  0xf6   :  { %880 = vst.msk [vmem:[#allocation2 + $0x2c2] ss:$8 sm:$0xf] %vm13_vm0, %v877_v60   ;;  %882 = vst.msk [vmem:[#allocation2 + $0x2c2] ss:$8 sm:$0xf0] %vm13_vm0, %v877_v60  }
  0xf7   :  { %871 = vst.msk [vmem:[#allocation2 + $0x282] ss:$8 sm:$0xf] %vm13_vm0, %v868_v61   ;;  %873 = vst.msk [vmem:[#allocation2 + $0x282] ss:$8 sm:$0xf0] %vm13_vm0, %v868_v61   ;;  %v895_v20 = vpop.permute.xlu1 %894   ;;  %v886_v21 = vpop.permute.xlu0 %885  }
  0xf8   :  { %898 = vst.msk [vmem:[#allocation2 + $0x342] ss:$8 sm:$0xf] %vm13_vm0, %v895_v20   ;;  %900 = vst.msk [vmem:[#allocation2 + $0x342] ss:$8 sm:$0xf0] %vm13_vm0, %v895_v20  }
  0xf9   :  { %889 = vst.msk [vmem:[#allocation2 + $0x302] ss:$8 sm:$0xf] %vm13_vm0, %v886_v21   ;;  %891 = vst.msk [vmem:[#allocation2 + $0x302] ss:$8 sm:$0xf0] %vm13_vm0, %v886_v21   ;;  %1415 = vrot.lane.b32.xlu1 %v5279_v22, %s5121_s12  ;;  %1406 = vrot.lane.b32.xlu0 %v5281_v23, %s5121_s12 }
  0xfa   :  { %v318_v59 = vld [vmem:[#allocation0 + $0x160] sm:$0xff]   ;;  %328 = vst.msk [vmem:[#allocation2 + $0xb40] ss:$8 sm:$0xf] %vm13_vm0, %v325_v58   ;;  %v339_v60 = vld [vmem:[#allocation0 + $0x178] sm:$0xff]   ;;  %v332_v61 = vld [vmem:[#allocation0 + $0x170] sm:$0xff]  }
  0xfb   :  { %v913_v22 = vpop.permute.xlu1 %912   ;;  %v904_v23 = vpop.permute.xlu0 %903   ;;  %330 = vst.msk [vmem:[#allocation2 + $0xb40] ss:$8 sm:$0xf0] %vm13_vm0, %v325_v58   ;;  %321 = vst.msk [vmem:[#allocation2 + $0xb00] ss:$8 sm:$0xf] %vm13_vm0, %v318_v59  }
  0xfc   :  { %916 = vst.msk [vmem:[#allocation2 + $0x3c2] ss:$8 sm:$0xf] %vm13_vm0, %v913_v22   ;;  %918 = vst.msk [vmem:[#allocation2 + $0x3c2] ss:$8 sm:$0xf0] %vm13_vm0, %v913_v22  }
  0xfd   :  { %907 = vst.msk [vmem:[#allocation2 + $0x382] ss:$8 sm:$0xf] %vm13_vm0, %v904_v23   ;;  %909 = vst.msk [vmem:[#allocation2 + $0x382] ss:$8 sm:$0xf0] %vm13_vm0, %v904_v23   ;;  %1433 = vrot.lane.b32.xlu1 %v5287_v24, %s5121_s12  ;;  %1424 = vrot.lane.b32.xlu0 %v5289_v25, %s5121_s12 }
  0xfe   :  { %v171_v24 = vld [vmem:[#allocation0 + $0xb8] sm:$0xff]   ;;  %v164_v25 = vld [vmem:[#allocation0 + $0xb0] sm:$0xff]   ;;  %323 = vst.msk [vmem:[#allocation2 + $0xb00] ss:$8 sm:$0xf0] %vm13_vm0, %v318_v59  }
  0xff   :  { %174 = vst.msk [vmem:[#allocation2 + $0x5c0] ss:$8 sm:$0xf] %vm13_vm0, %v171_v24   ;;  %176 = vst.msk [vmem:[#allocation2 + $0x5c0] ss:$8 sm:$0xf0] %vm13_vm0, %v171_v24   ;;  %v931_v48 = vpop.permute.xlu1 %930   ;;  %v922_v49 = vpop.permute.xlu0 %921  }
 0x100   :  { %167 = vst.msk [vmem:[#allocation2 + $0x580] ss:$8 sm:$0xf] %vm13_vm0, %v164_v25   ;;  %169 = vst.msk [vmem:[#allocation2 + $0x580] ss:$8 sm:$0xf0] %vm13_vm0, %v164_v25  }
 0x101   :  { %934 = vst.msk [vmem:[#allocation2 + $0x442] ss:$8 sm:$0xf] %vm13_vm0, %v931_v48   ;;  %936 = vst.msk [vmem:[#allocation2 + $0x442] ss:$8 sm:$0xf0] %vm13_vm0, %v931_v48   ;;  %1451 = vrot.lane.b32.xlu1 %v5295_v26, %s5121_s12  ;;  %1442 = vrot.lane.b32.xlu0 %v5297_v27, %s5121_s12 }
 0x102   :  { %925 = vst.msk [vmem:[#allocation2 + $0x402] ss:$8 sm:$0xf] %vm13_vm0, %v922_v49   ;;  %927 = vst.msk [vmem:[#allocation2 + $0x402] ss:$8 sm:$0xf0] %vm13_vm0, %v922_v49  }
 0x103   :  { %v185_v26 = vld [vmem:[#allocation0 + $0xc8] sm:$0xff]   ;;  %v178_v27 = vld [vmem:[#allocation0 + $0xc0] sm:$0xff]   ;;  %v949_v50 = vpop.permute.xlu1 %948   ;;  %v940_v51 = vpop.permute.xlu0 %939   ;;  %342 = vst.msk [vmem:[#allocation2 + $0xbc0] ss:$8 sm:$0xf] %vm13_vm0, %v339_v60  }
 0x104   :  { %188 = vst.msk [vmem:[#allocation2 + $0x640] ss:$8 sm:$0xf] %vm13_vm0, %v185_v26   ;;  %190 = vst.msk [vmem:[#allocation2 + $0x640] ss:$8 sm:$0xf0] %vm13_vm0, %v185_v26  }
 0x105   :  { %181 = vst.msk [vmem:[#allocation2 + $0x600] ss:$8 sm:$0xf] %vm13_vm0, %v178_v27   ;;  %183 = vst.msk [vmem:[#allocation2 + $0x600] ss:$8 sm:$0xf0] %vm13_vm0, %v178_v27   ;;  %1469 = vrot.lane.b32.xlu1 %v5303_v28, %s5121_s12  ;;  %1460 = vrot.lane.b32.xlu0 %v5305_v29, %s5121_s12 }
 0x106   :  { %952 = vst.msk [vmem:[#allocation2 + $0x4c2] ss:$8 sm:$0xf] %vm13_vm0, %v949_v50   ;;  %954 = vst.msk [vmem:[#allocation2 + $0x4c2] ss:$8 sm:$0xf0] %vm13_vm0, %v949_v50  }
 0x107   :  { %943 = vst.msk [vmem:[#allocation2 + $0x482] ss:$8 sm:$0xf] %vm13_vm0, %v940_v51   ;;  %945 = vst.msk [vmem:[#allocation2 + $0x482] ss:$8 sm:$0xf0] %vm13_vm0, %v940_v51   ;;  %v967_v28 = vpop.permute.xlu1 %966   ;;  %v958_v29 = vpop.permute.xlu0 %957  }
 0x108   :  { %970 = vst.msk [vmem:[#allocation2 + $0x542] ss:$8 sm:$0xf] %vm13_vm0, %v967_v28   ;;  %972 = vst.msk [vmem:[#allocation2 + $0x542] ss:$8 sm:$0xf0] %vm13_vm0, %v967_v28  }
 0x109   :  { %961 = vst.msk [vmem:[#allocation2 + $0x502] ss:$8 sm:$0xf] %vm13_vm0, %v958_v29   ;;  %963 = vst.msk [vmem:[#allocation2 + $0x502] ss:$8 sm:$0xf0] %vm13_vm0, %v958_v29   ;;  %1487 = vrot.lane.b32.xlu1 %v5311_v30, %s5121_s12  ;;  %1478 = vrot.lane.b32.xlu0 %v5313_v31, %s5121_s12 }
 0x10a   :  { %344 = vst.msk [vmem:[#allocation2 + $0xbc0] ss:$8 sm:$0xf0] %vm13_vm0, %v339_v60   ;;  %335 = vst.msk [vmem:[#allocation2 + $0xb80] ss:$8 sm:$0xf] %vm13_vm0, %v332_v61  }
 0x10b   :  { %v985_v30 = vpop.permute.xlu1 %984   ;;  %v976_v31 = vpop.permute.xlu0 %975   ;;  %337 = vst.msk [vmem:[#allocation2 + $0xb80] ss:$8 sm:$0xf0] %vm13_vm0, %v332_v61  }
 0x10c   :  { %988 = vst.msk [vmem:[#allocation2 + $0x5c2] ss:$8 sm:$0xf] %vm13_vm0, %v985_v30   ;;  %990 = vst.msk [vmem:[#allocation2 + $0x5c2] ss:$8 sm:$0xf0] %vm13_vm0, %v985_v30  }
 0x10d   :  { %979 = vst.msk [vmem:[#allocation2 + $0x582] ss:$8 sm:$0xf] %vm13_vm0, %v976_v31   ;;  %981 = vst.msk [vmem:[#allocation2 + $0x582] ss:$8 sm:$0xf0] %vm13_vm0, %v976_v31   ;;  %1505 = vrot.lane.b32.xlu1 %v5319_v32, %s5121_s12  ;;  %1496 = vrot.lane.b32.xlu0 %v5321_v33, %s5121_s12 }
 0x10e   :  { %v213_v32 = vld [vmem:[#allocation0 + $0xe8] sm:$0xff]   ;;  %v206_v33 = vld [vmem:[#allocation0 + $0xe0] sm:$0xff]  }
 0x10f   :  { %216 = vst.msk [vmem:[#allocation2 + $0x740] ss:$8 sm:$0xf] %vm13_vm0, %v213_v32   ;;  %218 = vst.msk [vmem:[#allocation2 + $0x740] ss:$8 sm:$0xf0] %vm13_vm0, %v213_v32   ;;  %v1003_v54 = vpop.permute.xlu1 %1002   ;;  %v994_v55 = vpop.permute.xlu0 %993  }
 0x110   :  { %209 = vst.msk [vmem:[#allocation2 + $0x700] ss:$8 sm:$0xf] %vm13_vm0, %v206_v33   ;;  %211 = vst.msk [vmem:[#allocation2 + $0x700] ss:$8 sm:$0xf0] %vm13_vm0, %v206_v33  }
 0x111   :  { %1006 = vst.msk [vmem:[#allocation2 + $0x642] ss:$8 sm:$0xf] %vm13_vm0, %v1003_v54   ;;  %1008 = vst.msk [vmem:[#allocation2 + $0x642] ss:$8 sm:$0xf0] %vm13_vm0, %v1003_v54   ;;  %1523 = vrot.lane.b32.xlu1 %v5327_v34, %s5121_s12  ;;  %1514 = vrot.lane.b32.xlu0 %v5329_v35, %s5121_s12 }
 0x112   :  { %997 = vst.msk [vmem:[#allocation2 + $0x602] ss:$8 sm:$0xf] %vm13_vm0, %v994_v55   ;;  %999 = vst.msk [vmem:[#allocation2 + $0x602] ss:$8 sm:$0xf0] %vm13_vm0, %v994_v55  }
 0x113   :  { %v227_v34 = vld [vmem:[#allocation0 + $0xf8] sm:$0xff]   ;;  %v220_v35 = vld [vmem:[#allocation0 + $0xf0] sm:$0xff]   ;;  %v1021_v1 = vpop.permute.xlu1 %1020   ;;  %v1012_v3 = vpop.permute.xlu0 %1011  }
 0x114   :  { %230 = vst.msk [vmem:[#allocation2 + $0x7c0] ss:$8 sm:$0xf] %vm13_vm0, %v227_v34   ;;  %232 = vst.msk [vmem:[#allocation2 + $0x7c0] ss:$8 sm:$0xf0] %vm13_vm0, %v227_v34  }
 0x115   :  { %223 = vst.msk [vmem:[#allocation2 + $0x780] ss:$8 sm:$0xf] %vm13_vm0, %v220_v35   ;;  %225 = vst.msk [vmem:[#allocation2 + $0x780] ss:$8 sm:$0xf0] %vm13_vm0, %v220_v35   ;;  %1541 = vrot.lane.b32.xlu1 %v5335_v36, %s5121_s12  ;;  %1532 = vrot.lane.b32.xlu0 %v5337_v37, %s5121_s12 }
 0x116   :  { %1024 = vst.msk [vmem:[#allocation2 + $0x6c2] ss:$8 sm:$0xf] %vm13_vm0, %v1021_v1   ;;  %1026 = vst.msk [vmem:[#allocation2 + $0x6c2] ss:$8 sm:$0xf0] %vm13_vm0, %v1021_v1  }
 0x117   :  { %1015 = vst.msk [vmem:[#allocation2 + $0x682] ss:$8 sm:$0xf] %vm13_vm0, %v1012_v3   ;;  %1017 = vst.msk [vmem:[#allocation2 + $0x682] ss:$8 sm:$0xf0] %vm13_vm0, %v1012_v3   ;;  %v1039_v36 = vpop.permute.xlu1 %1038   ;;  %v1030_v37 = vpop.permute.xlu0 %1029  }
 0x118   :  { %1042 = vst.msk [vmem:[#allocation2 + $0x742] ss:$8 sm:$0xf] %vm13_vm0, %v1039_v36   ;;  %1044 = vst.msk [vmem:[#allocation2 + $0x742] ss:$8 sm:$0xf0] %vm13_vm0, %v1039_v36  }
 0x119   :  { %1033 = vst.msk [vmem:[#allocation2 + $0x702] ss:$8 sm:$0xf] %vm13_vm0, %v1030_v37   ;;  %1035 = vst.msk [vmem:[#allocation2 + $0x702] ss:$8 sm:$0xf0] %vm13_vm0, %v1030_v37   ;;  %1559 = vrot.lane.b32.xlu1 %v5343_v38, %s5121_s12  ;;  %1550 = vrot.lane.b32.xlu0 %v5345_v39, %s5121_s12 }
 0x11b   :  { %v1057_v38 = vpop.permute.xlu1 %1056   ;;  %v1048_v39 = vpop.permute.xlu0 %1047  }
 0x11c   :  { %1060 = vst.msk [vmem:[#allocation2 + $0x7c2] ss:$8 sm:$0xf] %vm13_vm0, %v1057_v38   ;;  %1062 = vst.msk [vmem:[#allocation2 + $0x7c2] ss:$8 sm:$0xf0] %vm13_vm0, %v1057_v38  }
 0x11d   :  { %1051 = vst.msk [vmem:[#allocation2 + $0x782] ss:$8 sm:$0xf] %vm13_vm0, %v1048_v39   ;;  %1053 = vst.msk [vmem:[#allocation2 + $0x782] ss:$8 sm:$0xf0] %vm13_vm0, %v1048_v39   ;;  %1577 = vrot.lane.b32.xlu1 %v5351_v40, %s5121_s12  ;;  %1568 = vrot.lane.b32.xlu0 %v5353_v41, %s5121_s12 }
 0x11e   :  { %v255_v40 = vld [vmem:[#allocation0 + $0x118] sm:$0xff]   ;;  %v248_v41 = vld [vmem:[#allocation0 + $0x110] sm:$0xff]  }
 0x11f   :  { %258 = vst.msk [vmem:[#allocation2 + $0x8c0] ss:$8 sm:$0xf] %vm13_vm0, %v255_v40   ;;  %260 = vst.msk [vmem:[#allocation2 + $0x8c0] ss:$8 sm:$0xf0] %vm13_vm0, %v255_v40   ;;  %v1075_v4 = vpop.permute.xlu1 %1074   ;;  %v1066_v5 = vpop.permute.xlu0 %1065  }
 0x120   :  { %251 = vst.msk [vmem:[#allocation2 + $0x880] ss:$8 sm:$0xf] %vm13_vm0, %v248_v41   ;;  %253 = vst.msk [vmem:[#allocation2 + $0x880] ss:$8 sm:$0xf0] %vm13_vm0, %v248_v41  }
 0x121   :  { %1078 = vst.msk [vmem:[#allocation2 + $0x842] ss:$8 sm:$0xf] %vm13_vm0, %v1075_v4   ;;  %1080 = vst.msk [vmem:[#allocation2 + $0x842] ss:$8 sm:$0xf0] %vm13_vm0, %v1075_v4   ;;  %1595 = vrot.lane.b32.xlu1 %v5359_v42, %s5121_s12  ;;  %1586 = vrot.lane.b32.xlu0 %v5361_v43, %s5121_s12 }
 0x122   :  { %1069 = vst.msk [vmem:[#allocation2 + $0x802] ss:$8 sm:$0xf] %vm13_vm0, %v1066_v5   ;;  %1071 = vst.msk [vmem:[#allocation2 + $0x802] ss:$8 sm:$0xf0] %vm13_vm0, %v1066_v5  }
 0x123   :  { %v269_v42 = vld [vmem:[#allocation0 + $0x128] sm:$0xff]   ;;  %v262_v43 = vld [vmem:[#allocation0 + $0x120] sm:$0xff]   ;;  %v1093_v6 = vpop.permute.xlu1 %1092   ;;  %v1084_v7 = vpop.permute.xlu0 %1083  }
 0x124   :  { %272 = vst.msk [vmem:[#allocation2 + $0x940] ss:$8 sm:$0xf] %vm13_vm0, %v269_v42   ;;  %274 = vst.msk [vmem:[#allocation2 + $0x940] ss:$8 sm:$0xf0] %vm13_vm0, %v269_v42  }
 0x125   :  { %265 = vst.msk [vmem:[#allocation2 + $0x900] ss:$8 sm:$0xf] %vm13_vm0, %v262_v43   ;;  %267 = vst.msk [vmem:[#allocation2 + $0x900] ss:$8 sm:$0xf0] %vm13_vm0, %v262_v43   ;;  %1613 = vrot.lane.b32.xlu1 %v5367_v44, %s5121_s12  ;;  %1604 = vrot.lane.b32.xlu0 %v5369_v45, %s5121_s12 }
 0x126   :  { %1096 = vst.msk [vmem:[#allocation2 + $0x8c2] ss:$8 sm:$0xf] %vm13_vm0, %v1093_v6   ;;  %1098 = vst.msk [vmem:[#allocation2 + $0x8c2] ss:$8 sm:$0xf0] %vm13_vm0, %v1093_v6  }
 0x127   :  { %1087 = vst.msk [vmem:[#allocation2 + $0x882] ss:$8 sm:$0xf] %vm13_vm0, %v1084_v7   ;;  %1089 = vst.msk [vmem:[#allocation2 + $0x882] ss:$8 sm:$0xf0] %vm13_vm0, %v1084_v7   ;;  %v1111_v44 = vpop.permute.xlu1 %1110   ;;  %v1102_v45 = vpop.permute.xlu0 %1101  }
 0x128   :  { %1114 = vst.msk [vmem:[#allocation2 + $0x942] ss:$8 sm:$0xf] %vm13_vm0, %v1111_v44   ;;  %1116 = vst.msk [vmem:[#allocation2 + $0x942] ss:$8 sm:$0xf0] %vm13_vm0, %v1111_v44  }
 0x129   :  { %1105 = vst.msk [vmem:[#allocation2 + $0x902] ss:$8 sm:$0xf] %vm13_vm0, %v1102_v45   ;;  %1107 = vst.msk [vmem:[#allocation2 + $0x902] ss:$8 sm:$0xf0] %vm13_vm0, %v1102_v45   ;;  %1631 = vrot.lane.b32.xlu1 %v5375_v46, %s5121_s12  ;;  %1622 = vrot.lane.b32.xlu0 %v5377_v47, %s5121_s12 }
 0x12b   :  { %v1129_v46 = vpop.permute.xlu1 %1128   ;;  %v1120_v47 = vpop.permute.xlu0 %1119  }
 0x12c   :  { %1132 = vst.msk [vmem:[#allocation2 + $0x9c2] ss:$8 sm:$0xf] %vm13_vm0, %v1129_v46   ;;  %1134 = vst.msk [vmem:[#allocation2 + $0x9c2] ss:$8 sm:$0xf0] %vm13_vm0, %v1129_v46  }
 0x12d   :  { %1123 = vst.msk [vmem:[#allocation2 + $0x982] ss:$8 sm:$0xf] %vm13_vm0, %v1120_v47   ;;  %1125 = vst.msk [vmem:[#allocation2 + $0x982] ss:$8 sm:$0xf0] %vm13_vm0, %v1120_v47  }
 0x12f   :  { %v1147_v12 = vpop.permute.xlu1 %1146   ;;  %v1138_v13 = vpop.permute.xlu0 %1137  }
 0x130   :  { %1150 = vst.msk [vmem:[#allocation2 + $0xa42] ss:$8 sm:$0xf] %vm13_vm0, %v1147_v12   ;;  %1152 = vst.msk [vmem:[#allocation2 + $0xa42] ss:$8 sm:$0xf0] %vm13_vm0, %v1147_v12  }
 0x131   :  { %1141 = vst.msk [vmem:[#allocation2 + $0xa02] ss:$8 sm:$0xf] %vm13_vm0, %v1138_v13   ;;  %1143 = vst.msk [vmem:[#allocation2 + $0xa02] ss:$8 sm:$0xf0] %vm13_vm0, %v1138_v13  }
 0x133   :  { %v1165_v14 = vpop.permute.xlu1 %1164   ;;  %v1156_v15 = vpop.permute.xlu0 %1155  }
 0x134   :  { %1168 = vst.msk [vmem:[#allocation2 + $0xac2] ss:$8 sm:$0xf] %vm13_vm0, %v1165_v14   ;;  %1170 = vst.msk [vmem:[#allocation2 + $0xac2] ss:$8 sm:$0xf0] %vm13_vm0, %v1165_v14  }
 0x135   :  { %1159 = vst.msk [vmem:[#allocation2 + $0xa82] ss:$8 sm:$0xf] %vm13_vm0, %v1156_v15   ;;  %1161 = vst.msk [vmem:[#allocation2 + $0xa82] ss:$8 sm:$0xf0] %vm13_vm0, %v1156_v15  }
 0x137   :  { %v1183_v16 = vpop.permute.xlu1 %1182   ;;  %v1174_v17 = vpop.permute.xlu0 %1173  }
 0x138   :  { %1186 = vst.msk [vmem:[#allocation2 + $0xb42] ss:$8 sm:$0xf] %vm13_vm0, %v1183_v16   ;;  %1188 = vst.msk [vmem:[#allocation2 + $0xb42] ss:$8 sm:$0xf0] %vm13_vm0, %v1183_v16  }
 0x139   :  { %1177 = vst.msk [vmem:[#allocation2 + $0xb02] ss:$8 sm:$0xf] %vm13_vm0, %v1174_v17   ;;  %1179 = vst.msk [vmem:[#allocation2 + $0xb02] ss:$8 sm:$0xf0] %vm13_vm0, %v1174_v17  }
 0x13b   :  { %v1201_v18 = vpop.permute.xlu1 %1200   ;;  %v1192_v19 = vpop.permute.xlu0 %1191  }
 0x13c   :  { %1204 = vst.msk [vmem:[#allocation2 + $0xbc2] ss:$8 sm:$0xf] %vm13_vm0, %v1201_v18   ;;  %1206 = vst.msk [vmem:[#allocation2 + $0xbc2] ss:$8 sm:$0xf0] %vm13_vm0, %v1201_v18  }
 0x13d   :  { %1195 = vst.msk [vmem:[#allocation2 + $0xb82] ss:$8 sm:$0xf] %vm13_vm0, %v1192_v19   ;;  %1197 = vst.msk [vmem:[#allocation2 + $0xb82] ss:$8 sm:$0xf0] %vm13_vm0, %v1192_v19  }
 0x13f   :  { %v1218_v20 = vpop.permute.xlu1 %1217   ;;  %v1209_v21 = vpop.permute.xlu0 %1208  }
 0x140   :  { %1221 = vst.msk [vmem:[#allocation2 + $0x43] ss:$8 sm:$0xf] %vm13_vm0, %v1218_v20   ;;  %1223 = vst.msk [vmem:[#allocation2 + $0x43] ss:$8 sm:$0xf0] %vm13_vm0, %v1218_v20  }
 0x141   :  { %1212 = vst.msk [vmem:[#allocation2 + $0x3] ss:$8 sm:$0xf] %vm13_vm0, %v1209_v21   ;;  %1214 = vst.msk [vmem:[#allocation2 + $0x3] ss:$8 sm:$0xf0] %vm13_vm0, %v1209_v21  }
 0x143   :  { %v1236_v62 = vpop.permute.xlu1 %1235   ;;  %v1227_v63 = vpop.permute.xlu0 %1226  }
 0x144   :  { %1239 = vst.msk [vmem:[#allocation2 + $0xc3] ss:$8 sm:$0xf] %vm13_vm0, %v1236_v62   ;;  %1241 = vst.msk [vmem:[#allocation2 + $0xc3] ss:$8 sm:$0xf0] %vm13_vm0, %v1236_v62  }
 0x145   :  { %1230 = vst.msk [vmem:[#allocation2 + $0x83] ss:$8 sm:$0xf] %vm13_vm0, %v1227_v63   ;;  %1232 = vst.msk [vmem:[#allocation2 + $0x83] ss:$8 sm:$0xf0] %vm13_vm0, %v1227_v63  }
 0x147   :  { %v1695_v22 = vld [vmem:[#allocation2 + $0x40] sm:$0xf]  ;;  %v1702_v23 = vld [vmem:[#allocation2 + $0x48] sm:$0xf]  ;;  %v1709_v24 = vld [vmem:[#allocation2 + $0x50] sm:$0xf]  ;;  %v1254_v25 = vpop.permute.xlu1 %1253   ;;  %v1245_v48 = vpop.permute.xlu0 %1244  }
 0x148   :  { %v1716_v49 = vld [vmem:[#allocation2 + $0x58] sm:$0xf]  ;;  %v1723_v26 = vld [vmem:[#allocation2 + $0x60] sm:$0xf]  ;;  %v1730_v27 = vld [vmem:[#allocation2 + $0x68] sm:$0xf] }
 0x149   :  { %4716 = vst [vmem:[%s7084_s1 + $0x20] sm:$0xf] %v1695_v22  ;;  %4717 = vst [vmem:[%s7084_s1 + $0x24] sm:$0xf] %v1702_v23  ;;  %v1737_v50 = vld [vmem:[#allocation2 + $0x70] sm:$0xf] }
 0x14a   :  { %4718 = vst [vmem:[%s7084_s1 + $0x28] sm:$0xf] %v1709_v24  ;;  %1257 = vst.msk [vmem:[#allocation2 + $0x143] ss:$8 sm:$0xf] %vm13_vm0, %v1254_v25  }
 0x14b   :  { %1259 = vst.msk [vmem:[#allocation2 + $0x143] ss:$8 sm:$0xf0] %vm13_vm0, %v1254_v25   ;;  %1248 = vst.msk [vmem:[#allocation2 + $0x103] ss:$8 sm:$0xf] %vm13_vm0, %v1245_v48   ;;  %v1272_v33 = vpop.permute.xlu1 %1271   ;;  %v1263_v54 = vpop.permute.xlu0 %1262  }
 0x14c   :  { %1250 = vst.msk [vmem:[#allocation2 + $0x103] ss:$8 sm:$0xf0] %vm13_vm0, %v1245_v48   ;;  %v1744_v51 = vld [vmem:[#allocation2 + $0x78] sm:$0xf] }
 0x14d   :  { %v1642_v28 = vld [vmem:[#allocation2] sm:$0xf]  ;;  %4719 = vst [vmem:[%s7084_s1 + $0x2c] sm:$0xf] %v1716_v49  ;;  %4720 = vst [vmem:[%s7084_s1 + $0x30] sm:$0xf] %v1723_v26 }
 0x14e   :  { %4721 = vst [vmem:[%s7084_s1 + $0x34] sm:$0xf] %v1730_v27  ;;  %v1647_v29 = vld [vmem:[#allocation2 + $0x8] sm:$0xf]  ;;  %v1653_v52 = vld [vmem:[#allocation2 + $0x10] sm:$0xf] }
 0x14f   :  { %v1660_v53 = vld [vmem:[#allocation2 + $0x18] sm:$0xf]  ;;  %4722 = vst [vmem:[%s7084_s1 + $0x38] sm:$0xf] %v1737_v50  ;;  %4723 = vst [vmem:[%s7084_s1 + $0x3c] sm:$0xf] %v1744_v51  ;;  %v1290_v41 = vpop.permute.xlu1 %1289   ;;  %v1281_v4 = vpop.permute.xlu0 %1280  }
 0x150   :  { %1645 = vst [vmem:[%s7084_s1] sm:$0xf] %v1642_v28  ;;  %v1667_v30 = vld [vmem:[#allocation2 + $0x20] sm:$0xf]  ;;  %v1674_v31 = vld [vmem:[#allocation2 + $0x28] sm:$0xf] }
 0x151   :  { %v1681_v32 = vld [vmem:[#allocation2 + $0x30] sm:$0xf]  ;;  %4709 = vst [vmem:[%s7084_s1 + $0x4] sm:$0xf] %v1647_v29  ;;  %4710 = vst [vmem:[%s7084_s1 + $0x8] sm:$0xf] %v1653_v52 }
 0x152   :  { %4711 = vst [vmem:[%s7084_s1 + $0xc] sm:$0xf] %v1660_v53  ;;  %v1688_v55 = vld [vmem:[#allocation2 + $0x38] sm:$0xf]  ;;  %4712 = vst [vmem:[%s7084_s1 + $0x10] sm:$0xf] %v1667_v30 }
 0x153   :  { %4713 = vst [vmem:[%s7084_s1 + $0x14] sm:$0xf] %v1674_v31  ;;  %4714 = vst [vmem:[%s7084_s1 + $0x18] sm:$0xf] %v1681_v32  ;;  %v1807_v34 = vld [vmem:[#allocation2 + $0xc0] sm:$0xf]  ;;  %v1308_v11 = vpop.permute.xlu1 %1307   ;;  %v1299_v12 = vpop.permute.xlu0 %1298  }
 0x154   :  { %v1814_v35 = vld [vmem:[#allocation2 + $0xc8] sm:$0xf]  ;;  %1275 = vst.msk [vmem:[#allocation2 + $0x1c3] ss:$8 sm:$0xf] %vm13_vm0, %v1272_v33  }
 0x155   :  { %1277 = vst.msk [vmem:[#allocation2 + $0x1c3] ss:$8 sm:$0xf0] %vm13_vm0, %v1272_v33   ;;  %1266 = vst.msk [vmem:[#allocation2 + $0x183] ss:$8 sm:$0xf] %vm13_vm0, %v1263_v54  }
 0x156   :  { %1268 = vst.msk [vmem:[#allocation2 + $0x183] ss:$8 sm:$0xf0] %vm13_vm0, %v1263_v54   ;;  %4715 = vst [vmem:[%s7084_s1 + $0x1c] sm:$0xf] %v1688_v55 }
 0x157   :  { %v1821_v1 = vld [vmem:[#allocation2 + $0xd0] sm:$0xf]  ;;  %v1828_v3 = vld [vmem:[#allocation2 + $0xd8] sm:$0xf]  ;;  %v1835_v36 = vld [vmem:[#allocation2 + $0xe0] sm:$0xf]  ;;  %v1326_v61 = vpop.permute.xlu1 %1325   ;;  %v1317_v20 = vpop.permute.xlu0 %1316  }
 0x158   :  { %4732 = vst [vmem:[%s7084_s1 + $0x60] sm:$0xf] %v1807_v34  ;;  %4733 = vst [vmem:[%s7084_s1 + $0x64] sm:$0xf] %v1814_v35  ;;  %v1842_v37 = vld [vmem:[#allocation2 + $0xe8] sm:$0xf] }
 0x159   :  { %v1849_v0 = vld [vmem:[#allocation2 + $0xf0] sm:$0xf]  ;;  %v1856_v2 = vld [vmem:[#allocation2 + $0xf8] sm:$0xf]  ;;  %4734 = vst [vmem:[%s7084_s1 + $0x68] sm:$0xf] %v1821_v1 }
 0x15a   :  { %4735 = vst [vmem:[%s7084_s1 + $0x6c] sm:$0xf] %v1828_v3  ;;  %4736 = vst [vmem:[%s7084_s1 + $0x70] sm:$0xf] %v1835_v36  ;;  %v1751_v38 = vld [vmem:[#allocation2 + $0x80] sm:$0xf] }
 0x15b   :  { %v1758_v39 = vld [vmem:[#allocation2 + $0x88] sm:$0xf]  ;;  %v1765_v40 = vld [vmem:[#allocation2 + $0x90] sm:$0xf]  ;;  %4737 = vst [vmem:[%s7084_s1 + $0x74] sm:$0xf] %v1842_v37  ;;  %v1344_v51 = vpop.permute.xlu1 %1343   ;;  %v1335_v28 = vpop.permute.xlu0 %1334  }
 0x15c   :  { %4738 = vst [vmem:[%s7084_s1 + $0x78] sm:$0xf] %v1849_v0  ;;  %4739 = vst [vmem:[%s7084_s1 + $0x7c] sm:$0xf] %v1856_v2  ;;  %v1772_v5 = vld [vmem:[#allocation2 + $0x98] sm:$0xf] }
 0x15d   :  { %v1779_v42 = vld [vmem:[#allocation2 + $0xa0] sm:$0xf]  ;;  %v1786_v43 = vld [vmem:[#allocation2 + $0xa8] sm:$0xf]  ;;  %4724 = vst [vmem:[%s7084_s1 + $0x40] sm:$0xf] %v1751_v38 }
 0x15e   :  { %4725 = vst [vmem:[%s7084_s1 + $0x44] sm:$0xf] %v1758_v39  ;;  %4726 = vst [vmem:[%s7084_s1 + $0x48] sm:$0xf] %v1765_v40  ;;  %v1793_v6 = vld [vmem:[#allocation2 + $0xb0] sm:$0xf] }
 0x15f   :  { %1293 = vst.msk [vmem:[#allocation2 + $0x243] ss:$8 sm:$0xf] %vm13_vm0, %v1290_v41   ;;  %1295 = vst.msk [vmem:[#allocation2 + $0x243] ss:$8 sm:$0xf0] %vm13_vm0, %v1290_v41   ;;  %v1362_v3 = vpop.permute.xlu1 %1361   ;;  %v1353_v36 = vpop.permute.xlu0 %1352  }
 0x160   :  { %1284 = vst.msk [vmem:[#allocation2 + $0x203] ss:$8 sm:$0xf] %vm13_vm0, %v1281_v4   ;;  %1286 = vst.msk [vmem:[#allocation2 + $0x203] ss:$8 sm:$0xf0] %vm13_vm0, %v1281_v4  }
 0x161   :  { %v1800_v7 = vld [vmem:[#allocation2 + $0xb8] sm:$0xf]  ;;  %4727 = vst [vmem:[%s7084_s1 + $0x4c] sm:$0xf] %v1772_v5  ;;  %4728 = vst [vmem:[%s7084_s1 + $0x50] sm:$0xf] %v1779_v42 }
 0x162   :  { %4729 = vst [vmem:[%s7084_s1 + $0x54] sm:$0xf] %v1786_v43  ;;  %v1919_v44 = vld [vmem:[#allocation2 + $0x140] sm:$0xf]  ;;  %4730 = vst [vmem:[%s7084_s1 + $0x58] sm:$0xf] %v1793_v6 }
 0x163   :  { %4731 = vst [vmem:[%s7084_s1 + $0x5c] sm:$0xf] %v1800_v7  ;;  %v1926_v45 = vld [vmem:[#allocation2 + $0x148] sm:$0xf]  ;;  %v1933_v8 = vld [vmem:[#allocation2 + $0x150] sm:$0xf]  ;;  %v1380_v7 = vpop.permute.xlu1 %1379  }
 0x164   :  { %v1940_v9 = vld [vmem:[#allocation2 + $0x158] sm:$0xf]  ;;  %4748 = vst [vmem:[%s7084_s1 + $0xa0] sm:$0xf] %v1919_v44  ;;  %v1947_v46 = vld [vmem:[#allocation2 + $0x160] sm:$0xf]  ;;  %v1371_v44 = vpop.permute.xlu0 %1370  }
 0x165   :  { %v1954_v47 = vld [vmem:[#allocation2 + $0x168] sm:$0xf]  ;;  %v1961_v10 = vld [vmem:[#allocation2 + $0x170] sm:$0xf]  ;;  %4749 = vst [vmem:[%s7084_s1 + $0xa4] sm:$0xf] %v1926_v45 }
 0x166   :  { %4750 = vst [vmem:[%s7084_s1 + $0xa8] sm:$0xf] %v1933_v8  ;;  %4751 = vst [vmem:[%s7084_s1 + $0xac] sm:$0xf] %v1940_v9  ;;  %v1968_v13 = vld [vmem:[#allocation2 + $0x178] sm:$0xf] }
 0x167   :  { %v1863_v56 = vld [vmem:[#allocation2 + $0x100] sm:$0xf]  ;;  %v1870_v57 = vld [vmem:[#allocation2 + $0x108] sm:$0xf]  ;;  %4752 = vst [vmem:[%s7084_s1 + $0xb0] sm:$0xf] %v1947_v46 }
 0x168   :  { %4753 = vst [vmem:[%s7084_s1 + $0xb4] sm:$0xf] %v1954_v47  ;;  %4754 = vst [vmem:[%s7084_s1 + $0xb8] sm:$0xf] %v1961_v10  ;;  %v1877_v14 = vld [vmem:[#allocation2 + $0x110] sm:$0xf] }
 0x169   :  { %1311 = vst.msk [vmem:[#allocation2 + $0x2c3] ss:$8 sm:$0xf] %vm13_vm0, %v1308_v11   ;;  %1313 = vst.msk [vmem:[#allocation2 + $0x2c3] ss:$8 sm:$0xf0] %vm13_vm0, %v1308_v11  }
 0x16a   :  { %1302 = vst.msk [vmem:[#allocation2 + $0x283] ss:$8 sm:$0xf] %vm13_vm0, %v1299_v12   ;;  %1304 = vst.msk [vmem:[#allocation2 + $0x283] ss:$8 sm:$0xf0] %vm13_vm0, %v1299_v12  }
 0x16b   :  { %v1884_v15 = vld [vmem:[#allocation2 + $0x118] sm:$0xf]  ;;  %v1891_v16 = vld [vmem:[#allocation2 + $0x120] sm:$0xf]  ;;  %4755 = vst [vmem:[%s7084_s1 + $0xbc] sm:$0xf] %v1968_v13 }
 0x16c   :  { %4740 = vst [vmem:[%s7084_s1 + $0x80] sm:$0xf] %v1863_v56  ;;  %4741 = vst [vmem:[%s7084_s1 + $0x84] sm:$0xf] %v1870_v57  ;;  %v1898_v17 = vld [vmem:[#allocation2 + $0x128] sm:$0xf] }
 0x16d   :  { %v1905_v58 = vld [vmem:[#allocation2 + $0x130] sm:$0xf]  ;;  %v1912_v59 = vld [vmem:[#allocation2 + $0x138] sm:$0xf]  ;;  %4742 = vst [vmem:[%s7084_s1 + $0x88] sm:$0xf] %v1877_v14 }
 0x16e   :  { %4743 = vst [vmem:[%s7084_s1 + $0x8c] sm:$0xf] %v1884_v15  ;;  %4744 = vst [vmem:[%s7084_s1 + $0x90] sm:$0xf] %v1891_v16  ;;  %v2031_v18 = vld [vmem:[#allocation2 + $0x1c0] sm:$0xf]  ;;  %v1398_v15 = vpop.permute.xlu1 %1397   ;;  %v1389_v16 = vpop.permute.xlu0 %1388  }
 0x16f   :  { %4745 = vst [vmem:[%s7084_s1 + $0x94] sm:$0xf] %v1898_v17  ;;  %4746 = vst [vmem:[%s7084_s1 + $0x98] sm:$0xf] %v1905_v58  ;;  %v2038_v19 = vld [vmem:[#allocation2 + $0x1c8] sm:$0xf] }
 0x170   :  { %4747 = vst [vmem:[%s7084_s1 + $0x9c] sm:$0xf] %v1912_v59  ;;  %v2045_v60 = vld [vmem:[#allocation2 + $0x1d0] sm:$0xf]  ;;  %v2052_v21 = vld [vmem:[#allocation2 + $0x1d8] sm:$0xf] }
 0x171   :  { %v2059_v62 = vld [vmem:[#allocation2 + $0x1e0] sm:$0xf]  ;;  %v2066_v63 = vld [vmem:[#allocation2 + $0x1e8] sm:$0xf]  ;;  %4764 = vst [vmem:[%s7084_s1 + $0xe0] sm:$0xf] %v2031_v18 }
 0x172   :  { %4765 = vst [vmem:[%s7084_s1 + $0xe4] sm:$0xf] %v2038_v19  ;;  %4766 = vst [vmem:[%s7084_s1 + $0xe8] sm:$0xf] %v2045_v60  ;;  %v2073_v22 = vld [vmem:[#allocation2 + $0x1f0] sm:$0xf] }
 0x173   :  { %1329 = vst.msk [vmem:[#allocation2 + $0x343] ss:$8 sm:$0xf] %vm13_vm0, %v1326_v61   ;;  %1331 = vst.msk [vmem:[#allocation2 + $0x343] ss:$8 sm:$0xf0] %vm13_vm0, %v1326_v61  }
 0x174   :  { %1320 = vst.msk [vmem:[#allocation2 + $0x303] ss:$8 sm:$0xf] %vm13_vm0, %v1317_v20   ;;  %1322 = vst.msk [vmem:[#allocation2 + $0x303] ss:$8 sm:$0xf0] %vm13_vm0, %v1317_v20  }
 0x175   :  { %v2080_v23 = vld [vmem:[#allocation2 + $0x1f8] sm:$0xf]  ;;  %v1975_v24 = vld [vmem:[#allocation2 + $0x180] sm:$0xf]  ;;  %4767 = vst [vmem:[%s7084_s1 + $0xec] sm:$0xf] %v2052_v21 }
 0x176   :  { %4768 = vst [vmem:[%s7084_s1 + $0xf0] sm:$0xf] %v2059_v62  ;;  %4769 = vst [vmem:[%s7084_s1 + $0xf4] sm:$0xf] %v2066_v63  ;;  %v1982_v25 = vld [vmem:[#allocation2 + $0x188] sm:$0xf] }
 0x177   :  { %v1989_v48 = vld [vmem:[#allocation2 + $0x190] sm:$0xf]  ;;  %v1996_v49 = vld [vmem:[#allocation2 + $0x198] sm:$0xf]  ;;  %4770 = vst [vmem:[%s7084_s1 + $0xf8] sm:$0xf] %v2073_v22 }
 0x178   :  { %4771 = vst [vmem:[%s7084_s1 + $0xfc] sm:$0xf] %v2080_v23  ;;  %4756 = vst [vmem:[%s7084_s1 + $0xc0] sm:$0xf] %v1975_v24  ;;  %v2003_v26 = vld [vmem:[#allocation2 + $0x1a0] sm:$0xf]  ;;  %v1416_v23 = vpop.permute.xlu1 %1415   ;;  %v1407_v24 = vpop.permute.xlu0 %1406  }
 0x179   :  { %v2010_v27 = vld [vmem:[#allocation2 + $0x1a8] sm:$0xf]  ;;  %v2017_v50 = vld [vmem:[#allocation2 + $0x1b0] sm:$0xf]  ;;  %4757 = vst [vmem:[%s7084_s1 + $0xc4] sm:$0xf] %v1982_v25 }
 0x17a   :  { %4758 = vst [vmem:[%s7084_s1 + $0xc8] sm:$0xf] %v1989_v48  ;;  %4759 = vst [vmem:[%s7084_s1 + $0xcc] sm:$0xf] %v1996_v49  ;;  %v2024_v29 = vld [vmem:[#allocation2 + $0x1b8] sm:$0xf] }
 0x17b   :  { %4760 = vst [vmem:[%s7084_s1 + $0xd0] sm:$0xf] %v2003_v26  ;;  %4761 = vst [vmem:[%s7084_s1 + $0xd4] sm:$0xf] %v2010_v27  ;;  %v2143_v52 = vld [vmem:[#allocation2 + $0x240] sm:$0xf] }
 0x17c   :  { %4762 = vst [vmem:[%s7084_s1 + $0xd8] sm:$0xf] %v2017_v50  ;;  %v2150_v53 = vld [vmem:[#allocation2 + $0x248] sm:$0xf]  ;;  %4763 = vst [vmem:[%s7084_s1 + $0xdc] sm:$0xf] %v2024_v29 }
 0x17d   :  { %1347 = vst.msk [vmem:[#allocation2 + $0x3c3] ss:$8 sm:$0xf] %vm13_vm0, %v1344_v51   ;;  %1349 = vst.msk [vmem:[#allocation2 + $0x3c3] ss:$8 sm:$0xf0] %vm13_vm0, %v1344_v51  }
 0x17e   :  { %1338 = vst.msk [vmem:[#allocation2 + $0x383] ss:$8 sm:$0xf] %vm13_vm0, %v1335_v28   ;;  %1340 = vst.msk [vmem:[#allocation2 + $0x383] ss:$8 sm:$0xf0] %vm13_vm0, %v1335_v28  }
 0x17f   :  { %v2157_v30 = vld [vmem:[#allocation2 + $0x250] sm:$0xf]  ;;  %v2164_v31 = vld [vmem:[#allocation2 + $0x258] sm:$0xf]  ;;  %v2171_v32 = vld [vmem:[#allocation2 + $0x260] sm:$0xf] }
 0x180   :  { %4780 = vst [vmem:[%s7084_s1 + $0x120] sm:$0xf] %v2143_v52  ;;  %4781 = vst [vmem:[%s7084_s1 + $0x124] sm:$0xf] %v2150_v53  ;;  %v2178_v33 = vld [vmem:[#allocation2 + $0x268] sm:$0xf] }
 0x181   :  { %v2185_v54 = vld [vmem:[#allocation2 + $0x270] sm:$0xf]  ;;  %v2192_v55 = vld [vmem:[#allocation2 + $0x278] sm:$0xf]  ;;  %4782 = vst [vmem:[%s7084_s1 + $0x128] sm:$0xf] %v2157_v30 }
 0x182   :  { %4783 = vst [vmem:[%s7084_s1 + $0x12c] sm:$0xf] %v2164_v31  ;;  %4784 = vst [vmem:[%s7084_s1 + $0x130] sm:$0xf] %v2171_v32  ;;  %v2087_v34 = vld [vmem:[#allocation2 + $0x200] sm:$0xf]  ;;  %v1434_v31 = vpop.permute.xlu1 %1433   ;;  %v1425_v32 = vpop.permute.xlu0 %1424  }
 0x183   :  { %v2094_v35 = vld [vmem:[#allocation2 + $0x208] sm:$0xf]  ;;  %v2101_v1 = vld [vmem:[#allocation2 + $0x210] sm:$0xf]  ;;  %4785 = vst [vmem:[%s7084_s1 + $0x134] sm:$0xf] %v2178_v33 }
 0x184   :  { %4786 = vst [vmem:[%s7084_s1 + $0x138] sm:$0xf] %v2185_v54  ;;  %4787 = vst [vmem:[%s7084_s1 + $0x13c] sm:$0xf] %v2192_v55  ;;  %v2108_v37 = vld [vmem:[#allocation2 + $0x218] sm:$0xf] }
 0x185   :  { %v2115_v0 = vld [vmem:[#allocation2 + $0x220] sm:$0xf]  ;;  %v2122_v2 = vld [vmem:[#allocation2 + $0x228] sm:$0xf]  ;;  %4772 = vst [vmem:[%s7084_s1 + $0x100] sm:$0xf] %v2087_v34 }
 0x186   :  { %4773 = vst [vmem:[%s7084_s1 + $0x104] sm:$0xf] %v2094_v35  ;;  %4774 = vst [vmem:[%s7084_s1 + $0x108] sm:$0xf] %v2101_v1  ;;  %v2129_v38 = vld [vmem:[#allocation2 + $0x230] sm:$0xf] }
 0x187   :  { %1365 = vst.msk [vmem:[#allocation2 + $0x443] ss:$8 sm:$0xf] %vm13_vm0, %v1362_v3   ;;  %1367 = vst.msk [vmem:[#allocation2 + $0x443] ss:$8 sm:$0xf0] %vm13_vm0, %v1362_v3  }
 0x188   :  { %1356 = vst.msk [vmem:[#allocation2 + $0x403] ss:$8 sm:$0xf] %vm13_vm0, %v1353_v36   ;;  %1358 = vst.msk [vmem:[#allocation2 + $0x403] ss:$8 sm:$0xf0] %vm13_vm0, %v1353_v36  }
 0x189   :  { %v2136_v39 = vld [vmem:[#allocation2 + $0x238] sm:$0xf]  ;;  %4775 = vst [vmem:[%s7084_s1 + $0x10c] sm:$0xf] %v2108_v37  ;;  %4776 = vst [vmem:[%s7084_s1 + $0x110] sm:$0xf] %v2115_v0 }
 0x18a   :  { %4777 = vst [vmem:[%s7084_s1 + $0x114] sm:$0xf] %v2122_v2  ;;  %v2255_v40 = vld [vmem:[#allocation2 + $0x2c0] sm:$0xf]  ;;  %4778 = vst [vmem:[%s7084_s1 + $0x118] sm:$0xf] %v2129_v38 }
 0x18b   :  { %4779 = vst [vmem:[%s7084_s1 + $0x11c] sm:$0xf] %v2136_v39  ;;  %v2262_v41 = vld [vmem:[#allocation2 + $0x2c8] sm:$0xf]  ;;  %v2269_v4 = vld [vmem:[#allocation2 + $0x2d0] sm:$0xf]  ;;  %v1452_v39 = vpop.permute.xlu1 %1451  }
 0x18c   :  { %v2276_v5 = vld [vmem:[#allocation2 + $0x2d8] sm:$0xf]  ;;  %4796 = vst [vmem:[%s7084_s1 + $0x160] sm:$0xf] %v2255_v40  ;;  %v2283_v42 = vld [vmem:[#allocation2 + $0x2e0] sm:$0xf]  ;;  %v1443_v40 = vpop.permute.xlu0 %1442  }
 0x18d   :  { %v2290_v43 = vld [vmem:[#allocation2 + $0x2e8] sm:$0xf]  ;;  %v2297_v6 = vld [vmem:[#allocation2 + $0x2f0] sm:$0xf]  ;;  %4797 = vst [vmem:[%s7084_s1 + $0x164] sm:$0xf] %v2262_v41 }
 0x18e   :  { %4798 = vst [vmem:[%s7084_s1 + $0x168] sm:$0xf] %v2269_v4  ;;  %4799 = vst [vmem:[%s7084_s1 + $0x16c] sm:$0xf] %v2276_v5  ;;  %v2304_v45 = vld [vmem:[#allocation2 + $0x2f8] sm:$0xf] }
 0x18f   :  { %v2199_v8 = vld [vmem:[#allocation2 + $0x280] sm:$0xf]  ;;  %v2206_v9 = vld [vmem:[#allocation2 + $0x288] sm:$0xf]  ;;  %4800 = vst [vmem:[%s7084_s1 + $0x170] sm:$0xf] %v2283_v42 }
 0x190   :  { %4801 = vst [vmem:[%s7084_s1 + $0x174] sm:$0xf] %v2290_v43  ;;  %4802 = vst [vmem:[%s7084_s1 + $0x178] sm:$0xf] %v2297_v6  ;;  %v2213_v46 = vld [vmem:[#allocation2 + $0x290] sm:$0xf] }
 0x191   :  { %1383 = vst.msk [vmem:[#allocation2 + $0x4c3] ss:$8 sm:$0xf] %vm13_vm0, %v1380_v7   ;;  %1385 = vst.msk [vmem:[#allocation2 + $0x4c3] ss:$8 sm:$0xf0] %vm13_vm0, %v1380_v7  }
 0x192   :  { %1374 = vst.msk [vmem:[#allocation2 + $0x483] ss:$8 sm:$0xf] %vm13_vm0, %v1371_v44   ;;  %1376 = vst.msk [vmem:[#allocation2 + $0x483] ss:$8 sm:$0xf0] %vm13_vm0, %v1371_v44  }
 0x193   :  { %v2220_v47 = vld [vmem:[#allocation2 + $0x298] sm:$0xf]  ;;  %v2227_v10 = vld [vmem:[#allocation2 + $0x2a0] sm:$0xf]  ;;  %4803 = vst [vmem:[%s7084_s1 + $0x17c] sm:$0xf] %v2304_v45 }
 0x194   :  { %4788 = vst [vmem:[%s7084_s1 + $0x140] sm:$0xf] %v2199_v8  ;;  %4789 = vst [vmem:[%s7084_s1 + $0x144] sm:$0xf] %v2206_v9  ;;  %v2234_v11 = vld [vmem:[#allocation2 + $0x2a8] sm:$0xf] }
 0x195   :  { %v2241_v12 = vld [vmem:[#allocation2 + $0x2b0] sm:$0xf]  ;;  %v2248_v13 = vld [vmem:[#allocation2 + $0x2b8] sm:$0xf]  ;;  %4790 = vst [vmem:[%s7084_s1 + $0x148] sm:$0xf] %v2213_v46 }
 0x196   :  { %4791 = vst [vmem:[%s7084_s1 + $0x14c] sm:$0xf] %v2220_v47  ;;  %4792 = vst [vmem:[%s7084_s1 + $0x150] sm:$0xf] %v2227_v10  ;;  %v2367_v56 = vld [vmem:[#allocation2 + $0x340] sm:$0xf]  ;;  %v1470_v47 = vpop.permute.xlu1 %1469   ;;  %v1461_v10 = vpop.permute.xlu0 %1460  }
 0x197   :  { %v2374_v57 = vld [vmem:[#allocation2 + $0x348] sm:$0xf]  ;;  %v2381_v14 = vld [vmem:[#allocation2 + $0x350] sm:$0xf]  ;;  %4793 = vst [vmem:[%s7084_s1 + $0x154] sm:$0xf] %v2234_v11 }
 0x198   :  { %4794 = vst [vmem:[%s7084_s1 + $0x158] sm:$0xf] %v2241_v12  ;;  %4795 = vst [vmem:[%s7084_s1 + $0x15c] sm:$0xf] %v2248_v13  ;;  %v2388_v17 = vld [vmem:[#allocation2 + $0x358] sm:$0xf] }
 0x199   :  { %4812 = vst [vmem:[%s7084_s1 + $0x1a0] sm:$0xf] %v2367_v56  ;;  %4813 = vst [vmem:[%s7084_s1 + $0x1a4] sm:$0xf] %v2374_v57  ;;  %v2395_v58 = vld [vmem:[#allocation2 + $0x360] sm:$0xf] }
 0x19a   :  { %4814 = vst [vmem:[%s7084_s1 + $0x1a8] sm:$0xf] %v2381_v14  ;;  %v2402_v59 = vld [vmem:[#allocation2 + $0x368] sm:$0xf]  ;;  %4815 = vst [vmem:[%s7084_s1 + $0x1ac] sm:$0xf] %v2388_v17 }
 0x19b   :  { %1401 = vst.msk [vmem:[#allocation2 + $0x543] ss:$8 sm:$0xf] %vm13_vm0, %v1398_v15   ;;  %1403 = vst.msk [vmem:[#allocation2 + $0x543] ss:$8 sm:$0xf0] %vm13_vm0, %v1398_v15  }
 0x19c   :  { %1392 = vst.msk [vmem:[#allocation2 + $0x503] ss:$8 sm:$0xf] %vm13_vm0, %v1389_v16   ;;  %1394 = vst.msk [vmem:[#allocation2 + $0x503] ss:$8 sm:$0xf0] %vm13_vm0, %v1389_v16  }
 0x19d   :  { %v2409_v18 = vld [vmem:[#allocation2 + $0x370] sm:$0xf]  ;;  %v2416_v19 = vld [vmem:[#allocation2 + $0x378] sm:$0xf]  ;;  %v2311_v60 = vld [vmem:[#allocation2 + $0x300] sm:$0xf] }
 0x19e   :  { %4816 = vst [vmem:[%s7084_s1 + $0x1b0] sm:$0xf] %v2395_v58  ;;  %4817 = vst [vmem:[%s7084_s1 + $0x1b4] sm:$0xf] %v2402_v59  ;;  %v2318_v61 = vld [vmem:[#allocation2 + $0x308] sm:$0xf] }
 0x19f   :  { %4804 = vst [vmem:[%s7084_s1 + $0x180] sm:$0xf] %v2311_v60  ;;  %v2325_v20 = vld [vmem:[#allocation2 + $0x310] sm:$0xf]  ;;  %v2332_v21 = vld [vmem:[#allocation2 + $0x318] sm:$0xf]  ;;  %v1479_v60 = vpop.permute.xlu0 %1478  }
 0x1a0   :  { %4818 = vst [vmem:[%s7084_s1 + $0x1b8] sm:$0xf] %v2409_v18  ;;  %4819 = vst [vmem:[%s7084_s1 + $0x1bc] sm:$0xf] %v2416_v19  ;;  %v2339_v62 = vld [vmem:[#allocation2 + $0x320] sm:$0xf]  ;;  %v1488_v19 = vpop.permute.xlu1 %1487  }
 0x1a1   :  { %4805 = vst [vmem:[%s7084_s1 + $0x184] sm:$0xf] %v2318_v61  ;;  %4806 = vst [vmem:[%s7084_s1 + $0x188] sm:$0xf] %v2325_v20  ;;  %v2346_v63 = vld [vmem:[#allocation2 + $0x328] sm:$0xf] }
 0x1a2   :  { %4807 = vst [vmem:[%s7084_s1 + $0x18c] sm:$0xf] %v2332_v21  ;;  %v2353_v22 = vld [vmem:[#allocation2 + $0x330] sm:$0xf]  ;;  %v2360_v25 = vld [vmem:[#allocation2 + $0x338] sm:$0xf] }
 0x1a3   :  { %v2479_v48 = vld [vmem:[#allocation2 + $0x3c0] sm:$0xf]  ;;  %v2486_v49 = vld [vmem:[#allocation2 + $0x3c8] sm:$0xf]  ;;  %4808 = vst [vmem:[%s7084_s1 + $0x190] sm:$0xf] %v2339_v62 }
 0x1a4   :  { %4809 = vst [vmem:[%s7084_s1 + $0x194] sm:$0xf] %v2346_v63  ;;  %4810 = vst [vmem:[%s7084_s1 + $0x198] sm:$0xf] %v2353_v22  ;;  %v2493_v26 = vld [vmem:[#allocation2 + $0x3d0] sm:$0xf] }
 0x1a5   :  { %1419 = vst.msk [vmem:[#allocation2 + $0x5c3] ss:$8 sm:$0xf] %vm13_vm0, %v1416_v23   ;;  %1421 = vst.msk [vmem:[#allocation2 + $0x5c3] ss:$8 sm:$0xf0] %vm13_vm0, %v1416_v23  }
 0x1a6   :  { %1410 = vst.msk [vmem:[#allocation2 + $0x583] ss:$8 sm:$0xf] %vm13_vm0, %v1407_v24   ;;  %1412 = vst.msk [vmem:[#allocation2 + $0x583] ss:$8 sm:$0xf0] %vm13_vm0, %v1407_v24  }
 0x1a7   :  { %4828 = vst [vmem:[%s7084_s1 + $0x1e0] sm:$0xf] %v2479_v48  ;;  %4829 = vst [vmem:[%s7084_s1 + $0x1e4] sm:$0xf] %v2486_v49  ;;  %v2500_v27 = vld [vmem:[#allocation2 + $0x3d8] sm:$0xf] }
 0x1a8   :  { %v2507_v50 = vld [vmem:[#allocation2 + $0x3e0] sm:$0xf]  ;;  %4811 = vst [vmem:[%s7084_s1 + $0x19c] sm:$0xf] %v2360_v25  ;;  %4830 = vst [vmem:[%s7084_s1 + $0x1e8] sm:$0xf] %v2493_v26 }
 0x1a9   :  { %4831 = vst [vmem:[%s7084_s1 + $0x1ec] sm:$0xf] %v2500_v27  ;;  %4832 = vst [vmem:[%s7084_s1 + $0x1f0] sm:$0xf] %v2507_v50  ;;  %v2514_v51 = vld [vmem:[#allocation2 + $0x3e8] sm:$0xf]  ;;  %v1506_v27 = vpop.permute.xlu1 %1505   ;;  %v1497_v50 = vpop.permute.xlu0 %1496  }
 0x1aa   :  { %v2521_v28 = vld [vmem:[#allocation2 + $0x3f0] sm:$0xf]  ;;  %v2528_v29 = vld [vmem:[#allocation2 + $0x3f8] sm:$0xf]  ;;  %4833 = vst [vmem:[%s7084_s1 + $0x1f4] sm:$0xf] %v2514_v51 }
 0x1ab   :  { %4834 = vst [vmem:[%s7084_s1 + $0x1f8] sm:$0xf] %v2521_v28  ;;  %4835 = vst [vmem:[%s7084_s1 + $0x1fc] sm:$0xf] %v2528_v29  ;;  %v2423_v52 = vld [vmem:[#allocation2 + $0x380] sm:$0xf] }
 0x1ac   :  { %v2430_v53 = vld [vmem:[#allocation2 + $0x388] sm:$0xf]  ;;  %v2437_v30 = vld [vmem:[#allocation2 + $0x390] sm:$0xf]  ;;  %4820 = vst [vmem:[%s7084_s1 + $0x1c0] sm:$0xf] %v2423_v52 }
 0x1ad   :  { %4821 = vst [vmem:[%s7084_s1 + $0x1c4] sm:$0xf] %v2430_v53  ;;  %4822 = vst [vmem:[%s7084_s1 + $0x1c8] sm:$0xf] %v2437_v30  ;;  %v2444_v33 = vld [vmem:[#allocation2 + $0x398] sm:$0xf] }
 0x1ae   :  { %v2451_v54 = vld [vmem:[#allocation2 + $0x3a0] sm:$0xf]  ;;  %v2458_v55 = vld [vmem:[#allocation2 + $0x3a8] sm:$0xf]  ;;  %4823 = vst [vmem:[%s7084_s1 + $0x1cc] sm:$0xf] %v2444_v33 }
 0x1af   :  { %1437 = vst.msk [vmem:[#allocation2 + $0x643] ss:$8 sm:$0xf] %vm13_vm0, %v1434_v31   ;;  %1439 = vst.msk [vmem:[#allocation2 + $0x643] ss:$8 sm:$0xf0] %vm13_vm0, %v1434_v31  }
 0x1b0   :  { %1428 = vst.msk [vmem:[#allocation2 + $0x603] ss:$8 sm:$0xf] %vm13_vm0, %v1425_v32   ;;  %1430 = vst.msk [vmem:[#allocation2 + $0x603] ss:$8 sm:$0xf0] %vm13_vm0, %v1425_v32  }
 0x1b1   :  { %4824 = vst [vmem:[%s7084_s1 + $0x1d0] sm:$0xf] %v2451_v54  ;;  %4825 = vst [vmem:[%s7084_s1 + $0x1d4] sm:$0xf] %v2458_v55  ;;  %v2465_v34 = vld [vmem:[#allocation2 + $0x3b0] sm:$0xf] }
 0x1b2   :  { %v2472_v35 = vld [vmem:[#allocation2 + $0x3b8] sm:$0xf]  ;;  %v2591_v1 = vld [vmem:[#allocation2 + $0x440] sm:$0xf]  ;;  %4826 = vst [vmem:[%s7084_s1 + $0x1d8] sm:$0xf] %v2465_v34 }
 0x1b3   :  { %4827 = vst [vmem:[%s7084_s1 + $0x1dc] sm:$0xf] %v2472_v35  ;;  %4844 = vst [vmem:[%s7084_s1 + $0x220] sm:$0xf] %v2591_v1  ;;  %v2598_v3 = vld [vmem:[#allocation2 + $0x448] sm:$0xf]  ;;  %v1524_v35 = vpop.permute.xlu1 %1523   ;;  %v1515_v1 = vpop.permute.xlu0 %1514  }
 0x1b4   :  { %v2605_v36 = vld [vmem:[#allocation2 + $0x450] sm:$0xf]  ;;  %v2612_v37 = vld [vmem:[#allocation2 + $0x458] sm:$0xf]  ;;  %4845 = vst [vmem:[%s7084_s1 + $0x224] sm:$0xf] %v2598_v3 }
 0x1b5   :  { %4846 = vst [vmem:[%s7084_s1 + $0x228] sm:$0xf] %v2605_v36  ;;  %4847 = vst [vmem:[%s7084_s1 + $0x22c] sm:$0xf] %v2612_v37  ;;  %v2619_v0 = vld [vmem:[#allocation2 + $0x460] sm:$0xf] }
 0x1b6   :  { %v2626_v2 = vld [vmem:[#allocation2 + $0x468] sm:$0xf]  ;;  %v2633_v38 = vld [vmem:[#allocation2 + $0x470] sm:$0xf]  ;;  %4848 = vst [vmem:[%s7084_s1 + $0x230] sm:$0xf] %v2619_v0 }
 0x1b7   :  { %4849 = vst [vmem:[%s7084_s1 + $0x234] sm:$0xf] %v2626_v2  ;;  %4850 = vst [vmem:[%s7084_s1 + $0x238] sm:$0xf] %v2633_v38  ;;  %v2640_v41 = vld [vmem:[#allocation2 + $0x478] sm:$0xf] }
 0x1b8   :  { %v2535_v4 = vld [vmem:[#allocation2 + $0x400] sm:$0xf]  ;;  %v2542_v5 = vld [vmem:[#allocation2 + $0x408] sm:$0xf]  ;;  %4851 = vst [vmem:[%s7084_s1 + $0x23c] sm:$0xf] %v2640_v41 }
 0x1b9   :  { %1455 = vst.msk [vmem:[#allocation2 + $0x6c3] ss:$8 sm:$0xf] %vm13_vm0, %v1452_v39   ;;  %1457 = vst.msk [vmem:[#allocation2 + $0x6c3] ss:$8 sm:$0xf0] %vm13_vm0, %v1452_v39  }
 0x1ba   :  { %1446 = vst.msk [vmem:[#allocation2 + $0x683] ss:$8 sm:$0xf] %vm13_vm0, %v1443_v40   ;;  %1448 = vst.msk [vmem:[#allocation2 + $0x683] ss:$8 sm:$0xf0] %vm13_vm0, %v1443_v40  }
 0x1bb   :  { %4836 = vst [vmem:[%s7084_s1 + $0x200] sm:$0xf] %v2535_v4  ;;  %4837 = vst [vmem:[%s7084_s1 + $0x204] sm:$0xf] %v2542_v5  ;;  %v2549_v42 = vld [vmem:[#allocation2 + $0x410] sm:$0xf] }
 0x1bc   :  { %v2556_v43 = vld [vmem:[#allocation2 + $0x418] sm:$0xf]  ;;  %v2563_v6 = vld [vmem:[#allocation2 + $0x420] sm:$0xf]  ;;  %4838 = vst [vmem:[%s7084_s1 + $0x208] sm:$0xf] %v2549_v42 }
 0x1bd   :  { %4839 = vst [vmem:[%s7084_s1 + $0x20c] sm:$0xf] %v2556_v43  ;;  %4840 = vst [vmem:[%s7084_s1 + $0x210] sm:$0xf] %v2563_v6  ;;  %v2570_v7 = vld [vmem:[#allocation2 + $0x428] sm:$0xf]  ;;  %v1542_v43 = vpop.permute.xlu1 %1541   ;;  %v1533_v6 = vpop.permute.xlu0 %1532  }
 0x1be   :  { %v2577_v44 = vld [vmem:[#allocation2 + $0x430] sm:$0xf]  ;;  %v2584_v45 = vld [vmem:[#allocation2 + $0x438] sm:$0xf]  ;;  %4841 = vst [vmem:[%s7084_s1 + $0x214] sm:$0xf] %v2570_v7 }
 0x1bf   :  { %4842 = vst [vmem:[%s7084_s1 + $0x218] sm:$0xf] %v2577_v44  ;;  %4843 = vst [vmem:[%s7084_s1 + $0x21c] sm:$0xf] %v2584_v45  ;;  %v2703_v8 = vld [vmem:[#allocation2 + $0x4c0] sm:$0xf] }
 0x1c0   :  { %v2710_v9 = vld [vmem:[#allocation2 + $0x4c8] sm:$0xf]  ;;  %v2717_v46 = vld [vmem:[#allocation2 + $0x4d0] sm:$0xf]  ;;  %4860 = vst [vmem:[%s7084_s1 + $0x260] sm:$0xf] %v2703_v8 }
 0x1c1   :  { %4861 = vst [vmem:[%s7084_s1 + $0x264] sm:$0xf] %v2710_v9  ;;  %4862 = vst [vmem:[%s7084_s1 + $0x268] sm:$0xf] %v2717_v46  ;;  %v2724_v11 = vld [vmem:[#allocation2 + $0x4d8] sm:$0xf] }
 0x1c2   :  { %v2731_v12 = vld [vmem:[#allocation2 + $0x4e0] sm:$0xf]  ;;  %v2738_v13 = vld [vmem:[#allocation2 + $0x4e8] sm:$0xf]  ;;  %4863 = vst [vmem:[%s7084_s1 + $0x26c] sm:$0xf] %v2724_v11 }
 0x1c3   :  { %1473 = vst.msk [vmem:[#allocation2 + $0x743] ss:$8 sm:$0xf] %vm13_vm0, %v1470_v47   ;;  %1475 = vst.msk [vmem:[#allocation2 + $0x743] ss:$8 sm:$0xf0] %vm13_vm0, %v1470_v47  }
 0x1c4   :  { %1464 = vst.msk [vmem:[#allocation2 + $0x703] ss:$8 sm:$0xf] %vm13_vm0, %v1461_v10   ;;  %1466 = vst.msk [vmem:[#allocation2 + $0x703] ss:$8 sm:$0xf0] %vm13_vm0, %v1461_v10  }
 0x1c5   :  { %4864 = vst [vmem:[%s7084_s1 + $0x270] sm:$0xf] %v2731_v12  ;;  %4865 = vst [vmem:[%s7084_s1 + $0x274] sm:$0xf] %v2738_v13  ;;  %v2745_v56 = vld [vmem:[#allocation2 + $0x4f0] sm:$0xf] }
 0x1c6   :  { %v2752_v57 = vld [vmem:[#allocation2 + $0x4f8] sm:$0xf]  ;;  %v2647_v14 = vld [vmem:[#allocation2 + $0x480] sm:$0xf]  ;;  %4866 = vst [vmem:[%s7084_s1 + $0x278] sm:$0xf] %v2745_v56 }
 0x1c7   :  { %4867 = vst [vmem:[%s7084_s1 + $0x27c] sm:$0xf] %v2752_v57  ;;  %4852 = vst [vmem:[%s7084_s1 + $0x240] sm:$0xf] %v2647_v14  ;;  %v2654_v15 = vld [vmem:[#allocation2 + $0x488] sm:$0xf]  ;;  %v1560_v57 = vpop.permute.xlu1 %1559   ;;  %v1551_v14 = vpop.permute.xlu0 %1550  }
 0x1c8   :  { %v2661_v16 = vld [vmem:[#allocation2 + $0x490] sm:$0xf]  ;;  %v2668_v17 = vld [vmem:[#allocation2 + $0x498] sm:$0xf]  ;;  %4853 = vst [vmem:[%s7084_s1 + $0x244] sm:$0xf] %v2654_v15 }
 0x1c9   :  { %4854 = vst [vmem:[%s7084_s1 + $0x248] sm:$0xf] %v2661_v16  ;;  %4855 = vst [vmem:[%s7084_s1 + $0x24c] sm:$0xf] %v2668_v17  ;;  %v2675_v58 = vld [vmem:[#allocation2 + $0x4a0] sm:$0xf] }
 0x1ca   :  { %v2682_v59 = vld [vmem:[#allocation2 + $0x4a8] sm:$0xf]  ;;  %v2689_v18 = vld [vmem:[#allocation2 + $0x4b0] sm:$0xf]  ;;  %4856 = vst [vmem:[%s7084_s1 + $0x250] sm:$0xf] %v2675_v58 }
 0x1cb   :  { %4857 = vst [vmem:[%s7084_s1 + $0x254] sm:$0xf] %v2682_v59  ;;  %4858 = vst [vmem:[%s7084_s1 + $0x258] sm:$0xf] %v2689_v18  ;;  %v2696_v61 = vld [vmem:[#allocation2 + $0x4b8] sm:$0xf] }
 0x1cc   :  { %v2815_v20 = vld [vmem:[#allocation2 + $0x540] sm:$0xf]  ;;  %v2822_v21 = vld [vmem:[#allocation2 + $0x548] sm:$0xf]  ;;  %4859 = vst [vmem:[%s7084_s1 + $0x25c] sm:$0xf] %v2696_v61 }
 0x1cd   :  { %1491 = vst.msk [vmem:[#allocation2 + $0x7c3] ss:$8 sm:$0xf] %vm13_vm0, %v1488_v19   ;;  %1493 = vst.msk [vmem:[#allocation2 + $0x7c3] ss:$8 sm:$0xf0] %vm13_vm0, %v1488_v19  }
 0x1ce   :  { %1482 = vst.msk [vmem:[#allocation2 + $0x783] ss:$8 sm:$0xf] %vm13_vm0, %v1479_v60   ;;  %1484 = vst.msk [vmem:[#allocation2 + $0x783] ss:$8 sm:$0xf0] %vm13_vm0, %v1479_v60  }
 0x1cf   :  { %4876 = vst [vmem:[%s7084_s1 + $0x2a0] sm:$0xf] %v2815_v20  ;;  %4877 = vst [vmem:[%s7084_s1 + $0x2a4] sm:$0xf] %v2822_v21  ;;  %v2829_v62 = vld [vmem:[#allocation2 + $0x550] sm:$0xf] }
 0x1d0   :  { %v2836_v63 = vld [vmem:[#allocation2 + $0x558] sm:$0xf]  ;;  %v2843_v22 = vld [vmem:[#allocation2 + $0x560] sm:$0xf]  ;;  %4878 = vst [vmem:[%s7084_s1 + $0x2a8] sm:$0xf] %v2829_v62 }
 0x1d1   :  { %4879 = vst [vmem:[%s7084_s1 + $0x2ac] sm:$0xf] %v2836_v63  ;;  %4880 = vst [vmem:[%s7084_s1 + $0x2b0] sm:$0xf] %v2843_v22  ;;  %v2850_v23 = vld [vmem:[#allocation2 + $0x568] sm:$0xf]  ;;  %v1578_v63 = vpop.permute.xlu1 %1577   ;;  %v1569_v22 = vpop.permute.xlu0 %1568  }
 0x1d2   :  { %v2857_v24 = vld [vmem:[#allocation2 + $0x570] sm:$0xf]  ;;  %v2864_v25 = vld [vmem:[#allocation2 + $0x578] sm:$0xf]  ;;  %4881 = vst [vmem:[%s7084_s1 + $0x2b4] sm:$0xf] %v2850_v23 }
 0x1d3   :  { %4882 = vst [vmem:[%s7084_s1 + $0x2b8] sm:$0xf] %v2857_v24  ;;  %4883 = vst [vmem:[%s7084_s1 + $0x2bc] sm:$0xf] %v2864_v25  ;;  %v2759_v48 = vld [vmem:[#allocation2 + $0x500] sm:$0xf] }
 0x1d4   :  { %v2766_v49 = vld [vmem:[#allocation2 + $0x508] sm:$0xf]  ;;  %v2773_v26 = vld [vmem:[#allocation2 + $0x510] sm:$0xf]  ;;  %4868 = vst [vmem:[%s7084_s1 + $0x280] sm:$0xf] %v2759_v48 }
 0x1d5   :  { %4869 = vst [vmem:[%s7084_s1 + $0x284] sm:$0xf] %v2766_v49  ;;  %4870 = vst [vmem:[%s7084_s1 + $0x288] sm:$0xf] %v2773_v26  ;;  %v2780_v51 = vld [vmem:[#allocation2 + $0x518] sm:$0xf] }
 0x1d6   :  { %v2787_v28 = vld [vmem:[#allocation2 + $0x520] sm:$0xf]  ;;  %v2794_v29 = vld [vmem:[#allocation2 + $0x528] sm:$0xf]  ;;  %4871 = vst [vmem:[%s7084_s1 + $0x28c] sm:$0xf] %v2780_v51 }
 0x1d7   :  { %1509 = vst.msk [vmem:[#allocation2 + $0x843] ss:$8 sm:$0xf] %vm13_vm0, %v1506_v27   ;;  %1511 = vst.msk [vmem:[#allocation2 + $0x843] ss:$8 sm:$0xf0] %vm13_vm0, %v1506_v27  }
 0x1d8   :  { %1500 = vst.msk [vmem:[#allocation2 + $0x803] ss:$8 sm:$0xf] %vm13_vm0, %v1497_v50   ;;  %1502 = vst.msk [vmem:[#allocation2 + $0x803] ss:$8 sm:$0xf0] %vm13_vm0, %v1497_v50  }
 0x1d9   :  { %4872 = vst [vmem:[%s7084_s1 + $0x290] sm:$0xf] %v2787_v28  ;;  %4873 = vst [vmem:[%s7084_s1 + $0x294] sm:$0xf] %v2794_v29  ;;  %v2801_v52 = vld [vmem:[#allocation2 + $0x530] sm:$0xf] }
 0x1da   :  { %v2808_v53 = vld [vmem:[#allocation2 + $0x538] sm:$0xf]  ;;  %v2927_v30 = vld [vmem:[#allocation2 + $0x5c0] sm:$0xf]  ;;  %4874 = vst [vmem:[%s7084_s1 + $0x298] sm:$0xf] %v2801_v52 }
 0x1db   :  { %4875 = vst [vmem:[%s7084_s1 + $0x29c] sm:$0xf] %v2808_v53  ;;  %4892 = vst [vmem:[%s7084_s1 + $0x2e0] sm:$0xf] %v2927_v30  ;;  %v2934_v31 = vld [vmem:[#allocation2 + $0x5c8] sm:$0xf]  ;;  %v1596_v53 = vpop.permute.xlu1 %1595   ;;  %v1587_v30 = vpop.permute.xlu0 %1586  }
 0x1dc   :  { %v2941_v32 = vld [vmem:[#allocation2 + $0x5d0] sm:$0xf]  ;;  %v2948_v33 = vld [vmem:[#allocation2 + $0x5d8] sm:$0xf]  ;;  %4893 = vst [vmem:[%s7084_s1 + $0x2e4] sm:$0xf] %v2934_v31 }
 0x1dd   :  { %4894 = vst [vmem:[%s7084_s1 + $0x2e8] sm:$0xf] %v2941_v32  ;;  %4895 = vst [vmem:[%s7084_s1 + $0x2ec] sm:$0xf] %v2948_v33  ;;  %v2955_v54 = vld [vmem:[#allocation2 + $0x5e0] sm:$0xf] }
 0x1de   :  { %v2962_v55 = vld [vmem:[#allocation2 + $0x5e8] sm:$0xf]  ;;  %v2969_v34 = vld [vmem:[#allocation2 + $0x5f0] sm:$0xf]  ;;  %4896 = vst [vmem:[%s7084_s1 + $0x2f0] sm:$0xf] %v2955_v54 }
 0x1df   :  { %4897 = vst [vmem:[%s7084_s1 + $0x2f4] sm:$0xf] %v2962_v55  ;;  %4898 = vst [vmem:[%s7084_s1 + $0x2f8] sm:$0xf] %v2969_v34  ;;  %v2976_v3 = vld [vmem:[#allocation2 + $0x5f8] sm:$0xf] }
 0x1e0   :  { %v2871_v36 = vld [vmem:[#allocation2 + $0x580] sm:$0xf]  ;;  %v2878_v37 = vld [vmem:[#allocation2 + $0x588] sm:$0xf]  ;;  %4899 = vst [vmem:[%s7084_s1 + $0x2fc] sm:$0xf] %v2976_v3 }
 0x1e1   :  { %1527 = vst.msk [vmem:[#allocation2 + $0x8c3] ss:$8 sm:$0xf] %vm13_vm0, %v1524_v35   ;;  %1529 = vst.msk [vmem:[#allocation2 + $0x8c3] ss:$8 sm:$0xf0] %vm13_vm0, %v1524_v35  }
 0x1e2   :  { %1518 = vst.msk [vmem:[#allocation2 + $0x883] ss:$8 sm:$0xf] %vm13_vm0, %v1515_v1   ;;  %1520 = vst.msk [vmem:[#allocation2 + $0x883] ss:$8 sm:$0xf0] %vm13_vm0, %v1515_v1  }
 0x1e3   :  { %4884 = vst [vmem:[%s7084_s1 + $0x2c0] sm:$0xf] %v2871_v36  ;;  %4885 = vst [vmem:[%s7084_s1 + $0x2c4] sm:$0xf] %v2878_v37  ;;  %v2885_v0 = vld [vmem:[#allocation2 + $0x590] sm:$0xf] }
 0x1e4   :  { %v2892_v2 = vld [vmem:[#allocation2 + $0x598] sm:$0xf]  ;;  %v2899_v38 = vld [vmem:[#allocation2 + $0x5a0] sm:$0xf]  ;;  %4886 = vst [vmem:[%s7084_s1 + $0x2c8] sm:$0xf] %v2885_v0 }
 0x1e5   :  { %4887 = vst [vmem:[%s7084_s1 + $0x2cc] sm:$0xf] %v2892_v2  ;;  %4888 = vst [vmem:[%s7084_s1 + $0x2d0] sm:$0xf] %v2899_v38  ;;  %v2906_v39 = vld [vmem:[#allocation2 + $0x5a8] sm:$0xf]  ;;  %v1614_v2 = vpop.permute.xlu1 %1613   ;;  %v1605_v38 = vpop.permute.xlu0 %1604  }
 0x1e6   :  { %v2913_v40 = vld [vmem:[#allocation2 + $0x5b0] sm:$0xf]  ;;  %v2920_v41 = vld [vmem:[#allocation2 + $0x5b8] sm:$0xf]  ;;  %4889 = vst [vmem:[%s7084_s1 + $0x2d4] sm:$0xf] %v2906_v39 }
 0x1e7   :  { %4890 = vst [vmem:[%s7084_s1 + $0x2d8] sm:$0xf] %v2913_v40  ;;  %4891 = vst [vmem:[%s7084_s1 + $0x2dc] sm:$0xf] %v2920_v41  ;;  %v3039_v4 = vld [vmem:[#allocation2 + $0x640] sm:$0xf] }
 0x1e8   :  { %v3046_v5 = vld [vmem:[#allocation2 + $0x648] sm:$0xf]  ;;  %v3053_v42 = vld [vmem:[#allocation2 + $0x650] sm:$0xf]  ;;  %4908 = vst [vmem:[%s7084_s1 + $0x320] sm:$0xf] %v3039_v4 }
 0x1e9   :  { %4909 = vst [vmem:[%s7084_s1 + $0x324] sm:$0xf] %v3046_v5  ;;  %4910 = vst [vmem:[%s7084_s1 + $0x328] sm:$0xf] %v3053_v42  ;;  %v3060_v7 = vld [vmem:[#allocation2 + $0x658] sm:$0xf] }
 0x1ea   :  { %v3067_v44 = vld [vmem:[#allocation2 + $0x660] sm:$0xf]  ;;  %v3074_v45 = vld [vmem:[#allocation2 + $0x668] sm:$0xf]  ;;  %4911 = vst [vmem:[%s7084_s1 + $0x32c] sm:$0xf] %v3060_v7 }
 0x1eb   :  { %1545 = vst.msk [vmem:[#allocation2 + $0x943] ss:$8 sm:$0xf] %vm13_vm0, %v1542_v43   ;;  %1547 = vst.msk [vmem:[#allocation2 + $0x943] ss:$8 sm:$0xf0] %vm13_vm0, %v1542_v43  }
 0x1ec   :  { %1536 = vst.msk [vmem:[#allocation2 + $0x903] ss:$8 sm:$0xf] %vm13_vm0, %v1533_v6   ;;  %1538 = vst.msk [vmem:[#allocation2 + $0x903] ss:$8 sm:$0xf0] %vm13_vm0, %v1533_v6  }
 0x1ed   :  { %4912 = vst [vmem:[%s7084_s1 + $0x330] sm:$0xf] %v3067_v44  ;;  %4913 = vst [vmem:[%s7084_s1 + $0x334] sm:$0xf] %v3074_v45  ;;  %v3081_v8 = vld [vmem:[#allocation2 + $0x670] sm:$0xf] }
 0x1ee   :  { %v3088_v9 = vld [vmem:[#allocation2 + $0x678] sm:$0xf]  ;;  %v2983_v46 = vld [vmem:[#allocation2 + $0x600] sm:$0xf]  ;;  %4914 = vst [vmem:[%s7084_s1 + $0x338] sm:$0xf] %v3081_v8 }
 0x1ef   :  { %4915 = vst [vmem:[%s7084_s1 + $0x33c] sm:$0xf] %v3088_v9  ;;  %4900 = vst [vmem:[%s7084_s1 + $0x300] sm:$0xf] %v2983_v46  ;;  %v2990_v47 = vld [vmem:[#allocation2 + $0x608] sm:$0xf]  ;;  %v1632_v9 = vpop.permute.xlu1 %1631   ;;  %v1623_v46 = vpop.permute.xlu0 %1622  }
 0x1f0   :  { %v2997_v10 = vld [vmem:[#allocation2 + $0x610] sm:$0xf]  ;;  %v3004_v11 = vld [vmem:[#allocation2 + $0x618] sm:$0xf]  ;;  %4901 = vst [vmem:[%s7084_s1 + $0x304] sm:$0xf] %v2990_v47 }
 0x1f1   :  { %4902 = vst [vmem:[%s7084_s1 + $0x308] sm:$0xf] %v2997_v10  ;;  %4903 = vst [vmem:[%s7084_s1 + $0x30c] sm:$0xf] %v3004_v11  ;;  %v3011_v12 = vld [vmem:[#allocation2 + $0x620] sm:$0xf] }
 0x1f2   :  { %v3018_v13 = vld [vmem:[#allocation2 + $0x628] sm:$0xf]  ;;  %v3025_v56 = vld [vmem:[#allocation2 + $0x630] sm:$0xf]  ;;  %4904 = vst [vmem:[%s7084_s1 + $0x310] sm:$0xf] %v3011_v12 }
 0x1f3   :  { %4905 = vst [vmem:[%s7084_s1 + $0x314] sm:$0xf] %v3018_v13  ;;  %4906 = vst [vmem:[%s7084_s1 + $0x318] sm:$0xf] %v3025_v56  ;;  %v3032_v15 = vld [vmem:[#allocation2 + $0x638] sm:$0xf] }
 0x1f4   :  { %v3151_v16 = vld [vmem:[#allocation2 + $0x6c0] sm:$0xf]  ;;  %v3158_v17 = vld [vmem:[#allocation2 + $0x6c8] sm:$0xf]  ;;  %4907 = vst [vmem:[%s7084_s1 + $0x31c] sm:$0xf] %v3032_v15 }
 0x1f5   :  { %1563 = vst.msk [vmem:[#allocation2 + $0x9c3] ss:$8 sm:$0xf] %vm13_vm0, %v1560_v57   ;;  %1565 = vst.msk [vmem:[#allocation2 + $0x9c3] ss:$8 sm:$0xf0] %vm13_vm0, %v1560_v57  }
 0x1f6   :  { %1554 = vst.msk [vmem:[#allocation2 + $0x983] ss:$8 sm:$0xf] %vm13_vm0, %v1551_v14   ;;  %1556 = vst.msk [vmem:[#allocation2 + $0x983] ss:$8 sm:$0xf0] %vm13_vm0, %v1551_v14  }
 0x1f7   :  { %4924 = vst [vmem:[%s7084_s1 + $0x360] sm:$0xf] %v3151_v16  ;;  %4925 = vst [vmem:[%s7084_s1 + $0x364] sm:$0xf] %v3158_v17  ;;  %v3165_v58 = vld [vmem:[#allocation2 + $0x6d0] sm:$0xf] }
 0x1f8   :  { %v3172_v59 = vld [vmem:[#allocation2 + $0x6d8] sm:$0xf]  ;;  %v3179_v18 = vld [vmem:[#allocation2 + $0x6e0] sm:$0xf]  ;;  %4926 = vst [vmem:[%s7084_s1 + $0x368] sm:$0xf] %v3165_v58 }
 0x1f9   :  { %4927 = vst [vmem:[%s7084_s1 + $0x36c] sm:$0xf] %v3172_v59  ;;  %4928 = vst [vmem:[%s7084_s1 + $0x370] sm:$0xf] %v3179_v18  ;;  %v3186_v19 = vld [vmem:[#allocation2 + $0x6e8] sm:$0xf] }
 0x1fa   :  { %v3193_v60 = vld [vmem:[#allocation2 + $0x6f0] sm:$0xf]  ;;  %v3200_v61 = vld [vmem:[#allocation2 + $0x6f8] sm:$0xf]  ;;  %4929 = vst [vmem:[%s7084_s1 + $0x374] sm:$0xf] %v3186_v19 }
 0x1fb   :  { %4930 = vst [vmem:[%s7084_s1 + $0x378] sm:$0xf] %v3193_v60  ;;  %4931 = vst [vmem:[%s7084_s1 + $0x37c] sm:$0xf] %v3200_v61  ;;  %v3095_v20 = vld [vmem:[#allocation2 + $0x680] sm:$0xf] }
 0x1fc   :  { %v3102_v21 = vld [vmem:[#allocation2 + $0x688] sm:$0xf]  ;;  %v3109_v62 = vld [vmem:[#allocation2 + $0x690] sm:$0xf]  ;;  %4916 = vst [vmem:[%s7084_s1 + $0x340] sm:$0xf] %v3095_v20 }
 0x1fd   :  { %4917 = vst [vmem:[%s7084_s1 + $0x344] sm:$0xf] %v3102_v21  ;;  %4918 = vst [vmem:[%s7084_s1 + $0x348] sm:$0xf] %v3109_v62  ;;  %v3116_v23 = vld [vmem:[#allocation2 + $0x698] sm:$0xf] }
 0x1fe   :  { %v3123_v24 = vld [vmem:[#allocation2 + $0x6a0] sm:$0xf]  ;;  %v3130_v25 = vld [vmem:[#allocation2 + $0x6a8] sm:$0xf]  ;;  %4919 = vst [vmem:[%s7084_s1 + $0x34c] sm:$0xf] %v3116_v23 }
 0x1ff   :  { %1581 = vst.msk [vmem:[#allocation2 + $0xa43] ss:$8 sm:$0xf] %vm13_vm0, %v1578_v63   ;;  %1583 = vst.msk [vmem:[#allocation2 + $0xa43] ss:$8 sm:$0xf0] %vm13_vm0, %v1578_v63  }
 0x200   :  { %1572 = vst.msk [vmem:[#allocation2 + $0xa03] ss:$8 sm:$0xf] %vm13_vm0, %v1569_v22   ;;  %1574 = vst.msk [vmem:[#allocation2 + $0xa03] ss:$8 sm:$0xf0] %vm13_vm0, %v1569_v22  }
 0x201   :  { %4920 = vst [vmem:[%s7084_s1 + $0x350] sm:$0xf] %v3123_v24  ;;  %4921 = vst [vmem:[%s7084_s1 + $0x354] sm:$0xf] %v3130_v25  ;;  %v3137_v48 = vld [vmem:[#allocation2 + $0x6b0] sm:$0xf] }
 0x202   :  { %v3144_v49 = vld [vmem:[#allocation2 + $0x6b8] sm:$0xf]  ;;  %v3263_v26 = vld [vmem:[#allocation2 + $0x740] sm:$0xf]  ;;  %4922 = vst [vmem:[%s7084_s1 + $0x358] sm:$0xf] %v3137_v48 }
 0x203   :  { %4923 = vst [vmem:[%s7084_s1 + $0x35c] sm:$0xf] %v3144_v49  ;;  %4940 = vst [vmem:[%s7084_s1 + $0x3a0] sm:$0xf] %v3263_v26  ;;  %v3270_v27 = vld [vmem:[#allocation2 + $0x748] sm:$0xf] }
 0x204   :  { %v3277_v50 = vld [vmem:[#allocation2 + $0x750] sm:$0xf]  ;;  %v3284_v51 = vld [vmem:[#allocation2 + $0x758] sm:$0xf]  ;;  %4941 = vst [vmem:[%s7084_s1 + $0x3a4] sm:$0xf] %v3270_v27 }
 0x205   :  { %4942 = vst [vmem:[%s7084_s1 + $0x3a8] sm:$0xf] %v3277_v50  ;;  %4943 = vst [vmem:[%s7084_s1 + $0x3ac] sm:$0xf] %v3284_v51  ;;  %v3291_v28 = vld [vmem:[#allocation2 + $0x760] sm:$0xf] }
 0x206   :  { %v3298_v29 = vld [vmem:[#allocation2 + $0x768] sm:$0xf]  ;;  %v3305_v52 = vld [vmem:[#allocation2 + $0x770] sm:$0xf]  ;;  %4944 = vst [vmem:[%s7084_s1 + $0x3b0] sm:$0xf] %v3291_v28 }
 0x207   :  { %4945 = vst [vmem:[%s7084_s1 + $0x3b4] sm:$0xf] %v3298_v29  ;;  %4946 = vst [vmem:[%s7084_s1 + $0x3b8] sm:$0xf] %v3305_v52  ;;  %v3312_v31 = vld [vmem:[#allocation2 + $0x778] sm:$0xf] }
 0x208   :  { %v3207_v32 = vld [vmem:[#allocation2 + $0x700] sm:$0xf]  ;;  %v3214_v33 = vld [vmem:[#allocation2 + $0x708] sm:$0xf]  ;;  %4947 = vst [vmem:[%s7084_s1 + $0x3bc] sm:$0xf] %v3312_v31 }
 0x209   :  { %1599 = vst.msk [vmem:[#allocation2 + $0xac3] ss:$8 sm:$0xf] %vm13_vm0, %v1596_v53   ;;  %1601 = vst.msk [vmem:[#allocation2 + $0xac3] ss:$8 sm:$0xf0] %vm13_vm0, %v1596_v53  }
 0x20a   :  { %1590 = vst.msk [vmem:[#allocation2 + $0xa83] ss:$8 sm:$0xf] %vm13_vm0, %v1587_v30   ;;  %1592 = vst.msk [vmem:[#allocation2 + $0xa83] ss:$8 sm:$0xf0] %vm13_vm0, %v1587_v30  }
 0x20b   :  { %4932 = vst [vmem:[%s7084_s1 + $0x380] sm:$0xf] %v3207_v32  ;;  %4933 = vst [vmem:[%s7084_s1 + $0x384] sm:$0xf] %v3214_v33  ;;  %v3221_v54 = vld [vmem:[#allocation2 + $0x710] sm:$0xf] }
 0x20c   :  { %v3228_v55 = vld [vmem:[#allocation2 + $0x718] sm:$0xf]  ;;  %v3235_v34 = vld [vmem:[#allocation2 + $0x720] sm:$0xf]  ;;  %4934 = vst [vmem:[%s7084_s1 + $0x388] sm:$0xf] %v3221_v54 }
 0x20d   :  { %4935 = vst [vmem:[%s7084_s1 + $0x38c] sm:$0xf] %v3228_v55  ;;  %4936 = vst [vmem:[%s7084_s1 + $0x390] sm:$0xf] %v3235_v34  ;;  %v3242_v35 = vld [vmem:[#allocation2 + $0x728] sm:$0xf] }
 0x20e   :  { %v3249_v1 = vld [vmem:[#allocation2 + $0x730] sm:$0xf]  ;;  %v3256_v3 = vld [vmem:[#allocation2 + $0x738] sm:$0xf]  ;;  %4937 = vst [vmem:[%s7084_s1 + $0x394] sm:$0xf] %v3242_v35 }
 0x20f   :  { %4938 = vst [vmem:[%s7084_s1 + $0x398] sm:$0xf] %v3249_v1  ;;  %4939 = vst [vmem:[%s7084_s1 + $0x39c] sm:$0xf] %v3256_v3  ;;  %v3375_v36 = vld [vmem:[#allocation2 + $0x7c0] sm:$0xf] }
 0x210   :  { %v3382_v37 = vld [vmem:[#allocation2 + $0x7c8] sm:$0xf]  ;;  %v3389_v0 = vld [vmem:[#allocation2 + $0x7d0] sm:$0xf]  ;;  %4956 = vst [vmem:[%s7084_s1 + $0x3e0] sm:$0xf] %v3375_v36 }
 0x211   :  { %4957 = vst [vmem:[%s7084_s1 + $0x3e4] sm:$0xf] %v3382_v37  ;;  %4958 = vst [vmem:[%s7084_s1 + $0x3e8] sm:$0xf] %v3389_v0  ;;  %v3396_v39 = vld [vmem:[#allocation2 + $0x7d8] sm:$0xf] }
 0x212   :  { %v3403_v40 = vld [vmem:[#allocation2 + $0x7e0] sm:$0xf]  ;;  %v3410_v41 = vld [vmem:[#allocation2 + $0x7e8] sm:$0xf]  ;;  %4959 = vst [vmem:[%s7084_s1 + $0x3ec] sm:$0xf] %v3396_v39 }
 0x213   :  { %1617 = vst.msk [vmem:[#allocation2 + $0xb43] ss:$8 sm:$0xf] %vm13_vm0, %v1614_v2   ;;  %1619 = vst.msk [vmem:[#allocation2 + $0xb43] ss:$8 sm:$0xf0] %vm13_vm0, %v1614_v2  }
 0x214   :  { %1608 = vst.msk [vmem:[#allocation2 + $0xb03] ss:$8 sm:$0xf] %vm13_vm0, %v1605_v38   ;;  %1610 = vst.msk [vmem:[#allocation2 + $0xb03] ss:$8 sm:$0xf0] %vm13_vm0, %v1605_v38  }
 0x215   :  { %4960 = vst [vmem:[%s7084_s1 + $0x3f0] sm:$0xf] %v3403_v40  ;;  %4961 = vst [vmem:[%s7084_s1 + $0x3f4] sm:$0xf] %v3410_v41  ;;  %v3417_v4 = vld [vmem:[#allocation2 + $0x7f0] sm:$0xf] }
 0x216   :  { %v3424_v5 = vld [vmem:[#allocation2 + $0x7f8] sm:$0xf]  ;;  %v3319_v42 = vld [vmem:[#allocation2 + $0x780] sm:$0xf]  ;;  %4962 = vst [vmem:[%s7084_s1 + $0x3f8] sm:$0xf] %v3417_v4 }
 0x217   :  { %4963 = vst [vmem:[%s7084_s1 + $0x3fc] sm:$0xf] %v3424_v5  ;;  %4948 = vst [vmem:[%s7084_s1 + $0x3c0] sm:$0xf] %v3319_v42  ;;  %v3326_v43 = vld [vmem:[#allocation2 + $0x788] sm:$0xf] }
 0x218   :  { %v3333_v6 = vld [vmem:[#allocation2 + $0x790] sm:$0xf]  ;;  %v3340_v7 = vld [vmem:[#allocation2 + $0x798] sm:$0xf]  ;;  %4949 = vst [vmem:[%s7084_s1 + $0x3c4] sm:$0xf] %v3326_v43 }
 0x219   :  { %4950 = vst [vmem:[%s7084_s1 + $0x3c8] sm:$0xf] %v3333_v6  ;;  %4951 = vst [vmem:[%s7084_s1 + $0x3cc] sm:$0xf] %v3340_v7  ;;  %v3347_v44 = vld [vmem:[#allocation2 + $0x7a0] sm:$0xf] }
 0x21a   :  { %v3354_v45 = vld [vmem:[#allocation2 + $0x7a8] sm:$0xf]  ;;  %v3361_v8 = vld [vmem:[#allocation2 + $0x7b0] sm:$0xf]  ;;  %4952 = vst [vmem:[%s7084_s1 + $0x3d0] sm:$0xf] %v3347_v44 }
 0x21b   :  { %4953 = vst [vmem:[%s7084_s1 + $0x3d4] sm:$0xf] %v3354_v45  ;;  %4954 = vst [vmem:[%s7084_s1 + $0x3d8] sm:$0xf] %v3361_v8  ;;  %v3368_v47 = vld [vmem:[#allocation2 + $0x7b8] sm:$0xf] }
 0x21c   :  { %v3487_v10 = vld [vmem:[#allocation2 + $0x840] sm:$0xf]  ;;  %v3494_v11 = vld [vmem:[#allocation2 + $0x848] sm:$0xf]  ;;  %4955 = vst [vmem:[%s7084_s1 + $0x3dc] sm:$0xf] %v3368_v47 }
 0x21d   :  { %1635 = vst.msk [vmem:[#allocation2 + $0xbc3] ss:$8 sm:$0xf] %vm13_vm0, %v1632_v9   ;;  %1637 = vst.msk [vmem:[#allocation2 + $0xbc3] ss:$8 sm:$0xf0] %vm13_vm0, %v1632_v9  }
 0x21e   :  { %1626 = vst.msk [vmem:[#allocation2 + $0xb83] ss:$8 sm:$0xf] %vm13_vm0, %v1623_v46   ;;  %1628 = vst.msk [vmem:[#allocation2 + $0xb83] ss:$8 sm:$0xf0] %vm13_vm0, %v1623_v46  }
 0x21f   :  { %4972 = vst [vmem:[%s7084_s1 + $0x420] sm:$0xf] %v3487_v10  ;;  %4973 = vst [vmem:[%s7084_s1 + $0x424] sm:$0xf] %v3494_v11  ;;  %v3501_v12 = vld [vmem:[#allocation2 + $0x850] sm:$0xf] }
 0x220   :  { %v3508_v13 = vld [vmem:[#allocation2 + $0x858] sm:$0xf]  ;;  %v3515_v56 = vld [vmem:[#allocation2 + $0x860] sm:$0xf]  ;;  %4974 = vst [vmem:[%s7084_s1 + $0x428] sm:$0xf] %v3501_v12 }
 0x221   :  { %4975 = vst [vmem:[%s7084_s1 + $0x42c] sm:$0xf] %v3508_v13  ;;  %4976 = vst [vmem:[%s7084_s1 + $0x430] sm:$0xf] %v3515_v56  ;;  %v3522_v57 = vld [vmem:[#allocation2 + $0x868] sm:$0xf] }
 0x222   :  { %v3529_v14 = vld [vmem:[#allocation2 + $0x870] sm:$0xf]  ;;  %v3536_v15 = vld [vmem:[#allocation2 + $0x878] sm:$0xf]  ;;  %4977 = vst [vmem:[%s7084_s1 + $0x434] sm:$0xf] %v3522_v57 }
 0x223   :  { %4978 = vst [vmem:[%s7084_s1 + $0x438] sm:$0xf] %v3529_v14  ;;  %4979 = vst [vmem:[%s7084_s1 + $0x43c] sm:$0xf] %v3536_v15  ;;  %v3431_v16 = vld [vmem:[#allocation2 + $0x800] sm:$0xf] }
 0x224   :  { %v3438_v17 = vld [vmem:[#allocation2 + $0x808] sm:$0xf]  ;;  %v3445_v58 = vld [vmem:[#allocation2 + $0x810] sm:$0xf]  ;;  %4964 = vst [vmem:[%s7084_s1 + $0x400] sm:$0xf] %v3431_v16 }
 0x225   :  { %4965 = vst [vmem:[%s7084_s1 + $0x404] sm:$0xf] %v3438_v17  ;;  %4966 = vst [vmem:[%s7084_s1 + $0x408] sm:$0xf] %v3445_v58  ;;  %v3452_v59 = vld [vmem:[#allocation2 + $0x818] sm:$0xf] }
 0x226   :  { %v3459_v18 = vld [vmem:[#allocation2 + $0x820] sm:$0xf]  ;;  %v3466_v19 = vld [vmem:[#allocation2 + $0x828] sm:$0xf]  ;;  %4967 = vst [vmem:[%s7084_s1 + $0x40c] sm:$0xf] %v3452_v59 }
 0x227   :  { %4968 = vst [vmem:[%s7084_s1 + $0x410] sm:$0xf] %v3459_v18  ;;  %4969 = vst [vmem:[%s7084_s1 + $0x414] sm:$0xf] %v3466_v19  ;;  %v3473_v60 = vld [vmem:[#allocation2 + $0x830] sm:$0xf] }
 0x228   :  { %v3480_v61 = vld [vmem:[#allocation2 + $0x838] sm:$0xf]  ;;  %v3599_v20 = vld [vmem:[#allocation2 + $0x8c0] sm:$0xf]  ;;  %4970 = vst [vmem:[%s7084_s1 + $0x418] sm:$0xf] %v3473_v60 }
 0x229   :  { %4971 = vst [vmem:[%s7084_s1 + $0x41c] sm:$0xf] %v3480_v61  ;;  %4988 = vst [vmem:[%s7084_s1 + $0x460] sm:$0xf] %v3599_v20  ;;  %v3606_v21 = vld [vmem:[#allocation2 + $0x8c8] sm:$0xf] }
 0x22a   :  { %v3613_v62 = vld [vmem:[#allocation2 + $0x8d0] sm:$0xf]  ;;  %v3620_v63 = vld [vmem:[#allocation2 + $0x8d8] sm:$0xf]  ;;  %4989 = vst [vmem:[%s7084_s1 + $0x464] sm:$0xf] %v3606_v21 }
 0x22b   :  { %4990 = vst [vmem:[%s7084_s1 + $0x468] sm:$0xf] %v3613_v62  ;;  %4991 = vst [vmem:[%s7084_s1 + $0x46c] sm:$0xf] %v3620_v63  ;;  %v3627_v22 = vld [vmem:[#allocation2 + $0x8e0] sm:$0xf] }
 0x22c   :  { %v3634_v23 = vld [vmem:[#allocation2 + $0x8e8] sm:$0xf]  ;;  %v3641_v24 = vld [vmem:[#allocation2 + $0x8f0] sm:$0xf]  ;;  %4992 = vst [vmem:[%s7084_s1 + $0x470] sm:$0xf] %v3627_v22 }
 0x22d   :  { %4993 = vst [vmem:[%s7084_s1 + $0x474] sm:$0xf] %v3634_v23  ;;  %4994 = vst [vmem:[%s7084_s1 + $0x478] sm:$0xf] %v3641_v24  ;;  %v3648_v25 = vld [vmem:[#allocation2 + $0x8f8] sm:$0xf] }
 0x22e   :  { %v3543_v48 = vld [vmem:[#allocation2 + $0x880] sm:$0xf]  ;;  %v3550_v49 = vld [vmem:[#allocation2 + $0x888] sm:$0xf]  ;;  %4995 = vst [vmem:[%s7084_s1 + $0x47c] sm:$0xf] %v3648_v25 }
 0x22f   :  { %4980 = vst [vmem:[%s7084_s1 + $0x440] sm:$0xf] %v3543_v48  ;;  %4981 = vst [vmem:[%s7084_s1 + $0x444] sm:$0xf] %v3550_v49  ;;  %v3557_v26 = vld [vmem:[#allocation2 + $0x890] sm:$0xf] }
 0x230   :  { %v3564_v27 = vld [vmem:[#allocation2 + $0x898] sm:$0xf]  ;;  %v3571_v50 = vld [vmem:[#allocation2 + $0x8a0] sm:$0xf]  ;;  %4982 = vst [vmem:[%s7084_s1 + $0x448] sm:$0xf] %v3557_v26 }
 0x231   :  { %4983 = vst [vmem:[%s7084_s1 + $0x44c] sm:$0xf] %v3564_v27  ;;  %4984 = vst [vmem:[%s7084_s1 + $0x450] sm:$0xf] %v3571_v50  ;;  %v3578_v51 = vld [vmem:[#allocation2 + $0x8a8] sm:$0xf] }
 0x232   :  { %v3585_v28 = vld [vmem:[#allocation2 + $0x8b0] sm:$0xf]  ;;  %v3592_v29 = vld [vmem:[#allocation2 + $0x8b8] sm:$0xf]  ;;  %4985 = vst [vmem:[%s7084_s1 + $0x454] sm:$0xf] %v3578_v51 }
 0x233   :  { %4986 = vst [vmem:[%s7084_s1 + $0x458] sm:$0xf] %v3585_v28  ;;  %4987 = vst [vmem:[%s7084_s1 + $0x45c] sm:$0xf] %v3592_v29  ;;  %v3711_v52 = vld [vmem:[#allocation2 + $0x940] sm:$0xf] }
 0x234   :  { %v3718_v53 = vld [vmem:[#allocation2 + $0x948] sm:$0xf]  ;;  %v3725_v30 = vld [vmem:[#allocation2 + $0x950] sm:$0xf]  ;;  %5004 = vst [vmem:[%s7084_s1 + $0x4a0] sm:$0xf] %v3711_v52 }
 0x235   :  { %5005 = vst [vmem:[%s7084_s1 + $0x4a4] sm:$0xf] %v3718_v53  ;;  %5006 = vst [vmem:[%s7084_s1 + $0x4a8] sm:$0xf] %v3725_v30  ;;  %v3732_v31 = vld [vmem:[#allocation2 + $0x958] sm:$0xf] }
 0x236   :  { %v3739_v32 = vld [vmem:[#allocation2 + $0x960] sm:$0xf]  ;;  %v3746_v33 = vld [vmem:[#allocation2 + $0x968] sm:$0xf]  ;;  %5007 = vst [vmem:[%s7084_s1 + $0x4ac] sm:$0xf] %v3732_v31 }
 0x237   :  { %5008 = vst [vmem:[%s7084_s1 + $0x4b0] sm:$0xf] %v3739_v32  ;;  %5009 = vst [vmem:[%s7084_s1 + $0x4b4] sm:$0xf] %v3746_v33  ;;  %v3753_v54 = vld [vmem:[#allocation2 + $0x970] sm:$0xf] }
 0x238   :  { %v3760_v55 = vld [vmem:[#allocation2 + $0x978] sm:$0xf]  ;;  %v3655_v34 = vld [vmem:[#allocation2 + $0x900] sm:$0xf]  ;;  %5010 = vst [vmem:[%s7084_s1 + $0x4b8] sm:$0xf] %v3753_v54 }
 0x239   :  { %5011 = vst [vmem:[%s7084_s1 + $0x4bc] sm:$0xf] %v3760_v55  ;;  %4996 = vst [vmem:[%s7084_s1 + $0x480] sm:$0xf] %v3655_v34  ;;  %v3662_v35 = vld [vmem:[#allocation2 + $0x908] sm:$0xf] }
 0x23a   :  { %v3669_v1 = vld [vmem:[#allocation2 + $0x910] sm:$0xf]  ;;  %v3676_v3 = vld [vmem:[#allocation2 + $0x918] sm:$0xf]  ;;  %4997 = vst [vmem:[%s7084_s1 + $0x484] sm:$0xf] %v3662_v35 }
 0x23b   :  { %4998 = vst [vmem:[%s7084_s1 + $0x488] sm:$0xf] %v3669_v1  ;;  %4999 = vst [vmem:[%s7084_s1 + $0x48c] sm:$0xf] %v3676_v3  ;;  %v3683_v36 = vld [vmem:[#allocation2 + $0x920] sm:$0xf] }
 0x23c   :  { %v3690_v37 = vld [vmem:[#allocation2 + $0x928] sm:$0xf]  ;;  %v3697_v0 = vld [vmem:[#allocation2 + $0x930] sm:$0xf]  ;;  %5000 = vst [vmem:[%s7084_s1 + $0x490] sm:$0xf] %v3683_v36 }
 0x23d   :  { %5001 = vst [vmem:[%s7084_s1 + $0x494] sm:$0xf] %v3690_v37  ;;  %5002 = vst [vmem:[%s7084_s1 + $0x498] sm:$0xf] %v3697_v0  ;;  %v3704_v2 = vld [vmem:[#allocation2 + $0x938] sm:$0xf] }
 0x23e   :  { %v3823_v38 = vld [vmem:[#allocation2 + $0x9c0] sm:$0xf]  ;;  %v3830_v39 = vld [vmem:[#allocation2 + $0x9c8] sm:$0xf]  ;;  %5003 = vst [vmem:[%s7084_s1 + $0x49c] sm:$0xf] %v3704_v2 }
 0x23f   :  { %5020 = vst [vmem:[%s7084_s1 + $0x4e0] sm:$0xf] %v3823_v38  ;;  %5021 = vst [vmem:[%s7084_s1 + $0x4e4] sm:$0xf] %v3830_v39  ;;  %v3837_v40 = vld [vmem:[#allocation2 + $0x9d0] sm:$0xf] }
 0x240   :  { %v3844_v41 = vld [vmem:[#allocation2 + $0x9d8] sm:$0xf]  ;;  %v3851_v4 = vld [vmem:[#allocation2 + $0x9e0] sm:$0xf]  ;;  %5022 = vst [vmem:[%s7084_s1 + $0x4e8] sm:$0xf] %v3837_v40 }
 0x241   :  { %5023 = vst [vmem:[%s7084_s1 + $0x4ec] sm:$0xf] %v3844_v41  ;;  %5024 = vst [vmem:[%s7084_s1 + $0x4f0] sm:$0xf] %v3851_v4  ;;  %v3858_v5 = vld [vmem:[#allocation2 + $0x9e8] sm:$0xf] }
 0x242   :  { %v3865_v42 = vld [vmem:[#allocation2 + $0x9f0] sm:$0xf]  ;;  %v3872_v43 = vld [vmem:[#allocation2 + $0x9f8] sm:$0xf]  ;;  %5025 = vst [vmem:[%s7084_s1 + $0x4f4] sm:$0xf] %v3858_v5 }
 0x243   :  { %5026 = vst [vmem:[%s7084_s1 + $0x4f8] sm:$0xf] %v3865_v42  ;;  %5027 = vst [vmem:[%s7084_s1 + $0x4fc] sm:$0xf] %v3872_v43  ;;  %v3767_v6 = vld [vmem:[#allocation2 + $0x980] sm:$0xf] }
 0x244   :  { %v3774_v7 = vld [vmem:[#allocation2 + $0x988] sm:$0xf]  ;;  %v3781_v44 = vld [vmem:[#allocation2 + $0x990] sm:$0xf]  ;;  %5012 = vst [vmem:[%s7084_s1 + $0x4c0] sm:$0xf] %v3767_v6 }
 0x245   :  { %5013 = vst [vmem:[%s7084_s1 + $0x4c4] sm:$0xf] %v3774_v7  ;;  %5014 = vst [vmem:[%s7084_s1 + $0x4c8] sm:$0xf] %v3781_v44  ;;  %v3788_v45 = vld [vmem:[#allocation2 + $0x998] sm:$0xf] }
 0x246   :  { %v3795_v8 = vld [vmem:[#allocation2 + $0x9a0] sm:$0xf]  ;;  %v3802_v9 = vld [vmem:[#allocation2 + $0x9a8] sm:$0xf]  ;;  %5015 = vst [vmem:[%s7084_s1 + $0x4cc] sm:$0xf] %v3788_v45 }
 0x247   :  { %5016 = vst [vmem:[%s7084_s1 + $0x4d0] sm:$0xf] %v3795_v8  ;;  %5017 = vst [vmem:[%s7084_s1 + $0x4d4] sm:$0xf] %v3802_v9  ;;  %v3809_v46 = vld [vmem:[#allocation2 + $0x9b0] sm:$0xf] }
 0x248   :  { %v3816_v47 = vld [vmem:[#allocation2 + $0x9b8] sm:$0xf]  ;;  %v3935_v10 = vld [vmem:[#allocation2 + $0xa40] sm:$0xf]  ;;  %5018 = vst [vmem:[%s7084_s1 + $0x4d8] sm:$0xf] %v3809_v46 }
 0x249   :  { %5019 = vst [vmem:[%s7084_s1 + $0x4dc] sm:$0xf] %v3816_v47  ;;  %5036 = vst [vmem:[%s7084_s1 + $0x520] sm:$0xf] %v3935_v10  ;;  %v3942_v11 = vld [vmem:[#allocation2 + $0xa48] sm:$0xf] }
 0x24a   :  { %v3949_v12 = vld [vmem:[#allocation2 + $0xa50] sm:$0xf]  ;;  %v3956_v13 = vld [vmem:[#allocation2 + $0xa58] sm:$0xf]  ;;  %5037 = vst [vmem:[%s7084_s1 + $0x524] sm:$0xf] %v3942_v11 }
 0x24b   :  { %5038 = vst [vmem:[%s7084_s1 + $0x528] sm:$0xf] %v3949_v12  ;;  %5039 = vst [vmem:[%s7084_s1 + $0x52c] sm:$0xf] %v3956_v13  ;;  %v3963_v56 = vld [vmem:[#allocation2 + $0xa60] sm:$0xf] }
 0x24c   :  { %v3970_v57 = vld [vmem:[#allocation2 + $0xa68] sm:$0xf]  ;;  %v3977_v14 = vld [vmem:[#allocation2 + $0xa70] sm:$0xf]  ;;  %5040 = vst [vmem:[%s7084_s1 + $0x530] sm:$0xf] %v3963_v56 }
 0x24d   :  { %5041 = vst [vmem:[%s7084_s1 + $0x534] sm:$0xf] %v3970_v57  ;;  %5042 = vst [vmem:[%s7084_s1 + $0x538] sm:$0xf] %v3977_v14  ;;  %v3984_v15 = vld [vmem:[#allocation2 + $0xa78] sm:$0xf] }
 0x24e   :  { %v3879_v16 = vld [vmem:[#allocation2 + $0xa00] sm:$0xf]  ;;  %v3886_v17 = vld [vmem:[#allocation2 + $0xa08] sm:$0xf]  ;;  %5043 = vst [vmem:[%s7084_s1 + $0x53c] sm:$0xf] %v3984_v15 }
 0x24f   :  { %5028 = vst [vmem:[%s7084_s1 + $0x500] sm:$0xf] %v3879_v16  ;;  %5029 = vst [vmem:[%s7084_s1 + $0x504] sm:$0xf] %v3886_v17  ;;  %v3893_v58 = vld [vmem:[#allocation2 + $0xa10] sm:$0xf] }
 0x250   :  { %v3900_v59 = vld [vmem:[#allocation2 + $0xa18] sm:$0xf]  ;;  %v3907_v18 = vld [vmem:[#allocation2 + $0xa20] sm:$0xf]  ;;  %5030 = vst [vmem:[%s7084_s1 + $0x508] sm:$0xf] %v3893_v58 }
 0x251   :  { %5031 = vst [vmem:[%s7084_s1 + $0x50c] sm:$0xf] %v3900_v59  ;;  %5032 = vst [vmem:[%s7084_s1 + $0x510] sm:$0xf] %v3907_v18  ;;  %v3914_v19 = vld [vmem:[#allocation2 + $0xa28] sm:$0xf] }
 0x252   :  { %v3921_v60 = vld [vmem:[#allocation2 + $0xa30] sm:$0xf]  ;;  %v3928_v61 = vld [vmem:[#allocation2 + $0xa38] sm:$0xf]  ;;  %5033 = vst [vmem:[%s7084_s1 + $0x514] sm:$0xf] %v3914_v19 }
 0x253   :  { %5034 = vst [vmem:[%s7084_s1 + $0x518] sm:$0xf] %v3921_v60  ;;  %5035 = vst [vmem:[%s7084_s1 + $0x51c] sm:$0xf] %v3928_v61  ;;  %v4047_v20 = vld [vmem:[#allocation2 + $0xac0] sm:$0xf] }
 0x254   :  { %v4054_v21 = vld [vmem:[#allocation2 + $0xac8] sm:$0xf]  ;;  %v4061_v62 = vld [vmem:[#allocation2 + $0xad0] sm:$0xf]  ;;  %5052 = vst [vmem:[%s7084_s1 + $0x560] sm:$0xf] %v4047_v20 }
 0x255   :  { %5053 = vst [vmem:[%s7084_s1 + $0x564] sm:$0xf] %v4054_v21  ;;  %5054 = vst [vmem:[%s7084_s1 + $0x568] sm:$0xf] %v4061_v62  ;;  %v4068_v63 = vld [vmem:[#allocation2 + $0xad8] sm:$0xf] }
 0x256   :  { %v4075_v22 = vld [vmem:[#allocation2 + $0xae0] sm:$0xf]  ;;  %v4082_v23 = vld [vmem:[#allocation2 + $0xae8] sm:$0xf]  ;;  %5055 = vst [vmem:[%s7084_s1 + $0x56c] sm:$0xf] %v4068_v63 }
 0x257   :  { %5056 = vst [vmem:[%s7084_s1 + $0x570] sm:$0xf] %v4075_v22  ;;  %5057 = vst [vmem:[%s7084_s1 + $0x574] sm:$0xf] %v4082_v23  ;;  %v4089_v24 = vld [vmem:[#allocation2 + $0xaf0] sm:$0xf] }
 0x258   :  { %v4096_v25 = vld [vmem:[#allocation2 + $0xaf8] sm:$0xf]  ;;  %v3991_v48 = vld [vmem:[#allocation2 + $0xa80] sm:$0xf]  ;;  %5058 = vst [vmem:[%s7084_s1 + $0x578] sm:$0xf] %v4089_v24 }
 0x259   :  { %5059 = vst [vmem:[%s7084_s1 + $0x57c] sm:$0xf] %v4096_v25  ;;  %5044 = vst [vmem:[%s7084_s1 + $0x540] sm:$0xf] %v3991_v48  ;;  %v3998_v49 = vld [vmem:[#allocation2 + $0xa88] sm:$0xf] }
 0x25a   :  { %v4005_v26 = vld [vmem:[#allocation2 + $0xa90] sm:$0xf]  ;;  %v4012_v27 = vld [vmem:[#allocation2 + $0xa98] sm:$0xf]  ;;  %5045 = vst [vmem:[%s7084_s1 + $0x544] sm:$0xf] %v3998_v49 }
 0x25b   :  { %5046 = vst [vmem:[%s7084_s1 + $0x548] sm:$0xf] %v4005_v26  ;;  %5047 = vst [vmem:[%s7084_s1 + $0x54c] sm:$0xf] %v4012_v27  ;;  %v4019_v50 = vld [vmem:[#allocation2 + $0xaa0] sm:$0xf] }
 0x25c   :  { %v4026_v51 = vld [vmem:[#allocation2 + $0xaa8] sm:$0xf]  ;;  %v4033_v28 = vld [vmem:[#allocation2 + $0xab0] sm:$0xf]  ;;  %5048 = vst [vmem:[%s7084_s1 + $0x550] sm:$0xf] %v4019_v50 }
 0x25d   :  { %5049 = vst [vmem:[%s7084_s1 + $0x554] sm:$0xf] %v4026_v51  ;;  %5050 = vst [vmem:[%s7084_s1 + $0x558] sm:$0xf] %v4033_v28  ;;  %v4040_v29 = vld [vmem:[#allocation2 + $0xab8] sm:$0xf] }
 0x25e   :  { %v4159_v52 = vld [vmem:[#allocation2 + $0xb40] sm:$0xf]  ;;  %v4166_v53 = vld [vmem:[#allocation2 + $0xb48] sm:$0xf]  ;;  %5051 = vst [vmem:[%s7084_s1 + $0x55c] sm:$0xf] %v4040_v29 }
 0x25f   :  { %5068 = vst [vmem:[%s7084_s1 + $0x5a0] sm:$0xf] %v4159_v52  ;;  %5069 = vst [vmem:[%s7084_s1 + $0x5a4] sm:$0xf] %v4166_v53  ;;  %v4173_v30 = vld [vmem:[#allocation2 + $0xb50] sm:$0xf] }
 0x260   :  { %v4180_v31 = vld [vmem:[#allocation2 + $0xb58] sm:$0xf]  ;;  %v4187_v32 = vld [vmem:[#allocation2 + $0xb60] sm:$0xf]  ;;  %5070 = vst [vmem:[%s7084_s1 + $0x5a8] sm:$0xf] %v4173_v30 }
 0x261   :  { %5071 = vst [vmem:[%s7084_s1 + $0x5ac] sm:$0xf] %v4180_v31  ;;  %5072 = vst [vmem:[%s7084_s1 + $0x5b0] sm:$0xf] %v4187_v32  ;;  %v4194_v33 = vld [vmem:[#allocation2 + $0xb68] sm:$0xf] }
 0x262   :  { %v4201_v54 = vld [vmem:[#allocation2 + $0xb70] sm:$0xf]  ;;  %v4208_v55 = vld [vmem:[#allocation2 + $0xb78] sm:$0xf]  ;;  %5073 = vst [vmem:[%s7084_s1 + $0x5b4] sm:$0xf] %v4194_v33 }
 0x263   :  { %5074 = vst [vmem:[%s7084_s1 + $0x5b8] sm:$0xf] %v4201_v54  ;;  %5075 = vst [vmem:[%s7084_s1 + $0x5bc] sm:$0xf] %v4208_v55  ;;  %v4103_v34 = vld [vmem:[#allocation2 + $0xb00] sm:$0xf] }
 0x264   :  { %v4110_v35 = vld [vmem:[#allocation2 + $0xb08] sm:$0xf]  ;;  %v4117_v1 = vld [vmem:[#allocation2 + $0xb10] sm:$0xf]  ;;  %5060 = vst [vmem:[%s7084_s1 + $0x580] sm:$0xf] %v4103_v34 }
 0x265   :  { %5061 = vst [vmem:[%s7084_s1 + $0x584] sm:$0xf] %v4110_v35  ;;  %5062 = vst [vmem:[%s7084_s1 + $0x588] sm:$0xf] %v4117_v1  ;;  %v4124_v3 = vld [vmem:[#allocation2 + $0xb18] sm:$0xf] }
 0x266   :  { %v4131_v36 = vld [vmem:[#allocation2 + $0xb20] sm:$0xf]  ;;  %v4138_v37 = vld [vmem:[#allocation2 + $0xb28] sm:$0xf]  ;;  %5063 = vst [vmem:[%s7084_s1 + $0x58c] sm:$0xf] %v4124_v3 }
 0x267   :  { %5064 = vst [vmem:[%s7084_s1 + $0x590] sm:$0xf] %v4131_v36  ;;  %5065 = vst [vmem:[%s7084_s1 + $0x594] sm:$0xf] %v4138_v37  ;;  %v4145_v0 = vld [vmem:[#allocation2 + $0xb30] sm:$0xf] }
 0x268   :  { %v4152_v2 = vld [vmem:[#allocation2 + $0xb38] sm:$0xf]  ;;  %v4271_v38 = vld [vmem:[#allocation2 + $0xbc0] sm:$0xf]  ;;  %5066 = vst [vmem:[%s7084_s1 + $0x598] sm:$0xf] %v4145_v0 }
 0x269   :  { %5067 = vst [vmem:[%s7084_s1 + $0x59c] sm:$0xf] %v4152_v2  ;;  %5084 = vst [vmem:[%s7084_s1 + $0x5e0] sm:$0xf] %v4271_v38  ;;  %v4278_v39 = vld [vmem:[#allocation2 + $0xbc8] sm:$0xf] }
 0x26a   :  { %v4285_v40 = vld [vmem:[#allocation2 + $0xbd0] sm:$0xf]  ;;  %v4292_v41 = vld [vmem:[#allocation2 + $0xbd8] sm:$0xf]  ;;  %5085 = vst [vmem:[%s7084_s1 + $0x5e4] sm:$0xf] %v4278_v39 }
 0x26b   :  { %5086 = vst [vmem:[%s7084_s1 + $0x5e8] sm:$0xf] %v4285_v40  ;;  %5087 = vst [vmem:[%s7084_s1 + $0x5ec] sm:$0xf] %v4292_v41  ;;  %v4299_v4 = vld [vmem:[#allocation2 + $0xbe0] sm:$0xf] }
 0x26c   :  { %v4306_v5 = vld [vmem:[#allocation2 + $0xbe8] sm:$0xf]  ;;  %v4313_v42 = vld [vmem:[#allocation2 + $0xbf0] sm:$0xf]  ;;  %5088 = vst [vmem:[%s7084_s1 + $0x5f0] sm:$0xf] %v4299_v4 }
 0x26d   :  { %5089 = vst [vmem:[%s7084_s1 + $0x5f4] sm:$0xf] %v4306_v5  ;;  %5090 = vst [vmem:[%s7084_s1 + $0x5f8] sm:$0xf] %v4313_v42  ;;  %v4320_v43 = vld [vmem:[#allocation2 + $0xbf8] sm:$0xf] }
 0x26e   :  { %v4215_v6 = vld [vmem:[#allocation2 + $0xb80] sm:$0xf]  ;;  %v4222_v7 = vld [vmem:[#allocation2 + $0xb88] sm:$0xf]  ;;  %5091 = vst [vmem:[%s7084_s1 + $0x5fc] sm:$0xf] %v4320_v43 }
 0x26f   :  { %5076 = vst [vmem:[%s7084_s1 + $0x5c0] sm:$0xf] %v4215_v6  ;;  %5077 = vst [vmem:[%s7084_s1 + $0x5c4] sm:$0xf] %v4222_v7  ;;  %v4229_v44 = vld [vmem:[#allocation2 + $0xb90] sm:$0xf] }
 0x270   :  { %v4236_v45 = vld [vmem:[#allocation2 + $0xb98] sm:$0xf]  ;;  %v4243_v8 = vld [vmem:[#allocation2 + $0xba0] sm:$0xf]  ;;  %5078 = vst [vmem:[%s7084_s1 + $0x5c8] sm:$0xf] %v4229_v44 }
 0x271   :  { %5079 = vst [vmem:[%s7084_s1 + $0x5cc] sm:$0xf] %v4236_v45  ;;  %5080 = vst [vmem:[%s7084_s1 + $0x5d0] sm:$0xf] %v4243_v8  ;;  %v4250_v9 = vld [vmem:[#allocation2 + $0xba8] sm:$0xf] }
 0x272   :  { %v4257_v46 = vld [vmem:[#allocation2 + $0xbb0] sm:$0xf]  ;;  %v4264_v47 = vld [vmem:[#allocation2 + $0xbb8] sm:$0xf]  ;;  %5081 = vst [vmem:[%s7084_s1 + $0x5d4] sm:$0xf] %v4250_v9 }
 0x273   :  { %5082 = vst [vmem:[%s7084_s1 + $0x5d8] sm:$0xf] %v4257_v46  ;;  %5083 = vst [vmem:[%s7084_s1 + $0x5dc] sm:$0xf] %v4264_v47 }
 0x274   :  { %4326 = vsyncpa [#allocation1], 1 }

// kernel: _lambda_.4
= control target key start
LH: loop header
LB: loop body
LE: loop exit
PB: predicated region body
PF: predicated region fallthrough
CT: control target
= control target key end

     0   :  { %7 = vsyncpa [#allocation3], 0  ;;  %s584_s9 = smov 0   ;;  %s637_s0 = inlined_call_operand.vmem [shape: bf16[2,3,512], index: 0, kind: input, shape index: {}]   ;;  %s638_s1 = inlined_call_operand.hbm [shape: bf16[32,3], index: 1, kind: input, shape index: {}]   ;;  %s639_s2 = inlined_call_operand.vmem [shape: bf16[2,32,512], index: 2, kind: output, shape index: {}]  }
   0x1 LB: > { %s590_s10 = sadd.s32 4294967295, %s561_s9   ;;  %p463_p0 = scmp.ge.s32.totalorder %s561_s9, 1  ;;  %s561_s9 = sphi %s584_s9, %s13_s9  }
   0x2   : > { %p91_p1 = scmp.lt.s32.totalorder %s561_s9, 3  ;;  %s563_s11 = smov [#allocation2]  }
   0x3   : > { %s103_s12 = sshll.u32 %s563_s11, 4  ;;  %p506_p3 = scmp.eq.s32.totalorder %s590_s10, 0  ;;  %s104_s12 = int_to_ptr.vmem [resolvable:$true] %s103_s12 }
   0x4   : > { %p594_p2 = pnand %p463_p0, %p91_p1  ;;  %s536_s14 = scalar_lea.vmem %s104_s12, 256 }
   0x5   : > { %p537_p7 = scmp.ne.s32.totalorder %s104_s12, %s536_s14  ;;  %p544_p10 = scmp.lt.s32.totalorder %s104_s12, %s104_s12 }
   0x6   : > { %p502_p4 = pneg %p594_p2  ;;  %p545_p11 = scmp.lt.s32.totalorder %s536_s14, %s536_s14 }
   0x8   : > { %p503_p5 = pnand %p506_p3, %p502_p4  ;;  %p546_p12 = por %p545_p11, %p544_p10 }
   0xa   : > { %p527_p6 = pneg %p503_p5 }
   0xc   : > { %p539_p8 = pnand %p537_p7, %p527_p6 }
   0xe   : > { %p540_p9 = pneg %p539_p8 }
  0x10   : > { %p547_p13 = pnand %p546_p12, %p540_p9 }
  0x12   : > { %550 = shalt.err (!%p547_p13)
}
  0x13   : > { %s564_s15 = smov 64   ;;  %s565_s16 = smov 4  }
  0x14   : > { %505 = dma.hbm_to_vmem [thread:$0]  (!%p503_p5), %s638_s1, 256, %s104_s12, [#allocation3], %s564_s15, %s564_s15, %s565_s16  }
  0x15   : > { %127 = sbr.rel (%p594_p2) target bundleno = 257 (0x101), region = 28 }
  0x1a   : > { %556 = dma.done.wait (%p506_p3), [#allocation3], 256  }
  0x1b   : > { %558 = vsyncadd (%p506_p3), [#allocation3], 4294967040  ;;  %p149_p0 = scmp.lt.s32.totalorder %s590_s10, 1  ;;  %v180_v0 = vlaneseq  ;;  %v566_v1 = vmov 1983009808   ;;  %vm200_vm0 = vcmask 1040384  }
  0x1c   : > { %v178_v2 = vunpack.c.l.s4 %v566_v1  ;;  %v567_v4 = vmov 0   ;;  %vm201_vm1 = vcmask 1041408   ;;  %v568_v7 = vmov 65535   ;;  %v523_v20 = vld [vmem:[#allocation2] sm:$0xff]   ;;  %v524_v21 = vld [vmem:[#allocation2 + $0x8] sm:$0xff]  }
  0x1d   : > { %s642_s10 = smov (!%p149_p0, %s590_s10), 1  ;;  %v181_v3 = vshrl.u32 %v180_v0, 7  ;;  %248 = vmatprep.mubr.bf16.mxu0 %v567_v4  ;;  %301 = vmatprep.mubr.bf16.mxu1 %v567_v4  ;;  %v202_v8 = vsel %vm200_vm0, 4294967295, %v568_v7  ;;  %vm193_vm2 = vcmask 23552  }
  0x1e   : > { %v179_v5 = vunpack.c.0.s8 %v178_v2  ;;  %s488_s19 = sshll.u32 %s642_s10, 3  ;;  %v203_v11 = vsel %vm201_vm1, %v202_v8, 0  ;;  %s489_s23 = sshll.u32 %s642_s10, 6 }
  0x1f   : > { %s153_s22 = scalar_lea.vmem %s637_s0, %s488_s19  ;;  %s624_s26 = scalar_lea.vmem %s639_s2, %s489_s23 }
  0x20   : > { %v182_v6 = vsub.s32 %v179_v5, %v181_v3  ;;  %v164_v9 = vld [vmem:[%s153_s22] sm:$0xff] }
  0x21   : > { %v176_v12 = vcombine.high %v164_v9, %v164_v9 }
  0x22   : > { %v183_v10 = vrot.slane %v164_v9, %v182_v6 }
  0x23   : > { %v190_v14 = vrot.slane %v176_v12, %v182_v6 }
  0x24   : > { %v191_v13 = vcombine.high %v183_v10, %v183_v10  ;;  %v205_v15 = vand.u32 %v203_v11, %v183_v10 }
  0x25   : > { %v192_v17 = vcombine.high %v190_v14, %v190_v14  ;;  %v211_v18 = vand.u32 %v203_v11, %v190_v14 }
  0x26   : > { %v208_v16 = vand.u32 %v203_v11, %v191_v13 }
  0x27   : > { %v214_v19 = vand.u32 %v203_v11, %v192_v17 }
  0x28   : > { %230 = vmatprep.subr.bf16.mxu0 %v208_v16 }
  0x29   : > { %231 = vmatpush1.bf16.msra.mxu0 %v205_v15  ;;  %283 = vmatprep.subr.bf16.mxu1 %v214_v19 }
  0x2a   : > { %284 = vmatpush1.bf16.msra.mxu1 %v211_v18 }
  0x2c   : > { %474 = vmatmul.mubr.msk.bf16.vlgmr.msra.gmra.mxu0 %vm193_vm2, %v523_v20 }
  0x2d   : > { %258 = vmatprep.mubr.bf16.mxu0 %v567_v4  ;;  %476 = vmatmul.mubr.msk.bf16.vlgmr.msra.gmra.mxu1 %vm193_vm2, %v523_v20 }
  0x2e   : > { %311 = vmatprep.mubr.bf16.mxu1 %v567_v4 }
  0x34   : > { %475 = vmatmul.mubr.msk.bf16.gmra.mxu0 %vm193_vm2, %v524_v21 }
  0x35   : > { %477 = vmatmul.mubr.msk.bf16.gmra.mxu1 %vm193_vm2, %v524_v21 }
  0xec   : > { %v250_v22 = vpop.f32.mrf.mxu0 }
  0xed   : > { %v322_v23 = vmax.f32 %v250_v22, 0.0  ;;  %v303_v25 = vpop.f32.mrf.mxu1 }
  0xee   : > { %v252_v24 = vpop.f32.mrf.mxu0  ;;  %v324_v30 = vmax.f32 %v303_v25, 0.0 }
  0xef   : > { %v323_v26 = vmax.f32 %v252_v24, 0.0  ;;  %v305_v28 = vpop.f32.mrf.mxu1 }
  0xf0   : > { %v254_v27 = vpop.f32.mrf.mxu0  ;;  %v325_v31 = vmax.f32 %v305_v28, 0.0 }
  0xf1   : > { %v490_v29 = vpack.c.bf16 %v323_v26, %v322_v23  ;;  %v307_v33 = vpop.f32.mrf.mxu1  ;;  %v326_v34 = vmax.f32 %v254_v27, 0.0 }
  0xf2   : > { %v256_v32 = vpop.f32.mrf.mxu0  ;;  %v491_v35 = vpack.c.bf16 %v325_v31, %v324_v30  ;;  %v328_v40 = vmax.f32 %v307_v33, 0.0 }
  0xf3   : > { %386 = vst [vmem:[%s624_s26] sm:$0xff] %v490_v29  ;;  %v327_v36 = vmax.f32 %v256_v32, 0.0  ;;  %v309_v38 = vpop.f32.mrf.mxu1 }
  0xf4   : > { %v260_v37 = vpop.f32.mrf.mxu0  ;;  %387 = vst [vmem:[%s624_s26 + $0x8] sm:$0xff] %v491_v35  ;;  %v329_v42 = vmax.f32 %v309_v38, 0.0 }
  0xf5   : > { %v492_v39 = vpack.c.bf16 %v327_v36, %v326_v34  ;;  %v330_v41 = vmax.f32 %v260_v37, 0.0  ;;  %v313_v44 = vpop.f32.mrf.mxu1 }
  0xf6   : > { %v262_v43 = vpop.f32.mrf.mxu0  ;;  %v493_v45 = vpack.c.bf16 %v329_v42, %v328_v40  ;;  %v332_v50 = vmax.f32 %v313_v44, 0.0 }
  0xf7   : > { %388 = vst [vmem:[%s624_s26 + $0x10] sm:$0xff] %v492_v39  ;;  %v331_v46 = vmax.f32 %v262_v43, 0.0  ;;  %v315_v48 = vpop.f32.mrf.mxu1 }
  0xf8   : > { %v264_v47 = vpop.f32.mrf.mxu0  ;;  %389 = vst [vmem:[%s624_s26 + $0x18] sm:$0xff] %v493_v45  ;;  %v333_v51 = vmax.f32 %v315_v48, 0.0 }
  0xf9   : > { %v494_v49 = vpack.c.bf16 %v331_v46, %v330_v41  ;;  %v317_v53 = vpop.f32.mrf.mxu1  ;;  %v334_v54 = vmax.f32 %v264_v47, 0.0 }
  0xfa   : > { %v266_v52 = vpop.f32.mrf.mxu0  ;;  %v495_v55 = vpack.c.bf16 %v333_v51, %v332_v50  ;;  %v336_v59 = vmax.f32 %v317_v53, 0.0 }
  0xfb   : > { %390 = vst [vmem:[%s624_s26 + $0x20] sm:$0xff] %v494_v49  ;;  %v335_v56 = vmax.f32 %v266_v52, 0.0  ;;  %v319_v57 = vpop.f32.mrf.mxu1 }
  0xfc   : > { %391 = vst [vmem:[%s624_s26 + $0x28] sm:$0xff] %v495_v55  ;;  %v337_v60 = vmax.f32 %v319_v57, 0.0 }
  0xfd   : > { %v496_v58 = vpack.c.bf16 %v335_v56, %v334_v54 }
  0xfe   : > { %v497_v61 = vpack.c.bf16 %v337_v60, %v336_v59 }
  0xff   : > { %392 = vst [vmem:[%s624_s26 + $0x30] sm:$0xff] %v496_v58 }
 0x100   : > { %393 = vst [vmem:[%s624_s26 + $0x38] sm:$0xff] %v497_v61 }
 0x101 PF: > { %s13_s9 = sadd.s32 1, %s561_s9  }
 0x102   : > { %p10_p1 = scmp.ge.s32.totalorder %s13_s9, 4  }
 0x104   :  { %12 = sbr.rel (!%p10_p1) target bundleno = 1 (0x1), region = 63 }
 0x109   :  { %415 = vsyncpa [#allocation3], 1 }
 0x10a   :  { %417 = vsyncpa [#allocation3 + $0x1], 1 }

// kernel: _lambda_.5
= control target key start
LH: loop header
LB: loop body
LE: loop exit
PB: predicated region body
PF: predicated region fallthrough
CT: control target
= control target key end

     0   :  { %14 = vsyncpa [#allocation5], 0  ;;  %s2985_s0 = inlined_call_operand.vmem [shape: bf16[2,32,512], index: 0, kind: input, shape index: {}]   ;;  %s2986_s1 = inlined_call_operand.hbm [shape: bf16[16,288], index: 1, kind: input, shape index: {}]   ;;  %s2987_s2 = inlined_call_operand.hbm [shape: f32[1,16], index: 2, kind: input, shape index: {}]   ;;  %s2988_s3 = inlined_call_operand.hbm [shape: bf16[24,16], index: 3, kind: input, shape index: {}]   ;;  %s2989_s4 = inlined_call_operand.hbm [shape: f32[1,24], index: 4, kind: input, shape index: {}]   ;;  %s2990_s5 = inlined_call_operand.vmem [shape: f32[2,2,16], index: 5, kind: input, shape index: {}]   ;;  %s2991_s6 = inlined_call_operand.vmem [shape: f32[1,512], index: 6, kind: input, shape index: {}]   ;;  %s2992_s7 = inlined_call_operand.vmem [shape: bf16[2,16,512], index: 7, kind: output, shape index: {0}]   ;;  %s2993_s8 = inlined_call_operand.vmem [shape: f32[2,24,512], index: 8, kind: output, shape index: {1}]  }
   0x1   :  { %15 = vsyncpa [#allocation7], 0 }
   0x2   :  { %16 = vsyncpa [#allocation10], 0  ;;  %s2426_s27 = smov 0  }
   0x3 LB: > { %s2370_s28 = smov [#allocation6]   ;;  %s2432_s30 = sadd.s32 4294967295, %s2368_s27   ;;  %s2368_s27 = sphi %s2426_s27, %s22_s27  }
   0x4   : > { %s262_s29 = sshll.u32 %s2370_s28, 4  ;;  %p2066_p0 = scmp.ge.s32.totalorder %s2368_s27, 1  ;;  %s263_s29 = int_to_ptr.vmem [resolvable:$true] %s262_s29 }
   0x5   : > { %p236_p1 = scmp.lt.s32.totalorder %s2368_s27, 3  ;;  %p2210_p2 = scmp.eq.s32.totalorder %s2432_s30, 0 }
   0x6   : > { %s2371_s10 = smov [#allocation4]   ;;  %s2372_s13 = smov [#allocation8]  }
   0x7   : > { %p2437_p3 = pnand %p2066_p0, %p236_p1  ;;  %s248_s11 = sshll.u32 %s2371_s10, 4  ;;  %s2443_s11 = int_to_ptr.vmem [resolvable:$true] %s248_s11 }
   0x8   : > { %s272_s14 = sshll.u32 %s2372_s13, 4  ;;  %s2257_s15 = scalar_lea.vmem %s263_s29, 16  ;;  %s2451_s14 = int_to_ptr.vmem [resolvable:$true] %s272_s14 }
   0x9   : > { %p2197_p4 = pneg %p2437_p3  ;;  %p2258_p7 = scmp.ne.s32.totalorder %s263_s29, %s2257_s15 }
   0xa   : > { %s2264_s16 = scalar_lea.vmem %s263_s29, 32  ;;  %p2265_p10 = scmp.lt.s32.totalorder %s263_s29, %s263_s29 }
   0xb   : > { %p2447_p5 = pnand %p2210_p2, %p2197_p4  ;;  %p2266_p11 = scmp.lt.s32.totalorder %s2264_s16, %s2257_s15 }
   0xd   : > { %p2248_p6 = pneg %p2447_p5  ;;  %p2267_p12 = por %p2266_p11, %p2265_p10 }
   0xf   : > { %p2260_p8 = pnand %p2258_p7, %p2248_p6 }
  0x11   : > { %p2261_p9 = pneg %p2260_p8 }
  0x13   : > { %p2268_p13 = pnand %p2267_p12, %p2261_p9 }
  0x15   : > { %2271 = shalt.err (!%p2268_p13)
}
  0x16   : > { %2203 = dma.hbm_to_vmem [thread:$0]  (!%p2447_p5), %s2987_s2, 16, %s263_s29, [#allocation7]  }
  0x17   : > { %s2283_s19 = scalar_lea.vmem %s2443_s11, 384  ;;  %p2291_p7 = scmp.lt.s32.totalorder %s2443_s11, %s2443_s11 }
  0x18   : > { %p2284_p0 = scmp.ne.s32.totalorder %s2443_s11, %s2283_s19  ;;  %p2292_p8 = scmp.lt.s32.totalorder %s2283_s19, %s2283_s19 }
  0x1a   : > { %p2286_p1 = pnand %p2284_p0, %p2248_p6  ;;  %p2293_p9 = por %p2292_p8, %p2291_p7 }
  0x1c   : > { %p2287_p4 = pneg %p2286_p1 }
  0x1e   : > { %p2294_p10 = pnand %p2293_p9, %p2287_p4 }
  0x20   : > { %2297 = shalt.err (!%p2294_p10)
}
  0x21   : > { %s2373_s20 = smov 192   ;;  %s2374_s21 = smov 12  }
  0x22   : > { %2200 = dma.hbm_to_vmem [thread:$0]  (!%p2447_p5), %s2986_s1, 384, %s2443_s11, [#allocation5], %s2373_s20, %s2373_s20, %s2374_s21  }
  0x23   : > { %s2309_s24 = scalar_lea.vmem %s2451_s14, 192  ;;  %p2317_p0 = scmp.lt.s32.totalorder %s2451_s14, %s2451_s14 }
  0x24   : > { %p2310_p11 = scmp.ne.s32.totalorder %s2451_s14, %s2309_s24  ;;  %p2318_p1 = scmp.lt.s32.totalorder %s2309_s24, %s2309_s24 }
  0x26   : > { %p2312_p12 = pnand %p2310_p11, %p2248_p6  ;;  %p2319_p4 = por %p2318_p1, %p2317_p0 }
  0x28   : > { %p2313_p13 = pneg %p2312_p12 }
  0x2a   : > { %p2320_p7 = pnand %p2319_p4, %p2313_p13 }
  0x2c   : > { %2323 = shalt.err (!%p2320_p7)
}
  0x2d   : > { %s2375_s25 = smov 64   ;;  %s2376_s26 = smov 4  }
  0x2e   : > { %2206 = dma.hbm_to_vmem [thread:$0]  (!%p2447_p5), %s2988_s3, 192, %s2451_s14, [#allocation7], %s2375_s25, %s2375_s25, %s2376_s26  }
  0x2f   : > { %s2377_s10 = smov [#allocation9]  }
  0x30   : > { %s286_s11 = sshll.u32 %s2377_s10, 4  ;;  %s287_s11 = int_to_ptr.vmem [resolvable:$true] %s286_s11 }
  0x31   : > { %s2335_s13 = scalar_lea.vmem %s287_s11, 16  ;;  %s2342_s15 = scalar_lea.vmem %s287_s11, 32 }
  0x32   : > { %p2336_p8 = scmp.ne.s32.totalorder %s287_s11, %s2335_s13  ;;  %p2343_p11 = scmp.lt.s32.totalorder %s287_s11, %s287_s11 }
  0x33   : > { %p2344_p12 = scmp.lt.s32.totalorder %s2342_s15, %s2335_s13 }
  0x34   : > { %p2338_p9 = pnand %p2336_p8, %p2248_p6 }
  0x35   : > { %p2345_p13 = por %p2344_p12, %p2343_p11 }
  0x36   : > { %p2339_p10 = pneg %p2338_p9 }
  0x38   : > { %p2346_p0 = pnand %p2345_p13, %p2339_p10 }
  0x3a   : > { %2349 = shalt.err (!%p2346_p0)
}
  0x3b   : > { %2209 = dma.hbm_to_vmem [thread:$0]  (!%p2447_p5), %s2989_s4, 16, %s287_s11, [#allocation10]  }
  0x3c   : > { %317 = sbr.rel (%p2437_p3) target bundleno = 772 (0x304), region = 48 }
  0x41   : > { %2355 = dma.done.wait (%p2210_p2), [#allocation5], 384  }
  0x42   : > { %2357 = vsyncadd (%p2210_p2), [#allocation5], 4294966912 }
  0x43   : > { %2359 = dma.done.wait (%p2210_p2), [#allocation7], 208  }
  0x44   : > { %2361 = vsyncadd (%p2210_p2), [#allocation7], 4294967088 }
  0x45   : > { %2363 = dma.done.wait (%p2210_p2), [#allocation10], 16  }
  0x46   : > { %2365 = vsyncadd (%p2210_p2), [#allocation10], 4294967280  ;;  %p372_p3 = scmp.lt.s32.totalorder %s2432_s30, 1  ;;  %v2378_v0 = vmov 0   ;;  %s2379_s19 = smov 127   ;;  %vm484_vm0 = vcmask 1043456  }
  0x47   : > { %400 = vst [vmem:[#allocation2] sm:$0xff] %v2378_v0  ;;  %403 = vst [vmem:[#allocation2 + $0x18] sm:$0xff] %v2378_v0  ;;  %1569 = vmatprep.mubr.bf16.mxu1 %v2378_v0  ;;  %s2380_s20 = smov 1   ;;  %vm595_vm1 = vcmask 1039360   ;;  %vm486_vm2 = vcmask 7168   ;;  %vm1490_vm3 = vcmask 261120  }
  0x48   : > { %404 = vst [vmem:[#allocation2 + $0x20] sm:$0xff] %v2378_v0  ;;  %407 = vst [vmem:[#allocation2 + $0x38] sm:$0xff] %v2378_v0  ;;  %s2997_s30 = smov (!%p372_p3, %s2432_s30), 1  ;;  %vm1802_vm4 = vcmask 130048  }
  0x49   : > { %408 = vst [vmem:[#allocation2 + $0x40] sm:$0xff] %v2378_v0  ;;  %411 = vst [vmem:[#allocation2 + $0x58] sm:$0xff] %v2378_v0  ;;  %s2174_s9 = sshll.u32 %s2997_s30, 6  ;;  %s2079_s21 = sshll.u32 %s2997_s30, 1 }
  0x4a   : > { %412 = vst [vmem:[#allocation2 + $0x60] sm:$0xff] %v2378_v0  ;;  %415 = vst [vmem:[#allocation2 + $0x78] sm:$0xff] %v2378_v0  ;;  %s376_s18 = scalar_lea.vmem %s2985_s0, %s2174_s9  ;;  %s380_s24 = scalar_lea.vmem %s2990_s5, %s2079_s21 }
  0x4b   : > { %v2528_v1 = vld [vmem:[%s376_s18 + $0x30] sm:$0xff]  ;;  %v2530_v2 = vld [vmem:[%s376_s18 + $0x38] sm:$0xff]  ;;  %v2532_v3 = vld [vmem:[%s376_s18 + $0x20] sm:$0xff]  ;;  %s2175_s28 = sshll.u32 %s2997_s30, 5  ;;  %s2180_s13 = smul.u32 96, %s2997_s30 }
  0x4c   : > { %422 = vst [vmem:[#allocation2 + $0x68] sm:$0xff] %v2528_v1  ;;  %423 = vst [vmem:[#allocation2 + $0x70] sm:$0xff] %v2530_v2  ;;  %v2536_v4 = vld [vmem:[%s376_s18 + $0x28] sm:$0xff]  ;;  %v2541_v6 = vld [vmem:[%s376_s18] sm:$0xff]  ;;  %s2944_s11 = scalar_lea.vmem %s2992_s7, %s2175_s28 }
  0x4d   : > { %420 = vst [vmem:[#allocation2 + $0x48] sm:$0xff] %v2532_v3  ;;  %v2539_v5 = vld [vmem:[%s376_s18 + $0x8] sm:$0xff]  ;;  %421 = vst [vmem:[#allocation2 + $0x50] sm:$0xff] %v2536_v4  ;;  %v2546_v7 = vld [vmem:[%s376_s18 + $0x18] sm:$0xff]  ;;  %s2968_s17 = scalar_lea.vmem %s2993_s8, %s2180_s13 }
  0x4e   : > { %417 = vst [vmem:[#allocation2 + $0x10] sm:$0xff] %v2539_v5  ;;  %416 = vst [vmem:[#allocation2 + $0x8] sm:$0xff] %v2541_v6  ;;  %v2548_v8 = vld [vmem:[%s376_s18 + $0x10] sm:$0xff]  ;;  %v829_v43 = vld [vmem:[#allocation2 + $0x18] sm:$0xf] }
  0x4f   : > { %419 = vst [vmem:[#allocation2 + $0x30] sm:$0xff] %v2546_v7  ;;  %418 = vst [vmem:[#allocation2 + $0x28] sm:$0xff] %v2548_v8  ;;  %v832_v41 = vld [vmem:[#allocation2 + $0x38] sm:$0xf] }
  0x50   : > { %v835_v40 = vld [vmem:[#allocation2 + $0x58] sm:$0xf] }
  0x51   : > { %v838_v39 = vld [vmem:[#allocation2 + $0x78] sm:$0xf] }
  0x52   : > { %v746_v61 = vld [vmem:[#allocation2 + $0x78] sm:$0xf] }
  0x53   : > { %v2552_v9 = vld [vmem:[#allocation2 + $0x6c] sm:$0xff]  ;;  %v2560_v11 = vld [vmem:[#allocation2 + $0x74] sm:$0xff]  ;;  %v2574_v14 = vld [vmem:[#allocation2 + $0x64] sm:$0xff] }
  0x54   : > { %977 = vrot.lane.b32.xlu1 %v2552_v9, %s2379_s19  ;;  %v2556_v10 = vld [vmem:[#allocation2 + $0x4c] sm:$0xff]  ;;  %v2562_v12 = vld [vmem:[#allocation2 + $0x54] sm:$0xff]  ;;  %v2568_v13 = vld [vmem:[#allocation2 + $0x44] sm:$0xff] }
  0x55   : > { %971 = vrot.lane.b32.xlu0 %v2556_v10, %s2379_s19  ;;  %v2580_v15 = vld [vmem:[#allocation2 + $0x14] sm:$0xff]  ;;  %v935_v16 = vld [vmem:[#allocation2 + $0xc] sm:$0xff]  ;;  %v2590_v19 = vld [vmem:[#allocation2 + $0x4] sm:$0xff]  ;;  %v2100_v25 = vcombine.high %v2568_v13, %v2574_v14  ;;  %v2099_v27 = vcombine.low %v2568_v13, %v2574_v14 }
  0x56   : > { %v2585_v17 = vld [vmem:[#allocation2 + $0x34] sm:$0xff]  ;;  %v938_v18 = vld [vmem:[#allocation2 + $0x2c] sm:$0xff]  ;;  %v2595_v20 = vld [vmem:[#allocation2 + $0x24] sm:$0xff] }
  0x57   : > { %v638_v21 = vld [vmem:[#allocation2 + $0x74] sm:$0xf]  ;;  %v2096_v29 = vcombine.high %v2590_v19, %v2595_v20  ;;  %v2095_v31 = vcombine.low %v2590_v19, %v2595_v20  ;;  %v2636_v33 = vcombine.high %v935_v16, %v938_v18  ;;  %v2640_v34 = vcombine.low %v935_v16, %v938_v18  ;;  %v435_v35 = vld [vmem:[#allocation2 + $0x70] sm:$0xf]  ;;  %v743_v63 = vld [vmem:[#allocation2 + $0x58] sm:$0xf] }
  0x58   : > { %979 = vrot.lane.b32.xlu1 %v2560_v11, %s2379_s19  ;;  %v635_v22 = vld [vmem:[#allocation2 + $0x54] sm:$0xf]  ;;  %v432_v36 = vld [vmem:[#allocation2 + $0x50] sm:$0xf] }
  0x59   : > { %973 = vrot.lane.b32.xlu0 %v2562_v12, %s2379_s19  ;;  %v632_v23 = vld [vmem:[#allocation2 + $0x34] sm:$0xf]  ;;  %v429_v37 = vld [vmem:[#allocation2 + $0x30] sm:$0xf] }
  0x5a   : > { %v629_v24 = vld [vmem:[#allocation2 + $0x14] sm:$0xf]  ;;  %v426_v38 = vld [vmem:[#allocation2 + $0x10] sm:$0xf] }
  0x5b   : > { %v545_v26 = vld [vmem:[#allocation2 + $0x74] sm:$0xf] }
  0x5c   : > { %665 = vrot.lane.b32.xlu1 %v2556_v10, %s2380_s20  ;;  %v542_v28 = vld [vmem:[#allocation2 + $0x54] sm:$0xf] }
  0x5d   : > { %663 = vrot.lane.b32.xlu0 %v2568_v13, %s2380_s20  ;;  %v539_v30 = vld [vmem:[#allocation2 + $0x34] sm:$0xf] }
  0x5e   : > { %v536_v32 = vld [vmem:[#allocation2 + $0x14] sm:$0xf] }
  0x60   : > { %671 = vrot.lane.b32.xlu1 %v2552_v9, %s2380_s20 }
  0x61   : > { %669 = vrot.lane.b32.xlu0 %v2574_v14, %s2380_s20 }
  0x64   : > { %961 = vrot.lane.b32.xlu1 %v2580_v15, %s2379_s19 }
  0x65   : > { %959 = vrot.lane.b32.xlu0 %v935_v16, %s2379_s19 }
  0x68   : > { %967 = vrot.lane.b32.xlu1 %v2585_v17, %s2379_s19 }
  0x69   : > { %965 = vrot.lane.b32.xlu0 %v938_v18, %s2379_s19 }
  0x6c   : > { %653 = vrot.lane.b32.xlu1 %v935_v16, %s2380_s20 }
  0x6d   : > { %651 = vrot.lane.b32.xlu0 %v2590_v19, %s2380_s20 }
  0x70   : > { %659 = vrot.lane.b32.xlu1 %v938_v18, %s2380_s20 }
  0x71   : > { %657 = vrot.lane.b32.xlu0 %v2595_v20, %s2380_s20 }
  0x74   : > { %673 = vrot.lane.b32.xlu1 %v638_v21, %s2380_s20 }
  0x75   : > { %667 = vrot.lane.b32.xlu0 %v635_v22, %s2380_s20 }
  0x78   : > { %572 = vrot.lane.b32.xlu1 %v2556_v10, %s2379_s19 }
  0x79   : > { %570 = vrot.lane.b32.xlu0 %v2568_v13, %s2379_s19  ;;  %v2101_v13 = vcombine.low %v2556_v10, %v2552_v9 }
  0x7c   : > { %578 = vrot.lane.b32.xlu1 %v2552_v9, %s2379_s19 }
  0x7d   : > { %576 = vrot.lane.b32.xlu0 %v2574_v14, %s2379_s19 }
  0x80   : > { %661 = vrot.lane.b32.xlu1 %v632_v23, %s2380_s20 }
  0x81   : > { %655 = vrot.lane.b32.xlu0 %v629_v24, %s2380_s20 }
  0x84   : > { %560 = vrot.lane.b32.xlu1 %v935_v16, %s2379_s19 }
  0x85   : > { %558 = vrot.lane.b32.xlu0 %v2590_v19, %s2379_s19 }
  0x88   : > { %566 = vrot.lane.b32.xlu1 %v938_v18, %s2379_s19  ;;  %v737_v18 = vld [vmem:[#allocation2 + $0x18] sm:$0xf] }
  0x89   : > { %564 = vrot.lane.b32.xlu0 %v2595_v20, %s2379_s19 }
  0x8c   : > { %580 = vrot.lane.b32.xlu1 %v545_v26, %s2379_s19 }
  0x8d   : > { %574 = vrot.lane.b32.xlu0 %v542_v28, %s2379_s19 }
  0x90   : > { %568 = vrot.lane.b32.xlu1 %v539_v30, %s2379_s19 }
  0x91   : > { %562 = vrot.lane.b32.xlu0 %v536_v32, %s2379_s19 }
  0x94   : > { %462 = vrot.lane.b32.xlu1 %v2532_v3, %s2380_s20 }
  0x95   : > { %460 = vrot.lane.b32.xlu0 %v2378_v0, %s2380_s20 }
  0x98   : > { %468 = vrot.lane.b32.xlu1 %v2528_v1, %s2380_s20 }
  0x99   : > { %466 = vrot.lane.b32.xlu0 %v2378_v0, %s2380_s20 }
  0x9c   : > { %450 = vrot.lane.b32.xlu1 %v2541_v6, %s2380_s20 }
  0x9d   : > { %448 = vrot.lane.b32.xlu0 %v2378_v0, %s2380_s20 }
  0xa0   : > { %456 = vrot.lane.b32.xlu1 %v2548_v8, %s2380_s20 }
  0xa1   : > { %454 = vrot.lane.b32.xlu0 %v2378_v0, %s2380_s20 }
  0xa4   : > { %470 = vrot.lane.b32.xlu1 %v435_v35, %s2380_s20  ;;  %v946_v35 = vld [vmem:[#allocation2 + $0x7c] sm:$0xf] }
  0xa5   : > { %464 = vrot.lane.b32.xlu0 %v432_v36, %s2380_s20 }
  0xa8   : > { %458 = vrot.lane.b32.xlu1 %v429_v37, %s2380_s20  ;;  %v943_v37 = vld [vmem:[#allocation2 + $0x5c] sm:$0xf] }
  0xa9   : > { %452 = vrot.lane.b32.xlu0 %v426_v38, %s2380_s20 }
  0xac   : > { %865 = vrot.lane.b32.xlu1 %v2536_v4, %s2380_s20 }
  0xad   : > { %863 = vrot.lane.b32.xlu0 %v2532_v3, %s2380_s20 }
  0xb0   : > { %871 = vrot.lane.b32.xlu1 %v2530_v2, %s2380_s20 }
  0xb1   : > { %869 = vrot.lane.b32.xlu0 %v2528_v1, %s2380_s20 }
  0xb4   : > { %853 = vrot.lane.b32.xlu1 %v2539_v5, %s2380_s20 }
  0xb5   : > { %851 = vrot.lane.b32.xlu0 %v2541_v6, %s2380_s20 }
  0xb8   : > { %859 = vrot.lane.b32.xlu1 %v2546_v7, %s2380_s20 }
  0xb9   : > { %857 = vrot.lane.b32.xlu0 %v2548_v8, %s2380_s20 }
  0xbc   : > { %873 = vrot.lane.b32.xlu1 %v838_v39, %s2380_s20 }
  0xbd   : > { %867 = vrot.lane.b32.xlu0 %v835_v40, %s2380_s20 }
  0xc0   : > { %773 = vrot.lane.b32.xlu1 %v2536_v4, %s2379_s19 }
  0xc1   : > { %771 = vrot.lane.b32.xlu0 %v2532_v3, %s2379_s19 }
  0xc4   : > { %779 = vrot.lane.b32.xlu1 %v2530_v2, %s2379_s19  ;;  %v2710_v2 = vld [vmem:[#allocation4 + $0x4] ss:$12 sps:$4 sm:$0xff]  }
  0xc5   : > { %777 = vrot.lane.b32.xlu0 %v2528_v1, %s2379_s19  ;;  %1526 = vmatprep.mubr.bf16.mxu0 %v2710_v2 }
  0xc6   : > { %v978_v42 = vpop.permute.xlu1 %977 }
  0xc7   : > { %v972_v44 = vpop.permute.xlu0 %971  ;;  %v992_v46 = vrot.slane %v978_v42, 4 }
  0xc8   : > { %861 = vrot.lane.b32.xlu1 %v832_v41, %s2380_s20  ;;  %v989_v49 = vrot.slane %v972_v44, 4 }
  0xc9   : > { %855 = vrot.lane.b32.xlu0 %v829_v43, %s2380_s20 }
  0xca   : > { %v2682_v45 = vpop.permute.xlu1 %979 }
  0xcb   : > { %v993_v47 = vrot.slane %v2682_v45, 4  ;;  %v2685_v48 = vpop.permute.xlu0 %973 }
  0xcc   : > { %v990_v50 = vrot.slane %v2685_v48, 4  ;;  %761 = vrot.lane.b32.xlu1 %v2539_v5, %s2379_s19 }
  0xcd   : > { %759 = vrot.lane.b32.xlu0 %v2541_v6, %s2379_s19  ;;  %v1007_v51 = vsel %vm484_vm0, %v992_v46, %v993_v47  ;;  %v937_v46 = vld [vmem:[#allocation2 + $0x1c] sm:$0xf] }
  0xce   : > { %v2695_v52 = vpop.permute.xlu1 %665  ;;  %v1003_v53 = vsel %vm484_vm0, %v989_v49, %v990_v50  ;;  %v1008_v54 = vsel %vm595_vm1, %v978_v42, %v1007_v51  ;;  %v940_v42 = vld [vmem:[#allocation2 + $0x3c] sm:$0xf]  ;;  %v1676_v49 = vlaneseq }
  0xcf   : > { %v664_v55 = vpop.permute.xlu0 %663  ;;  %v1004_v56 = vsel %vm595_vm1, %v972_v44, %v1003_v53  ;;  %v682_v57 = vrot.slane %v2695_v52, 4 }
  0xd0   : > { %v681_v58 = vrot.slane %v664_v55, 4  ;;  %767 = vrot.lane.b32.xlu1 %v2546_v7, %s2379_s19  ;;  %v2156_v59 = vcombine.high %v1004_v56, %v1008_v54  ;;  %v2155_v60 = vcombine.low %v1004_v56, %v1008_v54  ;;  %v740_v7 = vld [vmem:[#allocation2 + $0x38] sm:$0xf] }
  0xd1   : > { %765 = vrot.lane.b32.xlu0 %v2548_v8, %s2379_s19 }
  0xd2   : > { %1549 = vmatprep.subr.bf16.mxu1 %v2156_v59  ;;  %v2707_v62 = vpop.permute.xlu1 %671  ;;  %v695_v5 = vsel %vm484_vm0, %v681_v58, %v682_v57 }
  0xd3   : > { %1550 = vmatpush1.bf16.msra.mxu1 %v2155_v60  ;;  %v685_v0 = vrot.slane %v2707_v62, 4  ;;  %v670_v1 = vpop.permute.xlu0 %669  ;;  %v696_v23 = vsel %vm486_vm2, %v664_v55, %v695_v5  ;;  %v2749_v60 = vshrl.u32 %v1676_v49, 7  ;;  %v1704_v5 = vld [vmem:[%s380_s24] sm:$0x3] }
  0xd4   : > { %v684_v4 = vrot.slane %v670_v1, 4  ;;  %781 = vrot.lane.b32.xlu1 %v746_v61, %s2379_s19  ;;  %v2752_v61 = vld [vmem:[#allocation4 + $0x8] ss:$12 sps:$4 sm:$0xff]  }
  0xd5   : > { %775 = vrot.lane.b32.xlu0 %v743_v63, %s2379_s19 }
  0xd6   : > { %v2718_v16 = vpop.permute.xlu1 %961  ;;  %v699_v21 = vsel %vm484_vm0, %v684_v4, %v685_v0  ;;  %v1682_v4 = vsub.s32 1, %v2749_v60 }
  0xd7   : > { %v960_v22 = vpop.permute.xlu0 %959  ;;  %v700_v24 = vsel %vm486_vm2, %v670_v1, %v699_v21  ;;  %v984_v26 = vrot.slane %v2718_v16, 4  ;;  %v2083_v1 = vld [vmem:[#allocation6] ss:$0 sm:$0xff] }
  0xd8   : > { %v983_v28 = vrot.slane %v960_v22, 4  ;;  %769 = vrot.lane.b32.xlu1 %v740_v7, %s2379_s19  ;;  %v2116_v30 = vcombine.high %v696_v23, %v700_v24  ;;  %v2115_v32 = vcombine.low %v696_v23, %v700_v24  ;;  %v1755_v23 = vrot.slane %v1704_v5, %v1682_v4 }
  0xd9   : > { %763 = vrot.lane.b32.xlu0 %v737_v18, %s2379_s19  ;;  %v1678_v24 = vsub.s32 0, %v2749_v60 }
  0xda   : > { %1494 = vmatprep.subr.bf16.mxu0 %v2116_v30  ;;  %v2728_v36 = vpop.permute.xlu1 %967  ;;  %v995_v40 = vsel %vm484_vm0, %v983_v28, %v984_v26 }
  0xdb   : > { %1495 = vmatpush1.bf16.msra.mxu0 %v2115_v32  ;;  %v987_v38 = vrot.slane %v2728_v36, 4  ;;  %v966_v39 = vpop.permute.xlu0 %965  ;;  %v996_v51 = vsel %vm595_vm1, %v960_v22, %v995_v40 }
  0xdc   : > { %v986_v41 = vrot.slane %v966_v39, 4  ;;  %981 = vrot.lane.b32.xlu1 %v946_v35, %s2379_s19 }
  0xdd   : > { %975 = vrot.lane.b32.xlu0 %v943_v37, %s2379_s19 }
  0xde   : > { %v999_v43 = vsel %vm484_vm0, %v986_v41, %v987_v38  ;;  %v2739_v44 = vpop.permute.xlu1 %653 }
  0xdf   : > { %v1000_v53 = vsel %vm595_vm1, %v966_v39, %v999_v43  ;;  %v676_v54 = vrot.slane %v2739_v44, 4  ;;  %v652_v55 = vpop.permute.xlu0 %651 }
  0xe0   : > { %v2151_v56 = vcombine.low %v996_v51, %v1000_v53  ;;  %v2152_v58 = vcombine.high %v996_v51, %v1000_v53  ;;  %v675_v59 = vrot.slane %v652_v55, 4  ;;  %969 = vrot.lane.b32.xlu1 %v940_v42, %s2379_s19 }
  0xe1   : > { %963 = vrot.lane.b32.xlu0 %v937_v46, %s2379_s19  ;;  %v1708_v46 = vrot.slane %v1704_v5, %v1678_v24 }
  0xe2   : > { %1551 = vmatprep.subr.bf16.mxu1 %v2152_v58  ;;  %v2754_v63 = vpop.permute.xlu1 %659  ;;  %v687_v21 = vsel %vm484_vm0, %v675_v59, %v676_v54 }
  0xe3   : > { %1552 = vmatpush1.bf16.msra.mxu1 %v2151_v56  ;;  %v679_v7 = vrot.slane %v2754_v63, 4  ;;  %v658_v18 = vpop.permute.xlu0 %657  ;;  %v688_v32 = vsel %vm486_vm2, %v652_v55, %v687_v21 }
  0xe4   : > { %v678_v22 = vrot.slane %v658_v18, 4  ;;  %1113 = vbcast.lane.b32.xlu1 %v2083_v1, 264 }
  0xe5   : > { %1109 = vbcast.lane.b32.xlu0 %v2083_v1, 256 }
  0xe6   : > { %v691_v28 = vsel %vm484_vm0, %v678_v22, %v679_v7  ;;  %v674_v30 = vpop.permute.xlu1 %673  ;;  %2159 = vmatmul.mubr.msk.bf16.vlgmr.msra.gmra.mxu1 %vm1490_vm3, %v2752_v61 }
  0xe7   : > { %v692_v35 = vsel %vm486_vm2, %v658_v18, %v691_v28  ;;  %v686_v37 = vrot.slane %v674_v30, 4  ;;  %v668_v39 = vpop.permute.xlu0 %667  ;;  %1612 = vmatprep.mubr.bf16.mxu1 %v2710_v2 }
  0xe8   : > { %v2111_v40 = vcombine.low %v688_v32, %v692_v35  ;;  %v2112_v41 = vcombine.high %v688_v32, %v692_v35  ;;  %v683_v42 = vrot.slane %v668_v39, 4  ;;  %1761 = vbcast.lane.b32.xlu1 %v1755_v23, 264 }
  0xe9   : > { %v701_v43 = vsel %vm484_vm0, %v685_v0, %v686_v37  ;;  %1757 = vbcast.lane.b32.xlu0 %v1755_v23, 256 }
  0xea   : > { %v697_v49 = vsel %vm484_vm0, %v682_v57, %v683_v42  ;;  %1496 = vmatprep.subr.bf16.mxu0 %v2112_v41  ;;  %v2778_v51 = vpop.permute.xlu1 %572  ;;  %v702_v2 = vsel %vm486_vm2, %v2707_v62, %v701_v43 }
  0xeb   : > { %1497 = vmatpush1.bf16.msra.mxu0 %v2111_v40  ;;  %v571_v53 = vpop.permute.xlu0 %570  ;;  %v698_v55 = vsel %vm486_vm2, %v2695_v52, %v697_v49  ;;  %v589_v0 = vrot.slane %v2778_v51, 4 }
  0xec   : > { %v588_v56 = vrot.slane %v571_v53, 4  ;;  %v2117_v58 = vcombine.low %v698_v55, %v702_v2  ;;  %v2118_v59 = vcombine.high %v698_v55, %v702_v2  ;;  %1714 = vbcast.lane.b32.xlu1 %v1708_v46, 264 }
  0xed   : > { %1710 = vbcast.lane.b32.xlu0 %v1708_v46, 256 }
  0xee   : > { %1580 = vmatprep.subr.bf16.mxu1 %v2118_v59  ;;  %v579_v57 = vpop.permute.xlu1 %578  ;;  %v603_v18 = vsel %vm484_vm0, %v588_v56, %v589_v0 }
  0xef   : > { %v592_v1 = vrot.slane %v579_v57, 4  ;;  %1581 = vmatpush1.bf16.msra.mxu1 %v2117_v58  ;;  %v577_v5 = vpop.permute.xlu0 %576  ;;  %v604_v52 = vsel %vm595_vm1, %v571_v53, %v603_v18 }
  0xf0   : > { %v591_v62 = vrot.slane %v577_v5, 4 }
  0xf2   : > { %v607_v21 = vsel %vm484_vm0, %v591_v62, %v592_v1  ;;  %v662_v22 = vpop.permute.xlu1 %661 }
  0xf3   : > { %v608_v23 = vsel %vm595_vm1, %v577_v5, %v607_v21  ;;  %v680_v28 = vrot.slane %v662_v22, 4  ;;  %v656_v30 = vpop.permute.xlu0 %655 }
  0xf4   : > { %v2107_v32 = vcombine.low %v604_v52, %v608_v23  ;;  %v2108_v35 = vcombine.high %v604_v52, %v608_v23  ;;  %v677_v37 = vrot.slane %v656_v30, 4 }
  0xf5   : > { %v693_v39 = vsel %vm484_vm0, %v679_v7, %v680_v28 }
  0xf6   : > { %v689_v40 = vsel %vm484_vm0, %v676_v54, %v677_v37  ;;  %1498 = vmatprep.subr.bf16.mxu0 %v2108_v35  ;;  %v561_v41 = vpop.permute.xlu1 %560  ;;  %v694_v42 = vsel %vm486_vm2, %v2754_v63, %v693_v39 }
  0xf7   : > { %1499 = vmatpush1.bf16.msra.mxu0 %v2107_v32  ;;  %v559_v43 = vpop.permute.xlu0 %558  ;;  %v690_v46 = vsel %vm486_vm2, %v2739_v44, %v689_v40  ;;  %v583_v49 = vrot.slane %v561_v41, 4 }
  0xf8   : > { %v582_v2 = vrot.slane %v559_v43, 4  ;;  %v2113_v53 = vcombine.low %v690_v46, %v694_v42  ;;  %v2114_v55 = vcombine.high %v690_v46, %v694_v42 }
  0xfa   : > { %1582 = vmatprep.subr.bf16.mxu1 %v2114_v55  ;;  %v567_v7 = vpop.permute.xlu1 %566  ;;  %v594_v54 = vsel %vm484_vm0, %v582_v2, %v583_v49 }
  0xfb   : > { %1583 = vmatpush1.bf16.msra.mxu1 %v2113_v53  ;;  %v586_v56 = vrot.slane %v567_v7, 4  ;;  %v565_v58 = vpop.permute.xlu0 %564  ;;  %v596_v18 = vsel %vm595_vm1, %v559_v43, %v594_v54 }
  0xfc   : > { %v585_v59 = vrot.slane %v565_v58, 4 }
  0xfe   : > { %v599_v5 = vsel %vm484_vm0, %v585_v59, %v586_v56  ;;  %v581_v63 = vpop.permute.xlu1 %580 }
  0xff   : > { %v600_v62 = vsel %vm595_vm1, %v565_v58, %v599_v5  ;;  %v593_v44 = vrot.slane %v581_v63, 4  ;;  %v575_v21 = vpop.permute.xlu0 %574 }
 0x100   : > { %v2103_v22 = vcombine.low %v596_v18, %v600_v62  ;;  %v2104_v52 = vcombine.high %v596_v18, %v600_v62  ;;  %v590_v23 = vrot.slane %v575_v21, 4 }
 0x101   : > { %v609_v28 = vsel %vm484_vm0, %v592_v1, %v593_v44 }
 0x102   : > { %v605_v30 = vsel %vm484_vm0, %v589_v0, %v590_v23  ;;  %1500 = vmatprep.subr.bf16.mxu0 %v2104_v52  ;;  %v569_v32 = vpop.permute.xlu1 %568  ;;  %v610_v35 = vsel %vm595_vm1, %v579_v57, %v609_v28 }
 0x103   : > { %v587_v37 = vrot.slane %v569_v32, 4  ;;  %1501 = vmatpush1.bf16.msra.mxu0 %v2103_v22  ;;  %v563_v39 = vpop.permute.xlu0 %562  ;;  %v606_v40 = vsel %vm595_vm1, %v2778_v51, %v605_v30  ;;  %v2102_v51 = vcombine.high %v2556_v10, %v2552_v9 }
 0x104   : > { %v584_v42 = vrot.slane %v563_v39, 4  ;;  %v2109_v43 = vcombine.low %v606_v40, %v610_v35  ;;  %v2110_v46 = vcombine.high %v606_v40, %v610_v35  ;;  %1502 = vmatprep.subr.bf16.mxu0 %v2100_v25 }
 0x105   : > { %v601_v1 = vsel %vm484_vm0, %v586_v56, %v587_v37 }
 0x106   : > { %v597_v0 = vsel %vm484_vm0, %v583_v49, %v584_v42  ;;  %1584 = vmatprep.subr.bf16.mxu1 %v2110_v46  ;;  %v463_v2 = vpop.permute.xlu1 %462  ;;  %v602_v57 = vsel %vm595_vm1, %v567_v7, %v601_v1 }
 0x107   : > { %1585 = vmatpush1.bf16.msra.mxu1 %v2109_v43  ;;  %v461_v53 = vpop.permute.xlu0 %460  ;;  %v598_v55 = vsel %vm595_vm1, %v561_v41, %v597_v0  ;;  %1503 = vmatpush1.bf16.msra.mxu0 %v2099_v27  ;;  %v479_v25 = vrot.slane %v463_v2, 4 }
 0x108   : > { %v478_v58 = vrot.slane %v461_v53, 4  ;;  %v2105_v56 = vcombine.low %v598_v55, %v602_v57  ;;  %v2106_v54 = vcombine.high %v598_v55, %v602_v57  ;;  %1504 = vmatprep.subr.bf16.mxu0 %v2096_v29 }
 0x10a   : > { %1586 = vmatprep.subr.bf16.mxu1 %v2106_v54  ;;  %v469_v49 = vpop.permute.xlu1 %468  ;;  %v494_v14 = vsel %vm484_vm0, %v478_v58, %v479_v25 }
 0x10b   : > { %v482_v7 = vrot.slane %v469_v49, 4  ;;  %1587 = vmatpush1.bf16.msra.mxu1 %v2105_v56  ;;  %v467_v41 = vpop.permute.xlu0 %466  ;;  %1505 = vmatpush1.bf16.msra.mxu0 %v2095_v31  ;;  %v495_v29 = vsel %vm486_vm2, %v461_v53, %v494_v14 }
 0x10c   : > { %v481_v27 = vrot.slane %v467_v41, 4  ;;  %1588 = vmatprep.subr.bf16.mxu1 %v2102_v51 }
 0x10e   : > { %v498_v59 = vsel %vm484_vm0, %v481_v27, %v482_v7  ;;  %v451_v5 = vpop.permute.xlu1 %450 }
 0x10f   : > { %v499_v63 = vsel %vm486_vm2, %v467_v41, %v498_v59  ;;  %v449_v18 = vpop.permute.xlu0 %448  ;;  %1589 = vmatpush1.bf16.msra.mxu1 %v2101_v13  ;;  %v473_v20 = vrot.slane %v451_v5, 4 }
 0x110   : > { %v2091_v62 = vcombine.low %v495_v29, %v499_v63  ;;  %v2092_v44 = vcombine.high %v495_v29, %v499_v63  ;;  %v472_v19 = vrot.slane %v449_v18, 4  ;;  %1590 = vmatprep.subr.bf16.mxu1 %v2636_v33 }
 0x112   : > { %1506 = vmatprep.subr.bf16.mxu0 %v2092_v44  ;;  %v457_v9 = vpop.permute.xlu1 %456  ;;  %v485_v21 = vsel %vm484_vm0, %v472_v19, %v473_v20  ;;  %v2146_v19 = vcombine.high %v2580_v15, %v2585_v17 }
 0x113   : > { %v455_v10 = vpop.permute.xlu0 %454  ;;  %1507 = vmatpush1.bf16.msra.mxu0 %v2091_v62  ;;  %v476_v31 = vrot.slane %v457_v9, 4  ;;  %1591 = vmatpush1.bf16.msra.mxu1 %v2640_v34  ;;  %v487_v32 = vsel %vm486_vm2, %v449_v18, %v485_v21 }
 0x114   : > { %v475_v22 = vrot.slane %v455_v10, 4 }
 0x116   : > { %v490_v52 = vsel %vm484_vm0, %v475_v22, %v476_v31  ;;  %v471_v23 = vpop.permute.xlu1 %470 }
 0x117   : > { %v465_v28 = vpop.permute.xlu0 %464  ;;  %v483_v30 = vrot.slane %v471_v23, 4  ;;  %v491_v35 = vsel %vm486_vm2, %v455_v10, %v490_v52 }
 0x118   : > { %v480_v37 = vrot.slane %v465_v28, 4  ;;  %v2088_v39 = vcombine.high %v487_v32, %v491_v35  ;;  %v2087_v40 = vcombine.low %v487_v32, %v491_v35 }
 0x119   : > { %v500_v42 = vsel %vm484_vm0, %v482_v7, %v483_v30 }
 0x11a   : > { %v496_v43 = vsel %vm484_vm0, %v479_v25, %v480_v37  ;;  %1508 = vmatprep.subr.bf16.mxu0 %v2088_v39  ;;  %v459_v46 = vpop.permute.xlu1 %458  ;;  %v501_v1 = vsel %vm486_vm2, %v469_v49, %v500_v42 }
 0x11b   : > { %v453_v0 = vpop.permute.xlu0 %452  ;;  %1509 = vmatpush1.bf16.msra.mxu0 %v2087_v40  ;;  %v477_v57 = vrot.slane %v459_v46, 4  ;;  %v497_v53 = vsel %vm486_vm2, %v463_v2, %v496_v43  ;;  %v2150_v2 = vcombine.high %v2562_v12, %v2560_v11 }
 0x11c   : > { %v474_v55 = vrot.slane %v453_v0, 4  ;;  %v2093_v58 = vcombine.low %v497_v53, %v501_v1  ;;  %v2094_v56 = vcombine.high %v497_v53, %v501_v1  ;;  %1510 = vmatprep.subr.bf16.mxu0 %v2102_v51 }
 0x11d   : > { %v492_v54 = vsel %vm484_vm0, %v476_v31, %v477_v57 }
 0x11e   : > { %v488_v41 = vsel %vm484_vm0, %v473_v20, %v474_v55  ;;  %1592 = vmatprep.subr.bf16.mxu1 %v2094_v56  ;;  %v866_v7 = vpop.permute.xlu1 %865  ;;  %v493_v25 = vsel %vm486_vm2, %v457_v9, %v492_v54 }
 0x11f   : > { %v864_v14 = vpop.permute.xlu0 %863  ;;  %1593 = vmatpush1.bf16.msra.mxu1 %v2093_v58  ;;  %v489_v49 = vsel %vm486_vm2, %v451_v5, %v488_v41  ;;  %1511 = vmatpush2.bf16.msra.mxu0 %v2101_v13  ;;  %v882_v59 = vrot.slane %v866_v7, 4  ;;  %v2149_v5 = vcombine.low %v2562_v12, %v2560_v11  ;;  %v2145_v11 = vcombine.low %v2580_v15, %v2585_v17 }
 0x120   : > { %v881_v27 = vrot.slane %v864_v14, 4  ;;  %v2089_v29 = vcombine.low %v489_v49, %v493_v25  ;;  %v2090_v51 = vcombine.high %v489_v49, %v493_v25  ;;  %1512 = vmatprep.subr.bf16.mxu0 %v2636_v33 }
 0x122   : > { %1594 = vmatprep.subr.bf16.mxu1 %v2090_v51  ;;  %v872_v63 = vpop.permute.xlu1 %871  ;;  %v895_v13 = vsel %vm484_vm0, %v881_v27, %v882_v59 }
 0x123   : > { %v870_v18 = vpop.permute.xlu0 %869  ;;  %1595 = vmatpush1.bf16.msra.mxu1 %v2089_v29  ;;  %v885_v62 = vrot.slane %v872_v63, 4  ;;  %1513 = vmatpush2.bf16.msra.mxu0 %v2640_v34  ;;  %v896_v10 = vsel %vm486_vm2, %v864_v14, %v895_v13 }
 0x124   : > { %v884_v44 = vrot.slane %v870_v18, 4  ;;  %1596 = vmatprep.subr.bf16.mxu1 %v2150_v2 }
 0x126   : > { %v899_v20 = vsel %vm484_vm0, %v884_v44, %v885_v62  ;;  %v2854_v33 = vpop.permute.xlu1 %853 }
 0x127   : > { %v852_v9 = vpop.permute.xlu0 %851  ;;  %v900_v31 = vsel %vm486_vm2, %v870_v18, %v899_v20  ;;  %1597 = vmatpush2.bf16.msra.mxu1 %v2149_v5  ;;  %v876_v34 = vrot.slane %v2854_v33, 4 }
 0x128   : > { %v875_v12 = vrot.slane %v852_v9, 4  ;;  %v2140_v21 = vcombine.high %v896_v10, %v900_v31  ;;  %v2139_v22 = vcombine.low %v896_v10, %v900_v31  ;;  %1598 = vmatprep.subr.bf16.mxu1 %v2146_v19 }
 0x12a   : > { %1514 = vmatprep.subr.bf16.mxu0 %v2140_v21  ;;  %v860_v52 = vpop.permute.xlu1 %859  ;;  %v887_v30 = vsel %vm484_vm0, %v875_v12, %v876_v34 }
 0x12b   : > { %v858_v23 = vpop.permute.xlu0 %857  ;;  %1515 = vmatpush2.bf16.msra.mxu0 %v2139_v22  ;;  %v879_v28 = vrot.slane %v860_v52, 4  ;;  %1599 = vmatpush2.bf16.msra.mxu1 %v2145_v11  ;;  %v888_v17 = vsel %vm486_vm2, %v852_v9, %v887_v30 }
 0x12c   : > { %v878_v32 = vrot.slane %v858_v23, 4 }
 0x12e   : > { %v891_v35 = vsel %vm484_vm0, %v878_v32, %v879_v28  ;;  %v874_v37 = vpop.permute.xlu1 %873 }
 0x12f   : > { %v868_v39 = vpop.permute.xlu0 %867  ;;  %v886_v15 = vrot.slane %v874_v37, 4  ;;  %v892_v40 = vsel %vm486_vm2, %v858_v23, %v891_v35  ;;  %v725_v37 = vld [vmem:[#allocation2 + $0x68] sm:$0xff] }
 0x130   : > { %v883_v42 = vrot.slane %v868_v39, 4  ;;  %v2136_v43 = vcombine.high %v888_v17, %v892_v40  ;;  %v2135_v46 = vcombine.low %v888_v17, %v892_v40 }
 0x131   : > { %v901_v1 = vsel %vm484_vm0, %v885_v62, %v886_v15 }
 0x132   : > { %v897_v0 = vsel %vm484_vm0, %v882_v59, %v883_v42  ;;  %1516 = vmatprep.subr.bf16.mxu0 %v2136_v43  ;;  %v2867_v57 = vpop.permute.xlu1 %773  ;;  %v902_v53 = vsel %vm486_vm2, %v872_v63, %v901_v1  ;;  %v2124_v1 = vcombine.high %v2532_v3, %v725_v37 }
 0x133   : > { %v772_v55 = vpop.permute.xlu0 %771  ;;  %1517 = vmatpush2.bf16.msra.mxu0 %v2135_v46  ;;  %v898_v58 = vsel %vm486_vm2, %v866_v7, %v897_v0  ;;  %v790_v54 = vrot.slane %v2867_v57, 4 }
 0x134   : > { %v789_v56 = vrot.slane %v772_v55, 4  ;;  %v2141_v41 = vcombine.low %v898_v58, %v902_v53  ;;  %v2142_v25 = vcombine.high %v898_v58, %v902_v53 }
 0x136   : > { %1600 = vmatprep.subr.bf16.mxu1 %v2142_v25  ;;  %v780_v14 = vpop.permute.xlu1 %779  ;;  %v803_v27 = vsel %vm484_vm0, %v789_v56, %v790_v54 }
 0x137   : > { %v778_v49 = vpop.permute.xlu0 %777  ;;  %1601 = vmatpush2.bf16.msra.mxu1 %v2141_v41  ;;  %v793_v2 = vrot.slane %v780_v14, 4  ;;  %v804_v7 = vsel %vm595_vm1, %v772_v55, %v803_v27 }
 0x138   : > { %v792_v59 = vrot.slane %v778_v49, 4 }
 0x13a   : > { %v807_v29 = vsel %vm484_vm0, %v792_v59, %v793_v2  ;;  %v862_v51 = vpop.permute.xlu1 %861 }
 0x13b   : > { %v856_v63 = vpop.permute.xlu0 %855  ;;  %v880_v18 = vrot.slane %v862_v51, 4  ;;  %v808_v62 = vsel %vm595_vm1, %v778_v49, %v807_v29  ;;  %v2123_v49 = vcombine.low %v2532_v3, %v725_v37  ;;  %v724_v51 = vld [vmem:[#allocation2 + $0x50] sm:$0xff] }
 0x13c   : > { %v877_v5 = vrot.slane %v856_v63, 4  ;;  %v2132_v13 = vcombine.high %v804_v7, %v808_v62  ;;  %v2131_v44 = vcombine.low %v804_v7, %v808_v62  ;;  %v726_v63 = vld [vmem:[#allocation2 + $0x70] sm:$0xff] }
 0x13d   : > { %v893_v19 = vsel %vm484_vm0, %v879_v28, %v880_v18 }
 0x13e   : > { %v889_v20 = vsel %vm484_vm0, %v876_v34, %v877_v5  ;;  %1518 = vmatprep.subr.bf16.mxu0 %v2132_v13  ;;  %v762_v9 = vpop.permute.xlu1 %761  ;;  %v894_v10 = vsel %vm486_vm2, %v860_v52, %v893_v19  ;;  %v2119_v5 = vcombine.low %v2541_v6, %v2548_v8 }
 0x13f   : > { %v760_v31 = vpop.permute.xlu0 %759  ;;  %1519 = vmatpush2.bf16.msra.mxu0 %v2131_v44  ;;  %v890_v11 = vsel %vm486_vm2, %v2854_v33, %v889_v20  ;;  %v784_v21 = vrot.slane %v762_v9, 4  ;;  %v2126_v20 = vcombine.high %v724_v51, %v726_v63 }
 0x140   : > { %v783_v12 = vrot.slane %v760_v31, 4  ;;  %v2137_v22 = vcombine.low %v890_v11, %v894_v10  ;;  %v2138_v23 = vcombine.high %v890_v11, %v894_v10  ;;  %v722_v11 = vld [vmem:[#allocation2 + $0x30] sm:$0xff] }
 0x142   : > { %1602 = vmatprep.subr.bf16.mxu1 %v2138_v23  ;;  %v768_v30 = vpop.permute.xlu1 %767  ;;  %v795_v34 = vsel %vm484_vm0, %v783_v12, %v784_v21  ;;  %v2125_v23 = vcombine.low %v724_v51, %v726_v63 }
 0x143   : > { %v766_v32 = vpop.permute.xlu0 %765  ;;  %1603 = vmatpush2.bf16.msra.mxu1 %v2137_v22  ;;  %v787_v28 = vrot.slane %v768_v30, 4  ;;  %v796_v33 = vsel %vm595_vm1, %v760_v31, %v795_v34  ;;  %v720_v31 = vld [vmem:[#allocation2 + $0x10] sm:$0xff] }
 0x144   : > { %v786_v35 = vrot.slane %v766_v32, 4  ;;  %v2122_v34 = vcombine.high %v720_v31, %v722_v11 }
 0x146   : > { %v799_v52 = vsel %vm484_vm0, %v786_v35, %v787_v28  ;;  %v782_v39 = vpop.permute.xlu1 %781 }
 0x147   : > { %v776_v15 = vpop.permute.xlu0 %775  ;;  %v794_v17 = vrot.slane %v782_v39, 4  ;;  %v800_v40 = vsel %vm595_vm1, %v766_v32, %v799_v52 }
 0x148   : > { %v791_v42 = vrot.slane %v776_v15, 4  ;;  %v2128_v43 = vcombine.high %v796_v33, %v800_v40  ;;  %v2127_v46 = vcombine.low %v796_v33, %v800_v40  ;;  %v2920_v15 = vld [vmem:[#allocation2] sm:$0xff] }
 0x149   : > { %v809_v0 = vsel %vm484_vm0, %v793_v2, %v794_v17  ;;  %v2120_v2 = vcombine.high %v2541_v6, %v2548_v8  ;;  %v1674_v33 = vld [vmem:[%s2991_s6] sm:$0xf] }
 0x14a   : > { %v805_v53 = vsel %vm484_vm0, %v790_v54, %v791_v42  ;;  %1520 = vmatprep.subr.bf16.mxu0 %v2128_v43  ;;  %v770_v55 = vpop.permute.xlu1 %769  ;;  %v810_v58 = vsel %vm595_vm1, %v780_v14, %v809_v0 }
 0x14b   : > { %v764_v56 = vpop.permute.xlu0 %763  ;;  %1521 = vmatpush2.bf16.msra.mxu0 %v2127_v46  ;;  %v788_v41 = vrot.slane %v770_v55, 4  ;;  %v806_v25 = vsel %vm595_vm1, %v2867_v57, %v805_v53 }
 0x14c   : > { %v785_v27 = vrot.slane %v764_v56, 4  ;;  %1522 = vmatprep.subr.bf16.mxu0 %v2124_v1  ;;  %v2133_v59 = vcombine.low %v806_v25, %v810_v58  ;;  %v2134_v29 = vcombine.high %v806_v25, %v810_v58  ;;  %v1679_v1 = vrot.slane %v1674_v33, %v1678_v24 }
 0x14d   : > { %v801_v54 = vsel %vm484_vm0, %v787_v28, %v788_v41  ;;  %v1683_v58 = vrot.slane %v1674_v33, %v1682_v4 }
 0x14e   : > { %v797_v14 = vsel %vm484_vm0, %v784_v21, %v785_v27  ;;  %1604 = vmatprep.subr.bf16.mxu1 %v2134_v29  ;;  %v982_v18 = vpop.permute.xlu1 %981  ;;  %v802_v7 = vsel %vm595_vm1, %v768_v30, %v801_v54  ;;  %v2240_v21 = vld [vmem:[#allocation4] ss:$12 sps:$4 sm:$0xff]  }
 0x14f   : > { %v976_v57 = vpop.permute.xlu0 %975  ;;  %1523 = vmatpush2.bf16.msra.mxu0 %v2123_v49  ;;  %1605 = vmatpush2.bf16.msra.mxu1 %v2133_v59  ;;  %v994_v3 = vrot.slane %v982_v18, 4  ;;  %v798_v62 = vsel %vm595_vm1, %v762_v9, %v797_v14  ;;  %v1686_v18 = vsub.s32 2, %v2749_v60 }
 0x150   : > { %v991_v13 = vrot.slane %v976_v57, 4  ;;  %1524 = vmatprep.subr.bf16.mxu0 %v2120_v2  ;;  %v2129_v44 = vcombine.low %v798_v62, %v802_v7  ;;  %v2130_v19 = vcombine.high %v798_v62, %v802_v7  ;;  %v1690_v7 = vsub.s32 3, %v2749_v60 }
 0x151   : > { %v1009_v10 = vsel %vm484_vm0, %v993_v47, %v994_v3  ;;  %v1687_v60 = vrot.slane %v1674_v33, %v1686_v18 }
 0x152   : > { %v1005_v12 = vsel %vm484_vm0, %v990_v50, %v991_v13  ;;  %1606 = vmatprep.subr.bf16.mxu1 %v2130_v19  ;;  %v970_v9 = vpop.permute.xlu1 %969  ;;  %v1010_v6 = vsel %vm595_vm1, %v2682_v45, %v1009_v10 }
 0x153   : > { %v964_v8 = vpop.permute.xlu0 %963  ;;  %1525 = vmatpush2.bf16.msra.mxu0 %v2119_v5  ;;  %1607 = vmatpush2.bf16.msra.mxu1 %v2129_v44  ;;  %v988_v22 = vrot.slane %v970_v9, 4  ;;  %v1006_v47 = vsel %vm595_vm1, %v2685_v48, %v1005_v12  ;;  %v2121_v48 = vcombine.low %v720_v31, %v722_v11  ;;  %v1691_v9 = vrot.slane %v1674_v33, %v1690_v7 }
 0x154   : > { %v985_v30 = vrot.slane %v964_v8, 4  ;;  %1608 = vmatprep.subr.bf16.mxu1 %v2126_v20  ;;  %v2157_v32 = vcombine.low %v1006_v47, %v1010_v6  ;;  %v2158_v28 = vcombine.high %v1006_v47, %v1010_v6 }
 0x155   : > { %v1001_v50 = vsel %vm484_vm0, %v987_v38, %v988_v22 }
 0x156   : > { %v997_v45 = vsel %vm484_vm0, %v984_v26, %v985_v30  ;;  %1527 = vmatmul.mubr.bf16.vlgmr.msra.gmra.mxu0 %v2240_v21  ;;  %1635 = vmatprep.subr.bf16.mxu0 %v2158_v28  ;;  %v1002_v35 = vsel %vm595_vm1, %v2728_v36, %v1001_v50  ;;  %v2165_v26 = vld [vmem:[#allocation9] ss:$0 sm:$0xff]  ;;  %v1114_v17 = vpop.permute.xlu1 %1113 }
 0x157   : > { %1609 = vmatpush2.bf16.msra.mxu1 %v2125_v23  ;;  %1636 = vmatpush1.bf16.msra.mxu0 %v2157_v32  ;;  %v998_v37 = vsel %vm595_vm1, %v2718_v16, %v997_v45  ;;  %v1110_v36 = vpop.permute.xlu0 %1109 }
 0x158   : > { %1610 = vmatprep.subr.bf16.mxu1 %v2122_v34  ;;  %v2153_v52 = vcombine.low %v998_v37, %v1002_v35  ;;  %v2154_v39 = vcombine.high %v998_v37, %v1002_v35  ;;  %1655 = vmatprep.mubr.bf16.mxu0 %v2920_v15 }
 0x159   : > { %1784 = vbcast.lane.b32.xlu0 %v2165_v26, 256  ;;  %1788 = vbcast.lane.b32.xlu1 %v2165_v26, 264 }
 0x15a   : > { %1637 = vmatprep.subr.bf16.mxu0 %v2154_v39  ;;  %v2936_v49 = vpop.permute.xlu1 %1761 }
 0x15b   : > { %1611 = vmatpush2.bf16.msra.mxu1 %v2121_v48  ;;  %1638 = vmatpush1.bf16.msra.mxu0 %v2153_v52  ;;  %v2930_v43 = vpop.permute.xlu0 %1757 }
 0x15d   : > { %1792 = vbcast.lane.b32.xlu0 %v2165_v26, 272 }
 0x15e   : > { %1613 = vmatmul.mubr.bf16.vlgmr.msra.gmra.mxu1 %v2240_v21  ;;  %2160 = vmatmul.mubr.msk.bf16.vlgmr.msra.gmra.mxu0 %vm1490_vm3, %v2752_v61  ;;  %v1715_v31 = vpop.permute.xlu1 %1714 }
 0x15f   : > { %1841 = vmatprep.mubr.bf16.mxu0 %v2920_v15  ;;  %1892 = vmatprep.mubr.bf16.mxu1 %v2920_v15  ;;  %v1711_v63 = vpop.permute.xlu0 %1710 }
 0x1a6   : > { %v1571_v16 = vpop.f32.mrf.mxu1 }
 0x1a8   : > { %v1573_v38 = vpop.f32.mrf.mxu1 }
 0x1aa   : > { %v1575_v61 = vpop.f32.mrf.mxu1 }
 0x1ac   : > { %v1577_v27 = vpop.f32.mrf.mxu1 }
 0x1cb   : > { %v1789_v18 = vpop.permute.xlu1 %1788 }
 0x216   : > { %v1528_v40 = vpop.f32.mrf.mxu0 }
 0x217   : > { %v1529_v42 = vadd.f32 %v1528_v40, %v1110_v36 }
 0x218   : > { %v1530_v46 = vpop.f32.mrf.mxu0 }
 0x219   : > { %v1572_v0 = vadd.f32 %v1571_v16, %v1529_v42  ;;  %v1531_v53 = vadd.f32 %v1530_v46, %v1110_v36 }
 0x21a   : > { %v1532_v55 = vpop.f32.mrf.mxu0 }
 0x21b   : > { %v1666_v56 = vmax.f32 %v1572_v0, 0.0  ;;  %v1574_v41 = vadd.f32 %v1573_v38, %v1531_v53  ;;  %v1533_v25 = vadd.f32 %v1532_v55, %v1114_v17  ;;  %v2243_v0 = vld [vmem:[#allocation8] sm:$0xff]  }
 0x21c   : > { %v1534_v59 = vpop.f32.mrf.mxu0 }
 0x21d   : > { %v1696_v29 = vmul.f32 %v1679_v1, %v1666_v56  ;;  %v1667_v2 = vmax.f32 %v1574_v41, 0.0  ;;  %v1576_v54 = vadd.f32 %v1575_v61, %v1533_v25  ;;  %v1535_v51 = vadd.f32 %v1534_v59, %v1114_v17 }
 0x21e   : > { %v1614_v24 = vpop.f32.mrf.mxu1  ;;  %v1657_v14 = vpop.f32.mrf.mxu0 }
 0x21f   : > { %v1697_v4 = vmul.f32 %v1683_v58, %v1667_v2  ;;  %v1670_v57 = vmax.f32 %v1576_v54, 0.0  ;;  %v1578_v3 = vadd.f32 %v1577_v27, %v1535_v51  ;;  %v1615_v62 = vadd.f32 %v1614_v24, %v1110_v36 }
 0x220   : > { %v1616_v5 = vpop.f32.mrf.mxu1  ;;  %v1659_v13 = vpop.f32.mrf.mxu0  ;;  %v1716_v19 = vmul.f32 %v1711_v63, %v1696_v29  ;;  %v1763_v52 = vmul.f32 %v2930_v43, %v1696_v29 }
 0x221   : > { %v1671_v44 = vmax.f32 %v1578_v3, 0.0  ;;  %v1717_v20 = vmul.f32 %v1711_v63, %v1697_v4  ;;  %v1700_v10 = vmul.f32 %v1679_v1, %v1670_v57  ;;  %v1658_v11 = vadd.f32 %v1657_v14, %v1615_v62 }
 0x222   : > { %v1617_v12 = vadd.f32 %v1616_v5, %v1110_v36  ;;  %v1618_v21 = vpop.f32.mrf.mxu1  ;;  %v1661_v6 = vpop.f32.mrf.mxu0  ;;  %v1764_v8 = vmul.f32 %v2930_v43, %v1697_v4 }
 0x223   : > { %v1701_v22 = vmul.f32 %v1683_v58, %v1671_v44  ;;  %v2176_v23 = vpack.c.bf16 %v1717_v20, %v1716_v19  ;;  %v1619_v47 = vadd.f32 %v1618_v21, %v1114_v17  ;;  %v1668_v30 = vmax.f32 %v1658_v11, 0.0 }
 0x224   : > { %v1767_v32 = vmul.f32 %v2936_v49, %v1700_v10  ;;  %v1660_v28 = vadd.f32 %v1659_v13, %v1617_v12  ;;  %v1720_v34 = vmul.f32 %v1715_v31, %v1700_v10  ;;  %v1620_v50 = vpop.f32.mrf.mxu1  ;;  %v1663_v16 = vpop.f32.mrf.mxu0 }
 0x225   : > { %1748 = vst [vmem:[%s2944_s11] sm:$0xff] %v2176_v23  ;;  %v1768_v45 = vmul.f32 %v2936_v49, %v1701_v22  ;;  %v1662_v35 = vadd.f32 %v1661_v6, %v1619_v47  ;;  %v1721_v48 = vmul.f32 %v1715_v31, %v1701_v22  ;;  %v1621_v37 = vadd.f32 %v1620_v50, %v1114_v17 }
 0x226   : > { %v1698_v39 = vmul.f32 %v1687_v60, %v1668_v30  ;;  %v1669_v26 = vmax.f32 %v1660_v28, 0.0  ;;  %v1771_v61 = vpack.c.bf16 %v1767_v32, %v1763_v52 }
 0x227   : > { %v1672_v36 = vmax.f32 %v1662_v35, 0.0  ;;  %v2178_v38 = vpack.c.bf16 %v1721_v48, %v1720_v34  ;;  %v1664_v33 = vadd.f32 %v1663_v16, %v1621_v37  ;;  %v1772_v40 = vpack.c.bf16 %v1768_v45, %v1764_v8 }
 0x228   : > { %v1699_v42 = vmul.f32 %v1691_v9, %v1669_v26  ;;  %v1718_v53 = vmul.f32 %v1711_v63, %v1698_v39  ;;  %v1765_v29 = vmul.f32 %v2930_v43, %v1698_v39 }
 0x229   : > { %v1702_v46 = vmul.f32 %v1687_v60, %v1672_v36  ;;  %1750 = vst [vmem:[%s2944_s11 + $0x10] sm:$0xff] %v2178_v38  ;;  %v1673_v1 = vmax.f32 %v1664_v33, 0.0  ;;  %1823 = vmatprep.subr.bf16.mxu0 %v1772_v40 }
 0x22a   : > { %v1719_v55 = vmul.f32 %v1711_v63, %v1699_v42  ;;  %1824 = vmatpush1.bf16.msra.mxu0 %v1771_v61  ;;  %v1766_v41 = vmul.f32 %v2930_v43, %v1699_v42  ;;  %v2244_v63 = vld [vmem:[#allocation8 + $0x8] ss:$0 sps:$4 sm:$0xff]   ;;  %v1785_v43 = vpop.permute.xlu0 %1784 }
 0x22b   : > { %v1703_v17 = vmul.f32 %v1691_v9, %v1673_v1  ;;  %v1769_v56 = vmul.f32 %v2936_v49, %v1702_v46  ;;  %v1722_v25 = vmul.f32 %v1715_v31, %v1702_v46 }
 0x22c   : > { %v2177_v58 = vpack.c.bf16 %v1719_v55, %v1718_v53 }
 0x22d   : > { %v1723_v27 = vmul.f32 %v1715_v31, %v1703_v17  ;;  %v1770_v59 = vmul.f32 %v2936_v49, %v1703_v17  ;;  %2168 = vmatmul.mubr.msk.bf16.vlgmr.msra.gmra.mxu0 %vm1802_vm4, %v2243_v0  ;;  %v1773_v51 = vpack.c.bf16 %v1769_v56, %v1765_v29 }
 0x22e   : > { %1749 = vst [vmem:[%s2944_s11 + $0x8] sm:$0xff] %v2177_v58  ;;  %1851 = vmatprep.mubr.bf16.mxu0 %v2920_v15  ;;  %v1793_v3 = vpop.permute.xlu0 %1792 }
 0x22f   : > { %v2179_v2 = vpack.c.bf16 %v1723_v27, %v1722_v25  ;;  %v1774_v54 = vpack.c.bf16 %v1770_v59, %v1766_v41 }
 0x231   : > { %1751 = vst [vmem:[%s2944_s11 + $0x18] sm:$0xff] %v2179_v2  ;;  %1874 = vmatprep.subr.bf16.mxu1 %v1774_v54 }
 0x232   : > { %1875 = vmatpush1.bf16.msra.mxu1 %v1773_v51 }
 0x235   : > { %2170 = vmatmul.mubr.msk.bf16.vlgmr.msra.gmra.mxu1 %vm1802_vm4, %v2243_v0  ;;  %2169 = vmatmul.mubr.msk.bf16.gmra.mxu0 %vm1802_vm4, %v2244_v63 }
 0x236   : > { %1902 = vmatprep.mubr.bf16.mxu1 %v2920_v15 }
 0x23d   : > { %2171 = vmatmul.mubr.msk.bf16.gmra.mxu1 %vm1802_vm4, %v2244_v63 }
 0x2ed   : > { %v1843_v49 = vpop.f32.mrf.mxu0 }
 0x2ee   : > { %v1844_v24 = vadd.f32 %v1843_v49, %v1785_v43 }
 0x2ef   : > { %v1845_v14 = vpop.f32.mrf.mxu0 }
 0x2f0   : > { %v1846_v7 = vadd.f32 %v1845_v14, %v1785_v43  ;;  %1911 = vst [vmem:[%s2968_s17] sm:$0xff] %v1844_v24 }
 0x2f1   : > { %v1847_v15 = vpop.f32.mrf.mxu0 }
 0x2f2   : > { %1912 = vst [vmem:[%s2968_s17 + $0x8] sm:$0xff] %v1846_v7  ;;  %v1848_v4 = vadd.f32 %v1847_v15, %v1789_v18 }
 0x2f3   : > { %v1849_v57 = vpop.f32.mrf.mxu0 }
 0x2f4   : > { %v1850_v62 = vadd.f32 %v1849_v57, %v1789_v18  ;;  %1915 = vst [vmem:[%s2968_s17 + $0x20] sm:$0xff] %v1848_v4 }
 0x2f5   : > { %v1894_v5 = vpop.f32.mrf.mxu1  ;;  %v1853_v13 = vpop.f32.mrf.mxu0 }
 0x2f6   : > { %v1895_v44 = vadd.f32 %v1894_v5, %v1785_v43  ;;  %1916 = vst [vmem:[%s2968_s17 + $0x28] sm:$0xff] %v1850_v62  ;;  %v1854_v19 = vadd.f32 %v1853_v13, %v1793_v3 }
 0x2f7   : > { %v1896_v20 = vpop.f32.mrf.mxu1  ;;  %v1855_v10 = vpop.f32.mrf.mxu0 }
 0x2f8   : > { %v1897_v31 = vadd.f32 %v1896_v20, %v1785_v43  ;;  %1913 = vst [vmem:[%s2968_s17 + $0x10] sm:$0xff] %v1895_v44  ;;  %v1856_v11 = vadd.f32 %v1855_v10, %v1793_v3  ;;  %1919 = vst [vmem:[%s2968_s17 + $0x40] sm:$0xff] %v1854_v19 }
 0x2f9   : > { %v1898_v60 = vpop.f32.mrf.mxu1  ;;  %v1857_v12 = vpop.f32.mrf.mxu0 }
 0x2fa   : > { %1914 = vst [vmem:[%s2968_s17 + $0x18] sm:$0xff] %v1897_v31  ;;  %v1899_v9 = vadd.f32 %v1898_v60, %v1789_v18  ;;  %1920 = vst [vmem:[%s2968_s17 + $0x48] sm:$0xff] %v1856_v11 }
 0x2fb   : > { %v1900_v21 = vpop.f32.mrf.mxu1  ;;  %v1858_v6 = vpop.f32.mrf.mxu0 }
 0x2fc   : > { %1917 = vst [vmem:[%s2968_s17 + $0x30] sm:$0xff] %v1899_v9  ;;  %v1901_v8 = vadd.f32 %v1900_v21, %v1789_v18 }
 0x2fd   : > { %v1904_v22 = vpop.f32.mrf.mxu1 }
 0x2fe   : > { %1918 = vst [vmem:[%s2968_s17 + $0x38] sm:$0xff] %v1901_v8  ;;  %v1905_v23 = vadd.f32 %v1904_v22, %v1793_v3 }
 0x2ff   : > { %v1906_v47 = vpop.f32.mrf.mxu1 }
 0x300   : > { %v1907_v30 = vadd.f32 %v1906_v47, %v1793_v3  ;;  %1921 = vst [vmem:[%s2968_s17 + $0x50] sm:$0xff] %v1905_v23 }
 0x301   : > { %v1908_v32 = vpop.f32.mrf.mxu1 }
 0x302   : > { %1922 = vst [vmem:[%s2968_s17 + $0x58] sm:$0xff] %v1907_v30 }
 0x303   : > { %v1909_v28 = vpop.f32.mrf.mxu1 }
 0x304 PF: > { %s22_s27 = sadd.s32 1, %s2368_s27  }
 0x305   : > { %p19_p2 = scmp.ge.s32.totalorder %s22_s27, 4  }
 0x307   :  { %21 = sbr.rel (!%p19_p2) target bundleno = 3 (0x3), region = 110 }
 0x30c   :  { %1960 = vsyncpa [#allocation5], 1 }
 0x30d   :  { %1962 = vsyncpa [#allocation5 + $0x1], 1 }
 0x30e   :  { %1963 = vsyncpa [#allocation7], 1 }
 0x30f   :  { %1964 = vsyncpa [#allocation10], 1 }

// kernel: _lambda_.7
= control target key start
LH: loop header
LB: loop body
LE: loop exit
PB: predicated region body
PF: predicated region fallthrough
CT: control target
= control target key end

     0   :  { %s4892_s12 = smov 0   ;;  %s4894_s13 = smov 0   ;;  %s6336_s0 = inlined_call_operand.vmem [shape: f32[2,16,512], index: 0, kind: input, shape index: {}]   ;;  %s6337_s1 = inlined_call_operand.vmem [shape: f32[2,24,512], index: 1, kind: input, shape index: {}]   ;;  %s6338_s2 = inlined_call_operand.vmem [shape: bf16[2,16,512,24], index: 2, kind: output, shape index: {0}]   ;;  %s6339_s3 = inlined_call_operand.vmem [shape: f32[2,16,512], index: 3, kind: output, shape index: {1}]  }
   0x1   :  { %s4896_s14 = smov 0   ;;  %s4898_s15 = smov 0  }
   0x2   :  { %s4900_s16 = smov 0   ;;  %s4902_s17 = smov 0  }
   0x3   :  { %s4904_s18 = smov 0  }
   0x4 LB: > { %s23_s19 = sadd.s32 1, %s4862_s16  ;;  %s26_s20 = sadd.s32 1, %s4866_s17  ;;  %s4870_s18 = sphi %s4904_s18, %s14_s18   ;;  %s4866_s17 = sphi %s4902_s17, %s6347_s17   ;;  %s4862_s16 = sphi %s4900_s16, %s6346_s16   ;;  %s4858_s15 = sphi %s4898_s15, %s6345_s15   ;;  %s4854_s14 = sphi %s4896_s14, %s6344_s14   ;;  %s4850_s13 = sphi %s4894_s13, %s6343_s13   ;;  %s4846_s12 = sphi %s4892_s12, %s6342_s12  }
   0x5   : > { %p24_p0 = scmp.ge.s32.totalorder %s23_s19, 4  ;;  %s4217_s21 = sadd.s32 4294967295, %s4870_s18  }
   0x6   : > { %p42_p1 = scmp.ne.s32.totalorder %s4850_s13, %s4846_s12  ;;  %p43_p2 = scmp.eq.s32.totalorder %s4870_s18, 0 }
   0x7   : > { %s6349_s19 = smov (%p24_p0, %s23_s19), 0  ;;  %s6351_s20 = smov (!%p24_p0, %s26_s20), %s4866_s17 }
   0x8   : > { %p28_p3 = scmp.ge.s32.totalorder %s6351_s20, 2  ;;  %p102_p4 = scmp.eq.s32.totalorder %s4217_s21, 7 }
   0x9   : > { %s31_s22 = ssub.s32 %s4862_s16, %s6349_s19  ;;  %p4938_p5 = por %p43_p2, %p42_p1 }
   0xa   : > { %s6353_s20 = smov (%p28_p3, %s6351_s20), 0  ;;  %p4944_p6 = por %p102_p4, %p42_p1 }
   0xb   : > { %s30_s25 = ssub.s32 %s4866_s17, %s6353_s20  ;;  %s35_s27 = sadd.s32 1, %s4850_s13 }
   0xc   : > { %s32_s26 = sor.u32 %s31_s22, %s30_s25  ;;  %p4220_p8 = scmp.ge.s32.totalorder %s4870_s18, 8 }
   0xd   : > { %p33_p7 = scmp.eq.s32.totalorder %s32_s26, 0 }
   0xe   : > { %152 = sbr.rel (%p4220_p8) target bundleno = 37 (0x25), region = 16 }
   0xf   : > { %s4952_s28 = scalar_select %p33_p7, %s4850_s13, %s35_s27  }
  0x13   : > { %155 = sbr.rel (!%p4938_p5) target bundleno = 27 (0x1b), region = 20  ;;  %s157_s29 = sand.u32 (%p4938_p5), 1, %s4850_s13  }
  0x14   : > { %s4222_s30 = sshll.u32 (%p4938_p5), %s4866_s17, 3  ;;  %s4221_s4 = sshll.u32 (%p4938_p5), %s157_s29, 4 }
  0x15   : > { %s161_s5 = sadd.s32 (%p4938_p5), %s4862_s16, %s4222_s30  ;;  %s159_s10 = scalar_lea.vmem (%p4938_p5), [#allocation2], %s4221_s4 }
  0x16   : > { %s4223_s6 = sshll.u32 (%p4938_p5), %s161_s5, 3 }
  0x17   : > { %s163_s9 = scalar_lea.vmem (%p4938_p5), %s6336_s0, %s4223_s6 }
  0x18   : > { %v194_v0 = vld [vmem:[%s163_s9] sm:$0xff] }
  0x19   : > { %v196_v1 = vld [vmem:[%s163_s9 + $0x20] sm:$0xff]  ;;  %195 = vst [vmem:[%s159_s10] sm:$0xff] %v194_v0 }
  0x1a   : > { %197 = vst [vmem:[%s159_s10 + $0x8] sm:$0xff] %v196_v1 }
  0x1b PF: > { %203 = sbr.rel (!%p4938_p5) target bundleno = 37 (0x25), region = 58  ;;  %s205_s11 = sand.u32 (%p4938_p5), 1, %s4850_s13  }
  0x1c   : > { %s4751_s21 = smul.u32 (%p4938_p5), 12, %s4866_s17 }
  0x1d   : > { %s4750_s22 = smul.u32 (%p4938_p5), 24, %s205_s11 }
  0x1e   : > { %s209_s25 = sadd.s32 (%p4938_p5), %s4862_s16, %s4751_s21 }
  0x1f   : > { %s4224_s26 = sshll.u32 (%p4938_p5), %s209_s25, 3  ;;  %s207_s4 = scalar_lea.vmem (%p4938_p5), [#allocation3], %s4750_s22 }
  0x20   : > { %s211_s30 = scalar_lea.vmem %s6337_s1, %s4224_s26 }
  0x21   : > { %v244_v2 = vld [vmem:[%s211_s30] sm:$0xff] }
  0x22   : > { %v246_v3 = vld [vmem:[%s211_s30 + $0x20] sm:$0xff]  ;;  %245 = vst [vmem:[%s207_s4] sm:$0xff] %v244_v2 }
  0x23   : > { %v248_v4 = vld [vmem:[%s211_s30 + $0x40] sm:$0xff]  ;;  %247 = vst [vmem:[%s207_s4 + $0x8] sm:$0xff] %v246_v3 }
  0x24   : > { %249 = vst [vmem:[%s207_s4 + $0x10] sm:$0xff] %v248_v4 }
  0x25 PF: > { %p4225_p9 = scmp.ge.s32.totalorder %s4870_s18, 1  ;;  %p254_p10 = scmp.lt.s32.totalorder %s4870_s18, 9 }
  0x27   : > { %p255_p11 = pnand %p4225_p9, %p254_p10 }
  0x28   : > { %s4974_s23 = sand.u32 (!%p255_p11), 1, %s4846_s12  }
  0x29   : > { %258 = sbr.rel (%p255_p11) target bundleno = 812 (0x32c), region = 96  ;;  %s4226_s6 = sshll.u32 (!%p255_p11), %s4974_s23, 4 }
  0x2a   : > { %s4752_s5 = smul.u32 (!%p255_p11), 24, %s4974_s23  ;;  %s263_s8 = scalar_lea.vmem (!%p255_p11), [#allocation2], %s4226_s6 }
  0x2b   : > { %s4982_s12 = scalar_lea.vmem (!%p255_p11), [#allocation5], %s4226_s6  ;;  %s4227_s9 = sshll.u32 (!%p255_p11), %s4974_s23, 10 }
  0x2c   : > { %s270_s7 = scalar_lea.vmem (!%p255_p11), [#allocation3], %s4752_s5  ;;  %s5061_s10 = scalar_lea.vmem (!%p255_p11), [#allocation4], %s4227_s9 }
  0x2e   : > { %v329_v5 = vld [vmem:[%s270_s7] sm:$0xff]  ;;  %v330_v9 = vld [vmem:[%s270_s7 + $0x8] sm:$0xff]  ;;  %v331_v12 = vld [vmem:[%s270_s7 + $0x10] sm:$0xff]  ;;  %v364_v30 = vlaneseq  ;;  %vm2716_vm0 = vcmask 191488   ;;  %s4487_s11 = sshll.u32 (%p4944_p6), %s4854_s14, 4  ;;  %s4488_s21 = sshll.u32 (%p4944_p6), %s4858_s15, 10 }
  0x2f   : > { %332 = vxpose.xlu0.b32.start [1/3] (short) %v329_v5, 128  ;;  %v299_v6 = vld [vmem:[%s263_s8] sm:$0xff]  ;;  %v300_v7 = vld [vmem:[%s263_s8 + $0x8] sm:$0xff]  ;;  %s2986_s22 = sadd.s32 (%p4944_p6), %s4488_s21, %s4487_s11 }
  0x30   : > { %v301_v8 = vmax.f32 %v299_v6, %v300_v7  ;;  %v365_v32 = vshrl.u32 %v364_v30, 7  ;;  %s4489_s25 = sshll.u32 (%p4944_p6), %s2986_s22, 2 }
  0x31   : > { %s6057_s29 = scalar_lea.vmem (%p4944_p6), %s6338_s2, %s4489_s25 }
  0x32   : > { %v302_v10 = vrot.slane %v301_v8, 4  ;;  %v366_v35 = vsub.s32 0, %v365_v32  ;;  %v567_v36 = vsub.s32 3, %v365_v32  ;;  %v634_v38 = vsub.s32 4, %v365_v32 }
  0x33   : > { %333 = vxpose.xlu0.b32.cont [2/3] (short) %v330_v9, 128  ;;  %v701_v39 = vsub.s32 5, %v365_v32  ;;  %v768_v40 = vsub.s32 6, %v365_v32  ;;  %v835_v41 = vsub.s32 7, %v365_v32  ;;  %v433_v44 = vsub.s32 1, %v365_v32 }
  0x34   : > { %v303_v11 = vmax.f32 %v301_v8, %v302_v10  ;;  %v500_v45 = vsub.s32 2, %v365_v32 }
  0x36   : > { %v304_v13 = vrot.slane %v303_v11, 2 }
  0x37   : > { %334 = vxpose.xlu0.b32.end [3/3] (short) %v331_v12, 128 }
  0x38   : > { %v305_v14 = vmax.f32 %v303_v11, %v304_v13 }
  0x3a   : > { %v306_v15 = vrot.slane %v305_v14, 1 }
  0x3c   : > { %v307_v16 = vmax.f32 %v305_v14, %v306_v15 }
  0x3e   : > { %v308_v17 = vsub.f32 %v299_v6, %v307_v16  ;;  %v309_v18 = vsub.f32 %v300_v7, %v307_v16 }
  0x40   : > { %v310_v19 = vmul.f32 1.442695, %v308_v17  ;;  %v312_v20 = vmul.f32 1.442695, %v309_v18 }
  0x42   : > { %4810 = vpow2.f32 %v310_v19 }
  0x43   : > { %4812 = vpow2.f32 %v312_v20 }
  0x4f   : > { %v4811_v21 = vpop.eup %4810 }
  0x50   : > { %v4813_v22 = vpop.eup %4812 }
  0x51   : > { %v314_v23 = vadd.f32 %v4813_v22, %v4811_v21 }
  0x53   : > { %v315_v24 = vrot.slane %v314_v23, 4 }
  0x55   : > { %v316_v25 = vadd.f32 %v315_v24, %v314_v23 }
  0x57   : > { %v317_v26 = vrot.slane %v316_v25, 2 }
  0x59   : > { %v318_v27 = vadd.f32 %v317_v26, %v316_v25 }
  0x5b   : > { %v319_v28 = vrot.slane %v318_v27, 1 }
  0x5d   : > { %v320_v29 = vadd.f32 %v319_v28, %v318_v27 }
  0x5f   : > { %4814 = vrcp.f32 %v320_v29 }
  0x6c   : > { %v4815_v31 = vpop.eup %4814 }
  0x6d   : > { %v322_v33 = vmul.f32 %v4815_v31, %v320_v29 }
  0x6f   : > { %v323_v34 = vsub.f32 2.0, %v322_v33 }
  0x71   : > { %v324_v37 = vmul.f32 %v4815_v31, %v323_v34 }
  0x73   : > { %v325_v42 = vmul.f32 %v4811_v21, %v324_v37  ;;  %v326_v43 = vmul.f32 %v4813_v22, %v324_v37 }
  0x75   : > { %327 = vst [vmem:[%s4982_s12] sm:$0xff] %v325_v42  ;;  %328 = vst [vmem:[%s4982_s12 + $0x8] sm:$0xff] %v326_v43  ;;  %v367_v46 = vrot.slane %v325_v42, %v366_v35  ;;  %v4986_v47 = vrot.slane %v325_v42, %v567_v36  ;;  %v4988_v48 = vrot.slane %v325_v42, %v634_v38 }
  0x76   : > { %v4990_v49 = vrot.slane %v325_v42, %v701_v39  ;;  %v4992_v50 = vrot.slane %v325_v42, %v768_v40  ;;  %v4994_v51 = vrot.slane %v325_v42, %v835_v41  ;;  %v4996_v52 = vrot.slane %v326_v43, %v366_v35 }
  0x77   : > { %v4998_v53 = vrot.slane %v326_v43, %v433_v44  ;;  %v5000_v54 = vrot.slane %v326_v43, %v500_v45  ;;  %v5002_v55 = vrot.slane %v326_v43, %v567_v36  ;;  %369 = vbcast.lane.b32.xlu1 %v367_v46, 256  ;;  %v5004_v56 = vrot.slane %v326_v43, %v634_v38 }
  0x78   : > { %v5006_v57 = vrot.slane %v326_v43, %v701_v39  ;;  %v5008_v58 = vrot.slane %v326_v43, %v768_v40  ;;  %v5010_v59 = vrot.slane %v326_v43, %v835_v41  ;;  %v434_v60 = vrot.slane %v325_v42, %v433_v44 }
  0x79   : > { %v5012_v61 = vrot.slane %v325_v42, %v500_v45 }
  0x7b   : > { %373 = vbcast.lane.b32.xlu1 %v367_v46, 264 }
  0x7f   : > { %377 = vbcast.lane.b32.xlu1 %v367_v46, 272 }
  0x83   : > { %385 = vbcast.lane.b32.xlu1 %v367_v46, 288 }
  0x87   : > { %389 = vbcast.lane.b32.xlu1 %v367_v46, 296 }
  0x8b   : > { %393 = vbcast.lane.b32.xlu1 %v367_v46, 304 }
  0x8f   : > { %397 = vbcast.lane.b32.xlu1 %v367_v46, 312 }
  0x93   : > { %401 = vbcast.lane.b32.xlu1 %v367_v46, 320 }
  0x94   : > { %381 = vbcast.lane.b32.xlu0 %v367_v46, 280 }
  0x97   : > { %405 = vbcast.lane.b32.xlu1 %v367_v46, 328 }
  0x98   : > { %484 = vbcast.lane.b32.xlu0 %v434_v60, 352 }
  0x9b   : > { %409 = vbcast.lane.b32.xlu1 %v367_v46, 336 }
  0x9c   : > { %492 = vbcast.lane.b32.xlu0 %v434_v60, 368 }
  0x9f   : > { %413 = vbcast.lane.b32.xlu1 %v367_v46, 344 }
  0xa0   : > { %503 = vbcast.lane.b32.xlu0 %v5012_v61, 256 }
  0xa3   : > { %417 = vbcast.lane.b32.xlu1 %v367_v46, 352 }
  0xa4   : > { %511 = vbcast.lane.b32.xlu0 %v5012_v61, 272 }
  0xa7   : > { %421 = vbcast.lane.b32.xlu1 %v367_v46, 360 }
  0xa8   : > { %519 = vbcast.lane.b32.xlu0 %v5012_v61, 288 }
  0xab   : > { %425 = vbcast.lane.b32.xlu1 %v367_v46, 368  ;;  %v5017_v62 = vpop.trf.xlu0 }
  0xac   : > { %527 = vbcast.lane.b32.xlu0 %v5012_v61, 304 }
  0xaf   : > { %429 = vbcast.lane.b32.xlu1 %v367_v46, 376  ;;  %v5020_v63 = vpop.trf.xlu0 }
  0xb0   : > { %535 = vbcast.lane.b32.xlu0 %v5012_v61, 320 }
  0xb3   : > { %436 = vbcast.lane.b32.xlu1 %v434_v60, 256  ;;  %v5023_v0 = vpop.trf.xlu0 }
  0xb4   : > { %543 = vbcast.lane.b32.xlu0 %v5012_v61, 336 }
  0xb7   : > { %440 = vbcast.lane.b32.xlu1 %v434_v60, 264  ;;  %v5027_v1 = vpop.trf.xlu0 }
  0xb8   : > { %551 = vbcast.lane.b32.xlu0 %v5012_v61, 352 }
  0xbb   : > { %444 = vbcast.lane.b32.xlu1 %v434_v60, 272  ;;  %v5030_v2 = vpop.trf.xlu0 }
  0xbc   : > { %559 = vbcast.lane.b32.xlu0 %v5012_v61, 368 }
  0xbf   : > { %448 = vbcast.lane.b32.xlu1 %v434_v60, 280  ;;  %v5034_v3 = vpop.trf.xlu0 }
  0xc0   : > { %570 = vbcast.lane.b32.xlu0 %v4986_v47, 256 }
  0xc3   : > { %452 = vbcast.lane.b32.xlu1 %v434_v60, 288  ;;  %v5037_v4 = vpop.trf.xlu0 }
  0xc4   : > { %578 = vbcast.lane.b32.xlu0 %v4986_v47, 272 }
  0xc7   : > { %456 = vbcast.lane.b32.xlu1 %v434_v60, 296  ;;  %v5041_v5 = vpop.trf.xlu0 }
  0xc8   : > { %586 = vbcast.lane.b32.xlu0 %v4986_v47, 288 }
  0xcb   : > { %460 = vbcast.lane.b32.xlu1 %v434_v60, 304  ;;  %v5044_v6 = vpop.trf.xlu0 }
  0xcc   : > { %594 = vbcast.lane.b32.xlu0 %v4986_v47, 304 }
  0xcf   : > { %464 = vbcast.lane.b32.xlu1 %v434_v60, 312  ;;  %v5048_v7 = vpop.trf.xlu0 }
  0xd0   : > { %602 = vbcast.lane.b32.xlu0 %v4986_v47, 320 }
  0xd3   : > { %468 = vbcast.lane.b32.xlu1 %v434_v60, 320  ;;  %v5051_v8 = vpop.trf.xlu0 }
  0xd4   : > { %610 = vbcast.lane.b32.xlu0 %v4986_v47, 336 }
  0xd7   : > { %472 = vbcast.lane.b32.xlu1 %v434_v60, 328  ;;  %v5056_v9 = vpop.trf.xlu0 }
  0xd8   : > { %618 = vbcast.lane.b32.xlu0 %v4986_v47, 352 }
  0xdb   : > { %476 = vbcast.lane.b32.xlu1 %v434_v60, 336  ;;  %v5066_v15 = vpop.trf.xlu0 }
  0xdc   : > { %626 = vbcast.lane.b32.xlu0 %v4986_v47, 368 }
  0xdf   : > { %480 = vbcast.lane.b32.xlu1 %v434_v60, 344  ;;  %v5075_v20 = vpop.trf.xlu0 }
  0xe0   : > { %637 = vbcast.lane.b32.xlu0 %v4988_v48, 256 }
  0xe3   : > { %488 = vbcast.lane.b32.xlu1 %v434_v60, 360  ;;  %v5085_v26 = vpop.trf.xlu0 }
  0xe4   : > { %645 = vbcast.lane.b32.xlu0 %v4988_v48, 272 }
  0xe7   : > { %496 = vbcast.lane.b32.xlu1 %v434_v60, 376  ;;  %v5094_v31 = vpop.trf.xlu0 }
  0xe8   : > { %653 = vbcast.lane.b32.xlu0 %v4988_v48, 288 }
  0xe9   : > { %v370_v10 = vpop.permute.xlu1 %369 }
  0xea   : > { %v1436_v11 = vmul.f32 %v370_v10, %v5017_v62 }
  0xeb   : > { %507 = vbcast.lane.b32.xlu1 %v5012_v61, 264 }
  0xec   : > { %v4494_v12 = vpack.c.bf16 %v1436_v11, %v1436_v11  ;;  %661 = vbcast.lane.b32.xlu0 %v4988_v48, 304 }
  0xed   : > { %v374_v13 = vpop.permute.xlu1 %373 }
  0xee   : > { %2717 = vst.msk [vmem:[%s5061_s10] sm:$0xf] %vm2716_vm0, %v4494_v12  ;;  %v1437_v14 = vmul.f32 %v374_v13, %v5020_v63 }
  0xef   : > { %515 = vbcast.lane.b32.xlu1 %v5012_v61, 280 }
  0xf0   : > { %v4495_v16 = vpack.c.bf16 %v1437_v14, %v1437_v14  ;;  %669 = vbcast.lane.b32.xlu0 %v4988_v48, 320 }
  0xf1   : > { %v378_v17 = vpop.permute.xlu1 %377 }
  0xf2   : > { %2718 = vst.msk [vmem:[%s5061_s10 + $0x4] sm:$0xf] %vm2716_vm0, %v4495_v16  ;;  %v1438_v18 = vmul.f32 %v378_v17, %v5023_v0 }
  0xf3   : > { %523 = vbcast.lane.b32.xlu1 %v5012_v61, 296 }
  0xf4   : > { %v4496_v19 = vpack.c.bf16 %v1438_v18, %v1438_v18  ;;  %677 = vbcast.lane.b32.xlu0 %v4988_v48, 336 }
  0xf5   : > { %v386_v21 = vpop.permute.xlu1 %385 }
  0xf6   : > { %2719 = vst.msk [vmem:[%s5061_s10 + $0x8] sm:$0xf] %vm2716_vm0, %v4496_v19  ;;  %v1440_v22 = vmul.f32 %v386_v21, %v5030_v2 }
  0xf7   : > { %531 = vbcast.lane.b32.xlu1 %v5012_v61, 312 }
  0xf8   : > { %v4498_v23 = vpack.c.bf16 %v1440_v22, %v1440_v22  ;;  %685 = vbcast.lane.b32.xlu0 %v4988_v48, 352 }
  0xf9   : > { %v390_v24 = vpop.permute.xlu1 %389 }
  0xfa   : > { %2721 = vst.msk [vmem:[%s5061_s10 + $0x10] sm:$0xf] %vm2716_vm0, %v4498_v23  ;;  %v1441_v25 = vmul.f32 %v390_v24, %v5034_v3 }
  0xfb   : > { %539 = vbcast.lane.b32.xlu1 %v5012_v61, 328 }
  0xfc   : > { %v4499_v27 = vpack.c.bf16 %v1441_v25, %v1441_v25  ;;  %693 = vbcast.lane.b32.xlu0 %v4988_v48, 368 }
  0xfd   : > { %v394_v28 = vpop.permute.xlu1 %393 }
  0xfe   : > { %2722 = vst.msk [vmem:[%s5061_s10 + $0x14] sm:$0xf] %vm2716_vm0, %v4499_v27  ;;  %v1442_v29 = vmul.f32 %v394_v28, %v5037_v4 }
  0xff   : > { %547 = vbcast.lane.b32.xlu1 %v5012_v61, 344 }
 0x100   : > { %v4500_v30 = vpack.c.bf16 %v1442_v29, %v1442_v29  ;;  %704 = vbcast.lane.b32.xlu0 %v4990_v49, 256 }
 0x101   : > { %v398_v32 = vpop.permute.xlu1 %397 }
 0x102   : > { %2723 = vst.msk [vmem:[%s5061_s10 + $0x18] sm:$0xf] %vm2716_vm0, %v4500_v30  ;;  %v1443_v33 = vmul.f32 %v398_v32, %v5041_v5 }
 0x103   : > { %555 = vbcast.lane.b32.xlu1 %v5012_v61, 360 }
 0x104   : > { %v4501_v34 = vpack.c.bf16 %v1443_v33, %v1443_v33  ;;  %712 = vbcast.lane.b32.xlu0 %v4990_v49, 272 }
 0x105   : > { %v402_v35 = vpop.permute.xlu1 %401 }
 0x106   : > { %2724 = vst.msk [vmem:[%s5061_s10 + $0x1c] sm:$0xf] %vm2716_vm0, %v4501_v34  ;;  %v1444_v36 = vmul.f32 %v402_v35, %v5044_v6  ;;  %v382_v37 = vpop.permute.xlu0 %381 }
 0x107   : > { %563 = vbcast.lane.b32.xlu1 %v5012_v61, 376  ;;  %v1439_v38 = vmul.f32 %v382_v37, %v5027_v1 }
 0x108   : > { %v4502_v39 = vpack.c.bf16 %v1444_v36, %v1444_v36  ;;  %720 = vbcast.lane.b32.xlu0 %v4990_v49, 288 }
 0x109   : > { %v4497_v40 = vpack.c.bf16 %v1439_v38, %v1439_v38  ;;  %v406_v41 = vpop.permute.xlu1 %405 }
 0x10a   : > { %2725 = vst.msk [vmem:[%s5061_s10 + $0x20] sm:$0xf] %vm2716_vm0, %v4502_v39  ;;  %v1445_v42 = vmul.f32 %v406_v41, %v5048_v7  ;;  %v485_v43 = vpop.permute.xlu0 %484 }
 0x10b   : > { %2720 = vst.msk [vmem:[%s5061_s10 + $0xc] sm:$0xf] %vm2716_vm0, %v4497_v40  ;;  %574 = vbcast.lane.b32.xlu1 %v4986_v47, 264  ;;  %v1464_v44 = vmul.f32 %v485_v43, %v5066_v15 }
 0x10c   : > { %v4503_v45 = vpack.c.bf16 %v1445_v42, %v1445_v42  ;;  %728 = vbcast.lane.b32.xlu0 %v4990_v49, 304 }
 0x10d   : > { %v4522_v46 = vpack.c.bf16 %v1464_v44, %v1464_v44  ;;  %v410_v60 = vpop.permute.xlu1 %409 }
 0x10e   : > { %2726 = vst.msk [vmem:[%s5061_s10 + $0x24] sm:$0xf] %vm2716_vm0, %v4503_v45  ;;  %v1446_v61 = vmul.f32 %v410_v60, %v5051_v8  ;;  %v493_v10 = vpop.permute.xlu0 %492 }
 0x10f   : > { %2745 = vst.msk [vmem:[%s5061_s10 + $0x70] sm:$0xf] %vm2716_vm0, %v4522_v46  ;;  %582 = vbcast.lane.b32.xlu1 %v4986_v47, 280  ;;  %v1466_v11 = vmul.f32 %v493_v10, %v5085_v26 }
 0x110   : > { %v4504_v12 = vpack.c.bf16 %v1446_v61, %v1446_v61  ;;  %736 = vbcast.lane.b32.xlu0 %v4990_v49, 320 }
 0x111   : > { %v4524_v13 = vpack.c.bf16 %v1466_v11, %v1466_v11  ;;  %v414_v14 = vpop.permute.xlu1 %413 }
 0x112   : > { %2727 = vst.msk [vmem:[%s5061_s10 + $0x28] sm:$0xf] %vm2716_vm0, %v4504_v12  ;;  %v1447_v16 = vmul.f32 %v414_v14, %v5056_v9  ;;  %v504_v17 = vpop.permute.xlu0 %503 }
 0x113   : > { %2747 = vst.msk [vmem:[%s5061_s10 + $0x78] sm:$0xf] %vm2716_vm0, %v4524_v13  ;;  %590 = vbcast.lane.b32.xlu1 %v4986_v47, 296  ;;  %v1468_v18 = vmul.f32 %v504_v17, %v5017_v62 }
 0x114   : > { %v4505_v19 = vpack.c.bf16 %v1447_v16, %v1447_v16  ;;  %744 = vbcast.lane.b32.xlu0 %v4990_v49, 336 }
 0x115   : > { %v4526_v21 = vpack.c.bf16 %v1468_v18, %v1468_v18  ;;  %v418_v22 = vpop.permute.xlu1 %417 }
 0x116   : > { %2728 = vst.msk [vmem:[%s5061_s10 + $0x2c] sm:$0xf] %vm2716_vm0, %v4505_v19  ;;  %v1448_v23 = vmul.f32 %v418_v22, %v5066_v15  ;;  %v512_v24 = vpop.permute.xlu0 %511 }
 0x117   : > { %2749 = vst.msk [vmem:[%s5061_s10 + $0x80] sm:$0xf] %vm2716_vm0, %v4526_v21  ;;  %598 = vbcast.lane.b32.xlu1 %v4986_v47, 312  ;;  %v1470_v25 = vmul.f32 %v512_v24, %v5023_v0 }
 0x118   : > { %v4506_v27 = vpack.c.bf16 %v1448_v23, %v1448_v23  ;;  %752 = vbcast.lane.b32.xlu0 %v4990_v49, 352 }
 0x119   : > { %v4528_v28 = vpack.c.bf16 %v1470_v25, %v1470_v25  ;;  %v422_v29 = vpop.permute.xlu1 %421 }
 0x11a   : > { %2729 = vst.msk [vmem:[%s5061_s10 + $0x30] sm:$0xf] %vm2716_vm0, %v4506_v27  ;;  %v1449_v30 = vmul.f32 %v422_v29, %v5075_v20  ;;  %v520_v32 = vpop.permute.xlu0 %519 }
 0x11b   : > { %2751 = vst.msk [vmem:[%s5061_s10 + $0x88] sm:$0xf] %vm2716_vm0, %v4528_v28  ;;  %606 = vbcast.lane.b32.xlu1 %v4986_v47, 328  ;;  %v1472_v33 = vmul.f32 %v520_v32, %v5030_v2 }
 0x11c   : > { %v4507_v34 = vpack.c.bf16 %v1449_v30, %v1449_v30  ;;  %760 = vbcast.lane.b32.xlu0 %v4990_v49, 368 }
 0x11d   : > { %v4530_v35 = vpack.c.bf16 %v1472_v33, %v1472_v33  ;;  %v426_v36 = vpop.permute.xlu1 %425 }
 0x11e   : > { %2730 = vst.msk [vmem:[%s5061_s10 + $0x34] sm:$0xf] %vm2716_vm0, %v4507_v34  ;;  %v1450_v37 = vmul.f32 %v426_v36, %v5085_v26  ;;  %v528_v38 = vpop.permute.xlu0 %527 }
 0x11f   : > { %2753 = vst.msk [vmem:[%s5061_s10 + $0x90] sm:$0xf] %vm2716_vm0, %v4530_v35  ;;  %614 = vbcast.lane.b32.xlu1 %v4986_v47, 344  ;;  %v1474_v39 = vmul.f32 %v528_v38, %v5037_v4 }
 0x120   : > { %v4508_v40 = vpack.c.bf16 %v1450_v37, %v1450_v37  ;;  %771 = vbcast.lane.b32.xlu0 %v4992_v50, 256 }
 0x121   : > { %v4532_v41 = vpack.c.bf16 %v1474_v39, %v1474_v39  ;;  %v430_v42 = vpop.permute.xlu1 %429 }
 0x122   : > { %2731 = vst.msk [vmem:[%s5061_s10 + $0x38] sm:$0xf] %vm2716_vm0, %v4508_v40  ;;  %v1451_v43 = vmul.f32 %v430_v42, %v5094_v31  ;;  %v536_v44 = vpop.permute.xlu0 %535 }
 0x123   : > { %2755 = vst.msk [vmem:[%s5061_s10 + $0x98] sm:$0xf] %vm2716_vm0, %v4532_v41  ;;  %622 = vbcast.lane.b32.xlu1 %v4986_v47, 360  ;;  %v1476_v45 = vmul.f32 %v536_v44, %v5044_v6 }
 0x124   : > { %v4509_v46 = vpack.c.bf16 %v1451_v43, %v1451_v43  ;;  %779 = vbcast.lane.b32.xlu0 %v4992_v50, 272 }
 0x125   : > { %v4534_v60 = vpack.c.bf16 %v1476_v45, %v1476_v45  ;;  %v437_v61 = vpop.permute.xlu1 %436 }
 0x126   : > { %2732 = vst.msk [vmem:[%s5061_s10 + $0x3c] sm:$0xf] %vm2716_vm0, %v4509_v46  ;;  %v1452_v10 = vmul.f32 %v437_v61, %v5017_v62  ;;  %v544_v11 = vpop.permute.xlu0 %543 }
 0x127   : > { %2757 = vst.msk [vmem:[%s5061_s10 + $0xa0] sm:$0xf] %vm2716_vm0, %v4534_v60  ;;  %630 = vbcast.lane.b32.xlu1 %v4986_v47, 376  ;;  %v1478_v12 = vmul.f32 %v544_v11, %v5051_v8 }
 0x128   : > { %v4510_v13 = vpack.c.bf16 %v1452_v10, %v1452_v10  ;;  %787 = vbcast.lane.b32.xlu0 %v4992_v50, 288 }
 0x129   : > { %v4536_v14 = vpack.c.bf16 %v1478_v12, %v1478_v12  ;;  %v441_v16 = vpop.permute.xlu1 %440 }
 0x12a   : > { %2733 = vst.msk [vmem:[%s5061_s10 + $0x40] sm:$0xf] %vm2716_vm0, %v4510_v13  ;;  %v1453_v17 = vmul.f32 %v441_v16, %v5020_v63  ;;  %v552_v18 = vpop.permute.xlu0 %551 }
 0x12b   : > { %2759 = vst.msk [vmem:[%s5061_s10 + $0xa8] sm:$0xf] %vm2716_vm0, %v4536_v14  ;;  %641 = vbcast.lane.b32.xlu1 %v4988_v48, 264  ;;  %v1480_v47 = vmul.f32 %v552_v18, %v5066_v15 }
 0x12c   : > { %v4511_v19 = vpack.c.bf16 %v1453_v17, %v1453_v17  ;;  %795 = vbcast.lane.b32.xlu0 %v4992_v50, 304 }
 0x12d   : > { %v4538_v21 = vpack.c.bf16 %v1480_v47, %v1480_v47  ;;  %v445_v22 = vpop.permute.xlu1 %444 }
 0x12e   : > { %2734 = vst.msk [vmem:[%s5061_s10 + $0x44] sm:$0xf] %vm2716_vm0, %v4511_v19  ;;  %v1454_v23 = vmul.f32 %v445_v22, %v5023_v0  ;;  %v560_v24 = vpop.permute.xlu0 %559 }
 0x12f   : > { %2761 = vst.msk [vmem:[%s5061_s10 + $0xb0] sm:$0xf] %vm2716_vm0, %v4538_v21  ;;  %649 = vbcast.lane.b32.xlu1 %v4988_v48, 280  ;;  %v1482_v25 = vmul.f32 %v560_v24, %v5085_v26 }
 0x130   : > { %v4512_v27 = vpack.c.bf16 %v1454_v23, %v1454_v23  ;;  %803 = vbcast.lane.b32.xlu0 %v4992_v50, 320 }
 0x131   : > { %v4540_v28 = vpack.c.bf16 %v1482_v25, %v1482_v25  ;;  %v449_v29 = vpop.permute.xlu1 %448 }
 0x132   : > { %2735 = vst.msk [vmem:[%s5061_s10 + $0x48] sm:$0xf] %vm2716_vm0, %v4512_v27  ;;  %v1455_v30 = vmul.f32 %v449_v29, %v5027_v1  ;;  %v571_v32 = vpop.permute.xlu0 %570 }
 0x133   : > { %2763 = vst.msk [vmem:[%s5061_s10 + $0xb8] sm:$0xf] %vm2716_vm0, %v4540_v28  ;;  %657 = vbcast.lane.b32.xlu1 %v4988_v48, 296  ;;  %v1484_v33 = vmul.f32 %v571_v32, %v5017_v62 }
 0x134   : > { %v4513_v34 = vpack.c.bf16 %v1455_v30, %v1455_v30  ;;  %811 = vbcast.lane.b32.xlu0 %v4992_v50, 336 }
 0x135   : > { %v4542_v35 = vpack.c.bf16 %v1484_v33, %v1484_v33  ;;  %v453_v36 = vpop.permute.xlu1 %452 }
 0x136   : > { %2736 = vst.msk [vmem:[%s5061_s10 + $0x4c] sm:$0xf] %vm2716_vm0, %v4513_v34  ;;  %v1456_v37 = vmul.f32 %v453_v36, %v5030_v2  ;;  %v579_v38 = vpop.permute.xlu0 %578 }
 0x137   : > { %2765 = vst.msk [vmem:[%s5061_s10 + $0xc0] sm:$0xf] %vm2716_vm0, %v4542_v35  ;;  %665 = vbcast.lane.b32.xlu1 %v4988_v48, 312  ;;  %v1486_v39 = vmul.f32 %v579_v38, %v5023_v0 }
 0x138   : > { %v4514_v40 = vpack.c.bf16 %v1456_v37, %v1456_v37  ;;  %819 = vbcast.lane.b32.xlu0 %v4992_v50, 352 }
 0x139   : > { %v4544_v41 = vpack.c.bf16 %v1486_v39, %v1486_v39  ;;  %v457_v42 = vpop.permute.xlu1 %456 }
 0x13a   : > { %2737 = vst.msk [vmem:[%s5061_s10 + $0x50] sm:$0xf] %vm2716_vm0, %v4514_v40  ;;  %v1457_v43 = vmul.f32 %v457_v42, %v5034_v3  ;;  %v587_v44 = vpop.permute.xlu0 %586 }
 0x13b   : > { %2767 = vst.msk [vmem:[%s5061_s10 + $0xc8] sm:$0xf] %vm2716_vm0, %v4544_v41  ;;  %673 = vbcast.lane.b32.xlu1 %v4988_v48, 328  ;;  %v1488_v45 = vmul.f32 %v587_v44, %v5030_v2 }
 0x13c   : > { %v4515_v46 = vpack.c.bf16 %v1457_v43, %v1457_v43  ;;  %827 = vbcast.lane.b32.xlu0 %v4992_v50, 368 }
 0x13d   : > { %v4546_v60 = vpack.c.bf16 %v1488_v45, %v1488_v45  ;;  %v461_v61 = vpop.permute.xlu1 %460 }
 0x13e   : > { %2738 = vst.msk [vmem:[%s5061_s10 + $0x54] sm:$0xf] %vm2716_vm0, %v4515_v46  ;;  %v1458_v10 = vmul.f32 %v461_v61, %v5037_v4  ;;  %v595_v11 = vpop.permute.xlu0 %594 }
 0x13f   : > { %2769 = vst.msk [vmem:[%s5061_s10 + $0xd0] sm:$0xf] %vm2716_vm0, %v4546_v60  ;;  %681 = vbcast.lane.b32.xlu1 %v4988_v48, 344  ;;  %v1490_v12 = vmul.f32 %v595_v11, %v5037_v4 }
 0x140   : > { %v4516_v13 = vpack.c.bf16 %v1458_v10, %v1458_v10  ;;  %838 = vbcast.lane.b32.xlu0 %v4994_v51, 256 }
 0x141   : > { %v4548_v14 = vpack.c.bf16 %v1490_v12, %v1490_v12  ;;  %v465_v16 = vpop.permute.xlu1 %464 }
 0x142   : > { %2739 = vst.msk [vmem:[%s5061_s10 + $0x58] sm:$0xf] %vm2716_vm0, %v4516_v13  ;;  %v1459_v17 = vmul.f32 %v465_v16, %v5041_v5  ;;  %v603_v18 = vpop.permute.xlu0 %602 }
 0x143   : > { %2771 = vst.msk [vmem:[%s5061_s10 + $0xd8] sm:$0xf] %vm2716_vm0, %v4548_v14  ;;  %689 = vbcast.lane.b32.xlu1 %v4988_v48, 360  ;;  %v1492_v47 = vmul.f32 %v603_v18, %v5044_v6 }
 0x144   : > { %v4517_v19 = vpack.c.bf16 %v1459_v17, %v1459_v17  ;;  %846 = vbcast.lane.b32.xlu0 %v4994_v51, 272 }
 0x145   : > { %v4550_v21 = vpack.c.bf16 %v1492_v47, %v1492_v47  ;;  %v469_v22 = vpop.permute.xlu1 %468 }
 0x146   : > { %2740 = vst.msk [vmem:[%s5061_s10 + $0x5c] sm:$0xf] %vm2716_vm0, %v4517_v19  ;;  %v1460_v23 = vmul.f32 %v469_v22, %v5044_v6  ;;  %v611_v24 = vpop.permute.xlu0 %610 }
 0x147   : > { %2773 = vst.msk [vmem:[%s5061_s10 + $0xe0] sm:$0xf] %vm2716_vm0, %v4550_v21  ;;  %697 = vbcast.lane.b32.xlu1 %v4988_v48, 376  ;;  %v1494_v25 = vmul.f32 %v611_v24, %v5051_v8 }
 0x148   : > { %v4518_v27 = vpack.c.bf16 %v1460_v23, %v1460_v23  ;;  %854 = vbcast.lane.b32.xlu0 %v4994_v51, 288 }
 0x149   : > { %v4552_v28 = vpack.c.bf16 %v1494_v25, %v1494_v25  ;;  %v473_v29 = vpop.permute.xlu1 %472 }
 0x14a   : > { %2741 = vst.msk [vmem:[%s5061_s10 + $0x60] sm:$0xf] %vm2716_vm0, %v4518_v27  ;;  %v1461_v30 = vmul.f32 %v473_v29, %v5048_v7  ;;  %v619_v32 = vpop.permute.xlu0 %618 }
 0x14b   : > { %2775 = vst.msk [vmem:[%s5061_s10 + $0xe8] sm:$0xf] %vm2716_vm0, %v4552_v28  ;;  %708 = vbcast.lane.b32.xlu1 %v4990_v49, 264  ;;  %v1496_v48 = vmul.f32 %v619_v32, %v5066_v15 }
 0x14c   : > { %v4519_v33 = vpack.c.bf16 %v1461_v30, %v1461_v30  ;;  %862 = vbcast.lane.b32.xlu0 %v4994_v51, 304 }
 0x14d   : > { %v4554_v34 = vpack.c.bf16 %v1496_v48, %v1496_v48  ;;  %v477_v35 = vpop.permute.xlu1 %476 }
 0x14e   : > { %2742 = vst.msk [vmem:[%s5061_s10 + $0x64] sm:$0xf] %vm2716_vm0, %v4519_v33  ;;  %v1462_v36 = vmul.f32 %v477_v35, %v5051_v8  ;;  %v627_v37 = vpop.permute.xlu0 %626 }
 0x14f   : > { %2777 = vst.msk [vmem:[%s5061_s10 + $0xf0] sm:$0xf] %vm2716_vm0, %v4554_v34  ;;  %716 = vbcast.lane.b32.xlu1 %v4990_v49, 280  ;;  %v1498_v38 = vmul.f32 %v627_v37, %v5085_v26 }
 0x150   : > { %v4520_v39 = vpack.c.bf16 %v1462_v36, %v1462_v36  ;;  %870 = vbcast.lane.b32.xlu0 %v4994_v51, 320 }
 0x151   : > { %v4556_v40 = vpack.c.bf16 %v1498_v38, %v1498_v38  ;;  %v481_v41 = vpop.permute.xlu1 %480 }
 0x152   : > { %2743 = vst.msk [vmem:[%s5061_s10 + $0x68] sm:$0xf] %vm2716_vm0, %v4520_v39  ;;  %v1463_v42 = vmul.f32 %v481_v41, %v5056_v9  ;;  %v638_v43 = vpop.permute.xlu0 %637 }
 0x153   : > { %2779 = vst.msk [vmem:[%s5061_s10 + $0xf8] sm:$0xf] %vm2716_vm0, %v4556_v40  ;;  %724 = vbcast.lane.b32.xlu1 %v4990_v49, 296  ;;  %v1500_v44 = vmul.f32 %v638_v43, %v5017_v62 }
 0x154   : > { %v4521_v45 = vpack.c.bf16 %v1463_v42, %v1463_v42  ;;  %878 = vbcast.lane.b32.xlu0 %v4994_v51, 336 }
 0x155   : > { %v4558_v46 = vpack.c.bf16 %v1500_v44, %v1500_v44  ;;  %v489_v60 = vpop.permute.xlu1 %488 }
 0x156   : > { %2744 = vst.msk [vmem:[%s5061_s10 + $0x6c] sm:$0xf] %vm2716_vm0, %v4521_v45  ;;  %v1465_v61 = vmul.f32 %v489_v60, %v5075_v20  ;;  %v646_v10 = vpop.permute.xlu0 %645 }
 0x157   : > { %2781 = vst.msk [vmem:[%s5061_s10 + $0x100] sm:$0xf] %vm2716_vm0, %v4558_v46  ;;  %732 = vbcast.lane.b32.xlu1 %v4990_v49, 312  ;;  %v1502_v11 = vmul.f32 %v646_v10, %v5023_v0 }
 0x158   : > { %v4523_v12 = vpack.c.bf16 %v1465_v61, %v1465_v61  ;;  %886 = vbcast.lane.b32.xlu0 %v4994_v51, 352 }
 0x159   : > { %v4560_v13 = vpack.c.bf16 %v1502_v11, %v1502_v11  ;;  %v497_v14 = vpop.permute.xlu1 %496 }
 0x15a   : > { %2746 = vst.msk [vmem:[%s5061_s10 + $0x74] sm:$0xf] %vm2716_vm0, %v4523_v12  ;;  %v1467_v16 = vmul.f32 %v497_v14, %v5094_v31  ;;  %v654_v17 = vpop.permute.xlu0 %653 }
 0x15b   : > { %2783 = vst.msk [vmem:[%s5061_s10 + $0x108] sm:$0xf] %vm2716_vm0, %v4560_v13  ;;  %740 = vbcast.lane.b32.xlu1 %v4990_v49, 328  ;;  %v1504_v18 = vmul.f32 %v654_v17, %v5030_v2 }
 0x15c   : > { %v4525_v47 = vpack.c.bf16 %v1467_v16, %v1467_v16  ;;  %894 = vbcast.lane.b32.xlu0 %v4994_v51, 368 }
 0x15d   : > { %v4562_v19 = vpack.c.bf16 %v1504_v18, %v1504_v18  ;;  %v508_v21 = vpop.permute.xlu1 %507 }
 0x15e   : > { %2748 = vst.msk [vmem:[%s5061_s10 + $0x7c] sm:$0xf] %vm2716_vm0, %v4525_v47  ;;  %v1469_v22 = vmul.f32 %v508_v21, %v5020_v63  ;;  %v662_v23 = vpop.permute.xlu0 %661 }
 0x15f   : > { %2785 = vst.msk [vmem:[%s5061_s10 + $0x110] sm:$0xf] %vm2716_vm0, %v4562_v19  ;;  %748 = vbcast.lane.b32.xlu1 %v4990_v49, 344  ;;  %v1506_v24 = vmul.f32 %v662_v23, %v5037_v4 }
 0x160   : > { %v4527_v25 = vpack.c.bf16 %v1469_v22, %v1469_v22  ;;  %905 = vbcast.lane.b32.xlu0 %v4996_v52, 256 }
 0x161   : > { %v4564_v27 = vpack.c.bf16 %v1506_v24, %v1506_v24  ;;  %v516_v28 = vpop.permute.xlu1 %515 }
 0x162   : > { %2750 = vst.msk [vmem:[%s5061_s10 + $0x84] sm:$0xf] %vm2716_vm0, %v4527_v25  ;;  %v1471_v29 = vmul.f32 %v516_v28, %v5027_v1  ;;  %v670_v30 = vpop.permute.xlu0 %669 }
 0x163   : > { %2787 = vst.msk [vmem:[%s5061_s10 + $0x118] sm:$0xf] %vm2716_vm0, %v4564_v27  ;;  %756 = vbcast.lane.b32.xlu1 %v4990_v49, 360  ;;  %v1508_v32 = vmul.f32 %v670_v30, %v5044_v6 }
 0x164   : > { %v4529_v48 = vpack.c.bf16 %v1471_v29, %v1471_v29  ;;  %913 = vbcast.lane.b32.xlu0 %v4996_v52, 272 }
 0x165   : > { %v4566_v33 = vpack.c.bf16 %v1508_v32, %v1508_v32  ;;  %v524_v34 = vpop.permute.xlu1 %523 }
 0x166   : > { %2752 = vst.msk [vmem:[%s5061_s10 + $0x8c] sm:$0xf] %vm2716_vm0, %v4529_v48  ;;  %v1473_v35 = vmul.f32 %v524_v34, %v5034_v3  ;;  %v678_v36 = vpop.permute.xlu0 %677 }
 0x167   : > { %2789 = vst.msk [vmem:[%s5061_s10 + $0x120] sm:$0xf] %vm2716_vm0, %v4566_v33  ;;  %764 = vbcast.lane.b32.xlu1 %v4990_v49, 376  ;;  %v1510_v37 = vmul.f32 %v678_v36, %v5051_v8 }
 0x168   : > { %v4531_v38 = vpack.c.bf16 %v1473_v35, %v1473_v35  ;;  %921 = vbcast.lane.b32.xlu0 %v4996_v52, 288 }
 0x169   : > { %v4568_v39 = vpack.c.bf16 %v1510_v37, %v1510_v37  ;;  %v532_v40 = vpop.permute.xlu1 %531 }
 0x16a   : > { %2754 = vst.msk [vmem:[%s5061_s10 + $0x94] sm:$0xf] %vm2716_vm0, %v4531_v38  ;;  %v1475_v41 = vmul.f32 %v532_v40, %v5041_v5  ;;  %v686_v42 = vpop.permute.xlu0 %685 }
 0x16b   : > { %2791 = vst.msk [vmem:[%s5061_s10 + $0x128] sm:$0xf] %vm2716_vm0, %v4568_v39  ;;  %775 = vbcast.lane.b32.xlu1 %v4992_v50, 264  ;;  %v1512_v49 = vmul.f32 %v686_v42, %v5066_v15 }
 0x16c   : > { %v4533_v43 = vpack.c.bf16 %v1475_v41, %v1475_v41  ;;  %929 = vbcast.lane.b32.xlu0 %v4996_v52, 304 }
 0x16d   : > { %v4570_v44 = vpack.c.bf16 %v1512_v49, %v1512_v49  ;;  %v540_v45 = vpop.permute.xlu1 %539 }
 0x16e   : > { %2756 = vst.msk [vmem:[%s5061_s10 + $0x9c] sm:$0xf] %vm2716_vm0, %v4533_v43  ;;  %v1477_v46 = vmul.f32 %v540_v45, %v5048_v7  ;;  %v694_v60 = vpop.permute.xlu0 %693 }
 0x16f   : > { %2793 = vst.msk [vmem:[%s5061_s10 + $0x130] sm:$0xf] %vm2716_vm0, %v4570_v44  ;;  %783 = vbcast.lane.b32.xlu1 %v4992_v50, 280  ;;  %v1514_v61 = vmul.f32 %v694_v60, %v5085_v26 }
 0x170   : > { %v4535_v10 = vpack.c.bf16 %v1477_v46, %v1477_v46  ;;  %937 = vbcast.lane.b32.xlu0 %v4996_v52, 320 }
 0x171   : > { %v4572_v11 = vpack.c.bf16 %v1514_v61, %v1514_v61  ;;  %v548_v12 = vpop.permute.xlu1 %547 }
 0x172   : > { %2758 = vst.msk [vmem:[%s5061_s10 + $0xa4] sm:$0xf] %vm2716_vm0, %v4535_v10  ;;  %v1479_v13 = vmul.f32 %v548_v12, %v5056_v9  ;;  %v705_v14 = vpop.permute.xlu0 %704 }
 0x173   : > { %2795 = vst.msk [vmem:[%s5061_s10 + $0x138] sm:$0xf] %vm2716_vm0, %v4572_v11  ;;  %791 = vbcast.lane.b32.xlu1 %v4992_v50, 296  ;;  %v1516_v16 = vmul.f32 %v705_v14, %v5017_v62 }
 0x174   : > { %v4537_v17 = vpack.c.bf16 %v1479_v13, %v1479_v13  ;;  %945 = vbcast.lane.b32.xlu0 %v4996_v52, 336 }
 0x175   : > { %v4574_v18 = vpack.c.bf16 %v1516_v16, %v1516_v16  ;;  %v556_v47 = vpop.permute.xlu1 %555 }
 0x176   : > { %2760 = vst.msk [vmem:[%s5061_s10 + $0xac] sm:$0xf] %vm2716_vm0, %v4537_v17  ;;  %v1481_v19 = vmul.f32 %v556_v47, %v5075_v20  ;;  %v713_v21 = vpop.permute.xlu0 %712 }
 0x177   : > { %2797 = vst.msk [vmem:[%s5061_s10 + $0x140] sm:$0xf] %vm2716_vm0, %v4574_v18  ;;  %799 = vbcast.lane.b32.xlu1 %v4992_v50, 312  ;;  %v1518_v22 = vmul.f32 %v713_v21, %v5023_v0 }
 0x178   : > { %v4539_v23 = vpack.c.bf16 %v1481_v19, %v1481_v19  ;;  %953 = vbcast.lane.b32.xlu0 %v4996_v52, 352 }
 0x179   : > { %v4576_v24 = vpack.c.bf16 %v1518_v22, %v1518_v22  ;;  %v564_v25 = vpop.permute.xlu1 %563 }
 0x17a   : > { %2762 = vst.msk [vmem:[%s5061_s10 + $0xb4] sm:$0xf] %vm2716_vm0, %v4539_v23  ;;  %v1483_v27 = vmul.f32 %v564_v25, %v5094_v31  ;;  %v721_v28 = vpop.permute.xlu0 %720 }
 0x17b   : > { %2799 = vst.msk [vmem:[%s5061_s10 + $0x148] sm:$0xf] %vm2716_vm0, %v4576_v24  ;;  %807 = vbcast.lane.b32.xlu1 %v4992_v50, 328  ;;  %v1520_v29 = vmul.f32 %v721_v28, %v5030_v2 }
 0x17c   : > { %v4541_v30 = vpack.c.bf16 %v1483_v27, %v1483_v27  ;;  %961 = vbcast.lane.b32.xlu0 %v4996_v52, 368 }
 0x17d   : > { %v4578_v32 = vpack.c.bf16 %v1520_v29, %v1520_v29  ;;  %v575_v48 = vpop.permute.xlu1 %574 }
 0x17e   : > { %2764 = vst.msk [vmem:[%s5061_s10 + $0xbc] sm:$0xf] %vm2716_vm0, %v4541_v30  ;;  %v1485_v33 = vmul.f32 %v575_v48, %v5020_v63  ;;  %v729_v34 = vpop.permute.xlu0 %728 }
 0x17f   : > { %2801 = vst.msk [vmem:[%s5061_s10 + $0x150] sm:$0xf] %vm2716_vm0, %v4578_v32  ;;  %815 = vbcast.lane.b32.xlu1 %v4992_v50, 344  ;;  %v1522_v35 = vmul.f32 %v729_v34, %v5037_v4 }
 0x180   : > { %v4543_v36 = vpack.c.bf16 %v1485_v33, %v1485_v33  ;;  %972 = vbcast.lane.b32.xlu0 %v4998_v53, 256 }
 0x181   : > { %v4580_v37 = vpack.c.bf16 %v1522_v35, %v1522_v35  ;;  %v583_v38 = vpop.permute.xlu1 %582 }
 0x182   : > { %2766 = vst.msk [vmem:[%s5061_s10 + $0xc4] sm:$0xf] %vm2716_vm0, %v4543_v36  ;;  %v1487_v39 = vmul.f32 %v583_v38, %v5027_v1  ;;  %v737_v40 = vpop.permute.xlu0 %736 }
 0x183   : > { %2803 = vst.msk [vmem:[%s5061_s10 + $0x158] sm:$0xf] %vm2716_vm0, %v4580_v37  ;;  %823 = vbcast.lane.b32.xlu1 %v4992_v50, 360  ;;  %v1524_v41 = vmul.f32 %v737_v40, %v5044_v6 }
 0x184   : > { %v4545_v42 = vpack.c.bf16 %v1487_v39, %v1487_v39  ;;  %980 = vbcast.lane.b32.xlu0 %v4998_v53, 272 }
 0x185   : > { %v4582_v49 = vpack.c.bf16 %v1524_v41, %v1524_v41  ;;  %v591_v43 = vpop.permute.xlu1 %590 }
 0x186   : > { %2768 = vst.msk [vmem:[%s5061_s10 + $0xcc] sm:$0xf] %vm2716_vm0, %v4545_v42  ;;  %v1489_v44 = vmul.f32 %v591_v43, %v5034_v3  ;;  %v745_v45 = vpop.permute.xlu0 %744 }
 0x187   : > { %2805 = vst.msk [vmem:[%s5061_s10 + $0x160] sm:$0xf] %vm2716_vm0, %v4582_v49  ;;  %831 = vbcast.lane.b32.xlu1 %v4992_v50, 376  ;;  %v1526_v46 = vmul.f32 %v745_v45, %v5051_v8 }
 0x188   : > { %v4547_v60 = vpack.c.bf16 %v1489_v44, %v1489_v44  ;;  %988 = vbcast.lane.b32.xlu0 %v4998_v53, 288 }
 0x189   : > { %v4584_v61 = vpack.c.bf16 %v1526_v46, %v1526_v46  ;;  %v599_v10 = vpop.permute.xlu1 %598 }
 0x18a   : > { %2770 = vst.msk [vmem:[%s5061_s10 + $0xd4] sm:$0xf] %vm2716_vm0, %v4547_v60  ;;  %v1491_v11 = vmul.f32 %v599_v10, %v5041_v5  ;;  %v753_v12 = vpop.permute.xlu0 %752 }
 0x18b   : > { %2807 = vst.msk [vmem:[%s5061_s10 + $0x168] sm:$0xf] %vm2716_vm0, %v4584_v61  ;;  %842 = vbcast.lane.b32.xlu1 %v4994_v51, 264  ;;  %v1528_v50 = vmul.f32 %v753_v12, %v5066_v15 }
 0x18c   : > { %v4549_v13 = vpack.c.bf16 %v1491_v11, %v1491_v11  ;;  %996 = vbcast.lane.b32.xlu0 %v4998_v53, 304 }
 0x18d   : > { %v4586_v14 = vpack.c.bf16 %v1528_v50, %v1528_v50  ;;  %v607_v16 = vpop.permute.xlu1 %606 }
 0x18e   : > { %2772 = vst.msk [vmem:[%s5061_s10 + $0xdc] sm:$0xf] %vm2716_vm0, %v4549_v13  ;;  %v1493_v17 = vmul.f32 %v607_v16, %v5048_v7  ;;  %v761_v18 = vpop.permute.xlu0 %760 }
 0x18f   : > { %2809 = vst.msk [vmem:[%s5061_s10 + $0x170] sm:$0xf] %vm2716_vm0, %v4586_v14  ;;  %850 = vbcast.lane.b32.xlu1 %v4994_v51, 280  ;;  %v1530_v47 = vmul.f32 %v761_v18, %v5085_v26 }
 0x190   : > { %v4551_v19 = vpack.c.bf16 %v1493_v17, %v1493_v17  ;;  %1004 = vbcast.lane.b32.xlu0 %v4998_v53, 320 }
 0x191   : > { %v4588_v21 = vpack.c.bf16 %v1530_v47, %v1530_v47  ;;  %v615_v22 = vpop.permute.xlu1 %614 }
 0x192   : > { %2774 = vst.msk [vmem:[%s5061_s10 + $0xe4] sm:$0xf] %vm2716_vm0, %v4551_v19  ;;  %v1495_v23 = vmul.f32 %v615_v22, %v5056_v9  ;;  %v772_v24 = vpop.permute.xlu0 %771 }
 0x193   : > { %2811 = vst.msk [vmem:[%s5061_s10 + $0x178] sm:$0xf] %vm2716_vm0, %v4588_v21  ;;  %858 = vbcast.lane.b32.xlu1 %v4994_v51, 296  ;;  %v1532_v25 = vmul.f32 %v772_v24, %v5017_v62 }
 0x194   : > { %v4553_v27 = vpack.c.bf16 %v1495_v23, %v1495_v23  ;;  %1012 = vbcast.lane.b32.xlu0 %v4998_v53, 336 }
 0x195   : > { %v4590_v28 = vpack.c.bf16 %v1532_v25, %v1532_v25  ;;  %v623_v29 = vpop.permute.xlu1 %622 }
 0x196   : > { %2776 = vst.msk [vmem:[%s5061_s10 + $0xec] sm:$0xf] %vm2716_vm0, %v4553_v27  ;;  %v1497_v30 = vmul.f32 %v623_v29, %v5075_v20  ;;  %v780_v32 = vpop.permute.xlu0 %779 }
 0x197   : > { %2813 = vst.msk [vmem:[%s5061_s10 + $0x180] sm:$0xf] %vm2716_vm0, %v4590_v28  ;;  %866 = vbcast.lane.b32.xlu1 %v4994_v51, 312  ;;  %v1534_v48 = vmul.f32 %v780_v32, %v5023_v0 }
 0x198   : > { %v4555_v33 = vpack.c.bf16 %v1497_v30, %v1497_v30  ;;  %1020 = vbcast.lane.b32.xlu0 %v4998_v53, 352 }
 0x199   : > { %v4592_v34 = vpack.c.bf16 %v1534_v48, %v1534_v48  ;;  %v631_v35 = vpop.permute.xlu1 %630 }
 0x19a   : > { %2778 = vst.msk [vmem:[%s5061_s10 + $0xf4] sm:$0xf] %vm2716_vm0, %v4555_v33  ;;  %v1499_v36 = vmul.f32 %v631_v35, %v5094_v31  ;;  %v788_v37 = vpop.permute.xlu0 %787 }
 0x19b   : > { %2815 = vst.msk [vmem:[%s5061_s10 + $0x188] sm:$0xf] %vm2716_vm0, %v4592_v34  ;;  %874 = vbcast.lane.b32.xlu1 %v4994_v51, 328  ;;  %v1536_v38 = vmul.f32 %v788_v37, %v5030_v2 }
 0x19c   : > { %v4557_v39 = vpack.c.bf16 %v1499_v36, %v1499_v36  ;;  %1028 = vbcast.lane.b32.xlu0 %v4998_v53, 368 }
 0x19d   : > { %v4594_v40 = vpack.c.bf16 %v1536_v38, %v1536_v38  ;;  %v642_v41 = vpop.permute.xlu1 %641 }
 0x19e   : > { %2780 = vst.msk [vmem:[%s5061_s10 + $0xfc] sm:$0xf] %vm2716_vm0, %v4557_v39  ;;  %v1501_v42 = vmul.f32 %v642_v41, %v5020_v63  ;;  %v796_v49 = vpop.permute.xlu0 %795 }
 0x19f   : > { %2817 = vst.msk [vmem:[%s5061_s10 + $0x190] sm:$0xf] %vm2716_vm0, %v4594_v40  ;;  %882 = vbcast.lane.b32.xlu1 %v4994_v51, 344  ;;  %v1538_v43 = vmul.f32 %v796_v49, %v5037_v4 }
 0x1a0   : > { %v4559_v44 = vpack.c.bf16 %v1501_v42, %v1501_v42  ;;  %1039 = vbcast.lane.b32.xlu0 %v5000_v54, 256 }
 0x1a1   : > { %v4596_v45 = vpack.c.bf16 %v1538_v43, %v1538_v43  ;;  %v650_v46 = vpop.permute.xlu1 %649 }
 0x1a2   : > { %2782 = vst.msk [vmem:[%s5061_s10 + $0x104] sm:$0xf] %vm2716_vm0, %v4559_v44  ;;  %v1503_v60 = vmul.f32 %v650_v46, %v5027_v1  ;;  %v804_v61 = vpop.permute.xlu0 %803 }
 0x1a3   : > { %2819 = vst.msk [vmem:[%s5061_s10 + $0x198] sm:$0xf] %vm2716_vm0, %v4596_v45  ;;  %890 = vbcast.lane.b32.xlu1 %v4994_v51, 360  ;;  %v1540_v10 = vmul.f32 %v804_v61, %v5044_v6 }
 0x1a4   : > { %v4561_v11 = vpack.c.bf16 %v1503_v60, %v1503_v60  ;;  %1047 = vbcast.lane.b32.xlu0 %v5000_v54, 272 }
 0x1a5   : > { %v4598_v12 = vpack.c.bf16 %v1540_v10, %v1540_v10  ;;  %v658_v50 = vpop.permute.xlu1 %657 }
 0x1a6   : > { %2784 = vst.msk [vmem:[%s5061_s10 + $0x10c] sm:$0xf] %vm2716_vm0, %v4561_v11  ;;  %v1505_v13 = vmul.f32 %v658_v50, %v5034_v3  ;;  %v812_v14 = vpop.permute.xlu0 %811 }
 0x1a7   : > { %2821 = vst.msk [vmem:[%s5061_s10 + $0x1a0] sm:$0xf] %vm2716_vm0, %v4598_v12  ;;  %898 = vbcast.lane.b32.xlu1 %v4994_v51, 376  ;;  %v1542_v16 = vmul.f32 %v812_v14, %v5051_v8 }
 0x1a8   : > { %v4563_v17 = vpack.c.bf16 %v1505_v13, %v1505_v13  ;;  %1055 = vbcast.lane.b32.xlu0 %v5000_v54, 288 }
 0x1a9   : > { %v4600_v18 = vpack.c.bf16 %v1542_v16, %v1542_v16  ;;  %v666_v47 = vpop.permute.xlu1 %665 }
 0x1aa   : > { %2786 = vst.msk [vmem:[%s5061_s10 + $0x114] sm:$0xf] %vm2716_vm0, %v4563_v17  ;;  %v1507_v19 = vmul.f32 %v666_v47, %v5041_v5  ;;  %v820_v21 = vpop.permute.xlu0 %819 }
 0x1ab   : > { %2823 = vst.msk [vmem:[%s5061_s10 + $0x1a8] sm:$0xf] %vm2716_vm0, %v4600_v18  ;;  %909 = vbcast.lane.b32.xlu1 %v4996_v52, 264  ;;  %v1544_v51 = vmul.f32 %v820_v21, %v5066_v15 }
 0x1ac   : > { %v4565_v22 = vpack.c.bf16 %v1507_v19, %v1507_v19  ;;  %1063 = vbcast.lane.b32.xlu0 %v5000_v54, 304 }
 0x1ad   : > { %v4602_v23 = vpack.c.bf16 %v1544_v51, %v1544_v51  ;;  %v674_v24 = vpop.permute.xlu1 %673 }
 0x1ae   : > { %2788 = vst.msk [vmem:[%s5061_s10 + $0x11c] sm:$0xf] %vm2716_vm0, %v4565_v22  ;;  %v1509_v25 = vmul.f32 %v674_v24, %v5048_v7  ;;  %v828_v27 = vpop.permute.xlu0 %827 }
 0x1af   : > { %2825 = vst.msk [vmem:[%s5061_s10 + $0x1b0] sm:$0xf] %vm2716_vm0, %v4602_v23  ;;  %917 = vbcast.lane.b32.xlu1 %v4996_v52, 280  ;;  %v1546_v28 = vmul.f32 %v828_v27, %v5085_v26 }
 0x1b0   : > { %v4567_v29 = vpack.c.bf16 %v1509_v25, %v1509_v25  ;;  %1071 = vbcast.lane.b32.xlu0 %v5000_v54, 320 }
 0x1b1   : > { %v4604_v30 = vpack.c.bf16 %v1546_v28, %v1546_v28  ;;  %v682_v32 = vpop.permute.xlu1 %681 }
 0x1b2   : > { %2790 = vst.msk [vmem:[%s5061_s10 + $0x124] sm:$0xf] %vm2716_vm0, %v4567_v29  ;;  %v1511_v48 = vmul.f32 %v682_v32, %v5056_v9  ;;  %v839_v33 = vpop.permute.xlu0 %838 }
 0x1b3   : > { %2827 = vst.msk [vmem:[%s5061_s10 + $0x1b8] sm:$0xf] %vm2716_vm0, %v4604_v30  ;;  %925 = vbcast.lane.b32.xlu1 %v4996_v52, 296  ;;  %v1548_v34 = vmul.f32 %v839_v33, %v5017_v62 }
 0x1b4   : > { %v4569_v35 = vpack.c.bf16 %v1511_v48, %v1511_v48  ;;  %1079 = vbcast.lane.b32.xlu0 %v5000_v54, 336 }
 0x1b5   : > { %v4606_v36 = vpack.c.bf16 %v1548_v34, %v1548_v34  ;;  %v690_v37 = vpop.permute.xlu1 %689 }
 0x1b6   : > { %2792 = vst.msk [vmem:[%s5061_s10 + $0x12c] sm:$0xf] %vm2716_vm0, %v4569_v35  ;;  %v1513_v38 = vmul.f32 %v690_v37, %v5075_v20  ;;  %v847_v39 = vpop.permute.xlu0 %846 }
 0x1b7   : > { %2829 = vst.msk [vmem:[%s5061_s10 + $0x1c0] sm:$0xf] %vm2716_vm0, %v4606_v36  ;;  %933 = vbcast.lane.b32.xlu1 %v4996_v52, 312  ;;  %v1550_v40 = vmul.f32 %v847_v39, %v5023_v0 }
 0x1b8   : > { %v4571_v41 = vpack.c.bf16 %v1513_v38, %v1513_v38  ;;  %1087 = vbcast.lane.b32.xlu0 %v5000_v54, 352 }
 0x1b9   : > { %v4608_v42 = vpack.c.bf16 %v1550_v40, %v1550_v40  ;;  %v698_v49 = vpop.permute.xlu1 %697 }
 0x1ba   : > { %2794 = vst.msk [vmem:[%s5061_s10 + $0x134] sm:$0xf] %vm2716_vm0, %v4571_v41  ;;  %v1515_v43 = vmul.f32 %v698_v49, %v5094_v31  ;;  %v855_v44 = vpop.permute.xlu0 %854 }
 0x1bb   : > { %2831 = vst.msk [vmem:[%s5061_s10 + $0x1c8] sm:$0xf] %vm2716_vm0, %v4608_v42  ;;  %941 = vbcast.lane.b32.xlu1 %v4996_v52, 328  ;;  %v1552_v45 = vmul.f32 %v855_v44, %v5030_v2 }
 0x1bc   : > { %v4573_v46 = vpack.c.bf16 %v1515_v43, %v1515_v43  ;;  %1095 = vbcast.lane.b32.xlu0 %v5000_v54, 368 }
 0x1bd   : > { %v4610_v60 = vpack.c.bf16 %v1552_v45, %v1552_v45  ;;  %v709_v61 = vpop.permute.xlu1 %708 }
 0x1be   : > { %2796 = vst.msk [vmem:[%s5061_s10 + $0x13c] sm:$0xf] %vm2716_vm0, %v4573_v46  ;;  %v1517_v10 = vmul.f32 %v709_v61, %v5020_v63  ;;  %v863_v11 = vpop.permute.xlu0 %862 }
 0x1bf   : > { %2833 = vst.msk [vmem:[%s5061_s10 + $0x1d0] sm:$0xf] %vm2716_vm0, %v4610_v60  ;;  %949 = vbcast.lane.b32.xlu1 %v4996_v52, 344  ;;  %v1554_v12 = vmul.f32 %v863_v11, %v5037_v4 }
 0x1c0   : > { %v4575_v50 = vpack.c.bf16 %v1517_v10, %v1517_v10  ;;  %1106 = vbcast.lane.b32.xlu0 %v5002_v55, 256 }
 0x1c1   : > { %v4612_v13 = vpack.c.bf16 %v1554_v12, %v1554_v12  ;;  %v717_v14 = vpop.permute.xlu1 %716 }
 0x1c2   : > { %2798 = vst.msk [vmem:[%s5061_s10 + $0x144] sm:$0xf] %vm2716_vm0, %v4575_v50  ;;  %v1519_v16 = vmul.f32 %v717_v14, %v5027_v1  ;;  %v871_v17 = vpop.permute.xlu0 %870 }
 0x1c3   : > { %2835 = vst.msk [vmem:[%s5061_s10 + $0x1d8] sm:$0xf] %vm2716_vm0, %v4612_v13  ;;  %957 = vbcast.lane.b32.xlu1 %v4996_v52, 360  ;;  %v1556_v18 = vmul.f32 %v871_v17, %v5044_v6 }
 0x1c4   : > { %v4577_v47 = vpack.c.bf16 %v1519_v16, %v1519_v16  ;;  %1114 = vbcast.lane.b32.xlu0 %v5002_v55, 272 }
 0x1c5   : > { %v4614_v19 = vpack.c.bf16 %v1556_v18, %v1556_v18  ;;  %v725_v21 = vpop.permute.xlu1 %724 }
 0x1c6   : > { %2800 = vst.msk [vmem:[%s5061_s10 + $0x14c] sm:$0xf] %vm2716_vm0, %v4577_v47  ;;  %v1521_v51 = vmul.f32 %v725_v21, %v5034_v3  ;;  %v879_v22 = vpop.permute.xlu0 %878 }
 0x1c7   : > { %2837 = vst.msk [vmem:[%s5061_s10 + $0x1e0] sm:$0xf] %vm2716_vm0, %v4614_v19  ;;  %965 = vbcast.lane.b32.xlu1 %v4996_v52, 376  ;;  %v1558_v23 = vmul.f32 %v879_v22, %v5051_v8 }
 0x1c8   : > { %v4579_v24 = vpack.c.bf16 %v1521_v51, %v1521_v51  ;;  %1122 = vbcast.lane.b32.xlu0 %v5002_v55, 288 }
 0x1c9   : > { %v4616_v25 = vpack.c.bf16 %v1558_v23, %v1558_v23  ;;  %v733_v27 = vpop.permute.xlu1 %732 }
 0x1ca   : > { %2802 = vst.msk [vmem:[%s5061_s10 + $0x154] sm:$0xf] %vm2716_vm0, %v4579_v24  ;;  %v1523_v28 = vmul.f32 %v733_v27, %v5041_v5  ;;  %v887_v29 = vpop.permute.xlu0 %886 }
 0x1cb   : > { %2839 = vst.msk [vmem:[%s5061_s10 + $0x1e8] sm:$0xf] %vm2716_vm0, %v4616_v25  ;;  %976 = vbcast.lane.b32.xlu1 %v4998_v53, 264  ;;  %v1560_v52 = vmul.f32 %v887_v29, %v5066_v15 }
 0x1cc   : > { %v4581_v30 = vpack.c.bf16 %v1523_v28, %v1523_v28  ;;  %1130 = vbcast.lane.b32.xlu0 %v5002_v55, 304 }
 0x1cd   : > { %v4618_v32 = vpack.c.bf16 %v1560_v52, %v1560_v52  ;;  %v741_v48 = vpop.permute.xlu1 %740 }
 0x1ce   : > { %2804 = vst.msk [vmem:[%s5061_s10 + $0x15c] sm:$0xf] %vm2716_vm0, %v4581_v30  ;;  %v1525_v33 = vmul.f32 %v741_v48, %v5048_v7  ;;  %v895_v34 = vpop.permute.xlu0 %894 }
 0x1cf   : > { %2841 = vst.msk [vmem:[%s5061_s10 + $0x1f0] sm:$0xf] %vm2716_vm0, %v4618_v32  ;;  %984 = vbcast.lane.b32.xlu1 %v4998_v53, 280  ;;  %v1562_v35 = vmul.f32 %v895_v34, %v5085_v26 }
 0x1d0   : > { %v4583_v36 = vpack.c.bf16 %v1525_v33, %v1525_v33  ;;  %1138 = vbcast.lane.b32.xlu0 %v5002_v55, 320 }
 0x1d1   : > { %v4620_v37 = vpack.c.bf16 %v1562_v35, %v1562_v35  ;;  %v749_v38 = vpop.permute.xlu1 %748 }
 0x1d2   : > { %2806 = vst.msk [vmem:[%s5061_s10 + $0x164] sm:$0xf] %vm2716_vm0, %v4583_v36  ;;  %v1527_v39 = vmul.f32 %v749_v38, %v5056_v9  ;;  %v906_v40 = vpop.permute.xlu0 %905 }
 0x1d3   : > { %2843 = vst.msk [vmem:[%s5061_s10 + $0x1f8] sm:$0xf] %vm2716_vm0, %v4620_v37  ;;  %992 = vbcast.lane.b32.xlu1 %v4998_v53, 296  ;;  %v1564_v41 = vmul.f32 %v906_v40, %v5017_v62 }
 0x1d4   : > { %v4585_v42 = vpack.c.bf16 %v1527_v39, %v1527_v39  ;;  %1146 = vbcast.lane.b32.xlu0 %v5002_v55, 336 }
 0x1d5   : > { %v4622_v49 = vpack.c.bf16 %v1564_v41, %v1564_v41  ;;  %v757_v43 = vpop.permute.xlu1 %756 }
 0x1d6   : > { %2808 = vst.msk [vmem:[%s5061_s10 + $0x16c] sm:$0xf] %vm2716_vm0, %v4585_v42  ;;  %v1529_v44 = vmul.f32 %v757_v43, %v5075_v20  ;;  %v914_v45 = vpop.permute.xlu0 %913 }
 0x1d7   : > { %2845 = vst.msk [vmem:[%s5061_s10 + $0x200] sm:$0xf] %vm2716_vm0, %v4622_v49  ;;  %1000 = vbcast.lane.b32.xlu1 %v4998_v53, 312  ;;  %v1566_v46 = vmul.f32 %v914_v45, %v5023_v0 }
 0x1d8   : > { %v4587_v60 = vpack.c.bf16 %v1529_v44, %v1529_v44  ;;  %1154 = vbcast.lane.b32.xlu0 %v5002_v55, 352 }
 0x1d9   : > { %v4624_v61 = vpack.c.bf16 %v1566_v46, %v1566_v46  ;;  %v765_v10 = vpop.permute.xlu1 %764 }
 0x1da   : > { %2810 = vst.msk [vmem:[%s5061_s10 + $0x174] sm:$0xf] %vm2716_vm0, %v4587_v60  ;;  %v1531_v11 = vmul.f32 %v765_v10, %v5094_v31  ;;  %v922_v12 = vpop.permute.xlu0 %921 }
 0x1db   : > { %2847 = vst.msk [vmem:[%s5061_s10 + $0x208] sm:$0xf] %vm2716_vm0, %v4624_v61  ;;  %1008 = vbcast.lane.b32.xlu1 %v4998_v53, 328  ;;  %v1568_v50 = vmul.f32 %v922_v12, %v5030_v2 }
 0x1dc   : > { %v4589_v13 = vpack.c.bf16 %v1531_v11, %v1531_v11  ;;  %1162 = vbcast.lane.b32.xlu0 %v5002_v55, 368 }
 0x1dd   : > { %v4626_v14 = vpack.c.bf16 %v1568_v50, %v1568_v50  ;;  %v776_v16 = vpop.permute.xlu1 %775 }
 0x1de   : > { %2812 = vst.msk [vmem:[%s5061_s10 + $0x17c] sm:$0xf] %vm2716_vm0, %v4589_v13  ;;  %v1533_v17 = vmul.f32 %v776_v16, %v5020_v63  ;;  %v930_v18 = vpop.permute.xlu0 %929 }
 0x1df   : > { %2849 = vst.msk [vmem:[%s5061_s10 + $0x210] sm:$0xf] %vm2716_vm0, %v4626_v14  ;;  %1016 = vbcast.lane.b32.xlu1 %v4998_v53, 344  ;;  %v1570_v47 = vmul.f32 %v930_v18, %v5037_v4 }
 0x1e0   : > { %v4591_v19 = vpack.c.bf16 %v1533_v17, %v1533_v17  ;;  %1173 = vbcast.lane.b32.xlu0 %v5004_v56, 256 }
 0x1e1   : > { %v4628_v21 = vpack.c.bf16 %v1570_v47, %v1570_v47  ;;  %v784_v51 = vpop.permute.xlu1 %783 }
 0x1e2   : > { %2814 = vst.msk [vmem:[%s5061_s10 + $0x184] sm:$0xf] %vm2716_vm0, %v4591_v19  ;;  %v1535_v22 = vmul.f32 %v784_v51, %v5027_v1  ;;  %v938_v23 = vpop.permute.xlu0 %937 }
 0x1e3   : > { %2851 = vst.msk [vmem:[%s5061_s10 + $0x218] sm:$0xf] %vm2716_vm0, %v4628_v21  ;;  %1024 = vbcast.lane.b32.xlu1 %v4998_v53, 360  ;;  %v1572_v24 = vmul.f32 %v938_v23, %v5044_v6 }
 0x1e4   : > { %v4593_v25 = vpack.c.bf16 %v1535_v22, %v1535_v22  ;;  %1181 = vbcast.lane.b32.xlu0 %v5004_v56, 272 }
 0x1e5   : > { %v4630_v27 = vpack.c.bf16 %v1572_v24, %v1572_v24  ;;  %v792_v28 = vpop.permute.xlu1 %791 }
 0x1e6   : > { %2816 = vst.msk [vmem:[%s5061_s10 + $0x18c] sm:$0xf] %vm2716_vm0, %v4593_v25  ;;  %v1537_v29 = vmul.f32 %v792_v28, %v5034_v3  ;;  %v946_v52 = vpop.permute.xlu0 %945 }
 0x1e7   : > { %2853 = vst.msk [vmem:[%s5061_s10 + $0x220] sm:$0xf] %vm2716_vm0, %v4630_v27  ;;  %1032 = vbcast.lane.b32.xlu1 %v4998_v53, 376  ;;  %v1574_v30 = vmul.f32 %v946_v52, %v5051_v8 }
 0x1e8   : > { %v4595_v32 = vpack.c.bf16 %v1537_v29, %v1537_v29  ;;  %1189 = vbcast.lane.b32.xlu0 %v5004_v56, 288 }
 0x1e9   : > { %v4632_v48 = vpack.c.bf16 %v1574_v30, %v1574_v30  ;;  %v800_v33 = vpop.permute.xlu1 %799 }
 0x1ea   : > { %2818 = vst.msk [vmem:[%s5061_s10 + $0x194] sm:$0xf] %vm2716_vm0, %v4595_v32  ;;  %v1539_v34 = vmul.f32 %v800_v33, %v5041_v5  ;;  %v954_v35 = vpop.permute.xlu0 %953 }
 0x1eb   : > { %2855 = vst.msk [vmem:[%s5061_s10 + $0x228] sm:$0xf] %vm2716_vm0, %v4632_v48  ;;  %1043 = vbcast.lane.b32.xlu1 %v5000_v54, 264  ;;  %v1576_v53 = vmul.f32 %v954_v35, %v5066_v15 }
 0x1ec   : > { %v4597_v36 = vpack.c.bf16 %v1539_v34, %v1539_v34  ;;  %1197 = vbcast.lane.b32.xlu0 %v5004_v56, 304 }
 0x1ed   : > { %v4634_v37 = vpack.c.bf16 %v1576_v53, %v1576_v53  ;;  %v808_v38 = vpop.permute.xlu1 %807 }
 0x1ee   : > { %2820 = vst.msk [vmem:[%s5061_s10 + $0x19c] sm:$0xf] %vm2716_vm0, %v4597_v36  ;;  %v1541_v39 = vmul.f32 %v808_v38, %v5048_v7  ;;  %v962_v40 = vpop.permute.xlu0 %961 }
 0x1ef   : > { %2857 = vst.msk [vmem:[%s5061_s10 + $0x230] sm:$0xf] %vm2716_vm0, %v4634_v37  ;;  %1051 = vbcast.lane.b32.xlu1 %v5000_v54, 280  ;;  %v1578_v41 = vmul.f32 %v962_v40, %v5085_v26 }
 0x1f0   : > { %v4599_v42 = vpack.c.bf16 %v1541_v39, %v1541_v39  ;;  %1205 = vbcast.lane.b32.xlu0 %v5004_v56, 320 }
 0x1f1   : > { %v4636_v49 = vpack.c.bf16 %v1578_v41, %v1578_v41  ;;  %v816_v43 = vpop.permute.xlu1 %815 }
 0x1f2   : > { %2822 = vst.msk [vmem:[%s5061_s10 + $0x1a4] sm:$0xf] %vm2716_vm0, %v4599_v42  ;;  %v1543_v44 = vmul.f32 %v816_v43, %v5056_v9  ;;  %v973_v45 = vpop.permute.xlu0 %972 }
 0x1f3   : > { %2859 = vst.msk [vmem:[%s5061_s10 + $0x238] sm:$0xf] %vm2716_vm0, %v4636_v49  ;;  %1059 = vbcast.lane.b32.xlu1 %v5000_v54, 296  ;;  %v1580_v46 = vmul.f32 %v973_v45, %v5017_v62 }
 0x1f4   : > { %v4601_v60 = vpack.c.bf16 %v1543_v44, %v1543_v44  ;;  %1213 = vbcast.lane.b32.xlu0 %v5004_v56, 336 }
 0x1f5   : > { %v4638_v61 = vpack.c.bf16 %v1580_v46, %v1580_v46  ;;  %v824_v10 = vpop.permute.xlu1 %823 }
 0x1f6   : > { %2824 = vst.msk [vmem:[%s5061_s10 + $0x1ac] sm:$0xf] %vm2716_vm0, %v4601_v60  ;;  %v1545_v11 = vmul.f32 %v824_v10, %v5075_v20  ;;  %v981_v12 = vpop.permute.xlu0 %980 }
 0x1f7   : > { %2861 = vst.msk [vmem:[%s5061_s10 + $0x240] sm:$0xf] %vm2716_vm0, %v4638_v61  ;;  %1067 = vbcast.lane.b32.xlu1 %v5000_v54, 312  ;;  %v1582_v50 = vmul.f32 %v981_v12, %v5023_v0 }
 0x1f8   : > { %v4603_v13 = vpack.c.bf16 %v1545_v11, %v1545_v11  ;;  %1221 = vbcast.lane.b32.xlu0 %v5004_v56, 352 }
 0x1f9   : > { %v4640_v14 = vpack.c.bf16 %v1582_v50, %v1582_v50  ;;  %v832_v16 = vpop.permute.xlu1 %831 }
 0x1fa   : > { %2826 = vst.msk [vmem:[%s5061_s10 + $0x1b4] sm:$0xf] %vm2716_vm0, %v4603_v13  ;;  %v1547_v17 = vmul.f32 %v832_v16, %v5094_v31  ;;  %v989_v18 = vpop.permute.xlu0 %988 }
 0x1fb   : > { %2863 = vst.msk [vmem:[%s5061_s10 + $0x248] sm:$0xf] %vm2716_vm0, %v4640_v14  ;;  %1075 = vbcast.lane.b32.xlu1 %v5000_v54, 328  ;;  %v1584_v47 = vmul.f32 %v989_v18, %v5030_v2 }
 0x1fc   : > { %v4605_v19 = vpack.c.bf16 %v1547_v17, %v1547_v17  ;;  %1229 = vbcast.lane.b32.xlu0 %v5004_v56, 368 }
 0x1fd   : > { %v4642_v21 = vpack.c.bf16 %v1584_v47, %v1584_v47  ;;  %v843_v51 = vpop.permute.xlu1 %842 }
 0x1fe   : > { %2828 = vst.msk [vmem:[%s5061_s10 + $0x1bc] sm:$0xf] %vm2716_vm0, %v4605_v19  ;;  %v1549_v22 = vmul.f32 %v843_v51, %v5020_v63  ;;  %v997_v23 = vpop.permute.xlu0 %996 }
 0x1ff   : > { %2865 = vst.msk [vmem:[%s5061_s10 + $0x250] sm:$0xf] %vm2716_vm0, %v4642_v21  ;;  %1083 = vbcast.lane.b32.xlu1 %v5000_v54, 344  ;;  %v1586_v24 = vmul.f32 %v997_v23, %v5037_v4 }
 0x200   : > { %v4607_v25 = vpack.c.bf16 %v1549_v22, %v1549_v22  ;;  %1240 = vbcast.lane.b32.xlu0 %v5006_v57, 256 }
 0x201   : > { %v4644_v27 = vpack.c.bf16 %v1586_v24, %v1586_v24  ;;  %v851_v28 = vpop.permute.xlu1 %850 }
 0x202   : > { %2830 = vst.msk [vmem:[%s5061_s10 + $0x1c4] sm:$0xf] %vm2716_vm0, %v4607_v25  ;;  %v1551_v29 = vmul.f32 %v851_v28, %v5027_v1  ;;  %v1005_v52 = vpop.permute.xlu0 %1004 }
 0x203   : > { %2867 = vst.msk [vmem:[%s5061_s10 + $0x258] sm:$0xf] %vm2716_vm0, %v4644_v27  ;;  %1091 = vbcast.lane.b32.xlu1 %v5000_v54, 360  ;;  %v1588_v30 = vmul.f32 %v1005_v52, %v5044_v6 }
 0x204   : > { %v4609_v32 = vpack.c.bf16 %v1551_v29, %v1551_v29  ;;  %1248 = vbcast.lane.b32.xlu0 %v5006_v57, 272 }
 0x205   : > { %v4646_v48 = vpack.c.bf16 %v1588_v30, %v1588_v30  ;;  %v859_v33 = vpop.permute.xlu1 %858 }
 0x206   : > { %2832 = vst.msk [vmem:[%s5061_s10 + $0x1cc] sm:$0xf] %vm2716_vm0, %v4609_v32  ;;  %v1553_v34 = vmul.f32 %v859_v33, %v5034_v3  ;;  %v1013_v35 = vpop.permute.xlu0 %1012 }
 0x207   : > { %2869 = vst.msk [vmem:[%s5061_s10 + $0x260] sm:$0xf] %vm2716_vm0, %v4646_v48  ;;  %1099 = vbcast.lane.b32.xlu1 %v5000_v54, 376  ;;  %v1590_v53 = vmul.f32 %v1013_v35, %v5051_v8 }
 0x208   : > { %v4611_v36 = vpack.c.bf16 %v1553_v34, %v1553_v34  ;;  %1256 = vbcast.lane.b32.xlu0 %v5006_v57, 288 }
 0x209   : > { %v4648_v37 = vpack.c.bf16 %v1590_v53, %v1590_v53  ;;  %v867_v38 = vpop.permute.xlu1 %866 }
 0x20a   : > { %2834 = vst.msk [vmem:[%s5061_s10 + $0x1d4] sm:$0xf] %vm2716_vm0, %v4611_v36  ;;  %v1555_v39 = vmul.f32 %v867_v38, %v5041_v5  ;;  %v1021_v40 = vpop.permute.xlu0 %1020 }
 0x20b   : > { %2871 = vst.msk [vmem:[%s5061_s10 + $0x268] sm:$0xf] %vm2716_vm0, %v4648_v37  ;;  %1110 = vbcast.lane.b32.xlu1 %v5002_v55, 264  ;;  %v1592_v54 = vmul.f32 %v1021_v40, %v5066_v15 }
 0x20c   : > { %v4613_v41 = vpack.c.bf16 %v1555_v39, %v1555_v39  ;;  %1264 = vbcast.lane.b32.xlu0 %v5006_v57, 304 }
 0x20d   : > { %v4650_v42 = vpack.c.bf16 %v1592_v54, %v1592_v54  ;;  %v875_v49 = vpop.permute.xlu1 %874 }
 0x20e   : > { %2836 = vst.msk [vmem:[%s5061_s10 + $0x1dc] sm:$0xf] %vm2716_vm0, %v4613_v41  ;;  %v1557_v43 = vmul.f32 %v875_v49, %v5048_v7  ;;  %v1029_v44 = vpop.permute.xlu0 %1028 }
 0x20f   : > { %2873 = vst.msk [vmem:[%s5061_s10 + $0x270] sm:$0xf] %vm2716_vm0, %v4650_v42  ;;  %1118 = vbcast.lane.b32.xlu1 %v5002_v55, 280  ;;  %v1594_v45 = vmul.f32 %v1029_v44, %v5085_v26 }
 0x210   : > { %v4615_v46 = vpack.c.bf16 %v1557_v43, %v1557_v43  ;;  %1272 = vbcast.lane.b32.xlu0 %v5006_v57, 320 }
 0x211   : > { %v4652_v60 = vpack.c.bf16 %v1594_v45, %v1594_v45  ;;  %v883_v61 = vpop.permute.xlu1 %882 }
 0x212   : > { %2838 = vst.msk [vmem:[%s5061_s10 + $0x1e4] sm:$0xf] %vm2716_vm0, %v4615_v46  ;;  %v1559_v10 = vmul.f32 %v883_v61, %v5056_v9  ;;  %v1040_v11 = vpop.permute.xlu0 %1039 }
 0x213   : > { %2875 = vst.msk [vmem:[%s5061_s10 + $0x278] sm:$0xf] %vm2716_vm0, %v4652_v60  ;;  %1126 = vbcast.lane.b32.xlu1 %v5002_v55, 296  ;;  %v1596_v12 = vmul.f32 %v1040_v11, %v5017_v62 }
 0x214   : > { %v4617_v50 = vpack.c.bf16 %v1559_v10, %v1559_v10  ;;  %1280 = vbcast.lane.b32.xlu0 %v5006_v57, 336 }
 0x215   : > { %v4654_v13 = vpack.c.bf16 %v1596_v12, %v1596_v12  ;;  %v891_v14 = vpop.permute.xlu1 %890 }
 0x216   : > { %2840 = vst.msk [vmem:[%s5061_s10 + $0x1ec] sm:$0xf] %vm2716_vm0, %v4617_v50  ;;  %v1561_v16 = vmul.f32 %v891_v14, %v5075_v20  ;;  %v1048_v17 = vpop.permute.xlu0 %1047 }
 0x217   : > { %2877 = vst.msk [vmem:[%s5061_s10 + $0x280] sm:$0xf] %vm2716_vm0, %v4654_v13  ;;  %1134 = vbcast.lane.b32.xlu1 %v5002_v55, 312  ;;  %v1598_v18 = vmul.f32 %v1048_v17, %v5023_v0 }
 0x218   : > { %v4619_v47 = vpack.c.bf16 %v1561_v16, %v1561_v16  ;;  %1288 = vbcast.lane.b32.xlu0 %v5006_v57, 352 }
 0x219   : > { %v4656_v19 = vpack.c.bf16 %v1598_v18, %v1598_v18  ;;  %v899_v21 = vpop.permute.xlu1 %898 }
 0x21a   : > { %2842 = vst.msk [vmem:[%s5061_s10 + $0x1f4] sm:$0xf] %vm2716_vm0, %v4619_v47  ;;  %v1563_v51 = vmul.f32 %v899_v21, %v5094_v31  ;;  %v1056_v22 = vpop.permute.xlu0 %1055 }
 0x21b   : > { %2879 = vst.msk [vmem:[%s5061_s10 + $0x288] sm:$0xf] %vm2716_vm0, %v4656_v19  ;;  %1142 = vbcast.lane.b32.xlu1 %v5002_v55, 328  ;;  %v1600_v23 = vmul.f32 %v1056_v22, %v5030_v2 }
 0x21c   : > { %v4621_v24 = vpack.c.bf16 %v1563_v51, %v1563_v51  ;;  %1296 = vbcast.lane.b32.xlu0 %v5006_v57, 368 }
 0x21d   : > { %v4658_v25 = vpack.c.bf16 %v1600_v23, %v1600_v23  ;;  %v910_v27 = vpop.permute.xlu1 %909 }
 0x21e   : > { %2844 = vst.msk [vmem:[%s5061_s10 + $0x1fc] sm:$0xf] %vm2716_vm0, %v4621_v24  ;;  %v1565_v28 = vmul.f32 %v910_v27, %v5020_v63  ;;  %v1064_v29 = vpop.permute.xlu0 %1063 }
 0x21f   : > { %2881 = vst.msk [vmem:[%s5061_s10 + $0x290] sm:$0xf] %vm2716_vm0, %v4658_v25  ;;  %1150 = vbcast.lane.b32.xlu1 %v5002_v55, 344  ;;  %v1602_v52 = vmul.f32 %v1064_v29, %v5037_v4 }
 0x220   : > { %v4623_v30 = vpack.c.bf16 %v1565_v28, %v1565_v28  ;;  %1307 = vbcast.lane.b32.xlu0 %v5008_v58, 256 }
 0x221   : > { %v4660_v32 = vpack.c.bf16 %v1602_v52, %v1602_v52  ;;  %v918_v48 = vpop.permute.xlu1 %917 }
 0x222   : > { %2846 = vst.msk [vmem:[%s5061_s10 + $0x204] sm:$0xf] %vm2716_vm0, %v4623_v30  ;;  %v1567_v33 = vmul.f32 %v918_v48, %v5027_v1  ;;  %v1072_v34 = vpop.permute.xlu0 %1071 }
 0x223   : > { %2883 = vst.msk [vmem:[%s5061_s10 + $0x298] sm:$0xf] %vm2716_vm0, %v4660_v32  ;;  %1158 = vbcast.lane.b32.xlu1 %v5002_v55, 360  ;;  %v1604_v35 = vmul.f32 %v1072_v34, %v5044_v6 }
 0x224   : > { %v4625_v53 = vpack.c.bf16 %v1567_v33, %v1567_v33  ;;  %1315 = vbcast.lane.b32.xlu0 %v5008_v58, 272 }
 0x225   : > { %v4662_v36 = vpack.c.bf16 %v1604_v35, %v1604_v35  ;;  %v926_v37 = vpop.permute.xlu1 %925 }
 0x226   : > { %2848 = vst.msk [vmem:[%s5061_s10 + $0x20c] sm:$0xf] %vm2716_vm0, %v4625_v53  ;;  %v1569_v38 = vmul.f32 %v926_v37, %v5034_v3  ;;  %v1080_v39 = vpop.permute.xlu0 %1079 }
 0x227   : > { %2885 = vst.msk [vmem:[%s5061_s10 + $0x2a0] sm:$0xf] %vm2716_vm0, %v4662_v36  ;;  %1166 = vbcast.lane.b32.xlu1 %v5002_v55, 376  ;;  %v1606_v40 = vmul.f32 %v1080_v39, %v5051_v8 }
 0x228   : > { %v4627_v54 = vpack.c.bf16 %v1569_v38, %v1569_v38  ;;  %1323 = vbcast.lane.b32.xlu0 %v5008_v58, 288 }
 0x229   : > { %v4664_v41 = vpack.c.bf16 %v1606_v40, %v1606_v40  ;;  %v934_v42 = vpop.permute.xlu1 %933 }
 0x22a   : > { %2850 = vst.msk [vmem:[%s5061_s10 + $0x214] sm:$0xf] %vm2716_vm0, %v4627_v54  ;;  %v1571_v49 = vmul.f32 %v934_v42, %v5041_v5  ;;  %v1088_v43 = vpop.permute.xlu0 %1087 }
 0x22b   : > { %2887 = vst.msk [vmem:[%s5061_s10 + $0x2a8] sm:$0xf] %vm2716_vm0, %v4664_v41  ;;  %1177 = vbcast.lane.b32.xlu1 %v5004_v56, 264  ;;  %v1608_v55 = vmul.f32 %v1088_v43, %v5066_v15 }
 0x22c   : > { %v4629_v44 = vpack.c.bf16 %v1571_v49, %v1571_v49  ;;  %1331 = vbcast.lane.b32.xlu0 %v5008_v58, 304 }
 0x22d   : > { %v4666_v45 = vpack.c.bf16 %v1608_v55, %v1608_v55  ;;  %v942_v46 = vpop.permute.xlu1 %941 }
 0x22e   : > { %2852 = vst.msk [vmem:[%s5061_s10 + $0x21c] sm:$0xf] %vm2716_vm0, %v4629_v44  ;;  %v1573_v60 = vmul.f32 %v942_v46, %v5048_v7  ;;  %v1096_v61 = vpop.permute.xlu0 %1095 }
 0x22f   : > { %2889 = vst.msk [vmem:[%s5061_s10 + $0x2b0] sm:$0xf] %vm2716_vm0, %v4666_v45  ;;  %1185 = vbcast.lane.b32.xlu1 %v5004_v56, 280  ;;  %v1610_v10 = vmul.f32 %v1096_v61, %v5085_v26 }
 0x230   : > { %v4631_v11 = vpack.c.bf16 %v1573_v60, %v1573_v60  ;;  %1339 = vbcast.lane.b32.xlu0 %v5008_v58, 320 }
 0x231   : > { %v4668_v12 = vpack.c.bf16 %v1610_v10, %v1610_v10  ;;  %v950_v50 = vpop.permute.xlu1 %949 }
 0x232   : > { %2854 = vst.msk [vmem:[%s5061_s10 + $0x224] sm:$0xf] %vm2716_vm0, %v4631_v11  ;;  %v1575_v13 = vmul.f32 %v950_v50, %v5056_v9  ;;  %v1107_v14 = vpop.permute.xlu0 %1106 }
 0x233   : > { %2891 = vst.msk [vmem:[%s5061_s10 + $0x2b8] sm:$0xf] %vm2716_vm0, %v4668_v12  ;;  %1193 = vbcast.lane.b32.xlu1 %v5004_v56, 296  ;;  %v1612_v16 = vmul.f32 %v1107_v14, %v5017_v62 }
 0x234   : > { %v4633_v17 = vpack.c.bf16 %v1575_v13, %v1575_v13  ;;  %1347 = vbcast.lane.b32.xlu0 %v5008_v58, 336 }
 0x235   : > { %v4670_v18 = vpack.c.bf16 %v1612_v16, %v1612_v16  ;;  %v958_v47 = vpop.permute.xlu1 %957 }
 0x236   : > { %2856 = vst.msk [vmem:[%s5061_s10 + $0x22c] sm:$0xf] %vm2716_vm0, %v4633_v17  ;;  %v1577_v19 = vmul.f32 %v958_v47, %v5075_v20  ;;  %v1115_v21 = vpop.permute.xlu0 %1114 }
 0x237   : > { %2893 = vst.msk [vmem:[%s5061_s10 + $0x2c0] sm:$0xf] %vm2716_vm0, %v4670_v18  ;;  %1201 = vbcast.lane.b32.xlu1 %v5004_v56, 312  ;;  %v1614_v51 = vmul.f32 %v1115_v21, %v5023_v0 }
 0x238   : > { %v4635_v22 = vpack.c.bf16 %v1577_v19, %v1577_v19  ;;  %1355 = vbcast.lane.b32.xlu0 %v5008_v58, 352 }
 0x239   : > { %v4672_v23 = vpack.c.bf16 %v1614_v51, %v1614_v51  ;;  %v966_v24 = vpop.permute.xlu1 %965 }
 0x23a   : > { %2858 = vst.msk [vmem:[%s5061_s10 + $0x234] sm:$0xf] %vm2716_vm0, %v4635_v22  ;;  %v1579_v25 = vmul.f32 %v966_v24, %v5094_v31  ;;  %v1123_v27 = vpop.permute.xlu0 %1122 }
 0x23b   : > { %2895 = vst.msk [vmem:[%s5061_s10 + $0x2c8] sm:$0xf] %vm2716_vm0, %v4672_v23  ;;  %1209 = vbcast.lane.b32.xlu1 %v5004_v56, 328  ;;  %v1616_v28 = vmul.f32 %v1123_v27, %v5030_v2 }
 0x23c   : > { %v4637_v29 = vpack.c.bf16 %v1579_v25, %v1579_v25  ;;  %1363 = vbcast.lane.b32.xlu0 %v5008_v58, 368 }
 0x23d   : > { %v4674_v52 = vpack.c.bf16 %v1616_v28, %v1616_v28  ;;  %v977_v30 = vpop.permute.xlu1 %976 }
 0x23e   : > { %2860 = vst.msk [vmem:[%s5061_s10 + $0x23c] sm:$0xf] %vm2716_vm0, %v4637_v29  ;;  %v1581_v32 = vmul.f32 %v977_v30, %v5020_v63  ;;  %v1131_v48 = vpop.permute.xlu0 %1130 }
 0x23f   : > { %2897 = vst.msk [vmem:[%s5061_s10 + $0x2d0] sm:$0xf] %vm2716_vm0, %v4674_v52  ;;  %1217 = vbcast.lane.b32.xlu1 %v5004_v56, 344  ;;  %v1618_v33 = vmul.f32 %v1131_v48, %v5037_v4 }
 0x240   : > { %v4639_v34 = vpack.c.bf16 %v1581_v32, %v1581_v32  ;;  %1374 = vbcast.lane.b32.xlu0 %v5010_v59, 256 }
 0x241   : > { %v4676_v35 = vpack.c.bf16 %v1618_v33, %v1618_v33  ;;  %v985_v53 = vpop.permute.xlu1 %984 }
 0x242   : > { %2862 = vst.msk [vmem:[%s5061_s10 + $0x244] sm:$0xf] %vm2716_vm0, %v4639_v34  ;;  %v1583_v36 = vmul.f32 %v985_v53, %v5027_v1  ;;  %v1139_v37 = vpop.permute.xlu0 %1138 }
 0x243   : > { %2899 = vst.msk [vmem:[%s5061_s10 + $0x2d8] sm:$0xf] %vm2716_vm0, %v4676_v35  ;;  %1225 = vbcast.lane.b32.xlu1 %v5004_v56, 360  ;;  %v1620_v38 = vmul.f32 %v1139_v37, %v5044_v6 }
 0x244   : > { %v4641_v39 = vpack.c.bf16 %v1583_v36, %v1583_v36  ;;  %1382 = vbcast.lane.b32.xlu0 %v5010_v59, 272 }
 0x245   : > { %v4678_v40 = vpack.c.bf16 %v1620_v38, %v1620_v38  ;;  %v993_v54 = vpop.permute.xlu1 %992 }
 0x246   : > { %2864 = vst.msk [vmem:[%s5061_s10 + $0x24c] sm:$0xf] %vm2716_vm0, %v4641_v39  ;;  %v1585_v41 = vmul.f32 %v993_v54, %v5034_v3  ;;  %v1147_v42 = vpop.permute.xlu0 %1146 }
 0x247   : > { %2901 = vst.msk [vmem:[%s5061_s10 + $0x2e0] sm:$0xf] %vm2716_vm0, %v4678_v40  ;;  %1233 = vbcast.lane.b32.xlu1 %v5004_v56, 376  ;;  %v1622_v49 = vmul.f32 %v1147_v42, %v5051_v8 }
 0x248   : > { %v4643_v43 = vpack.c.bf16 %v1585_v41, %v1585_v41  ;;  %1390 = vbcast.lane.b32.xlu0 %v5010_v59, 288 }
 0x249   : > { %v4680_v55 = vpack.c.bf16 %v1622_v49, %v1622_v49  ;;  %v1001_v44 = vpop.permute.xlu1 %1000 }
 0x24a   : > { %2866 = vst.msk [vmem:[%s5061_s10 + $0x254] sm:$0xf] %vm2716_vm0, %v4643_v43  ;;  %v1587_v45 = vmul.f32 %v1001_v44, %v5041_v5  ;;  %v1155_v46 = vpop.permute.xlu0 %1154 }
 0x24b   : > { %2903 = vst.msk [vmem:[%s5061_s10 + $0x2e8] sm:$0xf] %vm2716_vm0, %v4680_v55  ;;  %1244 = vbcast.lane.b32.xlu1 %v5006_v57, 264  ;;  %v1624_v56 = vmul.f32 %v1155_v46, %v5066_v15 }
 0x24c   : > { %v4645_v60 = vpack.c.bf16 %v1587_v45, %v1587_v45  ;;  %1398 = vbcast.lane.b32.xlu0 %v5010_v59, 304 }
 0x24d   : > { %v4682_v61 = vpack.c.bf16 %v1624_v56, %v1624_v56  ;;  %v1009_v10 = vpop.permute.xlu1 %1008 }
 0x24e   : > { %2868 = vst.msk [vmem:[%s5061_s10 + $0x25c] sm:$0xf] %vm2716_vm0, %v4645_v60  ;;  %v1589_v11 = vmul.f32 %v1009_v10, %v5048_v7  ;;  %v1163_v12 = vpop.permute.xlu0 %1162 }
 0x24f   : > { %2905 = vst.msk [vmem:[%s5061_s10 + $0x2f0] sm:$0xf] %vm2716_vm0, %v4682_v61  ;;  %1252 = vbcast.lane.b32.xlu1 %v5006_v57, 280  ;;  %v1626_v50 = vmul.f32 %v1163_v12, %v5085_v26 }
 0x250   : > { %v4647_v13 = vpack.c.bf16 %v1589_v11, %v1589_v11  ;;  %1406 = vbcast.lane.b32.xlu0 %v5010_v59, 320 }
 0x251   : > { %v4684_v14 = vpack.c.bf16 %v1626_v50, %v1626_v50  ;;  %v1017_v16 = vpop.permute.xlu1 %1016 }
 0x252   : > { %2870 = vst.msk [vmem:[%s5061_s10 + $0x264] sm:$0xf] %vm2716_vm0, %v4647_v13  ;;  %v1591_v17 = vmul.f32 %v1017_v16, %v5056_v9  ;;  %v1174_v18 = vpop.permute.xlu0 %1173 }
 0x253   : > { %2907 = vst.msk [vmem:[%s5061_s10 + $0x2f8] sm:$0xf] %vm2716_vm0, %v4684_v14  ;;  %1260 = vbcast.lane.b32.xlu1 %v5006_v57, 296  ;;  %v1628_v47 = vmul.f32 %v1174_v18, %v5017_v62 }
 0x254   : > { %v4649_v19 = vpack.c.bf16 %v1591_v17, %v1591_v17  ;;  %1414 = vbcast.lane.b32.xlu0 %v5010_v59, 336 }
 0x255   : > { %v4686_v21 = vpack.c.bf16 %v1628_v47, %v1628_v47  ;;  %v1025_v51 = vpop.permute.xlu1 %1024 }
 0x256   : > { %2872 = vst.msk [vmem:[%s5061_s10 + $0x26c] sm:$0xf] %vm2716_vm0, %v4649_v19  ;;  %v1593_v22 = vmul.f32 %v1025_v51, %v5075_v20  ;;  %v1182_v23 = vpop.permute.xlu0 %1181 }
 0x257   : > { %2909 = vst.msk [vmem:[%s5061_s10 + $0x300] sm:$0xf] %vm2716_vm0, %v4686_v21  ;;  %1268 = vbcast.lane.b32.xlu1 %v5006_v57, 312  ;;  %v1630_v24 = vmul.f32 %v1182_v23, %v5023_v0 }
 0x258   : > { %v4651_v25 = vpack.c.bf16 %v1593_v22, %v1593_v22  ;;  %1422 = vbcast.lane.b32.xlu0 %v5010_v59, 352 }
 0x259   : > { %v4688_v27 = vpack.c.bf16 %v1630_v24, %v1630_v24  ;;  %v1033_v28 = vpop.permute.xlu1 %1032 }
 0x25a   : > { %2874 = vst.msk [vmem:[%s5061_s10 + $0x274] sm:$0xf] %vm2716_vm0, %v4651_v25  ;;  %v1595_v29 = vmul.f32 %v1033_v28, %v5094_v31  ;;  %v1190_v52 = vpop.permute.xlu0 %1189 }
 0x25b   : > { %2911 = vst.msk [vmem:[%s5061_s10 + $0x308] sm:$0xf] %vm2716_vm0, %v4688_v27  ;;  %1276 = vbcast.lane.b32.xlu1 %v5006_v57, 328  ;;  %v1632_v30 = vmul.f32 %v1190_v52, %v5030_v2 }
 0x25c   : > { %v4653_v32 = vpack.c.bf16 %v1595_v29, %v1595_v29  ;;  %1430 = vbcast.lane.b32.xlu0 %v5010_v59, 368 }
 0x25d   : > { %v4690_v48 = vpack.c.bf16 %v1632_v30, %v1632_v30  ;;  %v1044_v33 = vpop.permute.xlu1 %1043 }
 0x25e   : > { %2876 = vst.msk [vmem:[%s5061_s10 + $0x27c] sm:$0xf] %vm2716_vm0, %v4653_v32  ;;  %v1597_v34 = vmul.f32 %v1044_v33, %v5020_v63  ;;  %v1198_v35 = vpop.permute.xlu0 %1197 }
 0x25f   : > { %2913 = vst.msk [vmem:[%s5061_s10 + $0x310] sm:$0xf] %vm2716_vm0, %v4690_v48  ;;  %1284 = vbcast.lane.b32.xlu1 %v5006_v57, 344  ;;  %v1634_v53 = vmul.f32 %v1198_v35, %v5037_v4 }
 0x260   : > { %v4655_v36 = vpack.c.bf16 %v1597_v34, %v1597_v34 }
 0x261   : > { %v4692_v37 = vpack.c.bf16 %v1634_v53, %v1634_v53  ;;  %v1052_v38 = vpop.permute.xlu1 %1051 }
 0x262   : > { %2878 = vst.msk [vmem:[%s5061_s10 + $0x284] sm:$0xf] %vm2716_vm0, %v4655_v36  ;;  %v1599_v39 = vmul.f32 %v1052_v38, %v5027_v1  ;;  %v1206_v40 = vpop.permute.xlu0 %1205 }
 0x263   : > { %2915 = vst.msk [vmem:[%s5061_s10 + $0x318] sm:$0xf] %vm2716_vm0, %v4692_v37  ;;  %1292 = vbcast.lane.b32.xlu1 %v5006_v57, 360  ;;  %v1636_v54 = vmul.f32 %v1206_v40, %v5044_v6 }
 0x264   : > { %v4657_v41 = vpack.c.bf16 %v1599_v39, %v1599_v39 }
 0x265   : > { %v4694_v42 = vpack.c.bf16 %v1636_v54, %v1636_v54  ;;  %v1060_v49 = vpop.permute.xlu1 %1059 }
 0x266   : > { %2880 = vst.msk [vmem:[%s5061_s10 + $0x28c] sm:$0xf] %vm2716_vm0, %v4657_v41  ;;  %v1601_v43 = vmul.f32 %v1060_v49, %v5034_v3  ;;  %v1214_v55 = vpop.permute.xlu0 %1213 }
 0x267   : > { %2917 = vst.msk [vmem:[%s5061_s10 + $0x320] sm:$0xf] %vm2716_vm0, %v4694_v42  ;;  %1300 = vbcast.lane.b32.xlu1 %v5006_v57, 376  ;;  %v1638_v44 = vmul.f32 %v1214_v55, %v5051_v8 }
 0x268   : > { %v4659_v45 = vpack.c.bf16 %v1601_v43, %v1601_v43 }
 0x269   : > { %v4696_v46 = vpack.c.bf16 %v1638_v44, %v1638_v44  ;;  %v1068_v56 = vpop.permute.xlu1 %1067 }
 0x26a   : > { %2882 = vst.msk [vmem:[%s5061_s10 + $0x294] sm:$0xf] %vm2716_vm0, %v4659_v45  ;;  %v1603_v60 = vmul.f32 %v1068_v56, %v5041_v5  ;;  %v1222_v61 = vpop.permute.xlu0 %1221 }
 0x26b   : > { %2919 = vst.msk [vmem:[%s5061_s10 + $0x328] sm:$0xf] %vm2716_vm0, %v4696_v46  ;;  %1311 = vbcast.lane.b32.xlu1 %v5008_v58, 264  ;;  %v1640_v10 = vmul.f32 %v1222_v61, %v5066_v15 }
 0x26c   : > { %v4661_v57 = vpack.c.bf16 %v1603_v60, %v1603_v60 }
 0x26d   : > { %v4698_v11 = vpack.c.bf16 %v1640_v10, %v1640_v10  ;;  %v1076_v12 = vpop.permute.xlu1 %1075 }
 0x26e   : > { %2884 = vst.msk [vmem:[%s5061_s10 + $0x29c] sm:$0xf] %vm2716_vm0, %v4661_v57  ;;  %v1605_v50 = vmul.f32 %v1076_v12, %v5048_v7  ;;  %v1230_v13 = vpop.permute.xlu0 %1229 }
 0x26f   : > { %2921 = vst.msk [vmem:[%s5061_s10 + $0x330] sm:$0xf] %vm2716_vm0, %v4698_v11  ;;  %1319 = vbcast.lane.b32.xlu1 %v5008_v58, 280  ;;  %v1642_v14 = vmul.f32 %v1230_v13, %v5085_v26 }
 0x270   : > { %v4663_v16 = vpack.c.bf16 %v1605_v50, %v1605_v50 }
 0x271   : > { %v4700_v17 = vpack.c.bf16 %v1642_v14, %v1642_v14  ;;  %v1084_v18 = vpop.permute.xlu1 %1083 }
 0x272   : > { %2886 = vst.msk [vmem:[%s5061_s10 + $0x2a4] sm:$0xf] %vm2716_vm0, %v4663_v16  ;;  %v1607_v47 = vmul.f32 %v1084_v18, %v5056_v9  ;;  %v1241_v19 = vpop.permute.xlu0 %1240 }
 0x273   : > { %2923 = vst.msk [vmem:[%s5061_s10 + $0x338] sm:$0xf] %vm2716_vm0, %v4700_v17  ;;  %1327 = vbcast.lane.b32.xlu1 %v5008_v58, 296  ;;  %v1644_v21 = vmul.f32 %v1241_v19, %v5017_v62 }
 0x274   : > { %v4665_v51 = vpack.c.bf16 %v1607_v47, %v1607_v47 }
 0x275   : > { %v4702_v22 = vpack.c.bf16 %v1644_v21, %v1644_v21  ;;  %v1092_v23 = vpop.permute.xlu1 %1091 }
 0x276   : > { %2888 = vst.msk [vmem:[%s5061_s10 + $0x2ac] sm:$0xf] %vm2716_vm0, %v4665_v51  ;;  %v1609_v24 = vmul.f32 %v1092_v23, %v5075_v20  ;;  %v1249_v25 = vpop.permute.xlu0 %1248 }
 0x277   : > { %2925 = vst.msk [vmem:[%s5061_s10 + $0x340] sm:$0xf] %vm2716_vm0, %v4702_v22  ;;  %1335 = vbcast.lane.b32.xlu1 %v5008_v58, 312  ;;  %v1646_v27 = vmul.f32 %v1249_v25, %v5023_v0 }
 0x278   : > { %v4667_v28 = vpack.c.bf16 %v1609_v24, %v1609_v24 }
 0x279   : > { %v4704_v29 = vpack.c.bf16 %v1646_v27, %v1646_v27  ;;  %v1100_v52 = vpop.permute.xlu1 %1099 }
 0x27a   : > { %2890 = vst.msk [vmem:[%s5061_s10 + $0x2b4] sm:$0xf] %vm2716_vm0, %v4667_v28  ;;  %v1611_v30 = vmul.f32 %v1100_v52, %v5094_v31  ;;  %v1257_v32 = vpop.permute.xlu0 %1256 }
 0x27b   : > { %2927 = vst.msk [vmem:[%s5061_s10 + $0x348] sm:$0xf] %vm2716_vm0, %v4704_v29  ;;  %1343 = vbcast.lane.b32.xlu1 %v5008_v58, 328  ;;  %v1648_v48 = vmul.f32 %v1257_v32, %v5030_v2 }
 0x27c   : > { %v4669_v33 = vpack.c.bf16 %v1611_v30, %v1611_v30 }
 0x27d   : > { %v4706_v34 = vpack.c.bf16 %v1648_v48, %v1648_v48  ;;  %v1111_v35 = vpop.permute.xlu1 %1110 }
 0x27e   : > { %2892 = vst.msk [vmem:[%s5061_s10 + $0x2bc] sm:$0xf] %vm2716_vm0, %v4669_v33  ;;  %v1613_v53 = vmul.f32 %v1111_v35, %v5020_v63  ;;  %v1265_v36 = vpop.permute.xlu0 %1264 }
 0x27f   : > { %2929 = vst.msk [vmem:[%s5061_s10 + $0x350] sm:$0xf] %vm2716_vm0, %v4706_v34  ;;  %1351 = vbcast.lane.b32.xlu1 %v5008_v58, 344  ;;  %v1650_v37 = vmul.f32 %v1265_v36, %v5037_v4 }
 0x280   : > { %v4671_v38 = vpack.c.bf16 %v1613_v53, %v1613_v53 }
 0x281   : > { %v4708_v39 = vpack.c.bf16 %v1650_v37, %v1650_v37  ;;  %v1119_v40 = vpop.permute.xlu1 %1118 }
 0x282   : > { %2894 = vst.msk [vmem:[%s5061_s10 + $0x2c4] sm:$0xf] %vm2716_vm0, %v4671_v38  ;;  %v1615_v54 = vmul.f32 %v1119_v40, %v5027_v1  ;;  %v1273_v41 = vpop.permute.xlu0 %1272 }
 0x283   : > { %2931 = vst.msk [vmem:[%s5061_s10 + $0x358] sm:$0xf] %vm2716_vm0, %v4708_v39  ;;  %1359 = vbcast.lane.b32.xlu1 %v5008_v58, 360  ;;  %v1652_v42 = vmul.f32 %v1273_v41, %v5044_v6 }
 0x284   : > { %v4673_v49 = vpack.c.bf16 %v1615_v54, %v1615_v54 }
 0x285   : > { %v4710_v43 = vpack.c.bf16 %v1652_v42, %v1652_v42  ;;  %v1127_v55 = vpop.permute.xlu1 %1126 }
 0x286   : > { %2896 = vst.msk [vmem:[%s5061_s10 + $0x2cc] sm:$0xf] %vm2716_vm0, %v4673_v49  ;;  %v1617_v44 = vmul.f32 %v1127_v55, %v5034_v3  ;;  %v1281_v45 = vpop.permute.xlu0 %1280 }
 0x287   : > { %2933 = vst.msk [vmem:[%s5061_s10 + $0x360] sm:$0xf] %vm2716_vm0, %v4710_v43  ;;  %1367 = vbcast.lane.b32.xlu1 %v5008_v58, 376  ;;  %v1654_v46 = vmul.f32 %v1281_v45, %v5051_v8 }
 0x288   : > { %v4675_v56 = vpack.c.bf16 %v1617_v44, %v1617_v44 }
 0x289   : > { %v4712_v60 = vpack.c.bf16 %v1654_v46, %v1654_v46  ;;  %v1135_v61 = vpop.permute.xlu1 %1134 }
 0x28a   : > { %2898 = vst.msk [vmem:[%s5061_s10 + $0x2d4] sm:$0xf] %vm2716_vm0, %v4675_v56  ;;  %v1619_v10 = vmul.f32 %v1135_v61, %v5041_v5  ;;  %v1289_v57 = vpop.permute.xlu0 %1288 }
 0x28b   : > { %2935 = vst.msk [vmem:[%s5061_s10 + $0x368] sm:$0xf] %vm2716_vm0, %v4712_v60  ;;  %1378 = vbcast.lane.b32.xlu1 %v5010_v59, 264  ;;  %v1656_v11 = vmul.f32 %v1289_v57, %v5066_v15 }
 0x28c   : > { %v4677_v58 = vpack.c.bf16 %v1619_v10, %v1619_v10 }
 0x28d   : > { %v4714_v12 = vpack.c.bf16 %v1656_v11, %v1656_v11  ;;  %v1143_v50 = vpop.permute.xlu1 %1142 }
 0x28e   : > { %2900 = vst.msk [vmem:[%s5061_s10 + $0x2dc] sm:$0xf] %vm2716_vm0, %v4677_v58  ;;  %v1621_v13 = vmul.f32 %v1143_v50, %v5048_v7  ;;  %v1297_v14 = vpop.permute.xlu0 %1296 }
 0x28f   : > { %2937 = vst.msk [vmem:[%s5061_s10 + $0x370] sm:$0xf] %vm2716_vm0, %v4714_v12  ;;  %1386 = vbcast.lane.b32.xlu1 %v5010_v59, 280  ;;  %v1658_v16 = vmul.f32 %v1297_v14, %v5085_v26 }
 0x290   : > { %v4679_v17 = vpack.c.bf16 %v1621_v13, %v1621_v13 }
 0x291   : > { %v4716_v18 = vpack.c.bf16 %v1658_v16, %v1658_v16  ;;  %v1151_v47 = vpop.permute.xlu1 %1150 }
 0x292   : > { %2902 = vst.msk [vmem:[%s5061_s10 + $0x2e4] sm:$0xf] %vm2716_vm0, %v4679_v17  ;;  %v1623_v19 = vmul.f32 %v1151_v47, %v5056_v9  ;;  %v1308_v21 = vpop.permute.xlu0 %1307 }
 0x293   : > { %2939 = vst.msk [vmem:[%s5061_s10 + $0x378] sm:$0xf] %vm2716_vm0, %v4716_v18  ;;  %1394 = vbcast.lane.b32.xlu1 %v5010_v59, 296  ;;  %v1660_v51 = vmul.f32 %v1308_v21, %v5017_v62 }
 0x294   : > { %v4681_v22 = vpack.c.bf16 %v1623_v19, %v1623_v19 }
 0x295   : > { %v4718_v23 = vpack.c.bf16 %v1660_v51, %v1660_v51  ;;  %v1159_v24 = vpop.permute.xlu1 %1158 }
 0x296   : > { %2904 = vst.msk [vmem:[%s5061_s10 + $0x2ec] sm:$0xf] %vm2716_vm0, %v4681_v22  ;;  %v1625_v25 = vmul.f32 %v1159_v24, %v5075_v20  ;;  %v1316_v27 = vpop.permute.xlu0 %1315 }
 0x297   : > { %2941 = vst.msk [vmem:[%s5061_s10 + $0x380] sm:$0xf] %vm2716_vm0, %v4718_v23  ;;  %1402 = vbcast.lane.b32.xlu1 %v5010_v59, 312  ;;  %v1662_v28 = vmul.f32 %v1316_v27, %v5023_v0 }
 0x298   : > { %v4683_v29 = vpack.c.bf16 %v1625_v25, %v1625_v25 }
 0x299   : > { %v4720_v52 = vpack.c.bf16 %v1662_v28, %v1662_v28  ;;  %v1167_v30 = vpop.permute.xlu1 %1166 }
 0x29a   : > { %2906 = vst.msk [vmem:[%s5061_s10 + $0x2f4] sm:$0xf] %vm2716_vm0, %v4683_v29  ;;  %v1627_v32 = vmul.f32 %v1167_v30, %v5094_v31  ;;  %v1324_v48 = vpop.permute.xlu0 %1323 }
 0x29b   : > { %2943 = vst.msk [vmem:[%s5061_s10 + $0x388] sm:$0xf] %vm2716_vm0, %v4720_v52  ;;  %1410 = vbcast.lane.b32.xlu1 %v5010_v59, 328  ;;  %v1664_v33 = vmul.f32 %v1324_v48, %v5030_v2 }
 0x29c   : > { %v4685_v34 = vpack.c.bf16 %v1627_v32, %v1627_v32 }
 0x29d   : > { %v4722_v35 = vpack.c.bf16 %v1664_v33, %v1664_v33  ;;  %v1178_v53 = vpop.permute.xlu1 %1177 }
 0x29e   : > { %2908 = vst.msk [vmem:[%s5061_s10 + $0x2fc] sm:$0xf] %vm2716_vm0, %v4685_v34  ;;  %v1629_v36 = vmul.f32 %v1178_v53, %v5020_v63  ;;  %v1332_v37 = vpop.permute.xlu0 %1331 }
 0x29f   : > { %2945 = vst.msk [vmem:[%s5061_s10 + $0x390] sm:$0xf] %vm2716_vm0, %v4722_v35  ;;  %1418 = vbcast.lane.b32.xlu1 %v5010_v59, 344  ;;  %v1666_v38 = vmul.f32 %v1332_v37, %v5037_v4 }
 0x2a0   : > { %v4687_v39 = vpack.c.bf16 %v1629_v36, %v1629_v36 }
 0x2a1   : > { %v4724_v40 = vpack.c.bf16 %v1666_v38, %v1666_v38  ;;  %v1186_v54 = vpop.permute.xlu1 %1185 }
 0x2a2   : > { %2910 = vst.msk [vmem:[%s5061_s10 + $0x304] sm:$0xf] %vm2716_vm0, %v4687_v39  ;;  %v1631_v41 = vmul.f32 %v1186_v54, %v5027_v1  ;;  %v1340_v42 = vpop.permute.xlu0 %1339 }
 0x2a3   : > { %2947 = vst.msk [vmem:[%s5061_s10 + $0x398] sm:$0xf] %vm2716_vm0, %v4724_v40  ;;  %1426 = vbcast.lane.b32.xlu1 %v5010_v59, 360  ;;  %v1668_v49 = vmul.f32 %v1340_v42, %v5044_v6 }
 0x2a4   : > { %v4689_v43 = vpack.c.bf16 %v1631_v41, %v1631_v41 }
 0x2a5   : > { %v4726_v55 = vpack.c.bf16 %v1668_v49, %v1668_v49  ;;  %v1194_v44 = vpop.permute.xlu1 %1193 }
 0x2a6   : > { %2912 = vst.msk [vmem:[%s5061_s10 + $0x30c] sm:$0xf] %vm2716_vm0, %v4689_v43  ;;  %v1633_v45 = vmul.f32 %v1194_v44, %v5034_v3  ;;  %v1348_v46 = vpop.permute.xlu0 %1347 }
 0x2a7   : > { %2949 = vst.msk [vmem:[%s5061_s10 + $0x3a0] sm:$0xf] %vm2716_vm0, %v4726_v55  ;;  %1434 = vbcast.lane.b32.xlu1 %v5010_v59, 376  ;;  %v1670_v56 = vmul.f32 %v1348_v46, %v5051_v8 }
 0x2a8   : > { %v4691_v60 = vpack.c.bf16 %v1633_v45, %v1633_v45 }
 0x2a9   : > { %v4728_v61 = vpack.c.bf16 %v1670_v56, %v1670_v56  ;;  %v1202_v10 = vpop.permute.xlu1 %1201 }
 0x2aa   : > { %2914 = vst.msk [vmem:[%s5061_s10 + $0x314] sm:$0xf] %vm2716_vm0, %v4691_v60  ;;  %v1635_v57 = vmul.f32 %v1202_v10, %v5041_v5  ;;  %v1356_v11 = vpop.permute.xlu0 %1355 }
 0x2ab   : > { %2951 = vst.msk [vmem:[%s5061_s10 + $0x3a8] sm:$0xf] %vm2716_vm0, %v4728_v61  ;;  %v1672_v58 = vmul.f32 %v1356_v11, %v5066_v15 }
 0x2ac   : > { %v4693_v12 = vpack.c.bf16 %v1635_v57, %v1635_v57 }
 0x2ad   : > { %v4730_v50 = vpack.c.bf16 %v1672_v58, %v1672_v58  ;;  %v1210_v59 = vpop.permute.xlu1 %1209 }
 0x2ae   : > { %2916 = vst.msk [vmem:[%s5061_s10 + $0x31c] sm:$0xf] %vm2716_vm0, %v4693_v12  ;;  %v1637_v13 = vmul.f32 %v1210_v59, %v5048_v7  ;;  %v1364_v14 = vpop.permute.xlu0 %1363 }
 0x2af   : > { %2953 = vst.msk [vmem:[%s5061_s10 + $0x3b0] sm:$0xf] %vm2716_vm0, %v4730_v50  ;;  %v1674_v16 = vmul.f32 %v1364_v14, %v5085_v26 }
 0x2b0   : > { %v4695_v17 = vpack.c.bf16 %v1637_v13, %v1637_v13 }
 0x2b1   : > { %v4732_v18 = vpack.c.bf16 %v1674_v16, %v1674_v16  ;;  %v1218_v47 = vpop.permute.xlu1 %1217 }
 0x2b2   : > { %2918 = vst.msk [vmem:[%s5061_s10 + $0x324] sm:$0xf] %vm2716_vm0, %v4695_v17  ;;  %v1639_v19 = vmul.f32 %v1218_v47, %v5056_v9  ;;  %v1375_v21 = vpop.permute.xlu0 %1374 }
 0x2b3   : > { %2955 = vst.msk [vmem:[%s5061_s10 + $0x3b8] sm:$0xf] %vm2716_vm0, %v4732_v18  ;;  %v1676_v51 = vmul.f32 %v1375_v21, %v5017_v62 }
 0x2b4   : > { %v4697_v22 = vpack.c.bf16 %v1639_v19, %v1639_v19 }
 0x2b5   : > { %v4734_v23 = vpack.c.bf16 %v1676_v51, %v1676_v51  ;;  %v1226_v24 = vpop.permute.xlu1 %1225 }
 0x2b6   : > { %2920 = vst.msk [vmem:[%s5061_s10 + $0x32c] sm:$0xf] %vm2716_vm0, %v4697_v22  ;;  %v1641_v25 = vmul.f32 %v1226_v24, %v5075_v20  ;;  %v1383_v27 = vpop.permute.xlu0 %1382 }
 0x2b7   : > { %2957 = vst.msk [vmem:[%s5061_s10 + $0x3c0] sm:$0xf] %vm2716_vm0, %v4734_v23  ;;  %v1678_v28 = vmul.f32 %v1383_v27, %v5023_v0 }
 0x2b8   : > { %v4699_v29 = vpack.c.bf16 %v1641_v25, %v1641_v25 }
 0x2b9   : > { %v4736_v52 = vpack.c.bf16 %v1678_v28, %v1678_v28  ;;  %v1234_v30 = vpop.permute.xlu1 %1233 }
 0x2ba   : > { %2922 = vst.msk [vmem:[%s5061_s10 + $0x334] sm:$0xf] %vm2716_vm0, %v4699_v29  ;;  %v1643_v62 = vmul.f32 %v1234_v30, %v5094_v31  ;;  %v1391_v32 = vpop.permute.xlu0 %1390 }
 0x2bb   : > { %2959 = vst.msk [vmem:[%s5061_s10 + $0x3c8] sm:$0xf] %vm2716_vm0, %v4736_v52  ;;  %v1680_v48 = vmul.f32 %v1391_v32, %v5030_v2 }
 0x2bc   : > { %v4701_v33 = vpack.c.bf16 %v1643_v62, %v1643_v62 }
 0x2bd   : > { %v4738_v34 = vpack.c.bf16 %v1680_v48, %v1680_v48  ;;  %v1245_v35 = vpop.permute.xlu1 %1244 }
 0x2be   : > { %2924 = vst.msk [vmem:[%s5061_s10 + $0x33c] sm:$0xf] %vm2716_vm0, %v4701_v33  ;;  %v1645_v0 = vmul.f32 %v1245_v35, %v5020_v63  ;;  %v1399_v53 = vpop.permute.xlu0 %1398 }
 0x2bf   : > { %2961 = vst.msk [vmem:[%s5061_s10 + $0x3d0] sm:$0xf] %vm2716_vm0, %v4738_v34  ;;  %v1682_v36 = vmul.f32 %v1399_v53, %v5037_v4 }
 0x2c0   : > { %v4703_v37 = vpack.c.bf16 %v1645_v0, %v1645_v0 }
 0x2c1   : > { %v4740_v38 = vpack.c.bf16 %v1682_v36, %v1682_v36  ;;  %v1253_v39 = vpop.permute.xlu1 %1252 }
 0x2c2   : > { %2926 = vst.msk [vmem:[%s5061_s10 + $0x344] sm:$0xf] %vm2716_vm0, %v4703_v37  ;;  %v1647_v2 = vmul.f32 %v1253_v39, %v5027_v1  ;;  %v1407_v40 = vpop.permute.xlu0 %1406 }
 0x2c3   : > { %2963 = vst.msk [vmem:[%s5061_s10 + $0x3d8] sm:$0xf] %vm2716_vm0, %v4740_v38  ;;  %v1684_v54 = vmul.f32 %v1407_v40, %v5044_v6 }
 0x2c4   : > { %v4705_v41 = vpack.c.bf16 %v1647_v2, %v1647_v2 }
 0x2c5   : > { %v4742_v42 = vpack.c.bf16 %v1684_v54, %v1684_v54  ;;  %v1261_v49 = vpop.permute.xlu1 %1260 }
 0x2c6   : > { %2928 = vst.msk [vmem:[%s5061_s10 + $0x34c] sm:$0xf] %vm2716_vm0, %v4705_v41  ;;  %v1649_v4 = vmul.f32 %v1261_v49, %v5034_v3  ;;  %v1415_v43 = vpop.permute.xlu0 %1414 }
 0x2c7   : > { %2965 = vst.msk [vmem:[%s5061_s10 + $0x3e0] sm:$0xf] %vm2716_vm0, %v4742_v42  ;;  %v1686_v55 = vmul.f32 %v1415_v43, %v5051_v8 }
 0x2c8   : > { %v4707_v44 = vpack.c.bf16 %v1649_v4, %v1649_v4 }
 0x2c9   : > { %v4744_v45 = vpack.c.bf16 %v1686_v55, %v1686_v55  ;;  %v1269_v46 = vpop.permute.xlu1 %1268 }
 0x2ca   : > { %2930 = vst.msk [vmem:[%s5061_s10 + $0x354] sm:$0xf] %vm2716_vm0, %v4707_v44  ;;  %v1651_v6 = vmul.f32 %v1269_v46, %v5041_v5  ;;  %v1423_v56 = vpop.permute.xlu0 %1422 }
 0x2cb   : > { %2967 = vst.msk [vmem:[%s5061_s10 + $0x3e8] sm:$0xf] %vm2716_vm0, %v4744_v45  ;;  %v1688_v60 = vmul.f32 %v1423_v56, %v5066_v15 }
 0x2cc   : > { %v4709_v61 = vpack.c.bf16 %v1651_v6, %v1651_v6 }
 0x2cd   : > { %v4746_v10 = vpack.c.bf16 %v1688_v60, %v1688_v60  ;;  %v1277_v57 = vpop.permute.xlu1 %1276 }
 0x2ce   : > { %2932 = vst.msk [vmem:[%s5061_s10 + $0x35c] sm:$0xf] %vm2716_vm0, %v4709_v61  ;;  %v1653_v8 = vmul.f32 %v1277_v57, %v5048_v7  ;;  %v1431_v11 = vpop.permute.xlu0 %1430 }
 0x2cf   : > { %2969 = vst.msk [vmem:[%s5061_s10 + $0x3f0] sm:$0xf] %vm2716_vm0, %v4746_v10  ;;  %v1690_v58 = vmul.f32 %v1431_v11, %v5085_v26 }
 0x2d0   : > { %v4711_v12 = vpack.c.bf16 %v1653_v8, %v1653_v8 }
 0x2d1   : > { %v4748_v50 = vpack.c.bf16 %v1690_v58, %v1690_v58  ;;  %v1285_v59 = vpop.permute.xlu1 %1284  ;;  %v3021_v58 = vld [vmem:[%s5061_s10 + $0x20] sm:$0xff] (%p4944_p6)  }
 0x2d2   : > { %2934 = vst.msk [vmem:[%s5061_s10 + $0x364] sm:$0xf] %vm2716_vm0, %v4711_v12  ;;  %v1655_v15 = vmul.f32 %v1285_v59, %v5056_v9  ;;  %v3025_v12 = vld [vmem:[%s5061_s10 + $0x28] sm:$0xff] (%p4944_p6)   ;;  %v3033_v59 = vld [vmem:[%s5061_s10 + $0x38] sm:$0xff] (%p4944_p6)   ;;  %3022 = vst [vmem:[%s6057_s29 + $0x20] sm:$0xff] (%p4944_p6), %v3021_v58  }
 0x2d3   : > { %2971 = vst.msk [vmem:[%s5061_s10 + $0x3f8] sm:$0xf] %vm2716_vm0, %v4748_v50  ;;  %v3029_v50 = vld [vmem:[%s5061_s10 + $0x30] sm:$0xff] (%p4944_p6)   ;;  %3026 = vst [vmem:[%s6057_s29 + $0x28] sm:$0xff] (%p4944_p6), %v3025_v12   ;;  %v3277_v58 = vld [vmem:[%s5061_s10 + $0x220] sm:$0xff] (%p4944_p6)  }
 0x2d4   : > { %v4713_v13 = vpack.c.bf16 %v1655_v15, %v1655_v15  ;;  %v3037_v15 = vld [vmem:[%s5061_s10 + $0x40] sm:$0xff] (%p4944_p6)   ;;  %3030 = vst [vmem:[%s6057_s29 + $0x30] sm:$0xff] (%p4944_p6), %v3029_v50   ;;  %3034 = vst [vmem:[%s6057_s29 + $0x38] sm:$0xff] (%p4944_p6), %v3033_v59   ;;  %v3281_v12 = vld [vmem:[%s5061_s10 + $0x228] sm:$0xff] (%p4944_p6)  }
 0x2d5   : > { %v1293_v14 = vpop.permute.xlu1 %1292  ;;  %3038 = vst [vmem:[%s6057_s29 + $0x100] sm:$0xff] (%p4944_p6), %v3037_v15   ;;  %3278 = vst [vmem:[%s6057_s29 + $0x820] sm:$0xff] (%p4944_p6), %v3277_v58   ;;  %v3285_v50 = vld [vmem:[%s5061_s10 + $0x230] sm:$0xff] (%p4944_p6)   ;;  %v3289_v59 = vld [vmem:[%s5061_s10 + $0x238] sm:$0xff] (%p4944_p6)  }
 0x2d6   : > { %2936 = vst.msk [vmem:[%s5061_s10 + $0x36c] sm:$0xf] %vm2716_vm0, %v4713_v13  ;;  %v1657_v16 = vmul.f32 %v1293_v14, %v5075_v20  ;;  %v3041_v13 = vld [vmem:[%s5061_s10 + $0x48] sm:$0xff] (%p4944_p6)   ;;  %v3045_v14 = vld [vmem:[%s5061_s10 + $0x50] sm:$0xff] (%p4944_p6)   ;;  %3282 = vst [vmem:[%s6057_s29 + $0x828] sm:$0xff] (%p4944_p6), %v3281_v12  }
 0x2d7   : > { %3042 = vst [vmem:[%s6057_s29 + $0x108] sm:$0xff] (%p4944_p6), %v3041_v13   ;;  %3046 = vst [vmem:[%s6057_s29 + $0x110] sm:$0xff] (%p4944_p6), %v3045_v14   ;;  %v3293_v15 = vld [vmem:[%s5061_s10 + $0x240] sm:$0xff] (%p4944_p6)   ;;  %v3297_v13 = vld [vmem:[%s5061_s10 + $0x248] sm:$0xff] (%p4944_p6)  }
 0x2d8   : > { %v4715_v17 = vpack.c.bf16 %v1657_v16, %v1657_v16  ;;  %v3049_v16 = vld [vmem:[%s5061_s10 + $0x58] sm:$0xff] (%p4944_p6)   ;;  %3286 = vst [vmem:[%s6057_s29 + $0x830] sm:$0xff] (%p4944_p6), %v3285_v50   ;;  %3290 = vst [vmem:[%s6057_s29 + $0x838] sm:$0xff] (%p4944_p6), %v3289_v59   ;;  %v3301_v14 = vld [vmem:[%s5061_s10 + $0x250] sm:$0xff] (%p4944_p6)  }
 0x2d9   : > { %v1301_v26 = vpop.permute.xlu1 %1300  ;;  %3050 = vst [vmem:[%s6057_s29 + $0x118] sm:$0xff] (%p4944_p6), %v3049_v16   ;;  %3294 = vst [vmem:[%s6057_s29 + $0x900] sm:$0xff] (%p4944_p6), %v3293_v15   ;;  %v3305_v16 = vld [vmem:[%s5061_s10 + $0x258] sm:$0xff] (%p4944_p6)  }
 0x2da   : > { %2938 = vst.msk [vmem:[%s5061_s10 + $0x374] sm:$0xf] %vm2716_vm0, %v4715_v17  ;;  %v1659_v18 = vmul.f32 %v1301_v26, %v5094_v31  ;;  %v3053_v17 = vld [vmem:[%s5061_s10 + $0x60] sm:$0xff] (%p4944_p6)   ;;  %v3057_v26 = vld [vmem:[%s5061_s10 + $0x68] sm:$0xff] (%p4944_p6)   ;;  %3298 = vst [vmem:[%s6057_s29 + $0x908] sm:$0xff] (%p4944_p6), %v3297_v13  }
 0x2db   : > { %3054 = vst [vmem:[%s6057_s29 + $0x120] sm:$0xff] (%p4944_p6), %v3053_v17   ;;  %3058 = vst [vmem:[%s6057_s29 + $0x128] sm:$0xff] (%p4944_p6), %v3057_v26   ;;  %v3309_v17 = vld [vmem:[%s5061_s10 + $0x260] sm:$0xff] (%p4944_p6)   ;;  %v3313_v26 = vld [vmem:[%s5061_s10 + $0x268] sm:$0xff] (%p4944_p6)  }
 0x2dc   : > { %v4717_v47 = vpack.c.bf16 %v1659_v18, %v1659_v18  ;;  %v3061_v18 = vld [vmem:[%s5061_s10 + $0x70] sm:$0xff] (%p4944_p6)   ;;  %3302 = vst [vmem:[%s6057_s29 + $0x910] sm:$0xff] (%p4944_p6), %v3301_v14   ;;  %3306 = vst [vmem:[%s6057_s29 + $0x918] sm:$0xff] (%p4944_p6), %v3305_v16  }
 0x2dd   : > { %v1312_v19 = vpop.permute.xlu1 %1311  ;;  %3062 = vst [vmem:[%s6057_s29 + $0x130] sm:$0xff] (%p4944_p6), %v3061_v18   ;;  %3310 = vst [vmem:[%s6057_s29 + $0x920] sm:$0xff] (%p4944_p6), %v3309_v17   ;;  %v3317_v18 = vld [vmem:[%s5061_s10 + $0x270] sm:$0xff] (%p4944_p6)  }
 0x2de   : > { %2940 = vst.msk [vmem:[%s5061_s10 + $0x37c] sm:$0xf] %vm2716_vm0, %v4717_v47  ;;  %v1661_v21 = vmul.f32 %v1312_v19, %v5020_v63  ;;  %v3065_v47 = vld [vmem:[%s5061_s10 + $0x78] sm:$0xff] (%p4944_p6)   ;;  %v3069_v19 = vld [vmem:[%s5061_s10 + $0x80] sm:$0xff] (%p4944_p6)   ;;  %3314 = vst [vmem:[%s6057_s29 + $0x928] sm:$0xff] (%p4944_p6), %v3313_v26  }
 0x2df   : > { %3066 = vst [vmem:[%s6057_s29 + $0x138] sm:$0xff] (%p4944_p6), %v3065_v47   ;;  %3070 = vst [vmem:[%s6057_s29 + $0x200] sm:$0xff] (%p4944_p6), %v3069_v19   ;;  %v3321_v47 = vld [vmem:[%s5061_s10 + $0x278] sm:$0xff] (%p4944_p6)   ;;  %v3325_v19 = vld [vmem:[%s5061_s10 + $0x280] sm:$0xff] (%p4944_p6)  }
 0x2e0   : > { %v4719_v51 = vpack.c.bf16 %v1661_v21, %v1661_v21  ;;  %v3073_v21 = vld [vmem:[%s5061_s10 + $0x88] sm:$0xff] (%p4944_p6)   ;;  %3318 = vst [vmem:[%s6057_s29 + $0x930] sm:$0xff] (%p4944_p6), %v3317_v18   ;;  %3322 = vst [vmem:[%s6057_s29 + $0x938] sm:$0xff] (%p4944_p6), %v3321_v47  }
 0x2e1   : > { %v1320_v22 = vpop.permute.xlu1 %1319  ;;  %3074 = vst [vmem:[%s6057_s29 + $0x208] sm:$0xff] (%p4944_p6), %v3073_v21   ;;  %3326 = vst [vmem:[%s6057_s29 + $0xa00] sm:$0xff] (%p4944_p6), %v3325_v19   ;;  %v3329_v21 = vld [vmem:[%s5061_s10 + $0x288] sm:$0xff] (%p4944_p6)  }
 0x2e2   : > { %2942 = vst.msk [vmem:[%s5061_s10 + $0x384] sm:$0xf] %vm2716_vm0, %v4719_v51  ;;  %v1663_v23 = vmul.f32 %v1320_v22, %v5027_v1  ;;  %v3077_v51 = vld [vmem:[%s5061_s10 + $0x90] sm:$0xff] (%p4944_p6)   ;;  %v3081_v22 = vld [vmem:[%s5061_s10 + $0x98] sm:$0xff] (%p4944_p6)   ;;  %3330 = vst [vmem:[%s6057_s29 + $0xa08] sm:$0xff] (%p4944_p6), %v3329_v21  }
 0x2e3   : > { %3078 = vst [vmem:[%s6057_s29 + $0x210] sm:$0xff] (%p4944_p6), %v3077_v51   ;;  %3082 = vst [vmem:[%s6057_s29 + $0x218] sm:$0xff] (%p4944_p6), %v3081_v22   ;;  %v3333_v51 = vld [vmem:[%s5061_s10 + $0x290] sm:$0xff] (%p4944_p6)   ;;  %v3337_v22 = vld [vmem:[%s5061_s10 + $0x298] sm:$0xff] (%p4944_p6)  }
 0x2e4   : > { %v4721_v24 = vpack.c.bf16 %v1663_v23, %v1663_v23  ;;  %v3085_v23 = vld [vmem:[%s5061_s10 + $0xa0] sm:$0xff] (%p4944_p6)   ;;  %3334 = vst [vmem:[%s6057_s29 + $0xa10] sm:$0xff] (%p4944_p6), %v3333_v51   ;;  %3338 = vst [vmem:[%s6057_s29 + $0xa18] sm:$0xff] (%p4944_p6), %v3337_v22  }
 0x2e5   : > { %v1328_v25 = vpop.permute.xlu1 %1327  ;;  %3086 = vst [vmem:[%s6057_s29 + $0x220] sm:$0xff] (%p4944_p6), %v3085_v23   ;;  %v3341_v23 = vld [vmem:[%s5061_s10 + $0x2a0] sm:$0xff] (%p4944_p6)  }
 0x2e6   : > { %2944 = vst.msk [vmem:[%s5061_s10 + $0x38c] sm:$0xf] %vm2716_vm0, %v4721_v24  ;;  %v1665_v27 = vmul.f32 %v1328_v25, %v5034_v3  ;;  %v3089_v24 = vld [vmem:[%s5061_s10 + $0xa8] sm:$0xff] (%p4944_p6)   ;;  %v3093_v25 = vld [vmem:[%s5061_s10 + $0xb0] sm:$0xff] (%p4944_p6)   ;;  %3342 = vst [vmem:[%s6057_s29 + $0xa20] sm:$0xff] (%p4944_p6), %v3341_v23  }
 0x2e7   : > { %3090 = vst [vmem:[%s6057_s29 + $0x228] sm:$0xff] (%p4944_p6), %v3089_v24   ;;  %3094 = vst [vmem:[%s6057_s29 + $0x230] sm:$0xff] (%p4944_p6), %v3093_v25   ;;  %v3345_v24 = vld [vmem:[%s5061_s10 + $0x2a8] sm:$0xff] (%p4944_p6)   ;;  %v3349_v25 = vld [vmem:[%s5061_s10 + $0x2b0] sm:$0xff] (%p4944_p6)  }
 0x2e8   : > { %v4723_v28 = vpack.c.bf16 %v1665_v27, %v1665_v27  ;;  %v3097_v27 = vld [vmem:[%s5061_s10 + $0xb8] sm:$0xff] (%p4944_p6)   ;;  %3346 = vst [vmem:[%s6057_s29 + $0xa28] sm:$0xff] (%p4944_p6), %v3345_v24   ;;  %3350 = vst [vmem:[%s6057_s29 + $0xa30] sm:$0xff] (%p4944_p6), %v3349_v25  }
 0x2e9   : > { %v1336_v29 = vpop.permute.xlu1 %1335  ;;  %3098 = vst [vmem:[%s6057_s29 + $0x238] sm:$0xff] (%p4944_p6), %v3097_v27   ;;  %v3353_v27 = vld [vmem:[%s5061_s10 + $0x2b8] sm:$0xff] (%p4944_p6)  }
 0x2ea   : > { %2946 = vst.msk [vmem:[%s5061_s10 + $0x394] sm:$0xf] %vm2716_vm0, %v4723_v28  ;;  %v1667_v52 = vmul.f32 %v1336_v29, %v5041_v5  ;;  %v3101_v28 = vld [vmem:[%s5061_s10 + $0xc0] sm:$0xff] (%p4944_p6)   ;;  %v3105_v29 = vld [vmem:[%s5061_s10 + $0xc8] sm:$0xff] (%p4944_p6)   ;;  %3354 = vst [vmem:[%s6057_s29 + $0xa38] sm:$0xff] (%p4944_p6), %v3353_v27  }
 0x2eb   : > { %3102 = vst [vmem:[%s6057_s29 + $0x300] sm:$0xff] (%p4944_p6), %v3101_v28   ;;  %3106 = vst [vmem:[%s6057_s29 + $0x308] sm:$0xff] (%p4944_p6), %v3105_v29   ;;  %v3357_v28 = vld [vmem:[%s5061_s10 + $0x2c0] sm:$0xff] (%p4944_p6)   ;;  %v3361_v29 = vld [vmem:[%s5061_s10 + $0x2c8] sm:$0xff] (%p4944_p6)  }
 0x2ec   : > { %v4725_v30 = vpack.c.bf16 %v1667_v52, %v1667_v52  ;;  %v3109_v52 = vld [vmem:[%s5061_s10 + $0xd0] sm:$0xff] (%p4944_p6)   ;;  %3358 = vst [vmem:[%s6057_s29 + $0xb00] sm:$0xff] (%p4944_p6), %v3357_v28   ;;  %3362 = vst [vmem:[%s6057_s29 + $0xb08] sm:$0xff] (%p4944_p6), %v3361_v29  }
 0x2ed   : > { %v1344_v62 = vpop.permute.xlu1 %1343  ;;  %3110 = vst [vmem:[%s6057_s29 + $0x310] sm:$0xff] (%p4944_p6), %v3109_v52   ;;  %v3365_v52 = vld [vmem:[%s5061_s10 + $0x2d0] sm:$0xff] (%p4944_p6)  }
 0x2ee   : > { %2948 = vst.msk [vmem:[%s5061_s10 + $0x39c] sm:$0xf] %vm2716_vm0, %v4725_v30  ;;  %v1669_v32 = vmul.f32 %v1344_v62, %v5048_v7  ;;  %v3113_v30 = vld [vmem:[%s5061_s10 + $0xd8] sm:$0xff] (%p4944_p6)   ;;  %v3117_v62 = vld [vmem:[%s5061_s10 + $0xe0] sm:$0xff] (%p4944_p6)   ;;  %3366 = vst [vmem:[%s6057_s29 + $0xb10] sm:$0xff] (%p4944_p6), %v3365_v52  }
 0x2ef   : > { %3114 = vst [vmem:[%s6057_s29 + $0x318] sm:$0xff] (%p4944_p6), %v3113_v30   ;;  %3118 = vst [vmem:[%s6057_s29 + $0x320] sm:$0xff] (%p4944_p6), %v3117_v62   ;;  %v3369_v30 = vld [vmem:[%s5061_s10 + $0x2d8] sm:$0xff] (%p4944_p6)   ;;  %v3373_v62 = vld [vmem:[%s5061_s10 + $0x2e0] sm:$0xff] (%p4944_p6)  }
 0x2f0   : > { %v4727_v48 = vpack.c.bf16 %v1669_v32, %v1669_v32  ;;  %v3121_v32 = vld [vmem:[%s5061_s10 + $0xe8] sm:$0xff] (%p4944_p6)   ;;  %3370 = vst [vmem:[%s6057_s29 + $0xb18] sm:$0xff] (%p4944_p6), %v3369_v30   ;;  %3374 = vst [vmem:[%s6057_s29 + $0xb20] sm:$0xff] (%p4944_p6), %v3373_v62  }
 0x2f1   : > { %v1352_v33 = vpop.permute.xlu1 %1351  ;;  %3122 = vst [vmem:[%s6057_s29 + $0x328] sm:$0xff] (%p4944_p6), %v3121_v32   ;;  %v3377_v32 = vld [vmem:[%s5061_s10 + $0x2e8] sm:$0xff] (%p4944_p6)  }
 0x2f2   : > { %2950 = vst.msk [vmem:[%s5061_s10 + $0x3a4] sm:$0xf] %vm2716_vm0, %v4727_v48  ;;  %v1671_v34 = vmul.f32 %v1352_v33, %v5056_v9  ;;  %v3125_v48 = vld [vmem:[%s5061_s10 + $0xf0] sm:$0xff] (%p4944_p6)   ;;  %v3129_v33 = vld [vmem:[%s5061_s10 + $0xf8] sm:$0xff] (%p4944_p6)   ;;  %3378 = vst [vmem:[%s6057_s29 + $0xb28] sm:$0xff] (%p4944_p6), %v3377_v32  }
 0x2f3   : > { %3126 = vst [vmem:[%s6057_s29 + $0x330] sm:$0xff] (%p4944_p6), %v3125_v48   ;;  %3130 = vst [vmem:[%s6057_s29 + $0x338] sm:$0xff] (%p4944_p6), %v3129_v33   ;;  %v3381_v48 = vld [vmem:[%s5061_s10 + $0x2f0] sm:$0xff] (%p4944_p6)   ;;  %v3385_v33 = vld [vmem:[%s5061_s10 + $0x2f8] sm:$0xff] (%p4944_p6)  }
 0x2f4   : > { %v4729_v35 = vpack.c.bf16 %v1671_v34, %v1671_v34  ;;  %v3133_v34 = vld [vmem:[%s5061_s10 + $0x100] sm:$0xff] (%p4944_p6)   ;;  %3382 = vst [vmem:[%s6057_s29 + $0xb30] sm:$0xff] (%p4944_p6), %v3381_v48   ;;  %3386 = vst [vmem:[%s6057_s29 + $0xb38] sm:$0xff] (%p4944_p6), %v3385_v33  }
 0x2f5   : > { %v1360_v0 = vpop.permute.xlu1 %1359  ;;  %3134 = vst [vmem:[%s6057_s29 + $0x400] sm:$0xff] (%p4944_p6), %v3133_v34   ;;  %v3389_v34 = vld [vmem:[%s5061_s10 + $0x300] sm:$0xff] (%p4944_p6)  }
 0x2f6   : > { %2952 = vst.msk [vmem:[%s5061_s10 + $0x3ac] sm:$0xf] %vm2716_vm0, %v4729_v35  ;;  %v1673_v53 = vmul.f32 %v1360_v0, %v5075_v20  ;;  %v3137_v35 = vld [vmem:[%s5061_s10 + $0x108] sm:$0xff] (%p4944_p6)   ;;  %v3141_v0 = vld [vmem:[%s5061_s10 + $0x110] sm:$0xff] (%p4944_p6)   ;;  %3390 = vst [vmem:[%s6057_s29 + $0xc00] sm:$0xff] (%p4944_p6), %v3389_v34  }
 0x2f7   : > { %3138 = vst [vmem:[%s6057_s29 + $0x408] sm:$0xff] (%p4944_p6), %v3137_v35   ;;  %3142 = vst [vmem:[%s6057_s29 + $0x410] sm:$0xff] (%p4944_p6), %v3141_v0   ;;  %v3393_v35 = vld [vmem:[%s5061_s10 + $0x308] sm:$0xff] (%p4944_p6)   ;;  %v3397_v0 = vld [vmem:[%s5061_s10 + $0x310] sm:$0xff] (%p4944_p6)  }
 0x2f8   : > { %v4731_v36 = vpack.c.bf16 %v1673_v53, %v1673_v53  ;;  %v3145_v53 = vld [vmem:[%s5061_s10 + $0x118] sm:$0xff] (%p4944_p6)   ;;  %3394 = vst [vmem:[%s6057_s29 + $0xc08] sm:$0xff] (%p4944_p6), %v3393_v35   ;;  %3398 = vst [vmem:[%s6057_s29 + $0xc10] sm:$0xff] (%p4944_p6), %v3397_v0  }
 0x2f9   : > { %v1368_v37 = vpop.permute.xlu1 %1367  ;;  %3146 = vst [vmem:[%s6057_s29 + $0x418] sm:$0xff] (%p4944_p6), %v3145_v53   ;;  %v3401_v53 = vld [vmem:[%s5061_s10 + $0x318] sm:$0xff] (%p4944_p6)  }
 0x2fa   : > { %2954 = vst.msk [vmem:[%s5061_s10 + $0x3b4] sm:$0xf] %vm2716_vm0, %v4731_v36  ;;  %v1675_v38 = vmul.f32 %v1368_v37, %v5094_v31  ;;  %v3149_v36 = vld [vmem:[%s5061_s10 + $0x120] sm:$0xff] (%p4944_p6)   ;;  %v3153_v37 = vld [vmem:[%s5061_s10 + $0x128] sm:$0xff] (%p4944_p6)   ;;  %3402 = vst [vmem:[%s6057_s29 + $0xc18] sm:$0xff] (%p4944_p6), %v3401_v53  }
 0x2fb   : > { %3150 = vst [vmem:[%s6057_s29 + $0x420] sm:$0xff] (%p4944_p6), %v3149_v36   ;;  %3154 = vst [vmem:[%s6057_s29 + $0x428] sm:$0xff] (%p4944_p6), %v3153_v37   ;;  %v3405_v36 = vld [vmem:[%s5061_s10 + $0x320] sm:$0xff] (%p4944_p6)   ;;  %v3409_v37 = vld [vmem:[%s5061_s10 + $0x328] sm:$0xff] (%p4944_p6)  }
 0x2fc   : > { %v4733_v39 = vpack.c.bf16 %v1675_v38, %v1675_v38  ;;  %v3157_v38 = vld [vmem:[%s5061_s10 + $0x130] sm:$0xff] (%p4944_p6)   ;;  %3406 = vst [vmem:[%s6057_s29 + $0xc20] sm:$0xff] (%p4944_p6), %v3405_v36   ;;  %3410 = vst [vmem:[%s6057_s29 + $0xc28] sm:$0xff] (%p4944_p6), %v3409_v37  }
 0x2fd   : > { %v1379_v2 = vpop.permute.xlu1 %1378  ;;  %3158 = vst [vmem:[%s6057_s29 + $0x430] sm:$0xff] (%p4944_p6), %v3157_v38   ;;  %v3413_v38 = vld [vmem:[%s5061_s10 + $0x330] sm:$0xff] (%p4944_p6)  }
 0x2fe   : > { %2956 = vst.msk [vmem:[%s5061_s10 + $0x3bc] sm:$0xf] %vm2716_vm0, %v4733_v39  ;;  %v1677_v40 = vmul.f32 %v1379_v2, %v5020_v63  ;;  %v3161_v39 = vld [vmem:[%s5061_s10 + $0x138] sm:$0xff] (%p4944_p6)   ;;  %v3165_v2 = vld [vmem:[%s5061_s10 + $0x140] sm:$0xff] (%p4944_p6)   ;;  %3414 = vst [vmem:[%s6057_s29 + $0xc30] sm:$0xff] (%p4944_p6), %v3413_v38  }
 0x2ff   : > { %3162 = vst [vmem:[%s6057_s29 + $0x438] sm:$0xff] (%p4944_p6), %v3161_v39   ;;  %3166 = vst [vmem:[%s6057_s29 + $0x500] sm:$0xff] (%p4944_p6), %v3165_v2   ;;  %v3417_v39 = vld [vmem:[%s5061_s10 + $0x338] sm:$0xff] (%p4944_p6)   ;;  %v3421_v2 = vld [vmem:[%s5061_s10 + $0x340] sm:$0xff] (%p4944_p6)  }
 0x300   : > { %v4735_v54 = vpack.c.bf16 %v1677_v40, %v1677_v40  ;;  %v3169_v40 = vld [vmem:[%s5061_s10 + $0x148] sm:$0xff] (%p4944_p6)   ;;  %3418 = vst [vmem:[%s6057_s29 + $0xc38] sm:$0xff] (%p4944_p6), %v3417_v39   ;;  %3422 = vst [vmem:[%s6057_s29 + $0xd00] sm:$0xff] (%p4944_p6), %v3421_v2  }
 0x301   : > { %v1387_v41 = vpop.permute.xlu1 %1386  ;;  %3170 = vst [vmem:[%s6057_s29 + $0x508] sm:$0xff] (%p4944_p6), %v3169_v40   ;;  %v3425_v40 = vld [vmem:[%s5061_s10 + $0x348] sm:$0xff] (%p4944_p6)  }
 0x302   : > { %2958 = vst.msk [vmem:[%s5061_s10 + $0x3c4] sm:$0xf] %vm2716_vm0, %v4735_v54  ;;  %v1679_v42 = vmul.f32 %v1387_v41, %v5027_v1  ;;  %v3173_v54 = vld [vmem:[%s5061_s10 + $0x150] sm:$0xff] (%p4944_p6)   ;;  %v3177_v41 = vld [vmem:[%s5061_s10 + $0x158] sm:$0xff] (%p4944_p6)   ;;  %3426 = vst [vmem:[%s6057_s29 + $0xd08] sm:$0xff] (%p4944_p6), %v3425_v40  }
 0x303   : > { %3174 = vst [vmem:[%s6057_s29 + $0x510] sm:$0xff] (%p4944_p6), %v3173_v54   ;;  %3178 = vst [vmem:[%s6057_s29 + $0x518] sm:$0xff] (%p4944_p6), %v3177_v41   ;;  %v3429_v54 = vld [vmem:[%s5061_s10 + $0x350] sm:$0xff] (%p4944_p6)   ;;  %v3433_v41 = vld [vmem:[%s5061_s10 + $0x358] sm:$0xff] (%p4944_p6)  }
 0x304   : > { %v4737_v49 = vpack.c.bf16 %v1679_v42, %v1679_v42  ;;  %v3181_v42 = vld [vmem:[%s5061_s10 + $0x160] sm:$0xff] (%p4944_p6)   ;;  %3430 = vst [vmem:[%s6057_s29 + $0xd10] sm:$0xff] (%p4944_p6), %v3429_v54   ;;  %3434 = vst [vmem:[%s6057_s29 + $0xd18] sm:$0xff] (%p4944_p6), %v3433_v41  }
 0x305   : > { %v1395_v4 = vpop.permute.xlu1 %1394  ;;  %3182 = vst [vmem:[%s6057_s29 + $0x520] sm:$0xff] (%p4944_p6), %v3181_v42   ;;  %v3437_v42 = vld [vmem:[%s5061_s10 + $0x360] sm:$0xff] (%p4944_p6)  }
 0x306   : > { %2960 = vst.msk [vmem:[%s5061_s10 + $0x3cc] sm:$0xf] %vm2716_vm0, %v4737_v49  ;;  %v1681_v43 = vmul.f32 %v1395_v4, %v5034_v3  ;;  %v3185_v49 = vld [vmem:[%s5061_s10 + $0x168] sm:$0xff] (%p4944_p6)   ;;  %v3189_v4 = vld [vmem:[%s5061_s10 + $0x170] sm:$0xff] (%p4944_p6)   ;;  %3438 = vst [vmem:[%s6057_s29 + $0xd20] sm:$0xff] (%p4944_p6), %v3437_v42  }
 0x307   : > { %3186 = vst [vmem:[%s6057_s29 + $0x528] sm:$0xff] (%p4944_p6), %v3185_v49   ;;  %3190 = vst [vmem:[%s6057_s29 + $0x530] sm:$0xff] (%p4944_p6), %v3189_v4   ;;  %v3441_v49 = vld [vmem:[%s5061_s10 + $0x368] sm:$0xff] (%p4944_p6)   ;;  %v3445_v4 = vld [vmem:[%s5061_s10 + $0x370] sm:$0xff] (%p4944_p6)  }
 0x308   : > { %v4739_v55 = vpack.c.bf16 %v1681_v43, %v1681_v43  ;;  %v3193_v43 = vld [vmem:[%s5061_s10 + $0x178] sm:$0xff] (%p4944_p6)   ;;  %3442 = vst [vmem:[%s6057_s29 + $0xd28] sm:$0xff] (%p4944_p6), %v3441_v49   ;;  %3446 = vst [vmem:[%s6057_s29 + $0xd30] sm:$0xff] (%p4944_p6), %v3445_v4  }
 0x309   : > { %v1403_v44 = vpop.permute.xlu1 %1402  ;;  %3194 = vst [vmem:[%s6057_s29 + $0x538] sm:$0xff] (%p4944_p6), %v3193_v43   ;;  %v3449_v43 = vld [vmem:[%s5061_s10 + $0x378] sm:$0xff] (%p4944_p6)  }
 0x30a   : > { %2962 = vst.msk [vmem:[%s5061_s10 + $0x3d4] sm:$0xf] %vm2716_vm0, %v4739_v55  ;;  %v1683_v63 = vmul.f32 %v1403_v44, %v5041_v5  ;;  %v3197_v55 = vld [vmem:[%s5061_s10 + $0x180] sm:$0xff] (%p4944_p6)   ;;  %v3201_v44 = vld [vmem:[%s5061_s10 + $0x188] sm:$0xff] (%p4944_p6)   ;;  %3450 = vst [vmem:[%s6057_s29 + $0xd38] sm:$0xff] (%p4944_p6), %v3449_v43  }
 0x30b   : > { %3198 = vst [vmem:[%s6057_s29 + $0x600] sm:$0xff] (%p4944_p6), %v3197_v55   ;;  %3202 = vst [vmem:[%s6057_s29 + $0x608] sm:$0xff] (%p4944_p6), %v3201_v44   ;;  %v3453_v55 = vld [vmem:[%s5061_s10 + $0x380] sm:$0xff] (%p4944_p6)   ;;  %v3457_v44 = vld [vmem:[%s5061_s10 + $0x388] sm:$0xff] (%p4944_p6)  }
 0x30c   : > { %v4741_v45 = vpack.c.bf16 %v1683_v63, %v1683_v63  ;;  %v3205_v63 = vld [vmem:[%s5061_s10 + $0x190] sm:$0xff] (%p4944_p6)   ;;  %3454 = vst [vmem:[%s6057_s29 + $0xe00] sm:$0xff] (%p4944_p6), %v3453_v55   ;;  %3458 = vst [vmem:[%s6057_s29 + $0xe08] sm:$0xff] (%p4944_p6), %v3457_v44  }
 0x30d   : > { %v1411_v46 = vpop.permute.xlu1 %1410  ;;  %3206 = vst [vmem:[%s6057_s29 + $0x610] sm:$0xff] (%p4944_p6), %v3205_v63   ;;  %v3461_v63 = vld [vmem:[%s5061_s10 + $0x390] sm:$0xff] (%p4944_p6)  }
 0x30e   : > { %2964 = vst.msk [vmem:[%s5061_s10 + $0x3dc] sm:$0xf] %vm2716_vm0, %v4741_v45  ;;  %v1685_v1 = vmul.f32 %v1411_v46, %v5048_v7  ;;  %v3005_v7 = vld [vmem:[%s5061_s10] sm:$0xff] (%p4944_p6)   ;;  %v3209_v45 = vld [vmem:[%s5061_s10 + $0x198] sm:$0xff] (%p4944_p6)   ;;  %3462 = vst [vmem:[%s6057_s29 + $0xe10] sm:$0xff] (%p4944_p6), %v3461_v63  }
 0x30f   : > { %3006 = vst [vmem:[%s6057_s29] sm:$0xff] (%p4944_p6), %v3005_v7   ;;  %v3213_v46 = vld [vmem:[%s5061_s10 + $0x1a0] sm:$0xff] (%p4944_p6)   ;;  %3210 = vst [vmem:[%s6057_s29 + $0x618] sm:$0xff] (%p4944_p6), %v3209_v45   ;;  %v3465_v45 = vld [vmem:[%s5061_s10 + $0x398] sm:$0xff] (%p4944_p6)  }
 0x310   : > { %v4743_v6 = vpack.c.bf16 %v1685_v1, %v1685_v1  ;;  %v3217_v1 = vld [vmem:[%s5061_s10 + $0x1a8] sm:$0xff] (%p4944_p6)   ;;  %3214 = vst [vmem:[%s6057_s29 + $0x620] sm:$0xff] (%p4944_p6), %v3213_v46   ;;  %v3261_v7 = vld [vmem:[%s5061_s10 + $0x200] sm:$0xff] (%p4944_p6)   ;;  %3466 = vst [vmem:[%s6057_s29 + $0xe18] sm:$0xff] (%p4944_p6), %v3465_v45  }
 0x311   : > { %v1419_v56 = vpop.permute.xlu1 %1418  ;;  %3218 = vst [vmem:[%s6057_s29 + $0x628] sm:$0xff] (%p4944_p6), %v3217_v1   ;;  %3262 = vst [vmem:[%s6057_s29 + $0x800] sm:$0xff] (%p4944_p6), %v3261_v7   ;;  %v3469_v46 = vld [vmem:[%s5061_s10 + $0x3a0] sm:$0xff] (%p4944_p6)   ;;  %v3473_v1 = vld [vmem:[%s5061_s10 + $0x3a8] sm:$0xff] (%p4944_p6)  }
 0x312   : > { %2966 = vst.msk [vmem:[%s5061_s10 + $0x3e4] sm:$0xf] %vm2716_vm0, %v4743_v6  ;;  %v1687_v3 = vmul.f32 %v1419_v56, %v5056_v9  ;;  %v3009_v9 = vld [vmem:[%s5061_s10 + $0x8] sm:$0xff] (%p4944_p6)   ;;  %v3221_v6 = vld [vmem:[%s5061_s10 + $0x1b0] sm:$0xff] (%p4944_p6)   ;;  %v3225_v56 = vld [vmem:[%s5061_s10 + $0x1b8] sm:$0xff] (%p4944_p6)  }
 0x313   : > { %3010 = vst [vmem:[%s6057_s29 + $0x8] sm:$0xff] (%p4944_p6), %v3009_v9   ;;  %3222 = vst [vmem:[%s6057_s29 + $0x630] sm:$0xff] (%p4944_p6), %v3221_v6   ;;  %v3265_v9 = vld [vmem:[%s5061_s10 + $0x208] sm:$0xff] (%p4944_p6)   ;;  %v3477_v6 = vld [vmem:[%s5061_s10 + $0x3b0] sm:$0xff] (%p4944_p6)  }
 0x314   : > { %v4745_v60 = vpack.c.bf16 %v1687_v3, %v1687_v3  ;;  %v3229_v3 = vld [vmem:[%s5061_s10 + $0x1c0] sm:$0xff] (%p4944_p6)   ;;  %3226 = vst [vmem:[%s6057_s29 + $0x638] sm:$0xff] (%p4944_p6), %v3225_v56   ;;  %3266 = vst [vmem:[%s6057_s29 + $0x808] sm:$0xff] (%p4944_p6), %v3265_v9   ;;  %v3481_v56 = vld [vmem:[%s5061_s10 + $0x3b8] sm:$0xff] (%p4944_p6)  }
 0x315   : > { %v1427_v61 = vpop.permute.xlu1 %1426  ;;  %3230 = vst [vmem:[%s6057_s29 + $0x700] sm:$0xff] (%p4944_p6), %v3229_v3   ;;  %3470 = vst [vmem:[%s6057_s29 + $0xe20] sm:$0xff] (%p4944_p6), %v3469_v46   ;;  %v3485_v3 = vld [vmem:[%s5061_s10 + $0x3c0] sm:$0xff] (%p4944_p6)  }
 0x316   : > { %2968 = vst.msk [vmem:[%s5061_s10 + $0x3ec] sm:$0xf] %vm2716_vm0, %v4745_v60  ;;  %v1689_v10 = vmul.f32 %v1427_v61, %v5075_v20  ;;  %v3013_v20 = vld [vmem:[%s5061_s10 + $0x10] sm:$0xff] (%p4944_p6)   ;;  %v3233_v60 = vld [vmem:[%s5061_s10 + $0x1c8] sm:$0xff] (%p4944_p6)   ;;  %3474 = vst [vmem:[%s6057_s29 + $0xe28] sm:$0xff] (%p4944_p6), %v3473_v1  }
 0x317   : > { %3014 = vst [vmem:[%s6057_s29 + $0x10] sm:$0xff] (%p4944_p6), %v3013_v20   ;;  %v3237_v61 = vld [vmem:[%s5061_s10 + $0x1d0] sm:$0xff] (%p4944_p6)   ;;  %3234 = vst [vmem:[%s6057_s29 + $0x708] sm:$0xff] (%p4944_p6), %v3233_v60   ;;  %v3489_v60 = vld [vmem:[%s5061_s10 + $0x3c8] sm:$0xff] (%p4944_p6)  }
 0x318   : > { %v4747_v5 = vpack.c.bf16 %v1689_v10, %v1689_v10  ;;  %v3241_v10 = vld [vmem:[%s5061_s10 + $0x1d8] sm:$0xff] (%p4944_p6)   ;;  %3238 = vst [vmem:[%s6057_s29 + $0x710] sm:$0xff] (%p4944_p6), %v3237_v61   ;;  %v3269_v20 = vld [vmem:[%s5061_s10 + $0x210] sm:$0xff] (%p4944_p6)   ;;  %3478 = vst [vmem:[%s6057_s29 + $0xe30] sm:$0xff] (%p4944_p6), %v3477_v6  }
 0x319   : > { %v1435_v57 = vpop.permute.xlu1 %1434  ;;  %3242 = vst [vmem:[%s6057_s29 + $0x718] sm:$0xff] (%p4944_p6), %v3241_v10   ;;  %3270 = vst [vmem:[%s6057_s29 + $0x810] sm:$0xff] (%p4944_p6), %v3269_v20   ;;  %v3493_v61 = vld [vmem:[%s5061_s10 + $0x3d0] sm:$0xff] (%p4944_p6)   ;;  %v3497_v10 = vld [vmem:[%s5061_s10 + $0x3d8] sm:$0xff] (%p4944_p6)  }
 0x31a   : > { %2970 = vst.msk [vmem:[%s5061_s10 + $0x3f4] sm:$0xf] %vm2716_vm0, %v4747_v5  ;;  %v1691_v8 = vmul.f32 %v1435_v57, %v5094_v31  ;;  %2983 = sbr.rel (!%p4944_p6) target bundleno = 807 (0x327), region = 108  ;;  %v3017_v31 = vld [vmem:[%s5061_s10 + $0x18] sm:$0xff] (%p4944_p6)   ;;  %v3245_v5 = vld [vmem:[%s5061_s10 + $0x1e0] sm:$0xff] (%p4944_p6)   ;;  %v3249_v57 = vld [vmem:[%s5061_s10 + $0x1e8] sm:$0xff] (%p4944_p6)  }
 0x31b   : > { %3018 = vst [vmem:[%s6057_s29 + $0x18] sm:$0xff] (%p4944_p6), %v3017_v31   ;;  %3246 = vst [vmem:[%s6057_s29 + $0x720] sm:$0xff] (%p4944_p6), %v3245_v5   ;;  %v3273_v31 = vld [vmem:[%s5061_s10 + $0x218] sm:$0xff] (%p4944_p6)   ;;  %v3501_v5 = vld [vmem:[%s5061_s10 + $0x3e0] sm:$0xff] (%p4944_p6)  }
 0x31c   : > { %v4749_v11 = vpack.c.bf16 %v1691_v8, %v1691_v8  ;;  %v3253_v8 = vld [vmem:[%s5061_s10 + $0x1f0] sm:$0xff] (%p4944_p6)   ;;  %3250 = vst [vmem:[%s6057_s29 + $0x728] sm:$0xff] (%p4944_p6), %v3249_v57   ;;  %3274 = vst [vmem:[%s6057_s29 + $0x818] sm:$0xff] (%p4944_p6), %v3273_v31  }
 0x31d   : > { %3254 = vst [vmem:[%s6057_s29 + $0x730] sm:$0xff] (%p4944_p6), %v3253_v8   ;;  %3482 = vst [vmem:[%s6057_s29 + $0xe38] sm:$0xff] (%p4944_p6), %v3481_v56   ;;  %v3505_v57 = vld [vmem:[%s5061_s10 + $0x3e8] sm:$0xff] (%p4944_p6)  }
 0x31e   : > { %2972 = vst.msk [vmem:[%s5061_s10 + $0x3fc] sm:$0xf] %vm2716_vm0, %v4749_v11  ;;  %v3257_v11 = vld [vmem:[%s5061_s10 + $0x1f8] sm:$0xff] (%p4944_p6)   ;;  %3486 = vst [vmem:[%s6057_s29 + $0xf00] sm:$0xff] (%p4944_p6), %v3485_v3  }
 0x31f   : > { %3258 = vst [vmem:[%s6057_s29 + $0x738] sm:$0xff] %v3257_v11   ;;  %3490 = vst [vmem:[%s6057_s29 + $0xf08] sm:$0xff] %v3489_v60  }
 0x320   : > { %3494 = vst [vmem:[%s6057_s29 + $0xf10] sm:$0xff] %v3493_v61   ;;  %3498 = vst [vmem:[%s6057_s29 + $0xf18] sm:$0xff] %v3497_v10  }
 0x321   : > { %3502 = vst [vmem:[%s6057_s29 + $0xf20] sm:$0xff] %v3501_v5   ;;  %3506 = vst [vmem:[%s6057_s29 + $0xf28] sm:$0xff] %v3505_v57   ;;  %v3509_v8 = vld [vmem:[%s5061_s10 + $0x3f0] sm:$0xff]  }
 0x322   : > { %3510 = vst [vmem:[%s6057_s29 + $0xf30] sm:$0xff] %v3509_v8  }
 0x325   : > { %v3513_v11 = vld [vmem:[%s5061_s10 + $0x3f8] sm:$0xff]  }
 0x326   : > { %3514 = vst [vmem:[%s6057_s29 + $0xf38] sm:$0xff] %v3513_v11  }
 0x327 PF: > { %4052 = sbr.rel (!%p4944_p6) target bundleno = 812 (0x32c), region = 149  ;;  %s4490_s30 = sshll.u32 (%p4944_p6), %s4858_s15, 3  ;;  %v4087_v7 = vld [vmem:[%s4982_s12] sm:$0xff] (%p4944_p6)  ;;  %v4089_v9 = vld [vmem:[%s4982_s12 + $0x8] sm:$0xff] (%p4944_p6) }
 0x328   : > { %s4054_s4 = sadd.s32 (%p4944_p6), %s4854_s14, %s4490_s30 }
 0x329   : > { %s4491_s23 = sshll.u32 (%p4944_p6), %s4054_s4, 3 }
 0x32a   : > { %s4056_s7 = scalar_lea.vmem (%p4944_p6), %s6339_s3, %s4491_s23 }
 0x32b   : > { %4088 = vst [vmem:[%s4056_s7] sm:$0xff] (%p4944_p6), %v4087_v7  ;;  %4090 = vst [vmem:[%s4056_s7 + $0x20] sm:$0xff] (%p4944_p6), %v4089_v9 }
 0x32c PF: > { %s14_s18 = sadd.s32 1, %s4870_s18   ;;  %s6342_s12 = smov %s4850_s13 }
 0x32d   : > { %p11_p12 = scmp.ge.s32.totalorder %s14_s18, 10   ;;  %s6343_s13 = smov %s4952_s28 }
 0x32e   : > { %s6344_s14 = smov %s4862_s16  ;;  %s6345_s15 = smov %s4866_s17 }
 0x32f   : > { %s6346_s16 = smov %s6349_s19  ;;  %s6347_s17 = smov %s6353_s20 }
 0x330   :  { %13 = sbr.rel (!%p11_p12) target bundleno = 4 (0x4), region = 238 }

// kernel: _lambda_.6
= control target key start
LH: loop header
LB: loop body
LE: loop exit
PB: predicated region body
PF: predicated region fallthrough
CT: control target
= control target key end

     0   :  { %12 = vsyncpa [#allocation5], 0  ;;  %s4539_s0 = inlined_call_operand.vmem [shape: bf16[2,16,512], index: 0, kind: input, shape index: {}]   ;;  %s4540_s1 = inlined_call_operand.hbm [shape: bf16[16,16], index: 1, kind: input, shape index: {}]   ;;  %s4541_s2 = inlined_call_operand.hbm [shape: bf16[3,16,144], index: 2, kind: input, shape index: {}]   ;;  %s4542_s3 = inlined_call_operand.hbm [shape: bf16[4,16,16], index: 3, kind: input, shape index: {}]   ;;  %s4543_s4 = inlined_call_operand.vmem [shape: f32[2,1,16], index: 4, kind: input, shape index: {}]   ;;  %s4544_s5 = inlined_call_operand.hbm [shape: bf16[16,16], index: 5, kind: input, shape index: {}]   ;;  %s4545_s6 = inlined_call_operand.hbm [shape: f32[1,16], index: 6, kind: input, shape index: {}]   ;;  %s4546_s7 = inlined_call_operand.vmem [shape: f32[2,16,512], index: 7, kind: output, shape index: {}]  }
   0x1   :  { %13 = vsyncpa [#allocation7], 0 }
   0x2   :  { %14 = vsyncpa [#allocation10], 0  ;;  %s3593_s24 = smov 0  }
   0x3 LB: > { %s3537_s25 = smov [#allocation6]   ;;  %s3599_s27 = sadd.s32 4294967295, %s3535_s24   ;;  %s3535_s24 = sphi %s3593_s24, %s20_s24  }
   0x4   : > { %s233_s26 = sshll.u32 %s3537_s25, 4  ;;  %p3104_p0 = scmp.ge.s32.totalorder %s3535_s24, 1  ;;  %s234_s26 = int_to_ptr.vmem [resolvable:$true] %s233_s26 }
   0x5   : > { %p208_p1 = scmp.lt.s32.totalorder %s3535_s24, 3  ;;  %p3305_p2 = scmp.eq.s32.totalorder %s3599_s27, 0 }
   0x6   : > { %s3538_s30 = smov [#allocation9]   ;;  %s3539_s9 = smov [#allocation4]  }
   0x7   : > { %p3604_p3 = pnand %p3104_p0, %p208_p1  ;;  %s259_s8 = sshll.u32 %s3538_s30, 4  ;;  %s3616_s8 = int_to_ptr.vmem [resolvable:$true] %s259_s8 }
   0x8   : > { %s220_s10 = sshll.u32 %s3539_s9, 4  ;;  %s3398_s12 = scalar_lea.vmem %s234_s26, 768  ;;  %s3618_s10 = int_to_ptr.vmem [resolvable:$true] %s220_s10 }
   0x9   : > { %p3289_p4 = pneg %p3604_p3  ;;  %p3399_p7 = scmp.ne.s32.totalorder %s234_s26, %s3398_s12 }
   0xa   : > { %p3406_p10 = scmp.lt.s32.totalorder %s234_s26, %s234_s26  ;;  %p3407_p11 = scmp.lt.s32.totalorder %s3398_s12, %s3398_s12 }
   0xb   : > { %p3612_p5 = pnand %p3305_p2, %p3289_p4 }
   0xc   : > { %p3408_p12 = por %p3407_p11, %p3406_p10 }
   0xd   : > { %p3622_p6 = pneg %p3612_p5 }
   0xf   : > { %p3401_p8 = pnand %p3399_p7, %p3622_p6 }
  0x11   : > { %p3402_p9 = pneg %p3401_p8 }
  0x13   : > { %p3409_p13 = pnand %p3408_p12, %p3402_p9 }
  0x15   : > { %3412 = shalt.err (!%p3409_p13)
}
  0x16   : > { %s3540_s13 = smov 128   ;;  %s3541_s14 = smov 8  }
  0x17   : > { %3295 = dma.hbm_to_vmem [thread:$0]  (!%p3612_p5), %s4541_s2, 768, %s234_s26, [#allocation7], %s3540_s13, %s3540_s13, %s3541_s14  }
  0x18   : > { %s3424_s17 = scalar_lea.vmem %s3616_s8, 128  ;;  %p3432_p7 = scmp.lt.s32.totalorder %s3616_s8, %s3616_s8 }
  0x19   : > { %p3425_p0 = scmp.ne.s32.totalorder %s3616_s8, %s3424_s17  ;;  %p3433_p8 = scmp.lt.s32.totalorder %s3424_s17, %s3424_s17 }
  0x1b   : > { %p3427_p1 = pnand %p3425_p0, %p3622_p6  ;;  %p3434_p9 = por %p3433_p8, %p3432_p7 }
  0x1d   : > { %p3428_p4 = pneg %p3427_p1 }
  0x1f   : > { %p3435_p10 = pnand %p3434_p9, %p3428_p4 }
  0x21   : > { %3438 = shalt.err (!%p3435_p10)
}
  0x22   : > { %s3542_s18 = smov 64   ;;  %s3543_s19 = smov 4  }
  0x23   : > { %3301 = dma.hbm_to_vmem [thread:$0]  (!%p3612_p5), %s4544_s5, 128, %s3616_s8, [#allocation10], %s3542_s18, %s3542_s18, %s3543_s19  }
  0x24   : > { %s3450_s22 = scalar_lea.vmem %s3618_s10, 128  ;;  %p3458_p0 = scmp.lt.s32.totalorder %s3618_s10, %s3618_s10 }
  0x25   : > { %p3451_p11 = scmp.ne.s32.totalorder %s3618_s10, %s3450_s22  ;;  %p3459_p1 = scmp.lt.s32.totalorder %s3450_s22, %s3450_s22 }
  0x27   : > { %p3453_p12 = pnand %p3451_p11, %p3622_p6  ;;  %p3460_p4 = por %p3459_p1, %p3458_p0 }
  0x29   : > { %p3454_p13 = pneg %p3453_p12 }
  0x2b   : > { %p3461_p7 = pnand %p3460_p4, %p3454_p13 }
  0x2d   : > { %3464 = shalt.err (!%p3461_p7)
}
  0x2e   : > { %3292 = dma.hbm_to_vmem [thread:$0]  (!%p3612_p5), %s4540_s1, 128, %s3618_s10, [#allocation5], %s3542_s18, %s3542_s18, %s3543_s19  }
  0x2f   : > { %s3544_s26 = smov [#allocation8]   ;;  %s3545_s8 = smov [#allocation11]  }
  0x30   : > { %s246_s30 = sshll.u32 %s3544_s26, 4  ;;  %s273_s9 = sshll.u32 %s3545_s8, 4  ;;  %s247_s30 = int_to_ptr.vmem [resolvable:$true] %s246_s30  ;;  %s274_s9 = int_to_ptr.vmem [resolvable:$true] %s273_s9 }
  0x31   : > { %s3476_s12 = scalar_lea.vmem %s247_s30, 512  ;;  %p3484_p11 = scmp.lt.s32.totalorder %s247_s30, %s247_s30 }
  0x32   : > { %p3477_p8 = scmp.ne.s32.totalorder %s247_s30, %s3476_s12  ;;  %p3485_p12 = scmp.lt.s32.totalorder %s3476_s12, %s3476_s12 }
  0x34   : > { %p3479_p9 = pnand %p3477_p8, %p3622_p6  ;;  %p3486_p13 = por %p3485_p12, %p3484_p11 }
  0x36   : > { %p3480_p10 = pneg %p3479_p9 }
  0x38   : > { %p3487_p0 = pnand %p3486_p13, %p3480_p10 }
  0x3a   : > { %3490 = shalt.err (!%p3487_p0)
}
  0x3b   : > { %3298 = dma.hbm_to_vmem [thread:$0]  (!%p3612_p5), %s4542_s3, 512, %s247_s30, [#allocation7], %s3542_s18, %s3542_s18, %s3543_s19  }
  0x3c   : > { %s3502_s14 = scalar_lea.vmem %s274_s9, 16  ;;  %s3509_s15 = scalar_lea.vmem %s274_s9, 32 }
  0x3d   : > { %p3503_p1 = scmp.ne.s32.totalorder %s274_s9, %s3502_s14  ;;  %p3510_p8 = scmp.lt.s32.totalorder %s274_s9, %s274_s9 }
  0x3e   : > { %p3511_p9 = scmp.lt.s32.totalorder %s3509_s15, %s3502_s14 }
  0x3f   : > { %p3505_p4 = pnand %p3503_p1, %p3622_p6 }
  0x40   : > { %p3512_p10 = por %p3511_p9, %p3510_p8 }
  0x41   : > { %p3506_p7 = pneg %p3505_p4 }
  0x43   : > { %p3513_p11 = pnand %p3512_p10, %p3506_p7 }
  0x45   : > { %3516 = shalt.err (!%p3513_p11)
}
  0x46   : > { %3304 = dma.hbm_to_vmem [thread:$0]  (!%p3612_p5), %s4545_s6, 16, %s274_s9, [#allocation10]  }
  0x47   : > { %300 = sbr.rel (%p3604_p3) target bundleno = 1406 (0x57e), region = 48 }
  0x4c   : > { %3522 = dma.done.wait (%p3305_p2), [#allocation5], 128  }
  0x4d   : > { %3524 = vsyncadd (%p3305_p2), [#allocation5], 4294967168 }
  0x4e   : > { %3526 = dma.done.wait (%p3305_p2), [#allocation7], 1280  }
  0x4f   : > { %3528 = vsyncadd (%p3305_p2), [#allocation7], 4294966016 }
  0x50   : > { %3530 = dma.done.wait (%p3305_p2), [#allocation10], 144  }
  0x51   : > { %3532 = vsyncadd (%p3305_p2), [#allocation10], 4294967152  ;;  %v3546_v0 = vmov 0   ;;  %s3547_s28 = smov 6   ;;  %p351_p2 = scmp.lt.s32.totalorder %s3599_s27, 1  ;;  %vm396_vm0 = vcmask 130048  }
  0x52   : > { %514 = vst [vmem:[#allocation2 + $0x70] sm:$0xff] %v3546_v0  ;;  %500 = vst [vmem:[#allocation2] sm:$0xff] %v3546_v0  ;;  %761 = vrot.lane.b32.xlu0 %v3546_v0, %s3547_s28  ;;  %432 = vmatprep.mubr.bf16.mxu0 %v3546_v0  ;;  %s3548_s20 = smov 122   ;;  %v3347_v20 = vld [vmem:[#allocation4] sm:$0xff]   ;;  %v3352_v41 = vld [vmem:[#allocation6 + $0x4] ss:$8 sps:$4 sm:$0xff]  }
  0x53   : > { %501 = vst [vmem:[#allocation2 + $0x8] sm:$0xff] %v3546_v0  ;;  %502 = vst [vmem:[#allocation2 + $0x10] sm:$0xff] %v3546_v0  ;;  %475 = vmatprep.mubr.bf16.mxu1 %v3546_v0  ;;  %s4601_s27 = smov (!%p351_p2, %s3599_s27), 1  ;;  %s3549_s21 = smov 12   ;;  %vm576_vm1 = vcmask 1043456   ;;  %vm578_vm2 = vcmask 48128  }
  0x54   : > { %503 = vst [vmem:[#allocation2 + $0x18] sm:$0xff] %v3546_v0  ;;  %504 = vst [vmem:[#allocation2 + $0x20] sm:$0xff] %v3546_v0  ;;  %s3267_s29 = sshll.u32 %s4601_s27, 5  ;;  %s3550_s22 = smov 116   ;;  %vm633_vm3 = vcmask 998400   ;;  %vm1399_vm4 = vcmask 97280  }
  0x55   : > { %505 = vst [vmem:[#allocation2 + $0x28] sm:$0xff] %v3546_v0  ;;  %506 = vst [vmem:[#allocation2 + $0x30] sm:$0xff] %v3546_v0  ;;  %s355_s19 = scalar_lea.vmem %s4539_s0, %s3267_s29  ;;  %s3551_s23 = smov 18   ;;  %vm1454_vm5 = vcmask 949248   ;;  %vm2135_vm6 = vcmask 146432   ;;  %vm2190_vm7 = vcmask 900096  }
  0x56   : > { %507 = vst [vmem:[#allocation2 + $0x38] sm:$0xff] %v3546_v0  ;;  %508 = vst [vmem:[#allocation2 + $0x40] sm:$0xff] %v3546_v0  ;;  %763 = vrot.lane.b32.xlu0 %v3546_v0, %s3547_s28  ;;  %v3750_v1 = vld [vmem:[%s355_s19 + $0x8] sm:$0xff]  ;;  %v3752_v2 = vld [vmem:[%s355_s19 + $0x10] sm:$0xff]  ;;  %s3552_s25 = smov 110   ;;  %s358_s8 = scalar_lea.vmem %s4543_s4, %s4601_s27 }
  0x57   : > { %509 = vst [vmem:[#allocation2 + $0x48] sm:$0xff] %v3546_v0  ;;  %510 = vst [vmem:[#allocation2 + $0x50] sm:$0xff] %v3546_v0  ;;  %v3754_v3 = vld [vmem:[%s355_s19] sm:$0xff]  ;;  %v3770_v7 = vld [vmem:[%s355_s19 + $0x18] sm:$0xff]  ;;  %s3268_s9 = sshll.u32 %s4601_s27, 6 }
  0x58   : > { %511 = vst [vmem:[#allocation2 + $0x58] sm:$0xff] %v3546_v0  ;;  %512 = vst [vmem:[#allocation2 + $0x60] sm:$0xff] %v3546_v0  ;;  %v3761_v5 = vcombine.high %v3754_v3, %v3752_v2  ;;  %v3765_v6 = vcombine.low %v3754_v3, %v3752_v2  ;;  %v3776_v9 = vcombine.high %v3750_v1, %v3770_v7  ;;  %s363_s13 = scalar_lea.vmem %s4546_s7, %s3268_s9 }
  0x59   : > { %513 = vst [vmem:[#allocation2 + $0x68] sm:$0xff] %v3546_v0  ;;  %515 = vst [vmem:[#allocation2 + $0x78] sm:$0xff] %v3546_v0  ;;  %v751_v4 = vld [vmem:[#allocation2 + $0x70] sm:$0xf]  ;;  %v3780_v10 = vcombine.low %v3750_v1, %v3770_v7  ;;  %v805_v40 = vld [vmem:[#allocation2 + $0x74] sm:$0xf] }
  0x5a   : > { %516 = vst [vmem:[#allocation2 + $0x80] sm:$0xff] %v3546_v0  ;;  %517 = vst [vmem:[#allocation2 + $0x88] sm:$0xff] %v3546_v0  ;;  %765 = vrot.lane.b32.xlu1 %v751_v4, %s3547_s28  ;;  %769 = vrot.lane.b32.xlu0 %v3546_v0, %s3547_s28 }
  0x5b   : > { %518 = vst [vmem:[#allocation2 + $0x90] sm:$0xff] %v3546_v0  ;;  %519 = vst [vmem:[#allocation2 + $0x98] sm:$0xff] %v3546_v0  ;;  %414 = vmatprep.subr.bf16.mxu0 %v3761_v5  ;;  %457 = vmatprep.subr.bf16.mxu1 %v3776_v9  ;;  %v3896_v48 = vld [vmem:[#allocation2 + $0x1c] sm:$0xff] }
  0x5c   : > { %520 = vst [vmem:[#allocation2 + $0xa0] sm:$0xff] %v3546_v0  ;;  %521 = vst [vmem:[#allocation2 + $0xa8] sm:$0xff] %v3546_v0  ;;  %415 = vmatpush1.bf16.msra.mxu0 %v3765_v6  ;;  %458 = vmatpush1.bf16.msra.mxu1 %v3780_v10  ;;  %v1425_v50 = vld [vmem:[#allocation2 + $0x2c] sm:$0xf]  ;;  %v3902_v51 = vld [vmem:[#allocation2 + $0x24] sm:$0xff] }
  0x5d   : > { %522 = vst [vmem:[#allocation2 + $0xb0] sm:$0xff] %v3546_v0  ;;  %523 = vst [vmem:[#allocation2 + $0xb8] sm:$0xff] %v3546_v0  ;;  %v3821_v27 = vld [vmem:[#allocation2 + $0x34] sm:$0xff]  ;;  %v604_v29 = vld [vmem:[#allocation2 + $0x44] sm:$0xf] }
  0x5e   : > { %524 = vst [vmem:[#allocation2 + $0xc0] sm:$0xff] %v3546_v0  ;;  %525 = vst [vmem:[#allocation2 + $0xc8] sm:$0xff] %v3546_v0  ;;  %767 = vrot.lane.b32.xlu1 %v3546_v0, %s3547_s28  ;;  %v3828_v30 = vld [vmem:[#allocation2 + $0x3c] sm:$0xff]  ;;  %v1370_v61 = vld [vmem:[#allocation2 + $0x28] sm:$0xf] }
  0x5f   : > { %526 = vst [vmem:[#allocation2 + $0xd0] sm:$0xff] %v3546_v0  ;;  %527 = vst [vmem:[#allocation2 + $0xd8] sm:$0xff] %v3546_v0  ;;  %v705_v8 = vld [vmem:[#allocation2 + $0x5c] sm:$0xf]  ;;  %3126 = vmatmul.mubr.msk.bf16.vlgmr.msra.gmra.mxu0 %vm396_vm0, %v3347_v20  ;;  %3127 = vmatmul.mubr.msk.bf16.vlgmr.msra.gmra.mxu1 %vm396_vm0, %v3347_v20  ;;  %v548_v36 = vld [vmem:[#allocation2 + $0x40] sm:$0xf] }
  0x60   : > { %528 = vst [vmem:[#allocation2 + $0xe0] sm:$0xff] %v3546_v0  ;;  %529 = vst [vmem:[#allocation2 + $0xe8] sm:$0xff] %v3546_v0  ;;  %719 = vrot.lane.b32.xlu0 %v705_v8, %s3548_s20  ;;  %v3787_v12 = vld [vmem:[#allocation2 + $0x6c] sm:$0xff]  ;;  %v803_v13 = vld [vmem:[#allocation2 + $0x64] sm:$0xff]  ;;  %3166 = vmatprep.mubr.msk.bf16.mxu0 %vm396_vm0, %v3352_v41 }
  0x61   : > { %530 = vst [vmem:[#allocation2 + $0xf0] sm:$0xff] %v3546_v0  ;;  %531 = vst [vmem:[#allocation2 + $0xf8] sm:$0xff] %v3546_v0  ;;  %3167 = vmatprep.mubr.msk.bf16.mxu1 %vm396_vm0, %v3352_v41  ;;  %v1572_v43 = vld [vmem:[#allocation2 + $0x88] sm:$0xf]  ;;  %v1526_v45 = vld [vmem:[#allocation2 + $0x5c] sm:$0xf] }
  0x62   : > { %532 = vst [vmem:[#allocation2 + $0x100] sm:$0xff] %v3546_v0  ;;  %533 = vst [vmem:[#allocation2 + $0x108] sm:$0xff] %v3546_v0 }
  0x63   : > { %534 = vst [vmem:[#allocation2 + $0x110] sm:$0xff] %v3546_v0  ;;  %535 = vst [vmem:[#allocation2 + $0x118] sm:$0xff] %v3546_v0 }
  0x64   : > { %536 = vst [vmem:[#allocation2 + $0x120] sm:$0xff] %v3546_v0  ;;  %537 = vst [vmem:[#allocation2 + $0x128] sm:$0xff] %v3546_v0  ;;  %715 = vrot.lane.b32.xlu0 %v3754_v3, %s3548_s20 }
  0x65   : > { %538 = vst [vmem:[#allocation2 + $0x130] sm:$0xff] %v3546_v0  ;;  %539 = vst [vmem:[#allocation2 + $0x138] sm:$0xff] %v3546_v0  ;;  %v3909_v54 = vld [vmem:[#allocation2 + $0xc4] sm:$0xff] }
  0x66   : > { %540 = vst [vmem:[#allocation2 + $0x140] sm:$0xff] %v3546_v0  ;;  %541 = vst [vmem:[#allocation2 + $0x148] sm:$0xff] %v3546_v0  ;;  %v3905_v53 = vld [vmem:[#allocation2 + $0xcc] sm:$0xff]  ;;  %v1428_v56 = vld [vmem:[#allocation2 + $0xd4] sm:$0xf] }
  0x67   : > { %543 = vst [vmem:[#allocation2 + $0x54] sm:$0xff] %v3750_v1  ;;  %544 = vst [vmem:[#allocation2 + $0xf4] sm:$0xff] %v3752_v2  ;;  %v3830_v31 = vld [vmem:[#allocation2 + $0xe4] sm:$0xff]  ;;  %v3836_v32 = vld [vmem:[#allocation2 + $0xdc] sm:$0xff] }
  0x68   : > { %542 = vst [vmem:[#allocation2 + $0x4c] sm:$0xff] %v3754_v3  ;;  %545 = vst [vmem:[#allocation2 + $0xfc] sm:$0xff] %v3770_v7  ;;  %723 = vrot.lane.b32.xlu0 %v3770_v7, %s3548_s20  ;;  %v3135_v33 = vcombine.high %v3821_v27, %v3836_v32  ;;  %v3134_v34 = vcombine.low %v3821_v27, %v3836_v32  ;;  %v607_v35 = vld [vmem:[#allocation2 + $0xec] sm:$0xf]  ;;  %v3137_v37 = vcombine.high %v3828_v30, %v3830_v31  ;;  %v551_v39 = vld [vmem:[#allocation2 + $0xe8] sm:$0xf] }
  0x69   : > { %v708_v22 = vld [vmem:[#allocation2 + $0x104] sm:$0xf]  ;;  %v3136_v38 = vcombine.low %v3828_v30, %v3830_v31  ;;  %4572 = vst [vmem:[#allocation15_spill] sm:$0xff] %v3896_v48  ;;  %4573 = vst [vmem:[#allocation16_spill] sm:$0xff] %v3902_v51  ;;  %v1373_v20 = vld [vmem:[#allocation2 + $0xd0] sm:$0xf] }
  0x6a   : > { %v754_v11 = vld [vmem:[#allocation2 + $0x118] sm:$0xf]  ;;  %v3789_v14 = vld [vmem:[#allocation2 + $0x10c] sm:$0xff]  ;;  %v808_v42 = vld [vmem:[#allocation2 + $0x11c] sm:$0xf]  ;;  %4574 = vst [vmem:[#allocation17_spill] sm:$0xff] %v3905_v53 }
  0x6b   : > { %v807_v15 = vld [vmem:[#allocation2 + $0x114] sm:$0xff]  ;;  %v3159_v16 = vcombine.high %v803_v13, %v3789_v14  ;;  %v3158_v17 = vcombine.low %v803_v13, %v3789_v14  ;;  %771 = vrot.lane.b32.xlu1 %v754_v11, %s3547_s28  ;;  %v1529_v46 = vld [vmem:[#allocation2 + $0x104] sm:$0xf] }
  0x6c   : > { %v3161_v18 = vcombine.high %v3787_v12, %v807_v15  ;;  %v3160_v19 = vcombine.low %v3787_v12, %v807_v15  ;;  %v1575_v44 = vld [vmem:[#allocation2 + $0x130] sm:$0xf] }
  0x6d   : > { %1079 = vmatprep.subr.bf16.mxu0 %v3159_v16 }
  0x6e   : > { %1122 = vmatprep.subr.bf16.mxu1 %v3161_v18  ;;  %1080 = vmatpush1.bf16.msra.mxu0 %v3158_v17  ;;  %v651_v23 = vld [vmem:[#allocation2 + $0x58] sm:$0xf]  ;;  %v652_v26 = vld [vmem:[#allocation2 + $0xf0] sm:$0xff]  ;;  %v3928_v18 = vld [vmem:[#allocation2 + $0x7c] sm:$0xff] }
  0x6f   : > { %1123 = vmatpush1.bf16.msra.mxu1 %v3160_v19  ;;  %717 = vrot.lane.b32.xlu1 %v3750_v1, %s3548_s20  ;;  %v3805_v21 = vld [vmem:[#allocation2 + $0x48] sm:$0xff]  ;;  %v3813_v24 = vld [vmem:[#allocation2 + $0x50] sm:$0xff]  ;;  %v3815_v25 = vld [vmem:[#allocation2 + $0xf8] sm:$0xff] }
  0x70   : > { %661 = vrot.lane.b32.xlu0 %v3805_v21, %s3547_s28  ;;  %v654_v28 = vld [vmem:[#allocation2 + $0x100] sm:$0xf]  ;;  %v1472_v47 = vld [vmem:[#allocation2 + $0x58] sm:$0xf] }
  0x71   : > { %v1475_v49 = vld [vmem:[#allocation2 + $0x100] sm:$0xf] }
  0x73   : > { %721 = vrot.lane.b32.xlu1 %v3752_v2, %s3548_s20 }
  0x74   : > { %665 = vrot.lane.b32.xlu0 %v651_v23, %s3547_s28 }
  0x77   : > { %725 = vrot.lane.b32.xlu1 %v708_v22, %s3548_s20 }
  0x78   : > { %669 = vrot.lane.b32.xlu0 %v3815_v25, %s3547_s28 }
  0x7b   : > { %663 = vrot.lane.b32.xlu1 %v3813_v24, %s3547_s28 }
  0x7c   : > { %614 = vrot.lane.b32.xlu0 %v3821_v27, %s3548_s20 }
  0x7f   : > { %667 = vrot.lane.b32.xlu1 %v652_v26, %s3547_s28 }
  0x80   : > { %618 = vrot.lane.b32.xlu0 %v604_v29, %s3548_s20 }
  0x83   : > { %671 = vrot.lane.b32.xlu1 %v654_v28, %s3547_s28 }
  0x84   : > { %622 = vrot.lane.b32.xlu0 %v3830_v31, %s3548_s20 }
  0x87   : > { %616 = vrot.lane.b32.xlu1 %v3828_v30, %s3548_s20 }
  0x88   : > { %558 = vrot.lane.b32.xlu0 %v3546_v0, %s3547_s28 }
  0x8b   : > { %620 = vrot.lane.b32.xlu1 %v3836_v32, %s3548_s20 }
  0x8c   : > { %562 = vrot.lane.b32.xlu0 %v548_v36, %s3547_s28 }
  0x8f   : > { %624 = vrot.lane.b32.xlu1 %v607_v35, %s3548_s20  ;;  %v1626_v35 = vld [vmem:[#allocation2 + $0x8c] sm:$0xf] }
  0x90   : > { %566 = vrot.lane.b32.xlu0 %v3546_v0, %s3547_s28 }
  0x93   : > { %560 = vrot.lane.b32.xlu1 %v3546_v0, %s3547_s28 }
  0x94   : > { %815 = vrot.lane.b32.xlu0 %v803_v13, %s3548_s20 }
  0x97   : > { %564 = vrot.lane.b32.xlu1 %v3546_v0, %s3547_s28 }
  0x98   : > { %819 = vrot.lane.b32.xlu0 %v805_v40, %s3548_s20 }
  0x9b   : > { %568 = vrot.lane.b32.xlu1 %v551_v39, %s3547_s28  ;;  %v3938_v39 = vld [vmem:[#allocation2 + $0x84] sm:$0xff] }
  0x9c   : > { %823 = vrot.lane.b32.xlu0 %v807_v15, %s3548_s20 }
  0x9f   : > { %817 = vrot.lane.b32.xlu1 %v3787_v12, %s3548_s20 }
  0xa0   : > { %1582 = vrot.lane.b32.xlu0 %v3546_v0, %s3549_s21 }
  0xa3   : > { %821 = vrot.lane.b32.xlu1 %v3789_v14, %s3548_s20 }
  0xa4   : > { %1586 = vrot.lane.b32.xlu0 %v1572_v43, %s3549_s21 }
  0xa7   : > { %825 = vrot.lane.b32.xlu1 %v808_v42, %s3548_s20 }
  0xa8   : > { %1590 = vrot.lane.b32.xlu0 %v3546_v0, %s3549_s21 }
  0xab   : > { %1584 = vrot.lane.b32.xlu1 %v3546_v0, %s3549_s21 }
  0xac   : > { %1536 = vrot.lane.b32.xlu0 %v3754_v3, %s3550_s22 }
  0xaf   : > { %1588 = vrot.lane.b32.xlu1 %v3546_v0, %s3549_s21 }
  0xb0   : > { %1540 = vrot.lane.b32.xlu0 %v1526_v45, %s3550_s22  ;;  %v3942_v45 = vld [vmem:[#allocation2 + $0x12c] sm:$0xff] }
  0xb3   : > { %1592 = vrot.lane.b32.xlu1 %v1575_v44, %s3549_s21 }
  0xb4   : > { %1544 = vrot.lane.b32.xlu0 %v3770_v7, %s3550_s22 }
  0xb7   : > { %1538 = vrot.lane.b32.xlu1 %v3750_v1, %s3550_s22 }
  0xb8   : > { %1482 = vrot.lane.b32.xlu0 %v3805_v21, %s3549_s21 }
  0xbb   : > { %1542 = vrot.lane.b32.xlu1 %v3752_v2, %s3550_s22 }
  0xbc   : > { %1486 = vrot.lane.b32.xlu0 %v1472_v47, %s3549_s21  ;;  %v3947_v47 = vld [vmem:[#allocation2 + $0x124] sm:$0xff] }
  0xbf   : > { %1546 = vrot.lane.b32.xlu1 %v1529_v46, %s3550_s22 }
  0xc0   : > { %1490 = vrot.lane.b32.xlu0 %v3815_v25, %s3549_s21 }
  0xc3   : > { %1484 = vrot.lane.b32.xlu1 %v3813_v24, %s3549_s21 }
  0xc4   : > { %1435 = vrot.lane.b32.xlu0 %v3896_v48, %s3550_s22  ;;  %v762_v52 = vpop.permute.xlu0 %761 }
  0xc5   : > { %v773_v59 = vrot.slane %v762_v52, 4 }
  0xc7   : > { %1488 = vrot.lane.b32.xlu1 %v652_v26, %s3549_s21 }
  0xc8   : > { %1439 = vrot.lane.b32.xlu0 %v1425_v50, %s3550_s22  ;;  %v764_v55 = vpop.permute.xlu0 %763 }
  0xc9   : > { %v774_v60 = vrot.slane %v764_v55, 4 }
  0xcb   : > { %1492 = vrot.lane.b32.xlu1 %v1475_v49, %s3549_s21  ;;  %v779_v4 = vsel %vm576_vm1, %v773_v59, %v774_v60 }
  0xcc   : > { %1443 = vrot.lane.b32.xlu0 %v3905_v53, %s3550_s22  ;;  %v766_v57 = vpop.permute.xlu1 %765  ;;  %v770_v58 = vpop.permute.xlu0 %769  ;;  %v780_v11 = vsel %vm578_vm2, %v762_v52, %v779_v4 }
  0xcd   : > { %v777_v62 = vrot.slane %v770_v58, 4  ;;  %v775_v2 = vrot.slane %v766_v57, 4 }
  0xcf   : > { %1437 = vrot.lane.b32.xlu1 %v3902_v51, %s3550_s22  ;;  %v781_v14 = vsel %vm576_vm1, %v774_v60, %v775_v2 }
  0xd0   : > { %1380 = vrot.lane.b32.xlu0 %v3546_v0, %s3549_s21  ;;  %v768_v63 = vpop.permute.xlu1 %767  ;;  %v782_v21 = vsel %vm578_vm2, %v764_v55, %v781_v14 }
  0xd1   : > { %v776_v3 = vrot.slane %v768_v63, 4 }
  0xd2   : > { %v720_v1 = vpop.permute.xlu0 %719 }
  0xd3   : > { %1441 = vrot.lane.b32.xlu1 %v3909_v54, %s3550_s22  ;;  %v783_v7 = vsel %vm576_vm1, %v776_v3, %v777_v62  ;;  %v729_v42 = vrot.slane %v720_v1, 4 }
  0xd4   : > { %1384 = vrot.lane.b32.xlu0 %v1370_v61, %s3549_s21  ;;  %v784_v12 = vsel %vm578_vm2, %v768_v63, %v783_v7  ;;  %v1629_v61 = vld [vmem:[#allocation2 + $0x134] sm:$0xf] }
  0xd5   : > { %v3154_v16 = vcombine.low %v780_v11, %v784_v12  ;;  %v3155_v17 = vcombine.high %v780_v11, %v784_v12 }
  0xd6   : > { %v716_v13 = vpop.permute.xlu0 %715 }
  0xd7   : > { %1445 = vrot.lane.b32.xlu1 %v1428_v56, %s3550_s22  ;;  %1081 = vmatprep.subr.bf16.mxu0 %v3155_v17  ;;  %v727_v29 = vrot.slane %v716_v13, 4 }
  0xd8   : > { %1388 = vrot.lane.b32.xlu0 %v3546_v0, %s3549_s21  ;;  %1082 = vmatpush1.bf16.msra.mxu0 %v3154_v16 }
  0xda   : > { %v724_v24 = vpop.permute.xlu0 %723 }
  0xdb   : > { %1382 = vrot.lane.b32.xlu1 %v3546_v0, %s3549_s21  ;;  %v731_v36 = vrot.slane %v724_v24, 4 }
  0xdc   : > { %1636 = vrot.lane.b32.xlu0 %v3928_v18, %s3550_s22 }
  0xdd   : > { %v772_v8 = vpop.permute.xlu1 %771 }
  0xde   : > { %v778_v15 = vrot.slane %v772_v8, 4 }
  0xdf   : > { %1386 = vrot.lane.b32.xlu1 %v3546_v0, %s3549_s21 }
  0xe0   : > { %v785_v19 = vsel %vm576_vm1, %v777_v62, %v778_v15  ;;  %1640 = vrot.lane.b32.xlu0 %v1626_v35, %s3550_s22 }
  0xe1   : > { %v786_v22 = vsel %vm578_vm2, %v770_v58, %v785_v19  ;;  %v718_v23 = vpop.permute.xlu1 %717 }
  0xe2   : > { %v3156_v25 = vcombine.low %v782_v21, %v786_v22  ;;  %v728_v26 = vrot.slane %v718_v23, 4  ;;  %v3157_v28 = vcombine.high %v782_v21, %v786_v22  ;;  %v662_v41 = vpop.permute.xlu0 %661 }
  0xe3   : > { %1390 = vrot.lane.b32.xlu1 %v1373_v20, %s3549_s21  ;;  %v673_v7 = vrot.slane %v662_v41, 4 }
  0xe4   : > { %1124 = vmatprep.subr.bf16.mxu1 %v3157_v28  ;;  %v733_v44 = vsel %vm576_vm1, %v727_v29, %v728_v26  ;;  %1644 = vrot.lane.b32.xlu0 %v3942_v45, %s3550_s22  ;;  %v735_v56 = vsel %vm576_vm1, %v728_v26, %v729_v42 }
  0xe5   : > { %v722_v40 = vpop.permute.xlu1 %721  ;;  %1125 = vmatpush1.bf16.msra.mxu1 %v3156_v25  ;;  %v734_v49 = vsel %vm633_vm3, %v716_v13, %v733_v44  ;;  %v736_v62 = vsel %vm633_vm3, %v718_v23, %v735_v56 }
  0xe6   : > { %v730_v43 = vrot.slane %v722_v40, 4  ;;  %v666_v55 = vpop.permute.xlu0 %665 }
  0xe7   : > { %1638 = vrot.lane.b32.xlu1 %v3938_v39, %s3550_s22  ;;  %v675_v16 = vrot.slane %v666_v55, 4 }
  0xe8   : > { %v737_v46 = vsel %vm576_vm1, %v730_v43, %v731_v36  ;;  %2318 = vrot.lane.b32.xlu0 %v3546_v0, %s3551_s23 }
  0xe9   : > { %v726_v50 = vpop.permute.xlu1 %725  ;;  %v738_v52 = vsel %vm633_vm3, %v722_v40, %v737_v46 }
  0xea   : > { %v732_v57 = vrot.slane %v726_v50, 4  ;;  %v3150_v58 = vcombine.low %v734_v49, %v738_v52  ;;  %v3151_v59 = vcombine.high %v734_v49, %v738_v52  ;;  %v670_v2 = vpop.permute.xlu0 %669 }
  0xeb   : > { %1642 = vrot.lane.b32.xlu1 %v3947_v47, %s3550_s22  ;;  %v677_v11 = vrot.slane %v670_v2, 4 }
  0xec   : > { %v739_v60 = vsel %vm576_vm1, %v731_v36, %v732_v57  ;;  %1083 = vmatprep.subr.bf16.mxu0 %v3151_v59 }
  0xed   : > { %v740_v63 = vsel %vm633_vm3, %v724_v24, %v739_v60  ;;  %v664_v1 = vpop.permute.xlu1 %663  ;;  %1084 = vmatpush1.bf16.msra.mxu0 %v3150_v58 }
  0xee   : > { %v3152_v3 = vcombine.low %v736_v62, %v740_v63  ;;  %v674_v4 = vrot.slane %v664_v1, 4  ;;  %v3153_v8 = vcombine.high %v736_v62, %v740_v63  ;;  %1085 = vmatprep.subr.bf16.mxu0 %v3761_v5  ;;  %v615_v13 = vpop.permute.xlu0 %614 }
  0xef   : > { %1646 = vrot.lane.b32.xlu1 %v1629_v61, %s3550_s22  ;;  %v626_v40 = vrot.slane %v615_v13, 4 }
  0xf0   : > { %1126 = vmatprep.subr.bf16.mxu1 %v3153_v8  ;;  %v679_v14 = vsel %vm576_vm1, %v673_v7, %v674_v4  ;;  %v681_v22 = vsel %vm576_vm1, %v674_v4, %v675_v16 }
  0xf1   : > { %1127 = vmatpush1.bf16.msra.mxu1 %v3152_v3  ;;  %v668_v12 = vpop.permute.xlu1 %667  ;;  %1086 = vmatpush1.bf16.msra.mxu0 %v3765_v6  ;;  %v680_v19 = vsel %vm578_vm2, %v662_v41, %v679_v14 }
  0xf2   : > { %v676_v15 = vrot.slane %v668_v12, 4  ;;  %1128 = vmatprep.subr.bf16.mxu1 %v3776_v9  ;;  %v619_v21 = vpop.permute.xlu0 %618  ;;  %v682_v9 = vsel %vm578_vm2, %v664_v1, %v681_v22 }
  0xf3   : > { %v628_v49 = vrot.slane %v619_v21, 4  ;;  %2320 = vrot.lane.b32.xlu1 %v3546_v0, %s3551_s23 }
  0xf4   : > { %v683_v17 = vsel %vm576_vm1, %v676_v15, %v677_v11 }
  0xf5   : > { %v672_v5 = vpop.permute.xlu1 %671  ;;  %1129 = vmatpush1.bf16.msra.mxu1 %v3780_v10  ;;  %v684_v20 = vsel %vm578_vm2, %v668_v12, %v683_v17 }
  0xf6   : > { %v678_v23 = vrot.slane %v672_v5, 4  ;;  %v3142_v6 = vcombine.low %v680_v19, %v684_v20  ;;  %v3143_v24 = vcombine.high %v680_v19, %v684_v20  ;;  %v623_v29 = vpop.permute.xlu0 %622 }
  0xf7   : > { %v630_v41 = vrot.slane %v623_v29, 4  ;;  %2324 = vrot.lane.b32.xlu1 %v3546_v0, %s3551_s23 }
  0xf8   : > { %v685_v25 = vsel %vm576_vm1, %v677_v11, %v678_v23  ;;  %1087 = vmatprep.subr.bf16.mxu0 %v3143_v24 }
  0xf9   : > { %v686_v26 = vsel %vm578_vm2, %v670_v2, %v685_v25  ;;  %v617_v28 = vpop.permute.xlu1 %616  ;;  %1088 = vmatpush1.bf16.msra.mxu0 %v3142_v6 }
  0xfa   : > { %v3144_v35 = vcombine.low %v682_v9, %v686_v26  ;;  %v3145_v10 = vcombine.high %v682_v9, %v686_v26  ;;  %v627_v36 = vrot.slane %v617_v28, 4  ;;  %v559_v43 = vpop.permute.xlu0 %558 }
  0xfb   : > { %v570_v11 = vrot.slane %v559_v43, 4 }
  0xfc   : > { %1130 = vmatprep.subr.bf16.mxu1 %v3145_v10  ;;  %v632_v44 = vsel %vm576_vm1, %v626_v40, %v627_v36  ;;  %v635_v58 = vsel %vm576_vm1, %v627_v36, %v628_v49 }
  0xfd   : > { %v621_v42 = vpop.permute.xlu1 %620  ;;  %1131 = vmatpush1.bf16.msra.mxu1 %v3144_v35  ;;  %v634_v52 = vsel %vm633_vm3, %v615_v13, %v632_v44  ;;  %v636_v63 = vsel %vm633_vm3, %v617_v28, %v635_v58 }
  0xfe   : > { %v629_v46 = vrot.slane %v621_v42, 4  ;;  %v563_v57 = vpop.permute.xlu0 %562 }
  0xff   : > { %v572_v17 = vrot.slane %v563_v57, 4 }
 0x100   : > { %v637_v50 = vsel %vm576_vm1, %v629_v46, %v630_v41 }
 0x101   : > { %v625_v55 = vpop.permute.xlu1 %624  ;;  %v638_v56 = vsel %vm633_vm3, %v621_v42, %v637_v50 }
 0x102   : > { %v631_v59 = vrot.slane %v625_v55, 4  ;;  %v3138_v60 = vcombine.low %v634_v52, %v638_v56  ;;  %v3139_v61 = vcombine.high %v634_v52, %v638_v56  ;;  %v567_v3 = vpop.permute.xlu0 %566  ;;  %v3354_v52 = vld [vmem:[#allocation6] ss:$8 sps:$4 sm:$0xff]  }
 0x103   : > { %v574_v12 = vrot.slane %v567_v3, 4 }
 0x104   : > { %v639_v62 = vsel %vm576_vm1, %v630_v41, %v631_v59  ;;  %1089 = vmatprep.subr.bf16.mxu0 %v3139_v61  ;;  %v1516_v59 = vld [vmem:[#allocation2 + $0x4c] sm:$0xff] }
 0x105   : > { %v640_v1 = vsel %vm633_vm3, %v623_v29, %v639_v62  ;;  %v561_v2 = vpop.permute.xlu1 %560  ;;  %1090 = vmatpush1.bf16.msra.mxu0 %v3138_v60  ;;  %v1518_v60 = vld [vmem:[#allocation2 + $0xf4] sm:$0xff] }
 0x106   : > { %v3140_v4 = vcombine.low %v636_v63, %v640_v1  ;;  %v3141_v7 = vcombine.high %v636_v63, %v640_v1  ;;  %v571_v8 = vrot.slane %v561_v2, 4  ;;  %1091 = vmatprep.subr.bf16.mxu0 %v3135_v33  ;;  %v816_v14 = vpop.permute.xlu0 %815  ;;  %v4010_v61 = vcombine.high %v1516_v59, %v1518_v60  ;;  %v1517_v63 = vld [vmem:[#allocation2 + $0x54] sm:$0xff]  ;;  %v1519_v1 = vld [vmem:[#allocation2 + $0xfc] sm:$0xff] }
 0x107   : > { %v827_v9 = vrot.slane %v816_v14, 4  ;;  %v4012_v62 = vcombine.low %v1516_v59, %v1518_v60 }
 0x108   : > { %1132 = vmatprep.subr.bf16.mxu1 %v3141_v7  ;;  %v577_v15 = vsel %vm576_vm1, %v570_v11, %v571_v8  ;;  %v2308_v7 = vld [vmem:[#allocation2 + $0xa0] sm:$0xf]  ;;  %v2311_v11 = vld [vmem:[#allocation2 + $0x148] sm:$0xf] }
 0x109   : > { %v565_v13 = vpop.permute.xlu1 %564  ;;  %1133 = vmatpush1.bf16.msra.mxu1 %v3140_v4  ;;  %1092 = vmatpush1.bf16.msra.mxu0 %v3134_v34  ;;  %v579_v33 = vsel %vm578_vm2, %v559_v43, %v577_v15  ;;  %v580_v34 = vsel %vm576_vm1, %v571_v8, %v572_v17  ;;  %v2262_v15 = vld [vmem:[#allocation2 + $0x5c] sm:$0xf]  ;;  %v2265_v17 = vld [vmem:[#allocation2 + $0x104] sm:$0xf] }
 0x10a   : > { %v573_v16 = vrot.slane %v565_v13, 4  ;;  %1134 = vmatprep.subr.bf16.mxu1 %v3137_v37  ;;  %v820_v32 = vpop.permute.xlu0 %819  ;;  %v581_v37 = vsel %vm578_vm2, %v561_v2, %v580_v34  ;;  %v4014_v2 = vcombine.low %v1517_v63, %v1519_v1  ;;  %2322 = vrot.lane.b32.xlu0 %v2308_v7, %s3551_s23  ;;  %v2209_v34 = vld [vmem:[#allocation2 + $0xf0] sm:$0xff] }
 0x10b   : > { %v829_v10 = vrot.slane %v820_v32, 4  ;;  %2328 = vrot.lane.b32.xlu1 %v2311_v11, %s3551_s23  ;;  %v2365_v11 = vld [vmem:[#allocation2 + $0x14c] sm:$0xf] }
 0x10c   : > { %v582_v19 = vsel %vm576_vm1, %v573_v16, %v574_v12 }
 0x10d   : > { %v569_v5 = vpop.permute.xlu1 %568  ;;  %1135 = vmatpush1.bf16.msra.mxu1 %v3136_v38  ;;  %v583_v27 = vsel %vm578_vm2, %v565_v13, %v582_v19 }
 0x10e   : > { %v575_v20 = vrot.slane %v569_v5, 4  ;;  %v3130_v21 = vcombine.low %v579_v33, %v583_v27  ;;  %v3131_v22 = vcombine.high %v579_v33, %v583_v27  ;;  %v824_v25 = vpop.permute.xlu0 %823  ;;  %2326 = vrot.lane.b32.xlu0 %v3546_v0, %s3551_s23  ;;  %v2207_v5 = vld [vmem:[#allocation2 + $0x50] sm:$0xff]  ;;  %v2206_v27 = vld [vmem:[#allocation2 + $0x48] sm:$0xff] }
 0x10f   : > { %v831_v26 = vrot.slane %v824_v25, 4  ;;  %2274 = vrot.lane.b32.xlu1 %v1517_v63, %s3552_s25 }
 0x110   : > { %v584_v23 = vsel %vm576_vm1, %v574_v12, %v575_v20  ;;  %1093 = vmatprep.subr.bf16.mxu0 %v3131_v22  ;;  %v2208_v20 = vld [vmem:[#allocation2 + $0x58] sm:$0xf]  ;;  %v2211_v22 = vld [vmem:[#allocation2 + $0x100] sm:$0xf] }
 0x111   : > { %v585_v6 = vsel %vm578_vm2, %v567_v3, %v584_v23  ;;  %v818_v24 = vpop.permute.xlu1 %817  ;;  %1094 = vmatpush1.bf16.msra.mxu0 %v3130_v21  ;;  %v4016_v3 = vcombine.high %v1517_v63, %v1519_v1  ;;  %v2210_v23 = vld [vmem:[#allocation2 + $0xf8] sm:$0xff] }
 0x112   : > { %v3132_v30 = vcombine.low %v581_v37, %v585_v6  ;;  %v3133_v31 = vcombine.high %v581_v37, %v585_v6  ;;  %v828_v38 = vrot.slane %v818_v24, 4  ;;  %v4018_v4 = vpop.permute.xlu0 %1582  ;;  %2272 = vrot.lane.b32.xlu0 %v1516_v59, %s3552_s25  ;;  %v2362_v59 = vld [vmem:[#allocation2 + $0xa4] sm:$0xf] }
 0x113   : > { %2278 = vrot.lane.b32.xlu1 %v1518_v60, %s3552_s25 }
 0x114   : > { %1136 = vmatprep.subr.bf16.mxu1 %v3133_v31  ;;  %v833_v29 = vsel %vm576_vm1, %v827_v9, %v828_v38  ;;  %v835_v43 = vsel %vm576_vm1, %v828_v38, %v829_v10  ;;  %v4074_v31 = vld [vmem:[#allocation2 + $0xac] sm:$0xff]  ;;  %v2161_v38 = vld [vmem:[#allocation2 + $0x14] sm:$0xf] }
 0x115   : > { %v822_v28 = vpop.permute.xlu1 %821  ;;  %1137 = vmatpush1.bf16.msra.mxu1 %v3132_v30  ;;  %v834_v40 = vsel %vm633_vm3, %v816_v14, %v833_v29  ;;  %v836_v55 = vsel %vm633_vm3, %v818_v24, %v835_v43  ;;  %v4064_v24 = vld [vmem:[#allocation2 + $0xc] sm:$0xff]  ;;  %4577 = vst [vmem:[#allocation20_spill] sm:$0xff] %v4074_v31  ;;  %v2109_v43 = vld [vmem:[#allocation2 + $0xb8] sm:$0xf] }
 0x116   : > { %v830_v35 = vrot.slane %v822_v28, 4  ;;  %v4029_v12 = vpop.permute.xlu0 %1586  ;;  %2276 = vrot.lane.b32.xlu0 %v2262_v15, %s3552_s25  ;;  %4575 = vst [vmem:[#allocation18_spill] sm:$0xff] %v4064_v24  ;;  %v4133_v15 = vld [vmem:[#allocation2 + $0x144] sm:$0xff] }
 0x117   : > { %2282 = vrot.lane.b32.xlu1 %v2265_v17, %s3552_s25  ;;  %4582 = vst [vmem:[#allocation25_spill] sm:$0xff] %v4133_v15 }
 0x118   : > { %v837_v36 = vsel %vm576_vm1, %v830_v35, %v831_v26 }
 0x119   : > { %v826_v41 = vpop.permute.xlu1 %825  ;;  %v838_v42 = vsel %vm633_vm3, %v822_v28, %v837_v36  ;;  %v4081_v28 = vld [vmem:[#allocation2 + $0xb4] sm:$0xff]  ;;  %v2106_v36 = vld [vmem:[#allocation2 + $0x10] sm:$0xf] }
 0x11a   : > { %v832_v44 = vrot.slane %v826_v41, 4  ;;  %v3162_v46 = vcombine.low %v834_v40, %v838_v42  ;;  %v3163_v49 = vcombine.high %v834_v40, %v838_v42  ;;  %v4036_v14 = vpop.permute.xlu0 %1590  ;;  %2280 = vrot.lane.b32.xlu0 %v1519_v1, %s3552_s25  ;;  %4578 = vst [vmem:[#allocation21_spill] sm:$0xff] %v4081_v28 }
 0x11b   : > { %2220 = vrot.lane.b32.xlu1 %v2207_v5, %s3551_s23 }
 0x11c   : > { %v839_v50 = vsel %vm576_vm1, %v831_v26, %v832_v44  ;;  %1109 = vmatprep.subr.bf16.mxu0 %v3163_v49  ;;  %v2164_v26 = vld [vmem:[#allocation2 + $0xbc] sm:$0xf] }
 0x11d   : > { %v840_v56 = vsel %vm633_vm3, %v824_v25, %v839_v50  ;;  %1110 = vmatpush2.bf16.msra.mxu0 %v3162_v46  ;;  %v4024_v8 = vpop.permute.xlu1 %1584  ;;  %v4066_v25 = vld [vmem:[#allocation2 + $0x4] sm:$0xff] }
 0x11e   : > { %v3164_v57 = vcombine.low %v836_v55, %v840_v56  ;;  %v3165_v58 = vcombine.high %v836_v55, %v840_v56  ;;  %v4044_v19 = vpop.permute.xlu0 %1536  ;;  %2218 = vrot.lane.b32.xlu0 %v2206_v27, %s3551_s23  ;;  %4576 = vst [vmem:[#allocation19_spill] sm:$0xff] %v4066_v25  ;;  %v4116_v55 = vld [vmem:[#allocation2 + $0x94] sm:$0xff] }
 0x11f   : > { %2224 = vrot.lane.b32.xlu1 %v2209_v34, %s3551_s23  ;;  %v4096_v40 = vpop.f32.mrf.mxu0  ;;  %v4103_v42 = vpop.f32.mrf.mxu1  ;;  %4580 = vst [vmem:[#allocation23_spill] sm:$0xff] %v4116_v55 }
 0x120   : > { %1152 = vmatprep.subr.bf16.mxu1 %v3165_v58  ;;  %1112 = vmatmul.mubr.bf16.vlgmr.msra.gmra.mxu0 %v3354_v52 }
 0x121   : > { %1153 = vmatpush2.bf16.msra.mxu1 %v3164_v57  ;;  %1220 = vmatprep.mubr.bf16.mxu0 %v3546_v0  ;;  %v4034_v13 = vpop.permute.xlu1 %1588  ;;  %v436_v44 = vpop.f32.mrf.mxu0 }
 0x122   : > { %v4050_v32 = vpop.permute.xlu0 %1540  ;;  %2222 = vrot.lane.b32.xlu0 %v2208_v20, %s3551_s23  ;;  %v4110_v49 = vpop.f32.mrf.mxu1 }
 0x123   : > { %2228 = vrot.lane.b32.xlu1 %v2211_v22, %s3551_s23  ;;  %v438_v56 = vpop.f32.mrf.mxu0 }
 0x124   : > { %1155 = vmatmul.mubr.bf16.vlgmr.msra.gmra.mxu1 %v3354_v52  ;;  %v4114_v52 = vld [vmem:[#allocation2 + $0x9c] sm:$0xff]  ;;  %v4124_v58 = vpop.f32.mrf.mxu1 }
 0x125   : > { %1263 = vmatprep.mubr.bf16.mxu1 %v3546_v0  ;;  %v4040_v16 = vpop.permute.xlu1 %1592  ;;  %4579 = vst [vmem:[#allocation22_spill] sm:$0xff] %v4114_v52  ;;  %v440_v60 = vpop.f32.mrf.mxu0 }
 0x126   : > { %v4058_v37 = vpop.permute.xlu0 %1544  ;;  %2226 = vrot.lane.b32.xlu0 %v2210_v23, %s3551_s23  ;;  %v483_v7 = vpop.f32.mrf.mxu1 }
 0x127   : > { %2173 = vrot.lane.b32.xlu1 %v4064_v24, %s3552_s25  ;;  %v493_v53 = vmax.f32 %v483_v7, 0.0 }
 0x129   : > { %v4048_v33 = vpop.permute.xlu1 %1538 }
 0x12a   : > { %v4068_v30 = vpop.permute.xlu0 %1482  ;;  %2171 = vrot.lane.b32.xlu0 %v4066_v25, %s3552_s25 }
 0x12b   : > { %2177 = vrot.lane.b32.xlu1 %v4074_v31, %s3552_s25  ;;  %v486_v31 = vmax.f32 %v4096_v40, 0.0 }
 0x12d   : > { %v4054_v21 = vpop.permute.xlu1 %1542 }
 0x12e   : > { %2175 = vrot.lane.b32.xlu0 %v2161_v38, %s3552_s25  ;;  %v4083_v29 = vpop.permute.xlu0 %1486 }
 0x12f   : > { %2181 = vrot.lane.b32.xlu1 %v2164_v26, %s3552_s25 }
 0x131   : > { %v4062_v6 = vpop.permute.xlu1 %1546 }
 0x132   : > { %2179 = vrot.lane.b32.xlu0 %v4081_v28, %s3552_s25  ;;  %v4090_v10 = vpop.permute.xlu0 %1490 }
 0x133   : > { %2118 = vrot.lane.b32.xlu1 %v3546_v0, %s3551_s23 }
 0x135   : > { %v4076_v9 = vpop.permute.xlu1 %1484 }
 0x136   : > { %2116 = vrot.lane.b32.xlu0 %v3546_v0, %s3551_s23  ;;  %v4105_v46 = vpop.permute.xlu0 %1435 }
 0x137   : > { %2122 = vrot.lane.b32.xlu1 %v3546_v0, %s3551_s23 }
 0x139   : > { %v4088_v35 = vpop.permute.xlu1 %1488 }
 0x13a   : > { %2120 = vrot.lane.b32.xlu0 %v2106_v36, %s3551_s23  ;;  %v4118_v57 = vpop.permute.xlu0 %1439  ;;  %v487_v36 = vmax.f32 %v436_v44, 0.0  ;;  %v3355_v44 = vld [vmem:[#allocation8 + $0x8] sm:$0xff]  }
 0x13b   : > { %2126 = vrot.lane.b32.xlu1 %v2109_v43, %s3551_s23  ;;  %v491_v43 = vmax.f32 %v440_v60, 0.0  ;;  %v1595_v60 = vrot.slane %v4024_v8, 4 }
 0x13d   : > { %v4098_v41 = vpop.permute.xlu1 %1492 }
 0x13e   : > { %2124 = vrot.lane.b32.xlu0 %v3546_v0, %s3551_s23  ;;  %v4126_v0 = vld [vmem:[#allocation2 + $0x13c] sm:$0xff]  ;;  %v4135_v5 = vpop.permute.xlu0 %1443 }
 0x13f   : > { %2374 = vrot.lane.b32.xlu1 %v4114_v52, %s3552_s25  ;;  %4581 = vst [vmem:[#allocation24_spill] sm:$0xff] %v4126_v0 }
 0x141   : > { %v4112_v50 = vpop.permute.xlu1 %1437 }
 0x142   : > { %2372 = vrot.lane.b32.xlu0 %v4116_v55, %s3552_s25  ;;  %v4142_v25 = vpop.permute.xlu0 %1380  ;;  %v490_v55 = vmax.f32 %v438_v56, 0.0 }
 0x143   : > { %2378 = vrot.lane.b32.xlu1 %v4126_v0, %s3552_s25 }
 0x144   : > { %v496_v7 = vpack.c.bf16 %v490_v55, %v486_v31  ;;  %v1549_v31 = vrot.slane %v4048_v33, 4  ;;  %v1548_v55 = vrot.slane %v4044_v19, 4 }
 0x145   : > { %v4128_v63 = vpop.permute.xlu1 %1441 }
 0x146   : > { %2376 = vrot.lane.b32.xlu0 %v2362_v59, %s3552_s25 }
 0x147   : > { %2382 = vrot.lane.b32.xlu1 %v2365_v11, %s3552_s25  ;;  %v489_v11 = vmax.f32 %v4110_v49, 0.0  ;;  %v1598_v49 = vrot.slane %v4036_v14, 4 }
 0x149   : > { %v4140_v20 = vpop.permute.xlu1 %1445 }
 0x14a   : > { %2380 = vrot.lane.b32.xlu0 %v4133_v15, %s3552_s25 }
 0x14d   : > { %v4148_v40 = vpop.permute.xlu1 %1382 }
 0x1e0   : > { %v1113_v1 = vpop.f32.mrf.mxu0 }
 0x1e1   : > { %v1168_v22 = vmax.f32 %v1113_v1, 0.0  ;;  %v497_v1 = vpack.c.bf16 %v491_v43, %v487_v36  ;;  %v4172_v36 = vpop.permute.xlu1 %1386 }
 0x1e2   : > { %v1115_v17 = vpop.f32.mrf.mxu0 }
 0x1e3   : > { %v1169_v59 = vmax.f32 %v1115_v17, 0.0  ;;  %v1594_v17 = vrot.slane %v4018_v4, 4 }
 0x1e4   : > { %v1156_v27 = vpop.f32.mrf.mxu1  ;;  %v1117_v34 = vpop.f32.mrf.mxu0 }
 0x1e5   : > { %v1172_v38 = vmax.f32 %v1117_v34, 0.0 }
 0x1e6   : > { %v1158_v23 = vpop.f32.mrf.mxu1  ;;  %v1119_v26 = vpop.f32.mrf.mxu0 }
 0x1e7   : > { %v1173_v24 = vmax.f32 %v1119_v26, 0.0  ;;  %v1176_v0 = vpack.c.bf16 %v1172_v38, %v1168_v22  ;;  %v1171_v34 = vmax.f32 %v1158_v23, 0.0  ;;  %v1170_v26 = vmax.f32 %v1156_v27, 0.0  ;;  %v4154_v22 = vpop.permute.xlu0 %1384 }
 0x1e8   : > { %v1160_v28 = vpop.f32.mrf.mxu1  ;;  %v3205_v27 = vcombine.high %v3928_v18, %v3947_v47  ;;  %v1596_v23 = vrot.slane %v4029_v12, 4  ;;  %v1552_v12 = vrot.slane %v4058_v37, 4 }
 0x1e9   : > { %v1177_v52 = vpack.c.bf16 %v1173_v24, %v1169_v59  ;;  %v1174_v15 = vmax.f32 %v1160_v28, 0.0  ;;  %v488_v24 = vmax.f32 %v4103_v42, 0.0  ;;  %v1597_v28 = vrot.slane %v4034_v13, 4 }
 0x1ea   : > { %v1162_v51 = vpop.f32.mrf.mxu1  ;;  %v1599_v42 = vrot.slane %v4040_v16, 4  ;;  %v4167_v16 = vld [vmem:[#allocation2 + $0x70] sm:$0xff]  ;;  %v1602_v59 = vsel %vm576_vm1, %v1595_v60, %v1596_v23 }
 0x1eb   : > { %v1175_v48 = vmax.f32 %v1162_v51, 0.0  ;;  %1202 = vmatprep.subr.bf16.mxu0 %v1177_v52  ;;  %v492_v51 = vmax.f32 %v4124_v58, 0.0  ;;  %v1178_v52 = vpack.c.bf16 %v1174_v15, %v1170_v26  ;;  %v1604_v58 = vsel %vm576_vm1, %v1597_v28, %v1598_v49  ;;  %v3369_v28 = vld [vmem:[#allocation6 + $0x14] ss:$8 sps:$4 sm:$0xff]  }
 0x1ec   : > { %1203 = vmatpush1.bf16.msra.mxu0 %v1176_v0  ;;  %v499_v0 = vpack.c.bf16 %v493_v53, %v489_v11  ;;  %v1551_v53 = vrot.slane %v4054_v21, 4  ;;  %v3207_v15 = vcombine.high %v3938_v39, %v3942_v45  ;;  %v1606_v11 = vsel %vm576_vm1, %v1598_v49, %v1599_v42 }
 0x1ed   : > { %v1179_v56 = vpack.c.bf16 %v1175_v48, %v1171_v34  ;;  %1296 = vmatprep.subr.bf16.mxu0 %v497_v1  ;;  %v1600_v48 = vsel %vm576_vm1, %v1594_v17, %v1595_v60  ;;  %v498_v38 = vpack.c.bf16 %v492_v51, %v488_v24  ;;  %v1550_v1 = vrot.slane %v4050_v32, 4  ;;  %v3360_v34 = vld [vmem:[#allocation8] sm:$0xff]   ;;  %v4203_v51 = vpop.permute.xlu1 %1390 }
 0x1ee   : > { %v1601_v43 = vsel %vm1399_vm4, %v4018_v4, %v1600_v48  ;;  %v1554_v17 = vsel %vm576_vm1, %v1548_v55, %v1549_v31  ;;  %v1553_v26 = vrot.slane %v4062_v6, 4  ;;  %v3204_v24 = vcombine.low %v3928_v18, %v3947_v47  ;;  %v4185_v4 = vpop.permute.xlu0 %1388 }
 0x1ef   : > { %1245 = vmatprep.subr.bf16.mxu1 %v1179_v56  ;;  %3169 = vmatmul.mubr.msk.bf16.vlgmr.msra.gmra.mxu0 %vm396_vm0, %v3355_v44  ;;  %v1605_v60 = vsel %vm1399_vm4, %v4034_v13, %v1604_v58  ;;  %v1558_v32 = vsel %vm576_vm1, %v1551_v53, %v1552_v12  ;;  %v1607_v6 = vsel %vm1399_vm4, %v4036_v14, %v1606_v11  ;;  %v1494_v47 = vrot.slane %v4068_v30, 4 }
 0x1f0   : > { %1246 = vmatpush1.bf16.msra.mxu1 %v1178_v52  ;;  %1297 = vmatpush1.bf16.msra.mxu0 %v496_v7  ;;  %v1555_v49 = vsel %vm1454_vm5, %v4044_v19, %v1554_v17  ;;  %v1556_v18 = vsel %vm576_vm1, %v1549_v31, %v1550_v1  ;;  %v3201_v13 = vcombine.high %v1601_v43, %v1605_v60  ;;  %v1495_v7 = vrot.slane %v4076_v9, 4 }
 0x1f1   : > { %1339 = vmatprep.subr.bf16.mxu1 %v499_v0  ;;  %1314 = vmatprep.mubr.bf16.mxu0 %v4167_v16  ;;  %v1560_v56 = vsel %vm576_vm1, %v1552_v12, %v1553_v26  ;;  %v1559_v14 = vsel %vm1454_vm5, %v4054_v21, %v1558_v32  ;;  %v1497_v19 = vrot.slane %v4088_v35, 4  ;;  %v1498_v52 = vrot.slane %v4090_v10, 4  ;;  %v4225_v12 = vpop.permute.xlu1 %1638 }
 0x1f2   : > { %1901 = vmatprep.subr.bf16.mxu0 %v3205_v27  ;;  %v3200_v0 = vcombine.low %v1601_v43, %v1605_v60  ;;  %v4210_v23 = vpop.permute.xlu0 %1636  ;;  %v1496_v42 = vrot.slane %v4083_v29, 4  ;;  %v3197_v21 = vcombine.high %v1555_v49, %v1559_v14  ;;  %v1500_v48 = vsel %vm576_vm1, %v1494_v47, %v1495_v7 }
 0x1f3   : > { %3170 = vmatmul.mubr.msk.bf16.vlgmr.msra.gmra.mxu1 %vm396_vm0, %v3355_v44  ;;  %v1603_v44 = vsel %vm1399_vm4, %v4024_v8, %v1602_v59  ;;  %v3206_v8 = vcombine.low %v3938_v39, %v3942_v45  ;;  %v1557_v39 = vsel %vm1454_vm5, %v4048_v33, %v1556_v18  ;;  %v1561_v45 = vsel %vm1454_vm5, %v4058_v37, %v1560_v56 }
 0x1f4   : > { %1340 = vmatpush1.bf16.msra.mxu1 %v498_v38  ;;  %1357 = vmatprep.mubr.bf16.mxu1 %v4167_v16  ;;  %v3203_v27 = vcombine.high %v1603_v44, %v1607_v6  ;;  %v1499_v31 = vrot.slane %v4098_v41, 4  ;;  %v1448_v55 = vrot.slane %v4112_v50, 4  ;;  %v1447_v58 = vrot.slane %v4105_v46, 4 }
 0x1f5   : > { %1944 = vmatprep.subr.bf16.mxu1 %v3207_v15  ;;  %v1504_v33 = vsel %vm576_vm1, %v1497_v19, %v1498_v52  ;;  %v1450_v53 = vrot.slane %v4128_v63, 4  ;;  %v1451_v37 = vrot.slane %v4135_v5, 4  ;;  %v3202_v29 = vcombine.low %v1603_v44, %v1607_v6  ;;  %v1643_v6 = vpop.permute.xlu1 %1642 }
 0x1f6   : > { %v3196_v15 = vcombine.low %v1555_v49, %v1559_v14  ;;  %v3199_v41 = vcombine.high %v1557_v39, %v1561_v45  ;;  %v1501_v38 = vsel %vm1399_vm4, %v4068_v30, %v1500_v48  ;;  %v1502_v43 = vsel %vm576_vm1, %v1495_v7, %v1496_v42 }
 0x1f7   : > { %3172 = vmatmul.mubr.msk.bf16.vlgmr.msra.gmra.mxu0 %vm396_vm0, %v3360_v34  ;;  %v1506_v59 = vsel %vm576_vm1, %v1498_v52, %v1499_v31  ;;  %v1453_v11 = vsel %vm576_vm1, %v1447_v58, %v1448_v55  ;;  %v1449_v1 = vrot.slane %v4118_v57, 4  ;;  %v1505_v17 = vsel %vm1399_vm4, %v4088_v35, %v1504_v33 }
 0x1f8   : > { %1902 = vmatpush1.bf16.msra.mxu0 %v3204_v24  ;;  %3212 = vmatprep.mubr.msk.bf16.mxu0 %vm396_vm0, %v3369_v28  ;;  %v1452_v26 = vrot.slane %v4140_v20, 4  ;;  %v1458_v24 = vsel %vm576_vm1, %v1450_v53, %v1451_v37  ;;  %v3198_v30 = vcombine.low %v1557_v39, %v1561_v45  ;;  %v1503_v60 = vsel %vm1399_vm4, %v4076_v9, %v1502_v43 }
 0x1f9   : > { %1903 = vmatprep.subr.bf16.mxu0 %v3201_v13  ;;  %v1507_v57 = vsel %vm1399_vm4, %v4090_v10, %v1506_v59  ;;  %v3189_v32 = vcombine.high %v1501_v38, %v1505_v17  ;;  %v1456_v35 = vsel %vm576_vm1, %v1448_v55, %v1449_v1  ;;  %v1393_v20 = vrot.slane %v4148_v40, 4 }
 0x1fa   : > { %v1392_v44 = vrot.slane %v4142_v25, 4  ;;  %v1459_v9 = vsel %vm1454_vm5, %v4128_v63, %v1458_v24  ;;  %v1460_v49 = vsel %vm576_vm1, %v1451_v37, %v1452_v26  ;;  %v1395_v10 = vrot.slane %v4172_v36, 4 }
 0x1fb   : > { %3173 = vmatmul.mubr.msk.bf16.vlgmr.msra.gmra.mxu1 %vm396_vm0, %v3360_v34  ;;  %v4234_v34 = vpop.permute.xlu0 %1640  ;;  %v3191_v18 = vcombine.high %v1503_v60, %v1507_v57  ;;  %v3188_v13 = vcombine.low %v1501_v38, %v1505_v17  ;;  %v1457_v56 = vsel %vm1454_vm5, %v4112_v50, %v1456_v35  ;;  %v1394_v7 = vrot.slane %v4154_v22, 4 }
 0x1fc   : > { %1945 = vmatpush1.bf16.msra.mxu1 %v3206_v8  ;;  %1904 = vmatpush1.bf16.msra.mxu0 %v3200_v0  ;;  %v1397_v8 = vrot.slane %v4203_v51, 4  ;;  %v1461_v14 = vsel %vm1454_vm5, %v4135_v5, %v1460_v49  ;;  %v1398_v19 = vsel %vm576_vm1, %v1392_v44, %v1393_v20  ;;  %v1649_v52 = vrot.slane %v4225_v12, 4  ;;  %v4583_v51 = vld [vmem:[#allocation15_spill] sm:$0xff]  ;;  %v1647_v5 = vpop.permute.xlu1 %1646 }
 0x1fd   : > { %1946 = vmatprep.subr.bf16.mxu1 %v3203_v27  ;;  %1905 = vmatprep.subr.bf16.mxu0 %v3197_v21  ;;  %v1648_v27 = vrot.slane %v4210_v23, 4  ;;  %v1651_v50 = vrot.slane %v1643_v6, 4  ;;  %v3181_v39 = vcombine.high %v4583_v51, %v3909_v54  ;;  %v3190_v45 = vcombine.low %v1503_v60, %v1507_v57 }
 0x1fe   : > { %3213 = vmatprep.mubr.msk.bf16.mxu1 %vm396_vm0, %v3369_v28  ;;  %v1455_v28 = vsel %vm1454_vm5, %v4105_v46, %v1453_v11  ;;  %v1396_v46 = vrot.slane %v4185_v4, 4  ;;  %v3187_v21 = vcombine.high %v1457_v56, %v1461_v14  ;;  %v1400_v48 = vsel %vm1399_vm4, %v4142_v25, %v1398_v19  ;;  %v4584_v25 = vld [vmem:[#allocation17_spill] sm:$0xff] }
 0x1ff   : > { %v1645_v47 = vpop.permute.xlu0 %1644  ;;  %v3185_v63 = vcombine.high %v1455_v28, %v1459_v9  ;;  %v3184_v42 = vcombine.low %v1455_v28, %v1459_v9  ;;  %v1401_v31 = vsel %vm576_vm1, %v1393_v20, %v1394_v7  ;;  %v1654_v58 = vsel %vm576_vm1, %v1648_v27, %v1649_v52 }
 0x200   : > { %1947 = vmatpush1.bf16.msra.mxu1 %v3202_v29  ;;  %1906 = vmatpush1.bf16.msra.mxu0 %v3196_v15  ;;  %v1403_v0 = vsel %vm576_vm1, %v1395_v10, %v1396_v46  ;;  %v1652_v22 = vrot.slane %v1645_v47, 4  ;;  %v1405_v55 = vsel %vm576_vm1, %v1396_v46, %v1397_v8  ;;  %v3180_v33 = vcombine.low %v4583_v51, %v3909_v54  ;;  %v4301_v20 = vpop.permute.xlu1 %2320 }
 0x201   : > { %1948 = vmatprep.subr.bf16.mxu1 %v3199_v41  ;;  %1907 = vmatprep.subr.bf16.mxu0 %v4010_v61  ;;  %v1404_v53 = vsel %vm1399_vm4, %v4172_v36, %v1403_v0  ;;  %v1650_v37 = vrot.slane %v4234_v34, 4  ;;  %v1653_v29 = vrot.slane %v1647_v5, 4  ;;  %v4585_v41 = vld [vmem:[#allocation16_spill] sm:$0xff]  ;;  %v3186_v43 = vcombine.low %v1457_v56, %v1461_v14 }
 0x202   : > { %v1658_v15 = vsel %vm576_vm1, %v1651_v50, %v1652_v22  ;;  %v3183_v38 = vcombine.high %v4585_v41, %v4584_v25  ;;  %v1402_v59 = vsel %vm1399_vm4, %v4148_v40, %v1401_v31  ;;  %v1406_v54 = vsel %vm1399_vm4, %v4185_v4, %v1405_v55 }
 0x203   : > { %v3177_v11 = vcombine.high %v1400_v48, %v1404_v53  ;;  %v1655_v36 = vsel %vm1454_vm5, %v4210_v23, %v1654_v58  ;;  %v3182_v1 = vcombine.low %v4585_v41, %v4584_v25  ;;  %v1659_v34 = vsel %vm1454_vm5, %v1643_v6, %v1658_v15 }
 0x204   : > { %1949 = vmatpush1.bf16.msra.mxu1 %v3198_v30  ;;  %1908 = vmatpush1.bf16.msra.mxu0 %v4012_v62  ;;  %v1656_v17 = vsel %vm576_vm1, %v1649_v52, %v1650_v37  ;;  %v1660_v26 = vsel %vm576_vm1, %v1652_v22, %v1653_v29  ;;  %v3176_v40 = vcombine.low %v1400_v48, %v1404_v53  ;;  %v4305_v6 = vpop.permute.xlu1 %2324 }
 0x205   : > { %1950 = vmatprep.subr.bf16.mxu1 %v4016_v3  ;;  %1909 = vmatprep.subr.bf16.mxu0 %v3189_v32  ;;  %v3179_v24 = vcombine.high %v1402_v59, %v1406_v54  ;;  %v3209_v4 = vcombine.high %v1655_v36, %v1659_v34  ;;  %v1657_v30 = vsel %vm1454_vm5, %v4225_v12, %v1656_v17  ;;  %v3371_v32 = vld [vmem:[#allocation6 + $0x10] ss:$8 sps:$4 sm:$0xff]   ;;  %v4299_v12 = vpop.permute.xlu0 %2318 }
 0x206   : > { %v1661_v23 = vsel %vm1454_vm5, %v1645_v47, %v1660_v26  ;;  %v3178_v60 = vcombine.low %v1402_v59, %v1406_v54  ;;  %v3208_v57 = vcombine.low %v1655_v36, %v1659_v34 }
 0x207   : > { %v3211_v28 = vcombine.high %v1657_v30, %v1661_v23  ;;  %v3210_v35 = vcombine.low %v1657_v30, %v1661_v23  ;;  %v2333_v23 = vrot.slane %v4305_v6, 4 }
 0x208   : > { %1951 = vmatpush1.bf16.msra.mxu1 %v4014_v2  ;;  %1910 = vmatpush1.bf16.msra.mxu0 %v3188_v13  ;;  %v4309_v49 = vpop.permute.xlu1 %2328 }
 0x209   : > { %1952 = vmatprep.subr.bf16.mxu1 %v3191_v18  ;;  %1911 = vmatprep.subr.bf16.mxu0 %v3185_v63  ;;  %v4303_v44 = vpop.permute.xlu0 %2322 }
 0x20c   : > { %1953 = vmatpush1.bf16.msra.mxu1 %v3190_v45  ;;  %1912 = vmatpush1.bf16.msra.mxu0 %v3184_v42  ;;  %v4313_v46 = vpop.permute.xlu1 %2274 }
 0x20d   : > { %1954 = vmatprep.subr.bf16.mxu1 %v3187_v21  ;;  %1913 = vmatprep.subr.bf16.mxu0 %v3181_v39  ;;  %v4307_v9 = vpop.permute.xlu0 %2326 }
 0x210   : > { %1955 = vmatpush1.bf16.msra.mxu1 %v3186_v43  ;;  %1914 = vmatpush1.bf16.msra.mxu0 %v3180_v33  ;;  %v4317_v47 = vpop.permute.xlu1 %2278 }
 0x211   : > { %1956 = vmatprep.subr.bf16.mxu1 %v3183_v38  ;;  %1915 = vmatprep.subr.bf16.mxu0 %v3177_v11  ;;  %v4311_v10 = vpop.permute.xlu0 %2272 }
 0x214   : > { %1957 = vmatpush1.bf16.msra.mxu1 %v3182_v1  ;;  %1916 = vmatpush1.bf16.msra.mxu0 %v3176_v40  ;;  %v4321_v14 = vpop.permute.xlu1 %2282 }
 0x215   : > { %1958 = vmatprep.subr.bf16.mxu1 %v3179_v24  ;;  %1931 = vmatprep.subr.bf16.mxu0 %v3209_v4  ;;  %v4315_v18 = vpop.permute.xlu0 %2276  ;;  %v2331_v24 = vrot.slane %v4301_v20, 4  ;;  %v2330_v4 = vrot.slane %v4299_v12, 4 }
 0x218   : > { %1959 = vmatpush1.bf16.msra.mxu1 %v3178_v60  ;;  %1932 = vmatpush2.bf16.msra.mxu0 %v3208_v57  ;;  %v4329_v5 = vpop.permute.xlu1 %2220  ;;  %v2334_v60 = vrot.slane %v4307_v9, 4 }
 0x219   : > { %1974 = vmatprep.subr.bf16.mxu1 %v3211_v28  ;;  %v4319_v56 = vpop.permute.xlu0 %2280  ;;  %v2332_v28 = vrot.slane %v4303_v44, 4 }
 0x21b   : > { %1934 = vmatmul.mubr.bf16.vlgmr.msra.gmra.mxu0 %v3371_v32 }
 0x21c   : > { %1975 = vmatpush2.bf16.msra.mxu1 %v3210_v35  ;;  %2042 = vmatprep.mubr.bf16.mxu0 %v4167_v16  ;;  %v4343_v25 = vpop.permute.xlu1 %2224 }
 0x21d   : > { %v4323_v27 = vpop.permute.xlu0 %2218 }
 0x21f   : > { %1977 = vmatmul.mubr.bf16.vlgmr.msra.gmra.mxu1 %v3371_v32 }
 0x220   : > { %2085 = vmatprep.mubr.bf16.mxu1 %v4167_v16  ;;  %v4349_v59 = vpop.permute.xlu1 %2228 }
 0x221   : > { %v4335_v55 = vpop.permute.xlu0 %2222 }
 0x224   : > { %v4353_v11 = vpop.permute.xlu1 %2173 }
 0x225   : > { %v4347_v43 = vpop.permute.xlu0 %2226 }
 0x228   : > { %v4357_v1 = vpop.permute.xlu1 %2177 }
 0x229   : > { %v4351_v54 = vpop.permute.xlu0 %2171 }
 0x22c   : > { %v4361_v17 = vpop.permute.xlu1 %2181 }
 0x22d   : > { %v4355_v36 = vpop.permute.xlu0 %2175 }
 0x230   : > { %v4369_v57 = vpop.permute.xlu1 %2118 }
 0x231   : > { %v4359_v34 = vpop.permute.xlu0 %2179 }
 0x235   : > { %v4363_v26 = vpop.permute.xlu0 %2116 }
 0x2af   : > { %v1222_v13 = vpop.f32.mrf.mxu0 }
 0x2b1   : > { %v1224_v7 = vpop.f32.mrf.mxu0 }
 0x2b3   : > { %v1265_v8 = vpop.f32.mrf.mxu1  ;;  %v1226_v63 = vpop.f32.mrf.mxu0 }
 0x2b5   : > { %v1267_v19 = vpop.f32.mrf.mxu1  ;;  %v1228_v52 = vpop.f32.mrf.mxu0 }
 0x2b7   : > { %v1269_v0 = vpop.f32.mrf.mxu1  ;;  %v1316_v50 = vpop.f32.mrf.mxu0 }
 0x2b8   : > { %v4325_v22 = vadd.f32 %v1316_v50, %v1222_v13  ;;  %v2336_v13 = vsel %vm576_vm1, %v2330_v4, %v2331_v24  ;;  %v2340_v50 = vsel %vm576_vm1, %v2333_v23, %v2334_v60  ;;  %v4590_v4 = vld [vmem:[#allocation23_spill] sm:$0xff] }
 0x2b9   : > { %v1271_v51 = vpop.f32.mrf.mxu1  ;;  %v1318_v39 = vpop.f32.mrf.mxu0  ;;  %v4379_v44 = vsel %vm2135_vm6, %v4299_v12, %v2336_v13 }
 0x2ba   : > { %v4327_v45 = vadd.f32 %v1318_v39, %v1224_v7  ;;  %v4373_v7 = vpop.permute.xlu0 %2120 }
 0x2bb   : > { %v1359_v42 = vpop.f32.mrf.mxu1  ;;  %v1320_v21 = vpop.f32.mrf.mxu0 }
 0x2bc   : > { %v4331_v48 = vadd.f32 %v1359_v42, %v1265_v8  ;;  %v4333_v31 = vadd.f32 %v1320_v21, %v1226_v63  ;;  %v2335_v8 = vrot.slane %v4309_v49, 4  ;;  %v2338_v42 = vsel %vm576_vm1, %v2331_v24, %v2332_v28 }
 0x2bd   : > { %v1361_v58 = vpop.f32.mrf.mxu1  ;;  %v1322_v33 = vpop.f32.mrf.mxu0  ;;  %v2285_v21 = vrot.slane %v4313_v46, 4  ;;  %v2287_v49 = vrot.slane %v4317_v47, 4  ;;  %v2341_v24 = vsel %vm2135_vm6, %v4305_v6, %v2340_v50  ;;  %v2286_v28 = vrot.slane %v4315_v18, 4  ;;  %v4591_v18 = vld [vmem:[#allocation25_spill] sm:$0xff] }
 0x2be   : > { %v4337_v53 = vadd.f32 %v1361_v58, %v1267_v19  ;;  %v4339_v37 = vadd.f32 %v1322_v33, %v1228_v52  ;;  %v2284_v58 = vrot.slane %v4311_v10, 4  ;;  %v2342_v23 = vsel %vm576_vm1, %v2334_v60, %v2335_v8 }
 0x2bf   : > { %v1363_v29 = vpop.f32.mrf.mxu1  ;;  %v2339_v50 = vsel %vm2135_vm6, %v4301_v20, %v2338_v42  ;;  %v2230_v20 = vrot.slane %v4323_v27, 4 }
 0x2c0   : > { %4586 = vst [vmem:[#allocation15_spill] sm:$0xff] %v4339_v37  ;;  %v4341_v15 = vadd.f32 %v1363_v29, %v1269_v0  ;;  %v2288_v29 = vrot.slane %v4319_v56, 4 }
 0x2c1   : > { %v1365_v41 = vpop.f32.mrf.mxu1 }
 0x2c2   : > { %4587 = vst [vmem:[#allocation17_spill] sm:$0xff] %v4341_v15  ;;  %v4345_v38 = vadd.f32 %v1365_v41, %v1271_v51  ;;  %v2294_v6 = vsel %vm576_vm1, %v2287_v49, %v2288_v29  ;;  %v2292_v49 = vsel %vm576_vm1, %v2285_v21, %v2286_v28  ;;  %v2235_v28 = vrot.slane %v4349_v59, 4 }
 0x2c4   : > { %4588 = vst [vmem:[#allocation16_spill] sm:$0xff] %v4345_v38  ;;  %v2289_v38 = vrot.slane %v4321_v14, 4  ;;  %v4592_v14 = vld [vmem:[#allocation22_spill] sm:$0xff] }
 0x2db   : > { %v1935_v40 = vpop.f32.mrf.mxu0 }
 0x2dc   : > { %v1990_v63 = vmax.f32 %v1935_v40, 0.0  ;;  %v4589_v40 = vld [vmem:[#allocation24_spill] sm:$0xff] }
 0x2dd   : > { %v1937_v30 = vpop.f32.mrf.mxu0  ;;  %v3247_v8 = vcombine.low %v4590_v4, %v4589_v40 }
 0x2de   : > { %v1991_v51 = vmax.f32 %v1937_v30, 0.0  ;;  %v3248_v30 = vcombine.high %v4590_v4, %v4589_v40  ;;  %v3243_v4 = vcombine.low %v4379_v44, %v2341_v24 }
 0x2df   : > { %v1978_v32 = vpop.f32.mrf.mxu1  ;;  %v1939_v35 = vpop.f32.mrf.mxu0 }
 0x2e0   : > { %v1994_v52 = vmax.f32 %v1939_v35, 0.0  ;;  %v1992_v60 = vmax.f32 %v1978_v32, 0.0 }
 0x2e1   : > { %v1980_v19 = vpop.f32.mrf.mxu1  ;;  %v1941_v0 = vpop.f32.mrf.mxu0 }
 0x2e2   : > { %v1995_v39 = vmax.f32 %v1941_v0, 0.0  ;;  %v1998_v35 = vpack.c.bf16 %v1994_v52, %v1990_v63  ;;  %v4389_v0 = vpop.permute.xlu1 %2122  ;;  %v1993_v15 = vmax.f32 %v1980_v19, 0.0  ;;  %v4398_v63 = vpop.permute.xlu0 %2124  ;;  %v3250_v19 = vcombine.high %v4592_v14, %v4591_v18 }
 0x2e3   : > { %v1982_v33 = vpop.f32.mrf.mxu1 }
 0x2e4   : > { %v1999_v41 = vpack.c.bf16 %v1995_v39, %v1991_v51  ;;  %v1996_v12 = vmax.f32 %v1982_v33, 0.0  ;;  %v3372_v51 = vld [vmem:[#allocation8 + $0x10] sm:$0xff]   ;;  %v2290_v39 = vsel %vm576_vm1, %v2284_v58, %v2285_v21  ;;  %v2343_v58 = vsel %vm2135_vm6, %v4307_v9, %v2342_v23 }
 0x2e5   : > { %v1984_v13 = vpop.f32.mrf.mxu1  ;;  %v3244_v33 = vcombine.high %v4379_v44, %v2341_v24  ;;  %v2291_v40 = vsel %vm2190_vm7, %v4311_v10, %v2290_v39  ;;  %v3249_v9 = vcombine.low %v4592_v14, %v4591_v18  ;;  %v2295_v10 = vsel %vm2190_vm7, %v4317_v47, %v2294_v6 }
 0x2e6   : > { %v1997_v37 = vmax.f32 %v1984_v13, 0.0  ;;  %2024 = vmatprep.subr.bf16.mxu0 %v1999_v41  ;;  %v2000_v32 = vpack.c.bf16 %v1996_v12, %v1992_v60  ;;  %v3381_v41 = vld [vmem:[#allocation6 + $0x24] ss:$8 sps:$4 sm:$0xff]   ;;  %v4417_v42 = vpop.permute.xlu1 %2126  ;;  %v2233_v21 = vrot.slane %v4343_v25, 4  ;;  %v2293_v23 = vsel %vm2190_vm7, %v4313_v46, %v2292_v49 }
 0x2e7   : > { %2025 = vmatpush1.bf16.msra.mxu0 %v1998_v35  ;;  %v2232_v47 = vrot.slane %v4335_v55, 4  ;;  %v3240_v12 = vcombine.high %v2291_v40, %v2295_v10  ;;  %v2184_v44 = vrot.slane %v4353_v11, 4  ;;  %v2183_v24 = vrot.slane %v4351_v54, 4 }
 0x2e8   : > { %v2001_v52 = vpack.c.bf16 %v1997_v37, %v1993_v15  ;;  %2637 = vmatprep.subr.bf16.mxu0 %v3248_v30  ;;  %v2296_v37 = vsel %vm576_vm1, %v2288_v29, %v2289_v38  ;;  %v2231_v15 = vrot.slane %v4329_v5, 4  ;;  %v2234_v38 = vrot.slane %v4347_v43, 4  ;;  %v4424_v30 = vpop.permute.xlu0 %2372 }
 0x2e9   : > { %v3246_v29 = vcombine.high %v2339_v50, %v2343_v58  ;;  %v2297_v35 = vsel %vm2190_vm7, %v4319_v56, %v2296_v37  ;;  %v2186_v39 = vrot.slane %v4357_v1, 4  ;;  %v2187_v56 = vrot.slane %v4359_v34, 4 }
 0x2ea   : > { %2067 = vmatprep.subr.bf16.mxu1 %v2001_v52  ;;  %3215 = vmatmul.mubr.msk.bf16.vlgmr.msra.gmra.mxu0 %vm396_vm0, %v3372_v51  ;;  %v2236_v13 = vsel %vm576_vm1, %v2230_v20, %v2231_v15  ;;  %v2240_v46 = vsel %vm576_vm1, %v2233_v21, %v2234_v38  ;;  %v3245_v55 = vcombine.low %v2339_v50, %v2343_v58  ;;  %v2185_v14 = vrot.slane %v4355_v36, 4 }
 0x2eb   : > { %2068 = vmatpush1.bf16.msra.mxu1 %v2000_v32  ;;  %2638 = vmatpush1.bf16.msra.mxu0 %v3247_v8  ;;  %v3239_v60 = vcombine.low %v2291_v40, %v2295_v10  ;;  %v3242_v59 = vcombine.high %v2293_v23, %v2297_v35  ;;  %v2237_v8 = vsel %vm2135_vm6, %v4323_v27, %v2236_v13  ;;  %v2188_v58 = vrot.slane %v4361_v17, 4 }
 0x2ec   : > { %2680 = vmatprep.subr.bf16.mxu1 %v3250_v19  ;;  %2639 = vmatprep.subr.bf16.mxu0 %v3244_v33  ;;  %v2238_v6 = vsel %vm576_vm1, %v2231_v15, %v2232_v47  ;;  %v2242_v52 = vsel %vm576_vm1, %v2234_v38, %v2235_v28  ;;  %v2189_v18 = vsel %vm576_vm1, %v2183_v24, %v2184_v44  ;;  %v4449_v19 = vpop.permute.xlu0 %2376  ;;  %v2129_v17 = vrot.slane %v4369_v57, 4 }
 0x2ed   : > { %3255 = vmatprep.mubr.msk.bf16.mxu0 %vm396_vm0, %v3381_v41  ;;  %v2241_v50 = vsel %vm2135_vm6, %v4343_v25, %v2240_v46  ;;  %v2194_v32 = vsel %vm576_vm1, %v2186_v39, %v2187_v56  ;;  %v3241_v27 = vcombine.low %v2293_v23, %v2297_v35  ;;  %v2239_v33 = vsel %vm2135_vm6, %v4329_v5, %v2238_v6  ;;  %v4594_v35 = vld [vmem:[#allocation19_spill] sm:$0xff] }
 0x2ee   : > { %3216 = vmatmul.mubr.msk.bf16.vlgmr.msra.gmra.mxu1 %vm396_vm0, %v3372_v51  ;;  %v4440_v51 = vpop.permute.xlu1 %2374  ;;  %v2243_v36 = vsel %vm2135_vm6, %v4347_v43, %v2242_v52  ;;  %v3232_v40 = vcombine.high %v2237_v8, %v2241_v50  ;;  %v2192_v25 = vsel %vm576_vm1, %v2184_v44, %v2185_v14  ;;  %v2128_v49 = vrot.slane %v4363_v26, 4 }
 0x2ef   : > { %2681 = vmatpush1.bf16.msra.mxu1 %v3249_v9  ;;  %2640 = vmatpush1.bf16.msra.mxu0 %v3243_v4  ;;  %v2196_v5 = vsel %vm576_vm1, %v2187_v56, %v2188_v58  ;;  %v2131_v43 = vrot.slane %v4389_v0, 4  ;;  %v3234_v15 = vcombine.high %v2239_v33, %v2243_v36  ;;  %v3231_v9 = vcombine.low %v2237_v8, %v2241_v50  ;;  %v4596_v8 = vld [vmem:[#allocation18_spill] sm:$0xff] }
 0x2f0   : > { %2682 = vmatprep.subr.bf16.mxu1 %v3246_v29  ;;  %2641 = vmatprep.subr.bf16.mxu0 %v3240_v12  ;;  %v2381_v20 = vpop.permute.xlu0 %2380  ;;  %v2193_v10 = vsel %vm2190_vm7, %v4353_v11, %v2192_v25  ;;  %v2133_v21 = vrot.slane %v4417_v42, 4  ;;  %v2197_v38 = vsel %vm2190_vm7, %v4359_v34, %v2196_v5  ;;  %v2134_v29 = vsel %vm576_vm1, %v2128_v49, %v2129_v17  ;;  %v4593_v42 = vld [vmem:[#allocation20_spill] sm:$0xff] }
 0x2f1   : > { %3256 = vmatprep.mubr.msk.bf16.mxu1 %vm396_vm0, %v3381_v41  ;;  %v2191_v41 = vsel %vm2190_vm7, %v4351_v54, %v2189_v18  ;;  %v2132_v54 = vrot.slane %v4398_v63, 4  ;;  %v2385_v4 = vrot.slane %v4440_v51, 4  ;;  %v3224_v47 = vcombine.high %v4594_v35, %v4593_v42 }
 0x2f2   : > { %v2379_v37 = vpop.permute.xlu1 %2378  ;;  %v3233_v12 = vcombine.low %v2239_v33, %v2243_v36  ;;  %v3230_v28 = vcombine.high %v2193_v10, %v2197_v38  ;;  %v2136_v44 = vsel %vm2135_vm6, %v4363_v26, %v2134_v29  ;;  %v3223_v39 = vcombine.low %v4594_v35, %v4593_v42  ;;  %v4595_v26 = vld [vmem:[#allocation21_spill] sm:$0xff] }
 0x2f3   : > { %2683 = vmatpush1.bf16.msra.mxu1 %v3245_v55  ;;  %2642 = vmatpush1.bf16.msra.mxu0 %v3239_v60  ;;  %v2139_v23 = vsel %vm576_vm1, %v2131_v43, %v2132_v54  ;;  %v2387_v11 = vrot.slane %v2379_v37, 4  ;;  %v2386_v55 = vrot.slane %v4449_v19, 4  ;;  %v3226_v6 = vcombine.high %v4596_v8, %v4595_v26 }
 0x2f4   : > { %2684 = vmatprep.subr.bf16.mxu1 %v3242_v59  ;;  %2643 = vmatprep.subr.bf16.mxu0 %v4010_v61  ;;  %v2195_v61 = vsel %vm2190_vm7, %v4357_v1, %v2194_v32  ;;  %v2140_v56 = vsel %vm2135_vm6, %v4389_v0, %v2139_v23  ;;  %v3229_v52 = vcombine.low %v2193_v10, %v2197_v38 }
 0x2f5   : > { %v3228_v1 = vcombine.high %v2191_v41, %v2195_v61  ;;  %v3227_v13 = vcombine.low %v2191_v41, %v2195_v61  ;;  %v3220_v50 = vcombine.high %v2136_v44, %v2140_v56  ;;  %v3225_v19 = vcombine.low %v4596_v8, %v4595_v26  ;;  %v3261_v26 = vld [vmem:[#allocation11] ss:$0 sm:$0xff] }
 0x2f6   : > { %v2383_v34 = vpop.permute.xlu1 %2382  ;;  %v2392_v32 = vsel %vm576_vm1, %v2385_v4, %v2386_v55 }
 0x2f7   : > { %2685 = vmatpush1.bf16.msra.mxu1 %v3241_v27  ;;  %2644 = vmatpush1.bf16.msra.mxu0 %v4012_v62  ;;  %v2130_v62 = vrot.slane %v4373_v7, 4  ;;  %v2388_v7 = vrot.slane %v2381_v20, 4  ;;  %v2389_v60 = vrot.slane %v2383_v34, 4  ;;  %v2393_v36 = vsel %vm2190_vm7, %v4440_v51, %v2392_v32  ;;  %v3260_v51 = vld [vmem:[%s358_s8] ss:$0 sm:$0xff] }
 0x2f8   : > { %2686 = vmatprep.subr.bf16.mxu1 %v4016_v3  ;;  %2645 = vmatprep.subr.bf16.mxu0 %v3232_v40  ;;  %v2384_v3 = vrot.slane %v4424_v30, 4 }
 0x2f9   : > { %v2137_v24 = vsel %vm576_vm1, %v2129_v17, %v2130_v62  ;;  %v2394_v59 = vsel %vm576_vm1, %v2387_v11, %v2388_v7  ;;  %v2396_v27 = vsel %vm576_vm1, %v2388_v7, %v2389_v60  ;;  %v3383_v17 = vld [vmem:[#allocation6 + $0x20] ss:$8 sps:$4 sm:$0xff]   ;;  %2846 = vbcast.lane.b32.xlu0 %v3260_v51, 256  ;;  %2850 = vbcast.lane.b32.xlu1 %v3260_v51, 264 }
 0x2fa   : > { %v2390_v46 = vsel %vm576_vm1, %v2384_v3, %v2385_v4  ;;  %v2138_v18 = vsel %vm2135_vm6, %v4369_v57, %v2137_v24  ;;  %v2395_v58 = vsel %vm2190_vm7, %v2379_v37, %v2394_v59  ;;  %v3219_v57 = vcombine.low %v2136_v44, %v2140_v56  ;;  %v4598_v4 = vld [vmem:[#allocation17_spill] sm:$0xff] }
 0x2fb   : > { %2687 = vmatpush1.bf16.msra.mxu1 %v4014_v2  ;;  %2646 = vmatpush1.bf16.msra.mxu0 %v3231_v9  ;;  %v2141_v2 = vsel %vm576_vm1, %v2132_v54, %v2133_v21  ;;  %v2391_v0 = vsel %vm2190_vm7, %v4424_v30, %v2390_v46  ;;  %v2397_v30 = vsel %vm2190_vm7, %v2381_v20, %v2396_v27  ;;  %v3384_v56 = vld [vmem:[#allocation8 + $0x18] sm:$0xff]  }
 0x2fc   : > { %2688 = vmatprep.subr.bf16.mxu1 %v3234_v15  ;;  %2647 = vmatprep.subr.bf16.mxu0 %v3228_v1  ;;  %v2142_v14 = vsel %vm2135_vm6, %v4398_v63, %v2141_v2  ;;  %v3252_v63 = vcombine.high %v2391_v0, %v2395_v58  ;;  %v3251_v40 = vcombine.low %v2391_v0, %v2395_v58  ;;  %v4597_v1 = vld [vmem:[#allocation15_spill] sm:$0xff] }
 0x2fd   : > { %v3222_v33 = vcombine.high %v2138_v18, %v2142_v14  ;;  %v3221_v41 = vcombine.low %v2138_v18, %v2142_v14  ;;  %v3254_v25 = vcombine.high %v2393_v36, %v2397_v30  ;;  %v3253_v49 = vcombine.low %v2393_v36, %v2397_v30  ;;  %2884 = vbcast.lane.b32.xlu1 %v3261_v26, 264 }
 0x2fe   : > { %2880 = vbcast.lane.b32.xlu0 %v3261_v26, 256 }
 0x2ff   : > { %2689 = vmatpush1.bf16.msra.mxu1 %v3233_v12  ;;  %2648 = vmatpush1.bf16.msra.mxu0 %v3227_v13 }
 0x300   : > { %2690 = vmatprep.subr.bf16.mxu1 %v3230_v28  ;;  %2649 = vmatprep.subr.bf16.mxu0 %v3224_v47 }
 0x303   : > { %2691 = vmatpush1.bf16.msra.mxu1 %v3229_v52  ;;  %2650 = vmatpush1.bf16.msra.mxu0 %v3223_v39 }
 0x304   : > { %2692 = vmatprep.subr.bf16.mxu1 %v3226_v6  ;;  %2651 = vmatprep.subr.bf16.mxu0 %v3220_v50 }
 0x307   : > { %2693 = vmatpush1.bf16.msra.mxu1 %v3225_v19  ;;  %2652 = vmatpush1.bf16.msra.mxu0 %v3219_v57 }
 0x308   : > { %2694 = vmatprep.subr.bf16.mxu1 %v3222_v33  ;;  %2667 = vmatprep.subr.bf16.mxu0 %v3252_v63 }
 0x30b   : > { %2695 = vmatpush1.bf16.msra.mxu1 %v3221_v41  ;;  %2668 = vmatpush2.bf16.msra.mxu0 %v3251_v40 }
 0x30c   : > { %2710 = vmatprep.subr.bf16.mxu1 %v3254_v25 }
 0x30e   : > { %2670 = vmatmul.mubr.bf16.vlgmr.msra.gmra.mxu0 %v3383_v17 }
 0x30f   : > { %2711 = vmatpush2.bf16.msra.mxu1 %v3253_v49  ;;  %2778 = vmatprep.mubr.bf16.mxu0 %v4167_v16 }
 0x312   : > { %2713 = vmatmul.mubr.bf16.vlgmr.msra.gmra.mxu1 %v3383_v17 }
 0x313   : > { %2821 = vmatprep.mubr.bf16.mxu1 %v4167_v16 }
 0x36b   : > { %v2847_v52 = vpop.permute.xlu0 %2846  ;;  %v2851_v14 = vpop.permute.xlu1 %2850 }
 0x3aa   : > { %v2044_v37 = vpop.f32.mrf.mxu0 }
 0x3ab   : > { %v2096_v61 = vadd.f32 %v2044_v37, %v4325_v22  ;;  %v4599_v22 = vld [vmem:[#allocation16_spill] sm:$0xff] }
 0x3ac   : > { %v2046_v5 = vpop.f32.mrf.mxu0 }
 0x3ad   : > { %v2097_v43 = vadd.f32 %v2046_v5, %v4327_v45 }
 0x3ae   : > { %v2087_v54 = vpop.f32.mrf.mxu1  ;;  %v2048_v15 = vpop.f32.mrf.mxu0 }
 0x3af   : > { %v2098_v20 = vadd.f32 %v2087_v54, %v4331_v48  ;;  %v2100_v9 = vadd.f32 %v2048_v15, %v4333_v31 }
 0x3b0   : > { %v2089_v10 = vpop.f32.mrf.mxu1  ;;  %v2050_v62 = vpop.f32.mrf.mxu0 }
 0x3b1   : > { %v2099_v21 = vadd.f32 %v2089_v10, %v4337_v53  ;;  %v2101_v38 = vadd.f32 %v2050_v62, %v4597_v1 }
 0x3b2   : > { %v2091_v29 = vpop.f32.mrf.mxu1 }
 0x3b3   : > { %v2102_v3 = vadd.f32 %v2091_v29, %v4598_v4  ;;  %v3385_v4 = vld [vmem:[#allocation9] sm:$0xff]  }
 0x3b4   : > { %v2093_v23 = vpop.f32.mrf.mxu1 }
 0x3b5   : > { %v2103_v11 = vadd.f32 %v2093_v23, %v4599_v22  ;;  %v2881_v23 = vpop.permute.xlu0 %2880 }
 0x3ce   : > { %v2671_v7 = vpop.f32.mrf.mxu0 }
 0x3cf   : > { %v2726_v47 = vmax.f32 %v2671_v7, 0.0 }
 0x3d0   : > { %v2673_v45 = vpop.f32.mrf.mxu0 }
 0x3d1   : > { %v2727_v34 = vmax.f32 %v2673_v45, 0.0  ;;  %v2885_v45 = vpop.permute.xlu1 %2884 }
 0x3d2   : > { %v2714_v42 = vpop.f32.mrf.mxu1  ;;  %v2675_v35 = vpop.f32.mrf.mxu0 }
 0x3d3   : > { %v2730_v12 = vmax.f32 %v2675_v35, 0.0  ;;  %v2728_v55 = vmax.f32 %v2714_v42, 0.0 }
 0x3d4   : > { %v2716_v48 = vpop.f32.mrf.mxu1  ;;  %v2677_v31 = vpop.f32.mrf.mxu0 }
 0x3d5   : > { %v2731_v13 = vmax.f32 %v2677_v31, 0.0  ;;  %v2734_v44 = vpack.c.bf16 %v2730_v12, %v2726_v47  ;;  %v2729_v46 = vmax.f32 %v2716_v48, 0.0 }
 0x3d6   : > { %v2718_v28 = vpop.f32.mrf.mxu1 }
 0x3d7   : > { %v2735_v53 = vpack.c.bf16 %v2731_v13, %v2727_v34  ;;  %v2732_v24 = vmax.f32 %v2718_v28, 0.0 }
 0x3d8   : > { %v2720_v2 = vpop.f32.mrf.mxu1 }
 0x3d9   : > { %v2733_v39 = vmax.f32 %v2720_v2, 0.0  ;;  %2760 = vmatprep.subr.bf16.mxu0 %v2735_v53  ;;  %v2736_v59 = vpack.c.bf16 %v2732_v24, %v2728_v55 }
 0x3da   : > { %2761 = vmatpush1.bf16.msra.mxu0 %v2734_v44 }
 0x3db   : > { %v2737_v60 = vpack.c.bf16 %v2733_v39, %v2729_v46 }
 0x3dd   : > { %2803 = vmatprep.subr.bf16.mxu1 %v2737_v60  ;;  %3258 = vmatmul.mubr.msk.bf16.vlgmr.msra.gmra.mxu0 %vm396_vm0, %v3384_v56 }
 0x3de   : > { %2804 = vmatpush1.bf16.msra.mxu1 %v2736_v59  ;;  %2926 = vmatprep.mubr.bf16.mxu0 %v4167_v16 }
 0x3e1   : > { %3259 = vmatmul.mubr.msk.bf16.vlgmr.msra.gmra.mxu1 %vm396_vm0, %v3384_v56 }
 0x3e2   : > { %2969 = vmatprep.mubr.bf16.mxu1 %v4167_v16 }
 0x49d   : > { %v2780_v8 = vpop.f32.mrf.mxu0 }
 0x49e   : > { %v2832_v6 = vadd.f32 %v2780_v8, %v2096_v61 }
 0x49f   : > { %v2782_v18 = vpop.f32.mrf.mxu0 }
 0x4a0   : > { %v2833_v0 = vadd.f32 %v2782_v18, %v2097_v43  ;;  %v2852_v32 = vadd.f32 %v2847_v52, %v2832_v6 }
 0x4a1   : > { %v2823_v50 = vpop.f32.mrf.mxu1  ;;  %v2784_v19 = vpop.f32.mrf.mxu0 }
 0x4a2   : > { %v2834_v58 = vadd.f32 %v2823_v50, %v2098_v20  ;;  %v2836_v27 = vadd.f32 %v2784_v19, %v2100_v9  ;;  %v2853_v30 = vadd.f32 %v2847_v52, %v2833_v0  ;;  %v2860_v25 = vmax.f32 %v2852_v32, 0.0 }
 0x4a3   : > { %v2825_v57 = vpop.f32.mrf.mxu1  ;;  %v2786_v33 = vpop.f32.mrf.mxu0 }
 0x4a4   : > { %v2835_v63 = vadd.f32 %v2825_v57, %v2099_v21  ;;  %v2856_v36 = vadd.f32 %v2851_v14, %v2836_v27  ;;  %v2837_v41 = vadd.f32 %v2786_v33, %v2101_v38  ;;  %v2854_v40 = vadd.f32 %v2847_v52, %v2834_v58 }
 0x4a5   : > { %v2827_v16 = vpop.f32.mrf.mxu1  ;;  %v2861_v15 = vmax.f32 %v2853_v30, 0.0 }
 0x4a6   : > { %v2838_v17 = vadd.f32 %v2827_v16, %v2102_v3  ;;  %v2864_v49 = vmax.f32 %v2856_v36, 0.0  ;;  %v2857_v51 = vadd.f32 %v2851_v14, %v2837_v41  ;;  %v2855_v61 = vadd.f32 %v2847_v52, %v2835_v63 }
 0x4a7   : > { %v2829_v37 = vpop.f32.mrf.mxu1  ;;  %v2862_v9 = vmax.f32 %v2854_v40, 0.0 }
 0x4a8   : > { %v2858_v5 = vadd.f32 %v2851_v14, %v2838_v17  ;;  %v2839_v43 = vadd.f32 %v2829_v37, %v2103_v11  ;;  %v2870_v54 = vpack.c.bf16 %v2864_v49, %v2860_v25  ;;  %v2865_v20 = vmax.f32 %v2857_v51, 0.0 }
 0x4a9   : > { %v2863_v29 = vmax.f32 %v2855_v61, 0.0 }
 0x4aa   : > { %v2866_v10 = vmax.f32 %v2858_v5, 0.0  ;;  %v2859_v62 = vadd.f32 %v2851_v14, %v2839_v43  ;;  %v2871_v21 = vpack.c.bf16 %v2865_v20, %v2861_v15 }
 0x4ac   : > { %v2867_v1 = vmax.f32 %v2859_v62, 0.0  ;;  %v2872_v38 = vpack.c.bf16 %v2866_v10, %v2862_v9  ;;  %2908 = vmatprep.subr.bf16.mxu0 %v2871_v21 }
 0x4ad   : > { %2909 = vmatpush1.bf16.msra.mxu0 %v2870_v54 }
 0x4ae   : > { %v2873_v3 = vpack.c.bf16 %v2867_v1, %v2863_v29 }
 0x4b0   : > { %2951 = vmatprep.subr.bf16.mxu1 %v2873_v3  ;;  %3263 = vmatmul.mubr.msk.bf16.vlgmr.msra.gmra.mxu0 %vm396_vm0, %v3385_v4 }
 0x4b1   : > { %2952 = vmatpush1.bf16.msra.mxu1 %v2872_v38 }
 0x4b4   : > { %3264 = vmatmul.mubr.msk.bf16.vlgmr.msra.gmra.mxu1 %vm396_vm0, %v3385_v4 }
 0x570   : > { %v2928_v22 = vpop.f32.mrf.mxu0 }
 0x571   : > { %v2929_v11 = vadd.f32 %v2928_v22, %v2881_v23 }
 0x572   : > { %v2930_v7 = vpop.f32.mrf.mxu0 }
 0x573   : > { %v2931_v35 = vadd.f32 %v2930_v7, %v2881_v23  ;;  %2980 = vst [vmem:[%s363_s13] sm:$0xff] %v2929_v11 }
 0x574   : > { %v2971_v42 = vpop.f32.mrf.mxu1  ;;  %v2932_v47 = vpop.f32.mrf.mxu0 }
 0x575   : > { %v2972_v48 = vadd.f32 %v2971_v42, %v2881_v23  ;;  %v2933_v31 = vadd.f32 %v2932_v47, %v2885_v45  ;;  %2981 = vst [vmem:[%s363_s13 + $0x8] sm:$0xff] %v2931_v35 }
 0x576   : > { %v2973_v12 = vpop.f32.mrf.mxu1  ;;  %v2934_v13 = vpop.f32.mrf.mxu0 }
 0x577   : > { %v2974_v34 = vadd.f32 %v2973_v12, %v2881_v23  ;;  %2982 = vst [vmem:[%s363_s13 + $0x10] sm:$0xff] %v2972_v48  ;;  %2984 = vst [vmem:[%s363_s13 + $0x20] sm:$0xff] %v2933_v31  ;;  %v2935_v53 = vadd.f32 %v2934_v13, %v2885_v45 }
 0x578   : > { %v2975_v28 = vpop.f32.mrf.mxu1 }
 0x579   : > { %v2976_v44 = vadd.f32 %v2975_v28, %v2885_v45  ;;  %2983 = vst [vmem:[%s363_s13 + $0x18] sm:$0xff] %v2974_v34  ;;  %2985 = vst [vmem:[%s363_s13 + $0x28] sm:$0xff] %v2935_v53 }
 0x57a   : > { %v2977_v24 = vpop.f32.mrf.mxu1 }
 0x57b   : > { %2986 = vst [vmem:[%s363_s13 + $0x30] sm:$0xff] %v2976_v44  ;;  %v2978_v2 = vadd.f32 %v2977_v24, %v2885_v45 }
 0x57d   : > { %2987 = vst [vmem:[%s363_s13 + $0x38] sm:$0xff] %v2978_v2 }
 0x57e PF: > { %s20_s24 = sadd.s32 1, %s3535_s24  }
 0x57f   : > { %p17_p3 = scmp.ge.s32.totalorder %s20_s24, 4  }
 0x581   :  { %19 = sbr.rel (!%p17_p3) target bundleno = 3 (0x3), region = 107 }
 0x586   :  { %3009 = vsyncpa [#allocation5], 1 }
 0x587   :  { %3011 = vsyncpa [#allocation5 + $0x1], 1 }
 0x588   :  { %3012 = vsyncpa [#allocation7], 1 }
 0x589   :  { %3013 = vsyncpa [#allocation10], 1 }

</bundles_post_ra>
